<compile_context>
chip_gen: v7x
topology: tpu7x:2x2x1
jax: 0.10.0
libtpu: 0.0.40
codegen_flags: <defaults>
</compile_context>

<pallas_src>
import jax
import jax.numpy as jnp
from jax import lax
from jax.experimental import pallas as pl
from jax.experimental.pallas import tpu as pltpu


# --------------------------------------------------------------------------- #
# Conv helper: 3x3 SAME conv (+ folded BN bias) + ReLU on a (H, W, cin) bf16 value
# --------------------------------------------------------------------------- #
def _conv3x3_bn_relu(x_hwc, w_ref, b_ref):
    """Returns (H*W, cout) float32.

    Halo handling: H direction via two zero rows concatenated on the leading axis
    (free); W direction via two hoisted column-shifted copies (x_m1 / x_p1), so the
    9 taps are free leading-axis row slices.  (pltpu.roll on the W axis + border
    mask would push these shifts to the idle XLU; concat keeps guaranteed jnp
    semantics.)
    """
    H, W, cin = x_hwc.shape
    dt = x_hwc.dtype
    zrow = jnp.zeros((1, W, cin), dt)
    xp = jnp.concatenate([zrow, x_hwc, zrow], axis=0)            # (H+2, W, cin)
    zcol = jnp.zeros((H + 2, 1, cin), dt)
    x_m1 = jnp.concatenate([zcol, xp[:, :W - 1, :]], axis=1)     # input col w-1
    x_p1 = jnp.concatenate([xp[:, 1:, :], zcol], axis=1)         # input col w+1
    srcs = (x_m1, xp, x_p1)                                      # kx = 0, 1, 2

    taps = [srcs[kx][ky:ky + H].reshape(H * W, cin)
            for ky in range(3) for kx in range(3)]

    if len(w_ref.shape) == 2:
        # im2col-fused path (only used when 9*cin is small): single matmul, K=9*cin.
        patches = jnp.concatenate(taps, axis=-1)                 # (HW, 9*cin)
        acc = jnp.dot(patches, w_ref[...],
                      preferred_element_type=jnp.float32)
    else:
        acc = None                                               # init from first tap
        for k, tap in enumerate(taps):
            part = jnp.dot(tap, w_ref[k],
                           preferred_element_type=jnp.float32)
            acc = part if acc is None else acc + part
    return jnp.maximum(acc + b_ref[...], 0.0)                    # (HW, cout) f32


# --------------------------------------------------------------------------- #
# Fused kernel: 3x(conv3x3+BN+ReLU) -> conv1x1(+bias) -> bilinear x2 -> ReLU
# --------------------------------------------------------------------------- #
def _protonet_kernel(x_ref, w1_ref, b1_ref, w2_ref, b2_ref, w3_ref, b3_ref,
                     u2_ref, wp_ref, bp_ref, o_ref, lhs_scr):
    # x_ref : (1, H, W, Cin) bf16       one image (NHWC)
    # w*_ref: (9, Cin, C) / (9*Cin, C)  BN-folded 3x3 weights (bf16, tap-major)
    # b*_ref: (1, C) f32                BN-folded biases
    # u2_ref: (2W, 4W) bf16             blockdiag(uw^T, uw^T) W-upsample matrix
    # wp_ref: (P, C) bf16               final 1x1 weights (transposed)
    # bp_ref: (P, 1) f32                final bias
    # o_ref : (1, P, H, 4W) f32         NCHW output, one row-pair per sublane row
    # lhs_scr: (P, H, 2W) bf16 scratch  staging for the W-upsample matmul LHS
    H, W = x_ref.shape[1], x_ref.shape[2]
    P, C = wp_ref.shape
    HW = H * W

    # ---- 3 x (conv3x3 + folded BN + ReLU); activations stay bf16 values in VMEM ----
    a1 = _conv3x3_bn_relu(x_ref[0], w1_ref, b1_ref)
    a1 = a1.astype(jnp.bfloat16).reshape(H, W, C)
    a2 = _conv3x3_bn_relu(a1, w2_ref, b2_ref)
    a2 = a2.astype(jnp.bfloat16).reshape(H, W, C)
    a3 = _conv3x3_bn_relu(a2, w3_ref, b3_ref)                    # (HW, C) f32

    # ---- 1x1 conv (+bias) BEFORE the upsample ----
    # conv1x1 and bilinear upsampling commute (both linear); the bias commutes
    # because every bilinear row sums to 1.  The final ReLU stays after the upsample.
    z = lax.dot_general(wp_ref[...], a3.astype(jnp.bfloat16),
                        dimension_numbers=(((1,), (1,)), ((), ())),
                        preferred_element_type=jnp.float32)      # (P, HW)
    z = z + bp_ref[...]

    # ---- bilinear x2, H direction (polyphase 0.25/0.75, edge clamp), flattened ----
    prev = jnp.concatenate([z[:, :W], z[:, :HW - W]], axis=1)    # row h-1 (clamped)
    nxt = jnp.concatenate([z[:, W:], z[:, HW - W:]], axis=1)     # row h+1 (clamped)
    h_even = (0.25 * prev + 0.75 * z).astype(jnp.bfloat16)       # output row 2h
    h_odd = (0.75 * z + 0.25 * nxt).astype(jnp.bfloat16)         # output row 2h+1

    # ---- regroup (P, HW) lanes into (P, H, 2W) rows for the W-direction matmul ----
    # (small explicit scatter; Mosaic-safe alternative to a lane->sublane reshape)
    for h in range(H):
        lhs_scr[:, h, 0:W] = h_even[:, h * W:(h + 1) * W]
        lhs_scr[:, h, W:2 * W] = h_odd[:, h * W:(h + 1) * W]

    # ---- W direction + row interleave folded into ONE matmul vs blockdiag(uw^T) ----
    lhs = lhs_scr[...].reshape(P * H, 2 * W)
    res = jnp.dot(lhs, u2_ref[...], preferred_element_type=jnp.float32)  # (P*H, 4W)

    # ---- final ReLU; (P, H, 4W) == NCHW (P, 2H, 2W) flattened per output-row pair ----
    o_ref[0] = jnp.maximum(res, 0.0).reshape(P, H, 4 * W).astype(o_ref.dtype)


# --------------------------------------------------------------------------- #
# Wrapper (NCHW in / NCHW out like the PyTorch module) + NHWC fast path
# --------------------------------------------------------------------------- #
def _vmem_limit_bytes(H, W, cin, C, P):
    bf, f32 = 2, 4
    weights = (9 * cin * C + 18 * C * C + P * C + 8 * W * W) * bf + (3 * C + P) * f32
    io_blocks = H * W * cin * bf + P * H * 4 * W * f32
    acts = 3 * (H + 2) * W * max(cin, C) * bf          # xp + 2 shifted copies (worst conv)
    acts += 2 * H * W * C * (f32 + bf)                 # conv accumulators + bf16 acts
    acts += P * H * W * (4 * f32 + 2 * bf) + P * H * 4 * W * f32
    est = 2 * (weights + io_blocks) + acts             # blocks double-buffered
    return int(min(64 * 2 ** 20, max(32 * 2 ** 20, 2 * est)))


def _protonet_pallas(x_nhwc_bf16, kp):
    B, H, W, cin = x_nhwc_bf16.shape
    P, C = kp["wp"].shape
    w1 = kp["w1"]
    if len(w1.shape) == 2:                             # im2col-fused conv1 weights
        w1_spec = pl.BlockSpec(w1.shape, lambda b: (0, 0))
    else:
        w1_spec = pl.BlockSpec(w1.shape, lambda b: (0, 0, 0))

    out = pl.pallas_call(
        _protonet_kernel,
        out_shape=jax.ShapeDtypeStruct((B, P, H, 4 * W), jnp.float32),
        grid_spec=pltpu.PrefetchScalarGridSpec(
            num_scalar_prefetch=0,
            grid=(B,),
            in_specs=[
                pl.BlockSpec((1, H, W, cin), lambda b: (b, 0, 0, 0)),
                w1_spec,
                pl.BlockSpec((1, C), lambda b: (0, 0)),
                pl.BlockSpec((9, C, C), lambda b: (0, 0, 0)),
                pl.BlockSpec((1, C), lambda b: (0, 0)),
                pl.BlockSpec((9, C, C), lambda b: (0, 0, 0)),
                pl.BlockSpec((1, C), lambda b: (0, 0)),
                pl.BlockSpec((2 * W, 4 * W), lambda b: (0, 0)),
                pl.BlockSpec((P, C), lambda b: (0, 0)),
                pl.BlockSpec((P, 1), lambda b: (0, 0)),
            ],
            out_specs=pl.BlockSpec((1, P, H, 4 * W), lambda b: (b, 0, 0, 0)),
            scratch_shapes=[pltpu.VMEM((P, H, 2 * W), jnp.bfloat16)],
        ),
        compiler_params=pltpu.CompilerParams(
            dimension_semantics=("parallel",),
            vmem_limit_bytes=_vmem_limit_bytes(H, W, cin, C, P)),
    )(x_nhwc_bf16, kp["w1"], kp["b1"], kp["w2"], kp["b2"], kp["w3"], kp["b3"],
      kp["u2"], kp["wp"], kp["bp"])
    # (B, P, H, 4W) -> (B, P, 2H, 2W) is a pure contiguous reshape (free).
    return out.reshape(B, P, 2 * H, 2 * W)


@jax.jit
def protonet_forward_nhwc(x_nhwc, kp):
    """Fast path for producers that already hold NHWC activations (no transpose)."""
    return _protonet_pallas(x_nhwc.astype(jnp.bfloat16), kp)


@jax.jit
def protonet_forward(x_nchw, kp):
    """NCHW interface matching the PyTorch module (single layout transpose + bf16 cast)."""
    x = jnp.transpose(x_nchw, (0, 2, 3, 1)).astype(jnp.bfloat16)
    return _protonet_pallas(x, kp)


# --------------------------------------------------------------------------- #
# Parameter construction (deterministic, mirrors ProtoNet._init_weights)
# --------------------------------------------------------------------------- #
def _kaiming_normal_fan_out(key, shape_hwio):
    # kaiming_normal_(mode='fan_out', nonlinearity='relu'): std = sqrt(2/(kh*kw*cout))
    kh, kw, _, cout = shape_hwio
    std = (2.0 / (kh * kw * cout)) ** 0.5
    return jax.random.normal(key, shape_hwio, dtype=jnp.float32) * std


def _fold_bn(w, b, gamma, beta, mean, var, eps=1e-5):
    scale = gamma / jnp.sqrt(var + eps)
    return w * scale, (b - mean) * scale + beta


def bilinear_matrix(out_size, in_size):
    """1-D bilinear interpolation matrix, align_corners=False (half-pixel)."""
    i = jnp.arange(out_size, dtype=jnp.float32)
    src = (i + 0.5) * (in_size / out_size) - 0.5
    i0 = jnp.floor(src)
    frac = src - i0
    i0c = jnp.clip(i0, 0, in_size - 1).astype(jnp.int32)
    i1c = jnp.clip(i0 + 1, 0, in_size - 1).astype(jnp.int32)
    u = jnp.zeros((out_size, in_size), jnp.float32)
    rows = jnp.arange(out_size)
    u = u.at[rows, i0c].add(1.0 - frac)
    u = u.at[rows, i1c].add(frac)
    return u


def make_protonet_params(key, in_channels, proto_channels, num_protos, H, W):
    keys = jax.random.split(key, 4)
    kp = {}
    ref_convs = []
    cin = in_channels
    for i in range(3):
        w = _kaiming_normal_fan_out(keys[i], (3, 3, cin, proto_channels))
        b = jnp.zeros((proto_channels,), jnp.float32)
        gamma = jnp.ones((proto_channels,), jnp.float32)
        beta = jnp.zeros((proto_channels,), jnp.float32)
        mean = jnp.zeros((proto_channels,), jnp.float32)
        var = jnp.ones((proto_channels,), jnp.float32)
        w_f, b_f = _fold_bn(w, b, gamma, beta, mean, var)
        w_bf = w_f.astype(jnp.bfloat16)                      # bf16 MXU operands
        ref_convs.append((w_bf.astype(jnp.float32), b_f))    # reference uses same values
        if i == 0 and 9 * cin <= 512:
            kp["w1"] = w_bf.reshape(9 * cin, proto_channels)   # im2col-fused layout
        else:
            kp[f"w{i + 1}"] = w_bf.reshape(9, cin, proto_channels)
        kp[f"b{i + 1}"] = b_f.reshape(1, proto_channels)
        cin = proto_channels
    w_final = _kaiming_normal_fan_out(
        keys[3], (1, 1, proto_channels, num_protos)).reshape(proto_channels,
                                                             num_protos)
    w_final_bf = w_final.astype(jnp.bfloat16)
    b_final = jnp.zeros((num_protos,), jnp.float32)
    kp["wp"] = jnp.transpose(w_final_bf)                     # (P, C) bf16
    kp["bp"] = b_final.reshape(num_protos, 1)
    uwT = bilinear_matrix(2 * W, W).T                        # (W, 2W)
    u2 = jnp.zeros((2 * W, 4 * W), jnp.float32)
    u2 = u2.at[:W, :2 * W].set(uwT)                          # even output rows
    u2 = u2.at[W:, 2 * W:].set(uwT)                          # odd output rows
    kp["u2"] = u2.astype(jnp.bfloat16)
    ref = {"convs": ref_convs,
           "w_final": w_final_bf.astype(jnp.float32),
           "b_final": b_final}
    return {"kernel": kp, "ref": ref}


# --------------------------------------------------------------------------- #
# Pure-JAX reference (module op order: upsample then conv1x1) for correctness
# --------------------------------------------------------------------------- #
def protonet_reference(x_nchw, ref_params):
    _, _, H, W = x_nchw.shape
    uh = bilinear_matrix(2 * H, H)
    uw = bilinear_matrix(2 * W, W)
    x = jnp.transpose(x_nchw, (0, 2, 3, 1))
    for w, b in ref_params["convs"]:
        x = lax.conv_general_dilated(
            x, w, window_strides=(1, 1), padding="SAME",
            dimension_numbers=("NHWC", "HWIO", "NHWC"))
        x = jnp.maximum(x + b.reshape(1, 1, 1, -1), 0.0)
    x = jnp.einsum("ih,bhwc->biwc", uh, x)
    x = jnp.einsum("vw,biwc->bivc", uw, x)
    x = jnp.einsum("bivc,cp->bivp", x, ref_params["w_final"])
    x = jnp.maximum(x + ref_params["b_final"].reshape(1, 1, 1, -1), 0.0)
    return jnp.transpose(x, (0, 3, 1, 2))


if __name__ == "__main__":
    # Small test shapes; tune/benchmark at production sizes (Cin=C=256, P=32, H,W>=64).
    B, IN_C, PROTO_C, NUM_PROTOS, H, W = 2, 4, 32, 8, 16, 16

    key = jax.random.PRNGKey(0)
    k_x, k_p = jax.random.split(key)
    x = jax.random.normal(k_x, (B, IN_C, H, W), dtype=jnp.float32)   # NCHW input

    params = make_protonet_params(k_p, IN_C, PROTO_C, NUM_PROTOS, H, W)

    out = protonet_forward(x, params["kernel"])
    out = jax.block_until_ready(out)

    assert out.shape == (B, NUM_PROTOS, 2 * H, 2 * W), out.shape
    assert bool(jnp.all(jnp.isfinite(out)))

    ref = protonet_reference(x, params["ref"])
    # bf16 matmul operands with f32 accumulation -> loosened tolerance vs f32 ref.
    assert jnp.allclose(out, ref, rtol=5e-2, atol=5e-2), \
        float(jnp.max(jnp.abs(out - ref)))

    print("KERNEL_OK")
</pallas_src>

<mosaic_0001>
module attributes {stable_mosaic.version = 11 : i64} {
  func.func @_protonet_kernel(%arg0: i32, %arg1: memref<1x16x16x4xbf16, #tpu.memory_space<vmem>>, %arg2: memref<36x32xbf16, #tpu.memory_space<vmem>>, %arg3: memref<1x32xf32, #tpu.memory_space<vmem>>, %arg4: memref<9x32x32xbf16, #tpu.memory_space<vmem>>, %arg5: memref<1x32xf32, #tpu.memory_space<vmem>>, %arg6: memref<9x32x32xbf16, #tpu.memory_space<vmem>>, %arg7: memref<1x32xf32, #tpu.memory_space<vmem>>, %arg8: memref<32x64xbf16, #tpu.memory_space<vmem>>, %arg9: memref<8x32xbf16, #tpu.memory_space<vmem>>, %arg10: memref<8x1xf32, #tpu.memory_space<vmem>>, %arg11: memref<1x8x16x64xf32, #tpu.memory_space<vmem>>, %arg12: memref<8x16x32xbf16, #tpu.memory_space<vmem>>) attributes {dimension_semantics = [#tpu.dimension_semantics<parallel>], iteration_bounds = array<i64: 2>, scalar_prefetch = 0 : i64, scratch_operands = 1 : i64, tpu.core_type = #tpu.core_type<tc>, window_params = [{transform_indices = @transform_0, window_bounds = array<i64: 1, 16, 16, 4>}, {pipeline_mode = #tpu.pipeline_mode<synchronous>, transform_indices = @transform_1, window_bounds = array<i64: 36, 32>}, {pipeline_mode = #tpu.pipeline_mode<synchronous>, transform_indices = @transform_2, window_bounds = array<i64: 1, 32>}, {pipeline_mode = #tpu.pipeline_mode<synchronous>, transform_indices = @transform_3, window_bounds = array<i64: 9, 32, 32>}, {pipeline_mode = #tpu.pipeline_mode<synchronous>, transform_indices = @transform_4, window_bounds = array<i64: 1, 32>}, {pipeline_mode = #tpu.pipeline_mode<synchronous>, transform_indices = @transform_5, window_bounds = array<i64: 9, 32, 32>}, {pipeline_mode = #tpu.pipeline_mode<synchronous>, transform_indices = @transform_6, window_bounds = array<i64: 1, 32>}, {pipeline_mode = #tpu.pipeline_mode<synchronous>, transform_indices = @transform_7, window_bounds = array<i64: 32, 64>}, {pipeline_mode = #tpu.pipeline_mode<synchronous>, transform_indices = @transform_8, window_bounds = array<i64: 8, 32>}, {pipeline_mode = #tpu.pipeline_mode<synchronous>, transform_indices = @transform_9, window_bounds = array<i64: 8, 1>}, {transform_indices = @transform_10, window_bounds = array<i64: 1, 8, 16, 64>}]} {
    %c0 = arith.constant 0 : index
    %c0_0 = arith.constant 0 : index
    %c0_1 = arith.constant 0 : index
    %c0_2 = arith.constant 0 : index
    %0 = vector.load %arg1[%c0, %c0_0, %c0_1, %c0_2] : memref<1x16x16x4xbf16, #tpu.memory_space<vmem>>, vector<1x16x16x4xbf16>
    %1 = vector.shape_cast %0 : vector<1x16x16x4xbf16> to vector<16x16x4xbf16>
    %cst = arith.constant 0.000000e+00 : bf16
    %2 = vector.broadcast %cst : bf16 to vector<1x16x4xbf16>
    %3 = tpu.concatenate %2, %1, %2 in 0 : vector<1x16x4xbf16>, vector<16x16x4xbf16>, vector<1x16x4xbf16> -> vector<18x16x4xbf16>
    %cst_3 = arith.constant 0.000000e+00 : bf16
    %4 = vector.broadcast %cst_3 : bf16 to vector<18x1x4xbf16>
    %5 = vector.extract_strided_slice %3 {offsets = [0, 0, 0], sizes = [18, 15, 4], strides = [1, 1, 1]} : vector<18x16x4xbf16> to vector<18x15x4xbf16>
    %6 = tpu.concatenate %4, %5 in 1 : vector<18x1x4xbf16>, vector<18x15x4xbf16> -> vector<18x16x4xbf16>
    %7 = vector.extract_strided_slice %3 {offsets = [0, 1, 0], sizes = [18, 15, 4], strides = [1, 1, 1]} : vector<18x16x4xbf16> to vector<18x15x4xbf16>
    %8 = tpu.concatenate %7, %4 in 1 : vector<18x15x4xbf16>, vector<18x1x4xbf16> -> vector<18x16x4xbf16>
    %9 = vector.extract_strided_slice %6 {offsets = [0, 0, 0], sizes = [16, 16, 4], strides = [1, 1, 1]} : vector<18x16x4xbf16> to vector<16x16x4xbf16>
    %10 = vector.shape_cast %9 : vector<16x16x4xbf16> to vector<256x4xbf16>
    %11 = vector.extract_strided_slice %3 {offsets = [0, 0, 0], sizes = [16, 16, 4], strides = [1, 1, 1]} : vector<18x16x4xbf16> to vector<16x16x4xbf16>
    %12 = vector.shape_cast %11 : vector<16x16x4xbf16> to vector<256x4xbf16>
    %13 = vector.extract_strided_slice %8 {offsets = [0, 0, 0], sizes = [16, 16, 4], strides = [1, 1, 1]} : vector<18x16x4xbf16> to vector<16x16x4xbf16>
    %14 = vector.shape_cast %13 : vector<16x16x4xbf16> to vector<256x4xbf16>
    %15 = vector.extract_strided_slice %6 {offsets = [1, 0, 0], sizes = [16, 16, 4], strides = [1, 1, 1]} : vector<18x16x4xbf16> to vector<16x16x4xbf16>
    %16 = vector.shape_cast %15 : vector<16x16x4xbf16> to vector<256x4xbf16>
    %17 = vector.extract_strided_slice %3 {offsets = [1, 0, 0], sizes = [16, 16, 4], strides = [1, 1, 1]} : vector<18x16x4xbf16> to vector<16x16x4xbf16>
    %18 = vector.shape_cast %17 : vector<16x16x4xbf16> to vector<256x4xbf16>
    %19 = vector.extract_strided_slice %8 {offsets = [1, 0, 0], sizes = [16, 16, 4], strides = [1, 1, 1]} : vector<18x16x4xbf16> to vector<16x16x4xbf16>
    %20 = vector.shape_cast %19 : vector<16x16x4xbf16> to vector<256x4xbf16>
    %21 = vector.extract_strided_slice %6 {offsets = [2, 0, 0], sizes = [16, 16, 4], strides = [1, 1, 1]} : vector<18x16x4xbf16> to vector<16x16x4xbf16>
    %22 = vector.shape_cast %21 : vector<16x16x4xbf16> to vector<256x4xbf16>
    %23 = vector.extract_strided_slice %3 {offsets = [2, 0, 0], sizes = [16, 16, 4], strides = [1, 1, 1]} : vector<18x16x4xbf16> to vector<16x16x4xbf16>
    %24 = vector.shape_cast %23 : vector<16x16x4xbf16> to vector<256x4xbf16>
    %25 = vector.extract_strided_slice %8 {offsets = [2, 0, 0], sizes = [16, 16, 4], strides = [1, 1, 1]} : vector<18x16x4xbf16> to vector<16x16x4xbf16>
    %26 = vector.shape_cast %25 : vector<16x16x4xbf16> to vector<256x4xbf16>
    %27 = tpu.concatenate %10, %12, %14, %16, %18, %20, %22, %24, %26 in 1 : vector<256x4xbf16>, vector<256x4xbf16>, vector<256x4xbf16>, vector<256x4xbf16>, vector<256x4xbf16>, vector<256x4xbf16>, vector<256x4xbf16>, vector<256x4xbf16>, vector<256x4xbf16> -> vector<256x36xbf16>
    %c0_4 = arith.constant 0 : index
    %c0_5 = arith.constant 0 : index
    %28 = vector.load %arg2[%c0_4, %c0_5] : memref<36x32xbf16, #tpu.memory_space<vmem>>, vector<36x32xbf16>
    %cst_6 = arith.constant dense<0.000000e+00> : vector<256x32xf32>
    %29 = tpu.matmul %27, %28, %cst_6 {dimension_numbers = #tpu.dot_dimension_numbers<[1], [0], [0], [1], [0, 0, 1, 1], [], []>} : vector<256x36xbf16>, vector<36x32xbf16>, vector<256x32xf32> -> vector<256x32xf32>
    %c0_7 = arith.constant 0 : index
    %c0_8 = arith.constant 0 : index
    %30 = vector.load %arg3[%c0_7, %c0_8] : memref<1x32xf32, #tpu.memory_space<vmem>>, vector<1x32xf32>
    %31 = vector.broadcast %30 : vector<1x32xf32> to vector<256x32xf32>
    %32 = arith.addf %29, %31 : vector<256x32xf32>
    %cst_9 = arith.constant 0.000000e+00 : f32
    %33 = vector.broadcast %cst_9 : f32 to vector<256x32xf32>
    %34 = arith.maximumf %32, %33 : vector<256x32xf32>
    %35 = arith.truncf %34 : vector<256x32xf32> to vector<256x32xbf16>
    %36 = vector.shape_cast %35 : vector<256x32xbf16> to vector<16x16x32xbf16>
    %cst_10 = arith.constant 0.000000e+00 : bf16
    %37 = vector.broadcast %cst_10 : bf16 to vector<1x16x32xbf16>
    %38 = tpu.concatenate %37, %36, %37 in 0 : vector<1x16x32xbf16>, vector<16x16x32xbf16>, vector<1x16x32xbf16> -> vector<18x16x32xbf16>
    %cst_11 = arith.constant 0.000000e+00 : bf16
    %39 = vector.broadcast %cst_11 : bf16 to vector<18x1x32xbf16>
    %40 = vector.extract_strided_slice %38 {offsets = [0, 0, 0], sizes = [18, 15, 32], strides = [1, 1, 1]} : vector<18x16x32xbf16> to vector<18x15x32xbf16>
    %41 = tpu.concatenate %39, %40 in 1 : vector<18x1x32xbf16>, vector<18x15x32xbf16> -> vector<18x16x32xbf16>
    %42 = vector.extract_strided_slice %38 {offsets = [0, 1, 0], sizes = [18, 15, 32], strides = [1, 1, 1]} : vector<18x16x32xbf16> to vector<18x15x32xbf16>
    %43 = tpu.concatenate %42, %39 in 1 : vector<18x15x32xbf16>, vector<18x1x32xbf16> -> vector<18x16x32xbf16>
    %44 = vector.extract_strided_slice %41 {offsets = [0, 0, 0], sizes = [16, 16, 32], strides = [1, 1, 1]} : vector<18x16x32xbf16> to vector<16x16x32xbf16>
    %45 = vector.shape_cast %44 : vector<16x16x32xbf16> to vector<256x32xbf16>
    %46 = vector.extract_strided_slice %38 {offsets = [0, 0, 0], sizes = [16, 16, 32], strides = [1, 1, 1]} : vector<18x16x32xbf16> to vector<16x16x32xbf16>
    %47 = vector.shape_cast %46 : vector<16x16x32xbf16> to vector<256x32xbf16>
    %48 = vector.extract_strided_slice %43 {offsets = [0, 0, 0], sizes = [16, 16, 32], strides = [1, 1, 1]} : vector<18x16x32xbf16> to vector<16x16x32xbf16>
    %49 = vector.shape_cast %48 : vector<16x16x32xbf16> to vector<256x32xbf16>
    %50 = vector.extract_strided_slice %41 {offsets = [1, 0, 0], sizes = [16, 16, 32], strides = [1, 1, 1]} : vector<18x16x32xbf16> to vector<16x16x32xbf16>
    %51 = vector.shape_cast %50 : vector<16x16x32xbf16> to vector<256x32xbf16>
    %52 = vector.extract_strided_slice %38 {offsets = [1, 0, 0], sizes = [16, 16, 32], strides = [1, 1, 1]} : vector<18x16x32xbf16> to vector<16x16x32xbf16>
    %53 = vector.shape_cast %52 : vector<16x16x32xbf16> to vector<256x32xbf16>
    %54 = vector.extract_strided_slice %43 {offsets = [1, 0, 0], sizes = [16, 16, 32], strides = [1, 1, 1]} : vector<18x16x32xbf16> to vector<16x16x32xbf16>
    %55 = vector.shape_cast %54 : vector<16x16x32xbf16> to vector<256x32xbf16>
    %56 = vector.extract_strided_slice %41 {offsets = [2, 0, 0], sizes = [16, 16, 32], strides = [1, 1, 1]} : vector<18x16x32xbf16> to vector<16x16x32xbf16>
    %57 = vector.shape_cast %56 : vector<16x16x32xbf16> to vector<256x32xbf16>
    %58 = vector.extract_strided_slice %38 {offsets = [2, 0, 0], sizes = [16, 16, 32], strides = [1, 1, 1]} : vector<18x16x32xbf16> to vector<16x16x32xbf16>
    %59 = vector.shape_cast %58 : vector<16x16x32xbf16> to vector<256x32xbf16>
    %60 = vector.extract_strided_slice %43 {offsets = [2, 0, 0], sizes = [16, 16, 32], strides = [1, 1, 1]} : vector<18x16x32xbf16> to vector<16x16x32xbf16>
    %61 = vector.shape_cast %60 : vector<16x16x32xbf16> to vector<256x32xbf16>
    %c0_12 = arith.constant 0 : index
    %c0_13 = arith.constant 0 : index
    %c0_14 = arith.constant 0 : index
    %62 = vector.load %arg4[%c0_12, %c0_13, %c0_14] : memref<9x32x32xbf16, #tpu.memory_space<vmem>>, vector<1x32x32xbf16>
    %63 = vector.shape_cast %62 : vector<1x32x32xbf16> to vector<32x32xbf16>
    %cst_15 = arith.constant dense<0.000000e+00> : vector<256x32xf32>
    %64 = tpu.matmul %45, %63, %cst_15 {dimension_numbers = #tpu.dot_dimension_numbers<[1], [0], [0], [1], [0, 0, 1, 1], [], []>} : vector<256x32xbf16>, vector<32x32xbf16>, vector<256x32xf32> -> vector<256x32xf32>
    %c1 = arith.constant 1 : index
    %c0_16 = arith.constant 0 : index
    %c0_17 = arith.constant 0 : index
    %65 = vector.load %arg4[%c1, %c0_16, %c0_17] : memref<9x32x32xbf16, #tpu.memory_space<vmem>>, vector<1x32x32xbf16>
    %66 = vector.shape_cast %65 : vector<1x32x32xbf16> to vector<32x32xbf16>
    %cst_18 = arith.constant dense<0.000000e+00> : vector<256x32xf32>
    %67 = tpu.matmul %47, %66, %cst_18 {dimension_numbers = #tpu.dot_dimension_numbers<[1], [0], [0], [1], [0, 0, 1, 1], [], []>} : vector<256x32xbf16>, vector<32x32xbf16>, vector<256x32xf32> -> vector<256x32xf32>
    %68 = arith.addf %64, %67 : vector<256x32xf32>
    %c2 = arith.constant 2 : index
    %c0_19 = arith.constant 0 : index
    %c0_20 = arith.constant 0 : index
    %69 = vector.load %arg4[%c2, %c0_19, %c0_20] : memref<9x32x32xbf16, #tpu.memory_space<vmem>>, vector<1x32x32xbf16>
    %70 = vector.shape_cast %69 : vector<1x32x32xbf16> to vector<32x32xbf16>
    %cst_21 = arith.constant dense<0.000000e+00> : vector<256x32xf32>
    %71 = tpu.matmul %49, %70, %cst_21 {dimension_numbers = #tpu.dot_dimension_numbers<[1], [0], [0], [1], [0, 0, 1, 1], [], []>} : vector<256x32xbf16>, vector<32x32xbf16>, vector<256x32xf32> -> vector<256x32xf32>
    %72 = arith.addf %68, %71 : vector<256x32xf32>
    %c3 = arith.constant 3 : index
    %c0_22 = arith.constant 0 : index
    %c0_23 = arith.constant 0 : index
    %73 = vector.load %arg4[%c3, %c0_22, %c0_23] : memref<9x32x32xbf16, #tpu.memory_space<vmem>>, vector<1x32x32xbf16>
    %74 = vector.shape_cast %73 : vector<1x32x32xbf16> to vector<32x32xbf16>
    %cst_24 = arith.constant dense<0.000000e+00> : vector<256x32xf32>
    %75 = tpu.matmul %51, %74, %cst_24 {dimension_numbers = #tpu.dot_dimension_numbers<[1], [0], [0], [1], [0, 0, 1, 1], [], []>} : vector<256x32xbf16>, vector<32x32xbf16>, vector<256x32xf32> -> vector<256x32xf32>
    %76 = arith.addf %72, %75 : vector<256x32xf32>
    %c4 = arith.constant 4 : index
    %c0_25 = arith.constant 0 : index
    %c0_26 = arith.constant 0 : index
    %77 = vector.load %arg4[%c4, %c0_25, %c0_26] : memref<9x32x32xbf16, #tpu.memory_space<vmem>>, vector<1x32x32xbf16>
    %78 = vector.shape_cast %77 : vector<1x32x32xbf16> to vector<32x32xbf16>
    %cst_27 = arith.constant dense<0.000000e+00> : vector<256x32xf32>
    %79 = tpu.matmul %53, %78, %cst_27 {dimension_numbers = #tpu.dot_dimension_numbers<[1], [0], [0], [1], [0, 0, 1, 1], [], []>} : vector<256x32xbf16>, vector<32x32xbf16>, vector<256x32xf32> -> vector<256x32xf32>
    %80 = arith.addf %76, %79 : vector<256x32xf32>
    %c5 = arith.constant 5 : index
    %c0_28 = arith.constant 0 : index
    %c0_29 = arith.constant 0 : index
    %81 = vector.load %arg4[%c5, %c0_28, %c0_29] : memref<9x32x32xbf16, #tpu.memory_space<vmem>>, vector<1x32x32xbf16>
    %82 = vector.shape_cast %81 : vector<1x32x32xbf16> to vector<32x32xbf16>
    %cst_30 = arith.constant dense<0.000000e+00> : vector<256x32xf32>
    %83 = tpu.matmul %55, %82, %cst_30 {dimension_numbers = #tpu.dot_dimension_numbers<[1], [0], [0], [1], [0, 0, 1, 1], [], []>} : vector<256x32xbf16>, vector<32x32xbf16>, vector<256x32xf32> -> vector<256x32xf32>
    %84 = arith.addf %80, %83 : vector<256x32xf32>
    %c6 = arith.constant 6 : index
    %c0_31 = arith.constant 0 : index
    %c0_32 = arith.constant 0 : index
    %85 = vector.load %arg4[%c6, %c0_31, %c0_32] : memref<9x32x32xbf16, #tpu.memory_space<vmem>>, vector<1x32x32xbf16>
    %86 = vector.shape_cast %85 : vector<1x32x32xbf16> to vector<32x32xbf16>
    %cst_33 = arith.constant dense<0.000000e+00> : vector<256x32xf32>
    %87 = tpu.matmul %57, %86, %cst_33 {dimension_numbers = #tpu.dot_dimension_numbers<[1], [0], [0], [1], [0, 0, 1, 1], [], []>} : vector<256x32xbf16>, vector<32x32xbf16>, vector<256x32xf32> -> vector<256x32xf32>
    %88 = arith.addf %84, %87 : vector<256x32xf32>
    %c7 = arith.constant 7 : index
    %c0_34 = arith.constant 0 : index
    %c0_35 = arith.constant 0 : index
    %89 = vector.load %arg4[%c7, %c0_34, %c0_35] : memref<9x32x32xbf16, #tpu.memory_space<vmem>>, vector<1x32x32xbf16>
    %90 = vector.shape_cast %89 : vector<1x32x32xbf16> to vector<32x32xbf16>
    %cst_36 = arith.constant dense<0.000000e+00> : vector<256x32xf32>
    %91 = tpu.matmul %59, %90, %cst_36 {dimension_numbers = #tpu.dot_dimension_numbers<[1], [0], [0], [1], [0, 0, 1, 1], [], []>} : vector<256x32xbf16>, vector<32x32xbf16>, vector<256x32xf32> -> vector<256x32xf32>
    %92 = arith.addf %88, %91 : vector<256x32xf32>
    %c8 = arith.constant 8 : index
    %c0_37 = arith.constant 0 : index
    %c0_38 = arith.constant 0 : index
    %93 = vector.load %arg4[%c8, %c0_37, %c0_38] : memref<9x32x32xbf16, #tpu.memory_space<vmem>>, vector<1x32x32xbf16>
    %94 = vector.shape_cast %93 : vector<1x32x32xbf16> to vector<32x32xbf16>
    %cst_39 = arith.constant dense<0.000000e+00> : vector<256x32xf32>
    %95 = tpu.matmul %61, %94, %cst_39 {dimension_numbers = #tpu.dot_dimension_numbers<[1], [0], [0], [1], [0, 0, 1, 1], [], []>} : vector<256x32xbf16>, vector<32x32xbf16>, vector<256x32xf32> -> vector<256x32xf32>
    %96 = arith.addf %92, %95 : vector<256x32xf32>
    %c0_40 = arith.constant 0 : index
    %c0_41 = arith.constant 0 : index
    %97 = vector.load %arg5[%c0_40, %c0_41] : memref<1x32xf32, #tpu.memory_space<vmem>>, vector<1x32xf32>
    %98 = vector.broadcast %97 : vector<1x32xf32> to vector<256x32xf32>
    %99 = arith.addf %96, %98 : vector<256x32xf32>
    %cst_42 = arith.constant 0.000000e+00 : f32
    %100 = vector.broadcast %cst_42 : f32 to vector<256x32xf32>
    %101 = arith.maximumf %99, %100 : vector<256x32xf32>
    %102 = arith.truncf %101 : vector<256x32xf32> to vector<256x32xbf16>
    %103 = vector.shape_cast %102 : vector<256x32xbf16> to vector<16x16x32xbf16>
    %cst_43 = arith.constant 0.000000e+00 : bf16
    %104 = vector.broadcast %cst_43 : bf16 to vector<1x16x32xbf16>
    %105 = tpu.concatenate %104, %103, %104 in 0 : vector<1x16x32xbf16>, vector<16x16x32xbf16>, vector<1x16x32xbf16> -> vector<18x16x32xbf16>
    %cst_44 = arith.constant 0.000000e+00 : bf16
    %106 = vector.broadcast %cst_44 : bf16 to vector<18x1x32xbf16>
    %107 = vector.extract_strided_slice %105 {offsets = [0, 0, 0], sizes = [18, 15, 32], strides = [1, 1, 1]} : vector<18x16x32xbf16> to vector<18x15x32xbf16>
    %108 = tpu.concatenate %106, %107 in 1 : vector<18x1x32xbf16>, vector<18x15x32xbf16> -> vector<18x16x32xbf16>
    %109 = vector.extract_strided_slice %105 {offsets = [0, 1, 0], sizes = [18, 15, 32], strides = [1, 1, 1]} : vector<18x16x32xbf16> to vector<18x15x32xbf16>
    %110 = tpu.concatenate %109, %106 in 1 : vector<18x15x32xbf16>, vector<18x1x32xbf16> -> vector<18x16x32xbf16>
    %111 = vector.extract_strided_slice %108 {offsets = [0, 0, 0], sizes = [16, 16, 32], strides = [1, 1, 1]} : vector<18x16x32xbf16> to vector<16x16x32xbf16>
    %112 = vector.shape_cast %111 : vector<16x16x32xbf16> to vector<256x32xbf16>
    %113 = vector.extract_strided_slice %105 {offsets = [0, 0, 0], sizes = [16, 16, 32], strides = [1, 1, 1]} : vector<18x16x32xbf16> to vector<16x16x32xbf16>
    %114 = vector.shape_cast %113 : vector<16x16x32xbf16> to vector<256x32xbf16>
    %115 = vector.extract_strided_slice %110 {offsets = [0, 0, 0], sizes = [16, 16, 32], strides = [1, 1, 1]} : vector<18x16x32xbf16> to vector<16x16x32xbf16>
    %116 = vector.shape_cast %115 : vector<16x16x32xbf16> to vector<256x32xbf16>
    %117 = vector.extract_strided_slice %108 {offsets = [1, 0, 0], sizes = [16, 16, 32], strides = [1, 1, 1]} : vector<18x16x32xbf16> to vector<16x16x32xbf16>
    %118 = vector.shape_cast %117 : vector<16x16x32xbf16> to vector<256x32xbf16>
    %119 = vector.extract_strided_slice %105 {offsets = [1, 0, 0], sizes = [16, 16, 32], strides = [1, 1, 1]} : vector<18x16x32xbf16> to vector<16x16x32xbf16>
    %120 = vector.shape_cast %119 : vector<16x16x32xbf16> to vector<256x32xbf16>
    %121 = vector.extract_strided_slice %110 {offsets = [1, 0, 0], sizes = [16, 16, 32], strides = [1, 1, 1]} : vector<18x16x32xbf16> to vector<16x16x32xbf16>
    %122 = vector.shape_cast %121 : vector<16x16x32xbf16> to vector<256x32xbf16>
    %123 = vector.extract_strided_slice %108 {offsets = [2, 0, 0], sizes = [16, 16, 32], strides = [1, 1, 1]} : vector<18x16x32xbf16> to vector<16x16x32xbf16>
    %124 = vector.shape_cast %123 : vector<16x16x32xbf16> to vector<256x32xbf16>
    %125 = vector.extract_strided_slice %105 {offsets = [2, 0, 0], sizes = [16, 16, 32], strides = [1, 1, 1]} : vector<18x16x32xbf16> to vector<16x16x32xbf16>
    %126 = vector.shape_cast %125 : vector<16x16x32xbf16> to vector<256x32xbf16>
    %127 = vector.extract_strided_slice %110 {offsets = [2, 0, 0], sizes = [16, 16, 32], strides = [1, 1, 1]} : vector<18x16x32xbf16> to vector<16x16x32xbf16>
    %128 = vector.shape_cast %127 : vector<16x16x32xbf16> to vector<256x32xbf16>
    %c0_45 = arith.constant 0 : index
    %c0_46 = arith.constant 0 : index
    %c0_47 = arith.constant 0 : index
    %129 = vector.load %arg6[%c0_45, %c0_46, %c0_47] : memref<9x32x32xbf16, #tpu.memory_space<vmem>>, vector<1x32x32xbf16>
    %130 = vector.shape_cast %129 : vector<1x32x32xbf16> to vector<32x32xbf16>
    %cst_48 = arith.constant dense<0.000000e+00> : vector<256x32xf32>
    %131 = tpu.matmul %112, %130, %cst_48 {dimension_numbers = #tpu.dot_dimension_numbers<[1], [0], [0], [1], [0, 0, 1, 1], [], []>} : vector<256x32xbf16>, vector<32x32xbf16>, vector<256x32xf32> -> vector<256x32xf32>
    %c1_49 = arith.constant 1 : index
    %c0_50 = arith.constant 0 : index
    %c0_51 = arith.constant 0 : index
    %132 = vector.load %arg6[%c1_49, %c0_50, %c0_51] : memref<9x32x32xbf16, #tpu.memory_space<vmem>>, vector<1x32x32xbf16>
    %133 = vector.shape_cast %132 : vector<1x32x32xbf16> to vector<32x32xbf16>
    %cst_52 = arith.constant dense<0.000000e+00> : vector<256x32xf32>
    %134 = tpu.matmul %114, %133, %cst_52 {dimension_numbers = #tpu.dot_dimension_numbers<[1], [0], [0], [1], [0, 0, 1, 1], [], []>} : vector<256x32xbf16>, vector<32x32xbf16>, vector<256x32xf32> -> vector<256x32xf32>
    %135 = arith.addf %131, %134 : vector<256x32xf32>
    %c2_53 = arith.constant 2 : index
    %c0_54 = arith.constant 0 : index
    %c0_55 = arith.constant 0 : index
    %136 = vector.load %arg6[%c2_53, %c0_54, %c0_55] : memref<9x32x32xbf16, #tpu.memory_space<vmem>>, vector<1x32x32xbf16>
    %137 = vector.shape_cast %136 : vector<1x32x32xbf16> to vector<32x32xbf16>
    %cst_56 = arith.constant dense<0.000000e+00> : vector<256x32xf32>
    %138 = tpu.matmul %116, %137, %cst_56 {dimension_numbers = #tpu.dot_dimension_numbers<[1], [0], [0], [1], [0, 0, 1, 1], [], []>} : vector<256x32xbf16>, vector<32x32xbf16>, vector<256x32xf32> -> vector<256x32xf32>
    %139 = arith.addf %135, %138 : vector<256x32xf32>
    %c3_57 = arith.constant 3 : index
    %c0_58 = arith.constant 0 : index
    %c0_59 = arith.constant 0 : index
    %140 = vector.load %arg6[%c3_57, %c0_58, %c0_59] : memref<9x32x32xbf16, #tpu.memory_space<vmem>>, vector<1x32x32xbf16>
    %141 = vector.shape_cast %140 : vector<1x32x32xbf16> to vector<32x32xbf16>
    %cst_60 = arith.constant dense<0.000000e+00> : vector<256x32xf32>
    %142 = tpu.matmul %118, %141, %cst_60 {dimension_numbers = #tpu.dot_dimension_numbers<[1], [0], [0], [1], [0, 0, 1, 1], [], []>} : vector<256x32xbf16>, vector<32x32xbf16>, vector<256x32xf32> -> vector<256x32xf32>
    %143 = arith.addf %139, %142 : vector<256x32xf32>
    %c4_61 = arith.constant 4 : index
    %c0_62 = arith.constant 0 : index
    %c0_63 = arith.constant 0 : index
    %144 = vector.load %arg6[%c4_61, %c0_62, %c0_63] : memref<9x32x32xbf16, #tpu.memory_space<vmem>>, vector<1x32x32xbf16>
    %145 = vector.shape_cast %144 : vector<1x32x32xbf16> to vector<32x32xbf16>
    %cst_64 = arith.constant dense<0.000000e+00> : vector<256x32xf32>
    %146 = tpu.matmul %120, %145, %cst_64 {dimension_numbers = #tpu.dot_dimension_numbers<[1], [0], [0], [1], [0, 0, 1, 1], [], []>} : vector<256x32xbf16>, vector<32x32xbf16>, vector<256x32xf32> -> vector<256x32xf32>
    %147 = arith.addf %143, %146 : vector<256x32xf32>
    %c5_65 = arith.constant 5 : index
    %c0_66 = arith.constant 0 : index
    %c0_67 = arith.constant 0 : index
    %148 = vector.load %arg6[%c5_65, %c0_66, %c0_67] : memref<9x32x32xbf16, #tpu.memory_space<vmem>>, vector<1x32x32xbf16>
    %149 = vector.shape_cast %148 : vector<1x32x32xbf16> to vector<32x32xbf16>
    %cst_68 = arith.constant dense<0.000000e+00> : vector<256x32xf32>
    %150 = tpu.matmul %122, %149, %cst_68 {dimension_numbers = #tpu.dot_dimension_numbers<[1], [0], [0], [1], [0, 0, 1, 1], [], []>} : vector<256x32xbf16>, vector<32x32xbf16>, vector<256x32xf32> -> vector<256x32xf32>
    %151 = arith.addf %147, %150 : vector<256x32xf32>
    %c6_69 = arith.constant 6 : index
    %c0_70 = arith.constant 0 : index
    %c0_71 = arith.constant 0 : index
    %152 = vector.load %arg6[%c6_69, %c0_70, %c0_71] : memref<9x32x32xbf16, #tpu.memory_space<vmem>>, vector<1x32x32xbf16>
    %153 = vector.shape_cast %152 : vector<1x32x32xbf16> to vector<32x32xbf16>
    %cst_72 = arith.constant dense<0.000000e+00> : vector<256x32xf32>
    %154 = tpu.matmul %124, %153, %cst_72 {dimension_numbers = #tpu.dot_dimension_numbers<[1], [0], [0], [1], [0, 0, 1, 1], [], []>} : vector<256x32xbf16>, vector<32x32xbf16>, vector<256x32xf32> -> vector<256x32xf32>
    %155 = arith.addf %151, %154 : vector<256x32xf32>
    %c7_73 = arith.constant 7 : index
    %c0_74 = arith.constant 0 : index
    %c0_75 = arith.constant 0 : index
    %156 = vector.load %arg6[%c7_73, %c0_74, %c0_75] : memref<9x32x32xbf16, #tpu.memory_space<vmem>>, vector<1x32x32xbf16>
    %157 = vector.shape_cast %156 : vector<1x32x32xbf16> to vector<32x32xbf16>
    %cst_76 = arith.constant dense<0.000000e+00> : vector<256x32xf32>
    %158 = tpu.matmul %126, %157, %cst_76 {dimension_numbers = #tpu.dot_dimension_numbers<[1], [0], [0], [1], [0, 0, 1, 1], [], []>} : vector<256x32xbf16>, vector<32x32xbf16>, vector<256x32xf32> -> vector<256x32xf32>
    %159 = arith.addf %155, %158 : vector<256x32xf32>
    %c8_77 = arith.constant 8 : index
    %c0_78 = arith.constant 0 : index
    %c0_79 = arith.constant 0 : index
    %160 = vector.load %arg6[%c8_77, %c0_78, %c0_79] : memref<9x32x32xbf16, #tpu.memory_space<vmem>>, vector<1x32x32xbf16>
    %161 = vector.shape_cast %160 : vector<1x32x32xbf16> to vector<32x32xbf16>
    %cst_80 = arith.constant dense<0.000000e+00> : vector<256x32xf32>
    %162 = tpu.matmul %128, %161, %cst_80 {dimension_numbers = #tpu.dot_dimension_numbers<[1], [0], [0], [1], [0, 0, 1, 1], [], []>} : vector<256x32xbf16>, vector<32x32xbf16>, vector<256x32xf32> -> vector<256x32xf32>
    %163 = arith.addf %159, %162 : vector<256x32xf32>
    %c0_81 = arith.constant 0 : index
    %c0_82 = arith.constant 0 : index
    %164 = vector.load %arg7[%c0_81, %c0_82] : memref<1x32xf32, #tpu.memory_space<vmem>>, vector<1x32xf32>
    %165 = vector.broadcast %164 : vector<1x32xf32> to vector<256x32xf32>
    %166 = arith.addf %163, %165 : vector<256x32xf32>
    %cst_83 = arith.constant 0.000000e+00 : f32
    %167 = vector.broadcast %cst_83 : f32 to vector<256x32xf32>
    %168 = arith.maximumf %166, %167 : vector<256x32xf32>
    %c0_84 = arith.constant 0 : index
    %c0_85 = arith.constant 0 : index
    %169 = vector.load %arg9[%c0_84, %c0_85] : memref<8x32xbf16, #tpu.memory_space<vmem>>, vector<8x32xbf16>
    %170 = arith.truncf %168 : vector<256x32xf32> to vector<256x32xbf16>
    %cst_86 = arith.constant dense<0.000000e+00> : vector<8x256xf32>
    %171 = tpu.matmul %169, %170, %cst_86 {dimension_numbers = #tpu.dot_dimension_numbers<[1], [1], [0], [0], [0, 0, 1, 0], [], []>} : vector<8x32xbf16>, vector<256x32xbf16>, vector<8x256xf32> -> vector<8x256xf32>
    %c0_87 = arith.constant 0 : index
    %c0_88 = arith.constant 0 : index
    %172 = vector.load %arg10[%c0_87, %c0_88] : memref<8x1xf32, #tpu.memory_space<vmem>>, vector<8x1xf32>
    %173 = vector.broadcast %172 : vector<8x1xf32> to vector<8x256xf32>
    %174 = arith.addf %171, %173 : vector<8x256xf32>
    %175 = vector.extract_strided_slice %174 {offsets = [0, 0], sizes = [8, 16], strides = [1, 1]} : vector<8x256xf32> to vector<8x16xf32>
    %176 = vector.extract_strided_slice %174 {offsets = [0, 0], sizes = [8, 240], strides = [1, 1]} : vector<8x256xf32> to vector<8x240xf32>
    %177 = tpu.concatenate %175, %176 in 1 : vector<8x16xf32>, vector<8x240xf32> -> vector<8x256xf32>
    %178 = vector.extract_strided_slice %174 {offsets = [0, 16], sizes = [8, 240], strides = [1, 1]} : vector<8x256xf32> to vector<8x240xf32>
    %179 = vector.extract_strided_slice %174 {offsets = [0, 240], sizes = [8, 16], strides = [1, 1]} : vector<8x256xf32> to vector<8x16xf32>
    %180 = tpu.concatenate %178, %179 in 1 : vector<8x240xf32>, vector<8x16xf32> -> vector<8x256xf32>
    %cst_89 = arith.constant 2.500000e-01 : f32
    %181 = vector.broadcast %cst_89 : f32 to vector<8x256xf32>
    %182 = arith.mulf %181, %177 : vector<8x256xf32>
    %cst_90 = arith.constant 7.500000e-01 : f32
    %183 = vector.broadcast %cst_90 : f32 to vector<8x256xf32>
    %184 = arith.mulf %183, %174 : vector<8x256xf32>
    %185 = arith.addf %182, %184 : vector<8x256xf32>
    %186 = arith.truncf %185 : vector<8x256xf32> to vector<8x256xbf16>
    %cst_91 = arith.constant 7.500000e-01 : f32
    %187 = vector.broadcast %cst_91 : f32 to vector<8x256xf32>
    %188 = arith.mulf %187, %174 : vector<8x256xf32>
    %cst_92 = arith.constant 2.500000e-01 : f32
    %189 = vector.broadcast %cst_92 : f32 to vector<8x256xf32>
    %190 = arith.mulf %189, %180 : vector<8x256xf32>
    %191 = arith.addf %188, %190 : vector<8x256xf32>
    %192 = arith.truncf %191 : vector<8x256xf32> to vector<8x256xbf16>
    %193 = vector.extract_strided_slice %186 {offsets = [0, 0], sizes = [8, 16], strides = [1, 1]} : vector<8x256xbf16> to vector<8x16xbf16>
    %c0_93 = arith.constant 0 : index
    %c0_94 = arith.constant 0 : index
    %c0_95 = arith.constant 0 : index
    %194 = vector.load %arg12[%c0_93, %c0_94, %c0_95] : memref<8x16x32xbf16, #tpu.memory_space<vmem>>, vector<8x1x16xbf16>
    %195 = vector.shape_cast %194 : vector<8x1x16xbf16> to vector<8x16xbf16>
    %196 = vector.shape_cast %193 : vector<8x16xbf16> to vector<8x1x16xbf16>
    tpu.vector_store %arg12[%c0_93, %c0_94, %c0_95], %196 {strides = array<i32>} : memref<8x16x32xbf16, #tpu.memory_space<vmem>>, vector<8x1x16xbf16>,
    %197 = vector.extract_strided_slice %192 {offsets = [0, 0], sizes = [8, 16], strides = [1, 1]} : vector<8x256xbf16> to vector<8x16xbf16>
    %c0_96 = arith.constant 0 : index
    %c0_97 = arith.constant 0 : index
    %c16 = arith.constant 16 : index
    %198 = vector.load %arg12[%c0_96, %c0_97, %c16] : memref<8x16x32xbf16, #tpu.memory_space<vmem>>, vector<8x1x16xbf16>
    %199 = vector.shape_cast %198 : vector<8x1x16xbf16> to vector<8x16xbf16>
    %200 = vector.shape_cast %197 : vector<8x16xbf16> to vector<8x1x16xbf16>
    tpu.vector_store %arg12[%c0_96, %c0_97, %c16], %200 {strides = array<i32>} : memref<8x16x32xbf16, #tpu.memory_space<vmem>>, vector<8x1x16xbf16>,
    %201 = vector.extract_strided_slice %186 {offsets = [0, 16], sizes = [8, 16], strides = [1, 1]} : vector<8x256xbf16> to vector<8x16xbf16>
    %c0_98 = arith.constant 0 : index
    %c1_99 = arith.constant 1 : index
    %c0_100 = arith.constant 0 : index
    %202 = vector.load %arg12[%c0_98, %c1_99, %c0_100] : memref<8x16x32xbf16, #tpu.memory_space<vmem>>, vector<8x1x16xbf16>
    %203 = vector.shape_cast %202 : vector<8x1x16xbf16> to vector<8x16xbf16>
    %204 = vector.shape_cast %201 : vector<8x16xbf16> to vector<8x1x16xbf16>
    tpu.vector_store %arg12[%c0_98, %c1_99, %c0_100], %204 {strides = array<i32>} : memref<8x16x32xbf16, #tpu.memory_space<vmem>>, vector<8x1x16xbf16>,
    %205 = vector.extract_strided_slice %192 {offsets = [0, 16], sizes = [8, 16], strides = [1, 1]} : vector<8x256xbf16> to vector<8x16xbf16>
    %c0_101 = arith.constant 0 : index
    %c1_102 = arith.constant 1 : index
    %c16_103 = arith.constant 16 : index
    %206 = vector.load %arg12[%c0_101, %c1_102, %c16_103] : memref<8x16x32xbf16, #tpu.memory_space<vmem>>, vector<8x1x16xbf16>
    %207 = vector.shape_cast %206 : vector<8x1x16xbf16> to vector<8x16xbf16>
    %208 = vector.shape_cast %205 : vector<8x16xbf16> to vector<8x1x16xbf16>
    tpu.vector_store %arg12[%c0_101, %c1_102, %c16_103], %208 {strides = array<i32>} : memref<8x16x32xbf16, #tpu.memory_space<vmem>>, vector<8x1x16xbf16>,
    %209 = vector.extract_strided_slice %186 {offsets = [0, 32], sizes = [8, 16], strides = [1, 1]} : vector<8x256xbf16> to vector<8x16xbf16>
    %c0_104 = arith.constant 0 : index
    %c2_105 = arith.constant 2 : index
    %c0_106 = arith.constant 0 : index
    %210 = vector.load %arg12[%c0_104, %c2_105, %c0_106] : memref<8x16x32xbf16, #tpu.memory_space<vmem>>, vector<8x1x16xbf16>
    %211 = vector.shape_cast %210 : vector<8x1x16xbf16> to vector<8x16xbf16>
    %212 = vector.shape_cast %209 : vector<8x16xbf16> to vector<8x1x16xbf16>
    tpu.vector_store %arg12[%c0_104, %c2_105, %c0_106], %212 {strides = array<i32>} : memref<8x16x32xbf16, #tpu.memory_space<vmem>>, vector<8x1x16xbf16>,
    %213 = vector.extract_strided_slice %192 {offsets = [0, 32], sizes = [8, 16], strides = [1, 1]} : vector<8x256xbf16> to vector<8x16xbf16>
    %c0_107 = arith.constant 0 : index
    %c2_108 = arith.constant 2 : index
    %c16_109 = arith.constant 16 : index
    %214 = vector.load %arg12[%c0_107, %c2_108, %c16_109] : memref<8x16x32xbf16, #tpu.memory_space<vmem>>, vector<8x1x16xbf16>
    %215 = vector.shape_cast %214 : vector<8x1x16xbf16> to vector<8x16xbf16>
    %216 = vector.shape_cast %213 : vector<8x16xbf16> to vector<8x1x16xbf16>
    tpu.vector_store %arg12[%c0_107, %c2_108, %c16_109], %216 {strides = array<i32>} : memref<8x16x32xbf16, #tpu.memory_space<vmem>>, vector<8x1x16xbf16>,
    %217 = vector.extract_strided_slice %186 {offsets = [0, 48], sizes = [8, 16], strides = [1, 1]} : vector<8x256xbf16> to vector<8x16xbf16>
    %c0_110 = arith.constant 0 : index
    %c3_111 = arith.constant 3 : index
    %c0_112 = arith.constant 0 : index
    %218 = vector.load %arg12[%c0_110, %c3_111, %c0_112] : memref<8x16x32xbf16, #tpu.memory_space<vmem>>, vector<8x1x16xbf16>
    %219 = vector.shape_cast %218 : vector<8x1x16xbf16> to vector<8x16xbf16>
    %220 = vector.shape_cast %217 : vector<8x16xbf16> to vector<8x1x16xbf16>
    tpu.vector_store %arg12[%c0_110, %c3_111, %c0_112], %220 {strides = array<i32>} : memref<8x16x32xbf16, #tpu.memory_space<vmem>>, vector<8x1x16xbf16>,
    %221 = vector.extract_strided_slice %192 {offsets = [0, 48], sizes = [8, 16], strides = [1, 1]} : vector<8x256xbf16> to vector<8x16xbf16>
    %c0_113 = arith.constant 0 : index
    %c3_114 = arith.constant 3 : index
    %c16_115 = arith.constant 16 : index
    %222 = vector.load %arg12[%c0_113, %c3_114, %c16_115] : memref<8x16x32xbf16, #tpu.memory_space<vmem>>, vector<8x1x16xbf16>
    %223 = vector.shape_cast %222 : vector<8x1x16xbf16> to vector<8x16xbf16>
    %224 = vector.shape_cast %221 : vector<8x16xbf16> to vector<8x1x16xbf16>
    tpu.vector_store %arg12[%c0_113, %c3_114, %c16_115], %224 {strides = array<i32>} : memref<8x16x32xbf16, #tpu.memory_space<vmem>>, vector<8x1x16xbf16>,
    %225 = vector.extract_strided_slice %186 {offsets = [0, 64], sizes = [8, 16], strides = [1, 1]} : vector<8x256xbf16> to vector<8x16xbf16>
    %c0_116 = arith.constant 0 : index
    %c4_117 = arith.constant 4 : index
    %c0_118 = arith.constant 0 : index
    %226 = vector.load %arg12[%c0_116, %c4_117, %c0_118] : memref<8x16x32xbf16, #tpu.memory_space<vmem>>, vector<8x1x16xbf16>
    %227 = vector.shape_cast %226 : vector<8x1x16xbf16> to vector<8x16xbf16>
    %228 = vector.shape_cast %225 : vector<8x16xbf16> to vector<8x1x16xbf16>
    tpu.vector_store %arg12[%c0_116, %c4_117, %c0_118], %228 {strides = array<i32>} : memref<8x16x32xbf16, #tpu.memory_space<vmem>>, vector<8x1x16xbf16>,
    %229 = vector.extract_strided_slice %192 {offsets = [0, 64], sizes = [8, 16], strides = [1, 1]} : vector<8x256xbf16> to vector<8x16xbf16>
    %c0_119 = arith.constant 0 : index
    %c4_120 = arith.constant 4 : index
    %c16_121 = arith.constant 16 : index
    %230 = vector.load %arg12[%c0_119, %c4_120, %c16_121] : memref<8x16x32xbf16, #tpu.memory_space<vmem>>, vector<8x1x16xbf16>
    %231 = vector.shape_cast %230 : vector<8x1x16xbf16> to vector<8x16xbf16>
    %232 = vector.shape_cast %229 : vector<8x16xbf16> to vector<8x1x16xbf16>
    tpu.vector_store %arg12[%c0_119, %c4_120, %c16_121], %232 {strides = array<i32>} : memref<8x16x32xbf16, #tpu.memory_space<vmem>>, vector<8x1x16xbf16>,
    %233 = vector.extract_strided_slice %186 {offsets = [0, 80], sizes = [8, 16], strides = [1, 1]} : vector<8x256xbf16> to vector<8x16xbf16>
    %c0_122 = arith.constant 0 : index
    %c5_123 = arith.constant 5 : index
    %c0_124 = arith.constant 0 : index
    %234 = vector.load %arg12[%c0_122, %c5_123, %c0_124] : memref<8x16x32xbf16, #tpu.memory_space<vmem>>, vector<8x1x16xbf16>
    %235 = vector.shape_cast %234 : vector<8x1x16xbf16> to vector<8x16xbf16>
    %236 = vector.shape_cast %233 : vector<8x16xbf16> to vector<8x1x16xbf16>
    tpu.vector_store %arg12[%c0_122, %c5_123, %c0_124], %236 {strides = array<i32>} : memref<8x16x32xbf16, #tpu.memory_space<vmem>>, vector<8x1x16xbf16>,
    %237 = vector.extract_strided_slice %192 {offsets = [0, 80], sizes = [8, 16], strides = [1, 1]} : vector<8x256xbf16> to vector<8x16xbf16>
    %c0_125 = arith.constant 0 : index
    %c5_126 = arith.constant 5 : index
    %c16_127 = arith.constant 16 : index
    %238 = vector.load %arg12[%c0_125, %c5_126, %c16_127] : memref<8x16x32xbf16, #tpu.memory_space<vmem>>, vector<8x1x16xbf16>
    %239 = vector.shape_cast %238 : vector<8x1x16xbf16> to vector<8x16xbf16>
    %240 = vector.shape_cast %237 : vector<8x16xbf16> to vector<8x1x16xbf16>
    tpu.vector_store %arg12[%c0_125, %c5_126, %c16_127], %240 {strides = array<i32>} : memref<8x16x32xbf16, #tpu.memory_space<vmem>>, vector<8x1x16xbf16>,
    %241 = vector.extract_strided_slice %186 {offsets = [0, 96], sizes = [8, 16], strides = [1, 1]} : vector<8x256xbf16> to vector<8x16xbf16>
    %c0_128 = arith.constant 0 : index
    %c6_129 = arith.constant 6 : index
    %c0_130 = arith.constant 0 : index
    %242 = vector.load %arg12[%c0_128, %c6_129, %c0_130] : memref<8x16x32xbf16, #tpu.memory_space<vmem>>, vector<8x1x16xbf16>
    %243 = vector.shape_cast %242 : vector<8x1x16xbf16> to vector<8x16xbf16>
    %244 = vector.shape_cast %241 : vector<8x16xbf16> to vector<8x1x16xbf16>
    tpu.vector_store %arg12[%c0_128, %c6_129, %c0_130], %244 {strides = array<i32>} : memref<8x16x32xbf16, #tpu.memory_space<vmem>>, vector<8x1x16xbf16>,
    %245 = vector.extract_strided_slice %192 {offsets = [0, 96], sizes = [8, 16], strides = [1, 1]} : vector<8x256xbf16> to vector<8x16xbf16>
    %c0_131 = arith.constant 0 : index
    %c6_132 = arith.constant 6 : index
    %c16_133 = arith.constant 16 : index
    %246 = vector.load %arg12[%c0_131, %c6_132, %c16_133] : memref<8x16x32xbf16, #tpu.memory_space<vmem>>, vector<8x1x16xbf16>
    %247 = vector.shape_cast %246 : vector<8x1x16xbf16> to vector<8x16xbf16>
    %248 = vector.shape_cast %245 : vector<8x16xbf16> to vector<8x1x16xbf16>
    tpu.vector_store %arg12[%c0_131, %c6_132, %c16_133], %248 {strides = array<i32>} : memref<8x16x32xbf16, #tpu.memory_space<vmem>>, vector<8x1x16xbf16>,
    %249 = vector.extract_strided_slice %186 {offsets = [0, 112], sizes = [8, 16], strides = [1, 1]} : vector<8x256xbf16> to vector<8x16xbf16>
    %c0_134 = arith.constant 0 : index
    %c7_135 = arith.constant 7 : index
    %c0_136 = arith.constant 0 : index
    %250 = vector.load %arg12[%c0_134, %c7_135, %c0_136] : memref<8x16x32xbf16, #tpu.memory_space<vmem>>, vector<8x1x16xbf16>
    %251 = vector.shape_cast %250 : vector<8x1x16xbf16> to vector<8x16xbf16>
    %252 = vector.shape_cast %249 : vector<8x16xbf16> to vector<8x1x16xbf16>
    tpu.vector_store %arg12[%c0_134, %c7_135, %c0_136], %252 {strides = array<i32>} : memref<8x16x32xbf16, #tpu.memory_space<vmem>>, vector<8x1x16xbf16>,
    %253 = vector.extract_strided_slice %192 {offsets = [0, 112], sizes = [8, 16], strides = [1, 1]} : vector<8x256xbf16> to vector<8x16xbf16>
    %c0_137 = arith.constant 0 : index
    %c7_138 = arith.constant 7 : index
    %c16_139 = arith.constant 16 : index
    %254 = vector.load %arg12[%c0_137, %c7_138, %c16_139] : memref<8x16x32xbf16, #tpu.memory_space<vmem>>, vector<8x1x16xbf16>
    %255 = vector.shape_cast %254 : vector<8x1x16xbf16> to vector<8x16xbf16>
    %256 = vector.shape_cast %253 : vector<8x16xbf16> to vector<8x1x16xbf16>
    tpu.vector_store %arg12[%c0_137, %c7_138, %c16_139], %256 {strides = array<i32>} : memref<8x16x32xbf16, #tpu.memory_space<vmem>>, vector<8x1x16xbf16>,
    %257 = vector.extract_strided_slice %186 {offsets = [0, 128], sizes = [8, 16], strides = [1, 1]} : vector<8x256xbf16> to vector<8x16xbf16>
    %c0_140 = arith.constant 0 : index
    %c8_141 = arith.constant 8 : index
    %c0_142 = arith.constant 0 : index
    %258 = vector.load %arg12[%c0_140, %c8_141, %c0_142] : memref<8x16x32xbf16, #tpu.memory_space<vmem>>, vector<8x1x16xbf16>
    %259 = vector.shape_cast %258 : vector<8x1x16xbf16> to vector<8x16xbf16>
    %260 = vector.shape_cast %257 : vector<8x16xbf16> to vector<8x1x16xbf16>
    tpu.vector_store %arg12[%c0_140, %c8_141, %c0_142], %260 {strides = array<i32>} : memref<8x16x32xbf16, #tpu.memory_space<vmem>>, vector<8x1x16xbf16>,
    %261 = vector.extract_strided_slice %192 {offsets = [0, 128], sizes = [8, 16], strides = [1, 1]} : vector<8x256xbf16> to vector<8x16xbf16>
    %c0_143 = arith.constant 0 : index
    %c8_144 = arith.constant 8 : index
    %c16_145 = arith.constant 16 : index
    %262 = vector.load %arg12[%c0_143, %c8_144, %c16_145] : memref<8x16x32xbf16, #tpu.memory_space<vmem>>, vector<8x1x16xbf16>
    %263 = vector.shape_cast %262 : vector<8x1x16xbf16> to vector<8x16xbf16>
    %264 = vector.shape_cast %261 : vector<8x16xbf16> to vector<8x1x16xbf16>
    tpu.vector_store %arg12[%c0_143, %c8_144, %c16_145], %264 {strides = array<i32>} : memref<8x16x32xbf16, #tpu.memory_space<vmem>>, vector<8x1x16xbf16>,
    %265 = vector.extract_strided_slice %186 {offsets = [0, 144], sizes = [8, 16], strides = [1, 1]} : vector<8x256xbf16> to vector<8x16xbf16>
    %c0_146 = arith.constant 0 : index
    %c9 = arith.constant 9 : index
    %c0_147 = arith.constant 0 : index
    %266 = vector.load %arg12[%c0_146, %c9, %c0_147] : memref<8x16x32xbf16, #tpu.memory_space<vmem>>, vector<8x1x16xbf16>
    %267 = vector.shape_cast %266 : vector<8x1x16xbf16> to vector<8x16xbf16>
    %268 = vector.shape_cast %265 : vector<8x16xbf16> to vector<8x1x16xbf16>
    tpu.vector_store %arg12[%c0_146, %c9, %c0_147], %268 {strides = array<i32>} : memref<8x16x32xbf16, #tpu.memory_space<vmem>>, vector<8x1x16xbf16>,
    %269 = vector.extract_strided_slice %192 {offsets = [0, 144], sizes = [8, 16], strides = [1, 1]} : vector<8x256xbf16> to vector<8x16xbf16>
    %c0_148 = arith.constant 0 : index
    %c9_149 = arith.constant 9 : index
    %c16_150 = arith.constant 16 : index
    %270 = vector.load %arg12[%c0_148, %c9_149, %c16_150] : memref<8x16x32xbf16, #tpu.memory_space<vmem>>, vector<8x1x16xbf16>
    %271 = vector.shape_cast %270 : vector<8x1x16xbf16> to vector<8x16xbf16>
    %272 = vector.shape_cast %269 : vector<8x16xbf16> to vector<8x1x16xbf16>
    tpu.vector_store %arg12[%c0_148, %c9_149, %c16_150], %272 {strides = array<i32>} : memref<8x16x32xbf16, #tpu.memory_space<vmem>>, vector<8x1x16xbf16>,
    %273 = vector.extract_strided_slice %186 {offsets = [0, 160], sizes = [8, 16], strides = [1, 1]} : vector<8x256xbf16> to vector<8x16xbf16>
    %c0_151 = arith.constant 0 : index
    %c10 = arith.constant 10 : index
    %c0_152 = arith.constant 0 : index
    %274 = vector.load %arg12[%c0_151, %c10, %c0_152] : memref<8x16x32xbf16, #tpu.memory_space<vmem>>, vector<8x1x16xbf16>
    %275 = vector.shape_cast %274 : vector<8x1x16xbf16> to vector<8x16xbf16>
    %276 = vector.shape_cast %273 : vector<8x16xbf16> to vector<8x1x16xbf16>
    tpu.vector_store %arg12[%c0_151, %c10, %c0_152], %276 {strides = array<i32>} : memref<8x16x32xbf16, #tpu.memory_space<vmem>>, vector<8x1x16xbf16>,
    %277 = vector.extract_strided_slice %192 {offsets = [0, 160], sizes = [8, 16], strides = [1, 1]} : vector<8x256xbf16> to vector<8x16xbf16>
    %c0_153 = arith.constant 0 : index
    %c10_154 = arith.constant 10 : index
    %c16_155 = arith.constant 16 : index
    %278 = vector.load %arg12[%c0_153, %c10_154, %c16_155] : memref<8x16x32xbf16, #tpu.memory_space<vmem>>, vector<8x1x16xbf16>
    %279 = vector.shape_cast %278 : vector<8x1x16xbf16> to vector<8x16xbf16>
    %280 = vector.shape_cast %277 : vector<8x16xbf16> to vector<8x1x16xbf16>
    tpu.vector_store %arg12[%c0_153, %c10_154, %c16_155], %280 {strides = array<i32>} : memref<8x16x32xbf16, #tpu.memory_space<vmem>>, vector<8x1x16xbf16>,
    %281 = vector.extract_strided_slice %186 {offsets = [0, 176], sizes = [8, 16], strides = [1, 1]} : vector<8x256xbf16> to vector<8x16xbf16>
    %c0_156 = arith.constant 0 : index
    %c11 = arith.constant 11 : index
    %c0_157 = arith.constant 0 : index
    %282 = vector.load %arg12[%c0_156, %c11, %c0_157] : memref<8x16x32xbf16, #tpu.memory_space<vmem>>, vector<8x1x16xbf16>
    %283 = vector.shape_cast %282 : vector<8x1x16xbf16> to vector<8x16xbf16>
    %284 = vector.shape_cast %281 : vector<8x16xbf16> to vector<8x1x16xbf16>
    tpu.vector_store %arg12[%c0_156, %c11, %c0_157], %284 {strides = array<i32>} : memref<8x16x32xbf16, #tpu.memory_space<vmem>>, vector<8x1x16xbf16>,
    %285 = vector.extract_strided_slice %192 {offsets = [0, 176], sizes = [8, 16], strides = [1, 1]} : vector<8x256xbf16> to vector<8x16xbf16>
    %c0_158 = arith.constant 0 : index
    %c11_159 = arith.constant 11 : index
    %c16_160 = arith.constant 16 : index
    %286 = vector.load %arg12[%c0_158, %c11_159, %c16_160] : memref<8x16x32xbf16, #tpu.memory_space<vmem>>, vector<8x1x16xbf16>
    %287 = vector.shape_cast %286 : vector<8x1x16xbf16> to vector<8x16xbf16>
    %288 = vector.shape_cast %285 : vector<8x16xbf16> to vector<8x1x16xbf16>
    tpu.vector_store %arg12[%c0_158, %c11_159, %c16_160], %288 {strides = array<i32>} : memref<8x16x32xbf16, #tpu.memory_space<vmem>>, vector<8x1x16xbf16>,
    %289 = vector.extract_strided_slice %186 {offsets = [0, 192], sizes = [8, 16], strides = [1, 1]} : vector<8x256xbf16> to vector<8x16xbf16>
    %c0_161 = arith.constant 0 : index
    %c12 = arith.constant 12 : index
    %c0_162 = arith.constant 0 : index
    %290 = vector.load %arg12[%c0_161, %c12, %c0_162] : memref<8x16x32xbf16, #tpu.memory_space<vmem>>, vector<8x1x16xbf16>
    %291 = vector.shape_cast %290 : vector<8x1x16xbf16> to vector<8x16xbf16>
    %292 = vector.shape_cast %289 : vector<8x16xbf16> to vector<8x1x16xbf16>
    tpu.vector_store %arg12[%c0_161, %c12, %c0_162], %292 {strides = array<i32>} : memref<8x16x32xbf16, #tpu.memory_space<vmem>>, vector<8x1x16xbf16>,
    %293 = vector.extract_strided_slice %192 {offsets = [0, 192], sizes = [8, 16], strides = [1, 1]} : vector<8x256xbf16> to vector<8x16xbf16>
    %c0_163 = arith.constant 0 : index
    %c12_164 = arith.constant 12 : index
    %c16_165 = arith.constant 16 : index
    %294 = vector.load %arg12[%c0_163, %c12_164, %c16_165] : memref<8x16x32xbf16, #tpu.memory_space<vmem>>, vector<8x1x16xbf16>
    %295 = vector.shape_cast %294 : vector<8x1x16xbf16> to vector<8x16xbf16>
    %296 = vector.shape_cast %293 : vector<8x16xbf16> to vector<8x1x16xbf16>
    tpu.vector_store %arg12[%c0_163, %c12_164, %c16_165], %296 {strides = array<i32>} : memref<8x16x32xbf16, #tpu.memory_space<vmem>>, vector<8x1x16xbf16>,
    %297 = vector.extract_strided_slice %186 {offsets = [0, 208], sizes = [8, 16], strides = [1, 1]} : vector<8x256xbf16> to vector<8x16xbf16>
    %c0_166 = arith.constant 0 : index
    %c13 = arith.constant 13 : index
    %c0_167 = arith.constant 0 : index
    %298 = vector.load %arg12[%c0_166, %c13, %c0_167] : memref<8x16x32xbf16, #tpu.memory_space<vmem>>, vector<8x1x16xbf16>
    %299 = vector.shape_cast %298 : vector<8x1x16xbf16> to vector<8x16xbf16>
    %300 = vector.shape_cast %297 : vector<8x16xbf16> to vector<8x1x16xbf16>
    tpu.vector_store %arg12[%c0_166, %c13, %c0_167], %300 {strides = array<i32>} : memref<8x16x32xbf16, #tpu.memory_space<vmem>>, vector<8x1x16xbf16>,
    %301 = vector.extract_strided_slice %192 {offsets = [0, 208], sizes = [8, 16], strides = [1, 1]} : vector<8x256xbf16> to vector<8x16xbf16>
    %c0_168 = arith.constant 0 : index
    %c13_169 = arith.constant 13 : index
    %c16_170 = arith.constant 16 : index
    %302 = vector.load %arg12[%c0_168, %c13_169, %c16_170] : memref<8x16x32xbf16, #tpu.memory_space<vmem>>, vector<8x1x16xbf16>
    %303 = vector.shape_cast %302 : vector<8x1x16xbf16> to vector<8x16xbf16>
    %304 = vector.shape_cast %301 : vector<8x16xbf16> to vector<8x1x16xbf16>
    tpu.vector_store %arg12[%c0_168, %c13_169, %c16_170], %304 {strides = array<i32>} : memref<8x16x32xbf16, #tpu.memory_space<vmem>>, vector<8x1x16xbf16>,
    %305 = vector.extract_strided_slice %186 {offsets = [0, 224], sizes = [8, 16], strides = [1, 1]} : vector<8x256xbf16> to vector<8x16xbf16>
    %c0_171 = arith.constant 0 : index
    %c14 = arith.constant 14 : index
    %c0_172 = arith.constant 0 : index
    %306 = vector.load %arg12[%c0_171, %c14, %c0_172] : memref<8x16x32xbf16, #tpu.memory_space<vmem>>, vector<8x1x16xbf16>
    %307 = vector.shape_cast %306 : vector<8x1x16xbf16> to vector<8x16xbf16>
    %308 = vector.shape_cast %305 : vector<8x16xbf16> to vector<8x1x16xbf16>
    tpu.vector_store %arg12[%c0_171, %c14, %c0_172], %308 {strides = array<i32>} : memref<8x16x32xbf16, #tpu.memory_space<vmem>>, vector<8x1x16xbf16>,
    %309 = vector.extract_strided_slice %192 {offsets = [0, 224], sizes = [8, 16], strides = [1, 1]} : vector<8x256xbf16> to vector<8x16xbf16>
    %c0_173 = arith.constant 0 : index
    %c14_174 = arith.constant 14 : index
    %c16_175 = arith.constant 16 : index
    %310 = vector.load %arg12[%c0_173, %c14_174, %c16_175] : memref<8x16x32xbf16, #tpu.memory_space<vmem>>, vector<8x1x16xbf16>
    %311 = vector.shape_cast %310 : vector<8x1x16xbf16> to vector<8x16xbf16>
    %312 = vector.shape_cast %309 : vector<8x16xbf16> to vector<8x1x16xbf16>
    tpu.vector_store %arg12[%c0_173, %c14_174, %c16_175], %312 {strides = array<i32>} : memref<8x16x32xbf16, #tpu.memory_space<vmem>>, vector<8x1x16xbf16>,
    %313 = vector.extract_strided_slice %186 {offsets = [0, 240], sizes = [8, 16], strides = [1, 1]} : vector<8x256xbf16> to vector<8x16xbf16>
    %c0_176 = arith.constant 0 : index
    %c15 = arith.constant 15 : index
    %c0_177 = arith.constant 0 : index
    %314 = vector.load %arg12[%c0_176, %c15, %c0_177] : memref<8x16x32xbf16, #tpu.memory_space<vmem>>, vector<8x1x16xbf16>
    %315 = vector.shape_cast %314 : vector<8x1x16xbf16> to vector<8x16xbf16>
    %316 = vector.shape_cast %313 : vector<8x16xbf16> to vector<8x1x16xbf16>
    tpu.vector_store %arg12[%c0_176, %c15, %c0_177], %316 {strides = array<i32>} : memref<8x16x32xbf16, #tpu.memory_space<vmem>>, vector<8x1x16xbf16>,
    %317 = vector.extract_strided_slice %192 {offsets = [0, 240], sizes = [8, 16], strides = [1, 1]} : vector<8x256xbf16> to vector<8x16xbf16>
    %c0_178 = arith.constant 0 : index
    %c15_179 = arith.constant 15 : index
    %c16_180 = arith.constant 16 : index
    %318 = vector.load %arg12[%c0_178, %c15_179, %c16_180] : memref<8x16x32xbf16, #tpu.memory_space<vmem>>, vector<8x1x16xbf16>
    %319 = vector.shape_cast %318 : vector<8x1x16xbf16> to vector<8x16xbf16>
    %320 = vector.shape_cast %317 : vector<8x16xbf16> to vector<8x1x16xbf16>
    tpu.vector_store %arg12[%c0_178, %c15_179, %c16_180], %320 {strides = array<i32>} : memref<8x16x32xbf16, #tpu.memory_space<vmem>>, vector<8x1x16xbf16>,
    %c0_181 = arith.constant 0 : index
    %c0_182 = arith.constant 0 : index
    %c0_183 = arith.constant 0 : index
    %321 = vector.load %arg12[%c0_181, %c0_182, %c0_183] : memref<8x16x32xbf16, #tpu.memory_space<vmem>>, vector<8x16x32xbf16>
    %322 = vector.shape_cast %321 : vector<8x16x32xbf16> to vector<128x32xbf16>
    %c0_184 = arith.constant 0 : index
    %c0_185 = arith.constant 0 : index
    %323 = vector.load %arg8[%c0_184, %c0_185] : memref<32x64xbf16, #tpu.memory_space<vmem>>, vector<32x64xbf16>
    %cst_186 = arith.constant dense<0.000000e+00> : vector<128x64xf32>
    %324 = tpu.matmul %322, %323, %cst_186 {dimension_numbers = #tpu.dot_dimension_numbers<[1], [0], [0], [1], [0, 0, 1, 1], [], []>} : vector<128x32xbf16>, vector<32x64xbf16>, vector<128x64xf32> -> vector<128x64xf32>
    %cst_187 = arith.constant 0.000000e+00 : f32
    %325 = vector.broadcast %cst_187 : f32 to vector<128x64xf32>
    %326 = arith.maximumf %324, %325 : vector<128x64xf32>
    %327 = vector.shape_cast %326 : vector<128x64xf32> to vector<8x16x64xf32>
    %c0_188 = arith.constant 0 : index
    %c0_189 = arith.constant 0 : index
    %c0_190 = arith.constant 0 : index
    %c0_191 = arith.constant 0 : index
    %328 = vector.load %arg11[%c0_188, %c0_189, %c0_190, %c0_191] : memref<1x8x16x64xf32, #tpu.memory_space<vmem>>, vector<1x8x16x64xf32>
    %329 = vector.shape_cast %328 : vector<1x8x16x64xf32> to vector<8x16x64xf32>
    %330 = vector.shape_cast %327 : vector<8x16x64xf32> to vector<1x8x16x64xf32>
    tpu.vector_store %arg11[%c0_188, %c0_189, %c0_190, %c0_191], %330 {strides = array<i32>} : memref<1x8x16x64xf32, #tpu.memory_space<vmem>>, vector<1x8x16x64xf32>,
    return
  }
  func.func @transform_0(%arg0: i32) -> (i32, i32, i32, i32) {
    %c0_i32 = arith.constant 0 : i32
    %c0_i32_0 = arith.constant 0 : i32
    %c0_i32_1 = arith.constant 0 : i32
    %c0_i32_2 = arith.constant 0 : i32
    return %arg0, %c0_i32, %c0_i32_0, %c0_i32_1 : i32, i32, i32, i32
  }
  func.func @transform_1(%arg0: i32) -> (i32, i32) {
    %c0_i32 = arith.constant 0 : i32
    %c0_i32_0 = arith.constant 0 : i32
    %c0_i32_1 = arith.constant 0 : i32
    return %c0_i32, %c0_i32_0 : i32, i32
  }
  func.func @transform_2(%arg0: i32) -> (i32, i32) {
    %c0_i32 = arith.constant 0 : i32
    %c0_i32_0 = arith.constant 0 : i32
    %c0_i32_1 = arith.constant 0 : i32
    return %c0_i32, %c0_i32_0 : i32, i32
  }
  func.func @transform_3(%arg0: i32) -> (i32, i32, i32) {
    %c0_i32 = arith.constant 0 : i32
    %c0_i32_0 = arith.constant 0 : i32
    %c0_i32_1 = arith.constant 0 : i32
    %c0_i32_2 = arith.constant 0 : i32
    return %c0_i32, %c0_i32_0, %c0_i32_1 : i32, i32, i32
  }
  func.func @transform_4(%arg0: i32) -> (i32, i32) {
    %c0_i32 = arith.constant 0 : i32
    %c0_i32_0 = arith.constant 0 : i32
    %c0_i32_1 = arith.constant 0 : i32
    return %c0_i32, %c0_i32_0 : i32, i32
  }
  func.func @transform_5(%arg0: i32) -> (i32, i32, i32) {
    %c0_i32 = arith.constant 0 : i32
    %c0_i32_0 = arith.constant 0 : i32
    %c0_i32_1 = arith.constant 0 : i32
    %c0_i32_2 = arith.constant 0 : i32
    return %c0_i32, %c0_i32_0, %c0_i32_1 : i32, i32, i32
  }
  func.func @transform_6(%arg0: i32) -> (i32, i32) {
    %c0_i32 = arith.constant 0 : i32
    %c0_i32_0 = arith.constant 0 : i32
    %c0_i32_1 = arith.constant 0 : i32
    return %c0_i32, %c0_i32_0 : i32, i32
  }
  func.func @transform_7(%arg0: i32) -> (i32, i32) {
    %c0_i32 = arith.constant 0 : i32
    %c0_i32_0 = arith.constant 0 : i32
    %c0_i32_1 = arith.constant 0 : i32
    return %c0_i32, %c0_i32_0 : i32, i32
  }
  func.func @transform_8(%arg0: i32) -> (i32, i32) {
    %c0_i32 = arith.constant 0 : i32
    %c0_i32_0 = arith.constant 0 : i32
    %c0_i32_1 = arith.constant 0 : i32
    return %c0_i32, %c0_i32_0 : i32, i32
  }
  func.func @transform_9(%arg0: i32) -> (i32, i32) {
    %c0_i32 = arith.constant 0 : i32
    %c0_i32_0 = arith.constant 0 : i32
    %c0_i32_1 = arith.constant 0 : i32
    return %c0_i32, %c0_i32_0 : i32, i32
  }
  func.func @transform_10(%arg0: i32) -> (i32, i32, i32, i32) {
    %c0_i32 = arith.constant 0 : i32
    %c0_i32_0 = arith.constant 0 : i32
    %c0_i32_1 = arith.constant 0 : i32
    %c0_i32_2 = arith.constant 0 : i32
    return %arg0, %c0_i32, %c0_i32_0, %c0_i32_1 : i32, i32, i32, i32
  }
}

</mosaic_0001>

<bundles_post_ra>
// kernel: protonet_forward.1
= control target key start
LH: loop header
LB: loop body
LE: loop exit
PB: predicated region body
PF: predicated region fallthrough
CT: control target
= control target key end

     0   :  { %s10464_s13 = smov 0   ;;  %s13995_s0 = inlined_call_operand.vmem [shape: bf16[2,16,16,4], index: 0, kind: input, shape index: {}]   ;;  %s13996_s1 = inlined_call_operand.vmem [shape: bf16[36,32], index: 1, kind: input, shape index: {}]   ;;  %s13997_s2 = inlined_call_operand.vmem [shape: f32[1,32], index: 2, kind: input, shape index: {}]   ;;  %s13998_s3 = inlined_call_operand.vmem [shape: bf16[9,32,32], index: 3, kind: input, shape index: {}]   ;;  %s13999_s4 = inlined_call_operand.vmem [shape: f32[1,32], index: 4, kind: input, shape index: {}]   ;;  %s14000_s5 = inlined_call_operand.vmem [shape: bf16[9,32,32], index: 5, kind: input, shape index: {}]   ;;  %s14001_s6 = inlined_call_operand.vmem [shape: f32[1,32], index: 6, kind: input, shape index: {}]   ;;  %s14002_s7 = inlined_call_operand.vmem [shape: bf16[32,64], index: 7, kind: input, shape index: {}]   ;;  %s14003_s8 = inlined_call_operand.vmem [shape: bf16[8,32], index: 8, kind: input, shape index: {}]   ;;  %s14004_s9 = inlined_call_operand.vmem [shape: f32[8,1], index: 9, kind: input, shape index: {}]   ;;  %s14005_s10 = inlined_call_operand.vmem [shape: f32[2,8,16,64], index: 10, kind: output, shape index: {}]  }
   0x1 LB: > { %s8238_s14 = sadd.s32 4294967295, %s10392_s13   ;;  %p8242_p0 = scmp.ge.s32.totalorder %s10392_s13, 1  ;;  %s10392_s13 = sphi %s10464_s13, %s20_s13  }
   0x2   : > { %p312_p1 = scmp.lt.s32.totalorder %s10392_s13, 3 }
   0x4   : > { %p313_p2 = pnand %p8242_p0, %p312_p1 }
   0x6   : > { %316 = sbr.rel (%p313_p2) target bundleno = 3247 (0xcaf), region = 60 }
   0xd   : > { %vm680_vm0 = vcmask 1047552   ;;  %vm14042_vm1 = vsmask.f32 7424  ;;  %v14006_v0 = vmov 0   ;;  %s10395_s15 = smov 4   ;;  %p350_p3 = scmp.lt.s32.totalorder %s8238_s14, 1 }
   0xe   : > { %701 = vrot.lane.b32.xlu0 %v14006_v0, %s10395_s15  ;;  %v629_v1 = vrot.slane %v14006_v0, 1  ;;  %vm10476_vm2 = vmand %vm680_vm0, %vm14042_vm1  ;;  %s10396_s16 = smov 8   ;;  %vm610_vm3 = vsmask.f32 256  ;;  %vm609_vm4 = vcmask 1040384   ;;  %s10397_s21 = smov 16  }
   0xf   : > { %10328 = vset.pattern.permute.xlu0 %v14006_v0  ;;  %s14378_s14 = smov (!%p350_p3, %s8238_s14), 1  ;;  %vm10510_vm5 = vmand %vm609_vm4, %vm610_vm3  ;;  %s10398_s22 = smov 12   ;;  %v10338_v26 = vld [vmem:[%s13996_s1] sm:$0xff]   ;;  %v10340_v29 = vld [vmem:[%s13996_s1 + $0x8] sm:$0xff]   ;;  %vm1331_vm6 = vcmask 1041408   ;;  %vm991_vm7 = vcmask 31744  }
  0x10   : > { %v10483_v3 = vsel %vm10476_vm2, %v629_v1, 0  ;;  %s8698_s17 = sshll.u32 %s14378_s14, 7  ;;  %s10399_s25 = smov 20   ;;  %9071 = vmatprep.subr.bf16.mxu0 %v10338_v26  ;;  %9777 = vmatprep.subr.bf16.mxu1 %v10338_v26  ;;  %v10341_v30 = vld [vmem:[%s13996_s1 + $0x10] ss:$0 sps:$4 sm:$0x33]  }
  0x11   : > { %749 = vrot.lane.b32.xlu1 %v10483_v3, %s10396_s16  ;;  %s10495_s20 = scalar_lea.vmem %s13995_s0, %s8698_s17  ;;  %9072 = vmatpush3.bf16.msra.mxu0 %v10338_v26  ;;  %s10400_s30 = smov 24   ;;  %v1333_v34 = vsel %vm1331_vm6, %v10341_v30, 0  ;;  %vm1040_vm8 = vcmask 64512   ;;  %vm1073_vm9 = vcmask 97280   ;;  %vm1106_vm10 = vcmask 130048   ;;  %v10378_v13 = vld [vmem:[%s14000_s5 + $0x60] sm:$0xff]  }
  0x12   : > { %v10329_v4 = vld [vmem:[%s10495_s20] sm:$0xff]   ;;  %v10499_v5 = vld [vmem:[%s10495_s20 + $0x8] sm:$0xff]   ;;  %v10507_v10 = vld [vmem:[%s10495_s20 + $0x10] sm:$0xff]   ;;  %9073 = vmatprep.subr.bf16.mxu0 %v10340_v29  ;;  %9780 = vmatpush3.bf16.msra.mxu1 %v10338_v26  ;;  %s10401_s11 = smov 28   ;;  %s10402_s12 = smov 32   ;;  %vm1139_vm11 = vcmask 162816  }
  0x13   : > { %703 = vrot.lane.b32.xlu0 %v10329_v4, %s10395_s15  ;;  %v481_v6 = vshrl.u32 %v10329_v4, 16  ;;  %v484_v7 = vshll.u32 %v10329_v4, 16  ;;  %v488_v8 = vshrl.u32 %v10499_v5, 16  ;;  %v491_v9 = vshll.u32 %v10499_v5, 16  ;;  %9778 = vmatprep.subr.bf16.mxu1 %v10340_v29  ;;  %v10332_v33 = vld [vmem:[%s10495_s20 + $0x18] sm:$0xff]   ;;  %v10333_v41 = vld [vmem:[%s10495_s20 + $0x20] sm:$0xff]  }
  0x14   : > { %v495_v18 = vshrl.u32 %v10507_v10, 16  ;;  %v498_v22 = vshll.u32 %v10507_v10, 16  ;;  %v502_v36 = vshrl.u32 %v10332_v33, 16  ;;  %v505_v37 = vshll.u32 %v10332_v33, 16  ;;  %v10334_v52 = vld [vmem:[%s10495_s20 + $0x28] sm:$0xff]   ;;  %v10335_v59 = vld [vmem:[%s10495_s20 + $0x30] sm:$0xff]  }
  0x15   : > { %831 = vrot.lane.b32.xlu1 %v10499_v5, %s10397_s21  ;;  %v631_v11 = vrot.slane %v484_v7, 1  ;;  %v483_v12 = vrot.slane %v481_v6, 7  ;;  %v490_v14 = vrot.slane %v488_v8, 7  ;;  %v633_v17 = vrot.slane %v491_v9, 1  ;;  %9074 = vmatpush3.bf16.msra.mxu0 %v10340_v29  ;;  %v10382_v2 = vld [vmem:[%s14000_s5 + $0x80] sm:$0xff]   ;;  %s10403_s24 = smov 112  }
  0x16   : > { %v497_v25 = vrot.slane %v495_v18, 7  ;;  %v635_v32 = vrot.slane %v498_v22, 1  ;;  %9781 = vmatpush3.bf16.msra.mxu1 %v10340_v29  ;;  %10295 = vmatprep.subr.msk.bf16.mxu0 %vm1331_vm6, %v10341_v30  ;;  %v504_v39 = vrot.slane %v502_v36, 7  ;;  %v637_v42 = vrot.slane %v505_v37, 1  ;;  %s10406_s26 = smov 96   ;;  %s10407_s27 = smov 80  }
  0x17   : > { %829 = vrot.lane.b32.xlu0 %v10329_v4, %s10397_s21  ;;  %v632_v15 = vor.u32 %v631_v11, %v481_v6  ;;  %v486_v16 = vor.u32 %v484_v7, %v483_v12  ;;  %v493_v19 = vor.u32 %v491_v9, %v490_v14  ;;  %v634_v24 = vor.u32 %v633_v17, %v488_v8  ;;  %v10336_v9 = vld [vmem:[%s10495_s20 + $0x38] sm:$0xff]   ;;  %v10637_v17 = vld [vmem:[%s10495_s20 + $0x40] sm:$0xff]   ;;  %s10408_s28 = smov 64  }
  0x18   : > { %v500_v28 = vor.u32 %v498_v22, %v497_v25  ;;  %v636_v35 = vor.u32 %v635_v32, %v495_v18  ;;  %10296 = vmatprep.subr.msk.bf16.mxu1 %vm1331_vm6, %v10341_v30  ;;  %v507_v40 = vor.u32 %v505_v37, %v504_v39  ;;  %v509_v44 = vshrl.u32 %v10333_v41, 16 }
  0x19   : > { %v684_v20 = vsel %vm10476_vm2, %v632_v15, 0  ;;  %v10520_v21 = vsel %vm10510_vm5, 0, %v486_v16  ;;  %v10528_v23 = vsel %vm10510_vm5, 0, %v493_v19  ;;  %v685_v27 = vsel %vm10476_vm2, %v634_v24, 0  ;;  %9076 = vmatpush3.bf16.msra.mxu0 %v1333_v34 }
  0x1a   : > { %751 = vrot.lane.b32.xlu1 %v684_v20, %s10396_s16  ;;  %v10549_v31 = vsel %vm10510_vm5, 0, %v500_v28  ;;  %9782 = vmatpush3.bf16.msra.mxu1 %v1333_v34  ;;  %v686_v38 = vsel %vm10476_vm2, %v636_v35, 0  ;;  %v10570_v43 = vsel %vm10510_vm5, 0, %v507_v40  ;;  %v511_v45 = vrot.slane %v509_v44, 7  ;;  %v10666_v35 = vld [vmem:[%s10495_s20 + $0x48] sm:$0xff]  }
  0x1b   : > { %797 = vrot.lane.b32.xlu0 %v10520_v21, %s10398_s22  ;;  %v512_v46 = vshll.u32 %v10333_v41, 16  ;;  %v638_v47 = vor.u32 %v637_v42, %v502_v36  ;;  %v516_v54 = vshrl.u32 %v10334_v52, 16  ;;  %v519_v57 = vshll.u32 %v10334_v52, 16 }
  0x1c   : > { %v523_v62 = vshrl.u32 %v10335_v59, 16  ;;  %v526_v4 = vshll.u32 %v10335_v59, 16  ;;  %v530_v11 = vshrl.u32 %v10336_v9, 16  ;;  %v533_v15 = vshll.u32 %v10336_v9, 16 }
  0x1d   : > { %v514_v48 = vor.u32 %v512_v46, %v511_v45  ;;  %v687_v49 = vsel %vm10476_vm2, %v638_v47, 0  ;;  %v639_v51 = vrot.slane %v512_v46, 1  ;;  %v518_v56 = vrot.slane %v516_v54, 7 }
  0x1e   : > { %799 = vrot.lane.b32.xlu1 %v10528_v23, %s10398_s22  ;;  %v641_v61 = vrot.slane %v519_v57, 1  ;;  %v525_v1 = vrot.slane %v523_v62, 7  ;;  %v643_v8 = vrot.slane %v526_v4, 1  ;;  %v532_v14 = vrot.slane %v530_v11, 7 }
  0x1f   : > { %862 = vrot.lane.b32.xlu0 %v684_v20, %s10399_s25  ;;  %v10585_v50 = vsel %vm10510_vm5, 0, %v514_v48  ;;  %v640_v53 = vor.u32 %v639_v51, %v509_v44  ;;  %v521_v58 = vor.u32 %v519_v57, %v518_v56  ;;  %v645_v19 = vrot.slane %v533_v15, 1 }
  0x20   : > { %v642_v63 = vor.u32 %v641_v61, %v516_v54  ;;  %v528_v6 = vor.u32 %v526_v4, %v525_v1  ;;  %v535_v16 = vor.u32 %v533_v15, %v532_v14  ;;  %v537_v20 = vshrl.u32 %v10637_v17, 16 }
  0x21   : > { %v688_v55 = vsel %vm10476_vm2, %v640_v53, 0  ;;  %v10608_v60 = vsel %vm10510_vm5, 0, %v521_v58  ;;  %v646_v22 = vor.u32 %v645_v19, %v530_v11  ;;  %v540_v25 = vshll.u32 %v10637_v17, 16 }
  0x22   : > { %864 = vrot.lane.b32.xlu1 %v685_v27, %s10399_s25  ;;  %v10622_v7 = vsel %vm10510_vm5, 0, %v528_v6  ;;  %v10644_v18 = vsel %vm10510_vm5, 0, %v535_v16  ;;  %v539_v24 = vrot.slane %v537_v20, 7  ;;  %v476_v39 = vrot.slane %v14006_v0, 7 }
  0x23   : > { %895 = vrot.lane.b32.xlu0 %v10528_v23, %s10400_s30  ;;  %v647_v32 = vrot.slane %v540_v25, 1  ;;  %v547_v45 = vshll.u32 %v10666_v35, 16  ;;  %vm1172_vm12 = vcmask 195584   ;;  %vm1205_vm13 = vcmask 228352  }
  0x24   : > { %v542_v28 = vor.u32 %v540_v25, %v539_v24  ;;  %v10680_v46 = vsel %vm10510_vm5, 0, %v476_v39  ;;  %vm14029_vm14 = vcmask 261120   ;;  %vm1298_vm15 = vcmask 293888  }
  0x25   : > { %v648_v36 = vor.u32 %v647_v32, %v537_v20  ;;  %v649_v58 = vrot.slane %v547_v45, 1  ;;  %vm6160_vm0 = vcmask 916480   ;;  %vm7174_vm4 = vsmask.f32 4352 }
  0x26   : > { %897 = vrot.lane.b32.xlu1 %v10549_v31, %s10400_s30  ;;  %v10660_v30 = vsel %vm10510_vm5, 0, %v542_v28 }
  0x27   : > { %927 = vrot.lane.b32.xlu0 %v10499_v5, %s10401_s11 }
  0x2a   : > { %929 = vrot.lane.b32.xlu1 %v10507_v10, %s10401_s11 }
  0x2b   : > { %959 = vrot.lane.b32.xlu0 %v685_v27, %s10402_s12 }
  0x2e   : > { %705 = vrot.lane.b32.xlu1 %v10499_v5, %s10395_s15  ;;  %v689_v5 = vsel %vm10476_vm2, %v642_v63, 0 }
  0x2f   : > { %961 = vrot.lane.b32.xlu0 %v686_v38, %s10402_s12 }
  0x32   : > { %707 = vrot.lane.b32.xlu1 %v10507_v10, %s10395_s15 }
  0x33   : > { %753 = vrot.lane.b32.xlu0 %v685_v27, %s10396_s16  ;;  %v691_v27 = vsel %vm10476_vm2, %v646_v22, 0 }
  0x36   : > { %755 = vrot.lane.b32.xlu1 %v686_v38, %s10396_s16 }
  0x37   : > { %801 = vrot.lane.b32.xlu0 %v10549_v31, %s10398_s22 }
  0x3a   : > { %803 = vrot.lane.b32.xlu1 %v10570_v43, %s10398_s22 }
  0x3b   : > { %833 = vrot.lane.b32.xlu0 %v10507_v10, %s10397_s21  ;;  %v644_v10 = vor.u32 %v643_v8, %v523_v62 }
  0x3d   : > { %v690_v12 = vsel %vm10476_vm2, %v644_v10, 0 }
  0x3e   : > { %835 = vrot.lane.b32.xlu1 %v10332_v33, %s10397_s21 }
  0x3f   : > { %866 = vrot.lane.b32.xlu0 %v686_v38, %s10399_s25  ;;  %v544_v38 = vshrl.u32 %v10666_v35, 16 }
  0x41   : > { %v546_v44 = vrot.slane %v544_v38, 7 }
  0x42   : > { %868 = vrot.lane.b32.xlu1 %v687_v49, %s10399_s25 }
  0x43   : > { %899 = vrot.lane.b32.xlu0 %v10570_v43, %s10400_s30  ;;  %v549_v51 = vor.u32 %v547_v45, %v546_v44 }
  0x45   : > { %v10697_v57 = vsel %vm10510_vm5, 0, %v549_v51  ;;  %v10754_v51 = vld [vmem:[%s10495_s20 + $0x60] sm:$0xff]  }
  0x46   : > { %901 = vrot.lane.b32.xlu1 %v10585_v50, %s10400_s30 }
  0x47   : > { %931 = vrot.lane.b32.xlu0 %v10332_v33, %s10401_s11 }
  0x4a   : > { %933 = vrot.lane.b32.xlu1 %v10333_v41, %s10401_s11 }
  0x4b   : > { %963 = vrot.lane.b32.xlu0 %v687_v49, %s10402_s12 }
  0x4e   : > { %709 = vrot.lane.b32.xlu1 %v10332_v33, %s10395_s15 }
  0x4f   : > { %965 = vrot.lane.b32.xlu0 %v688_v55, %s10402_s12 }
  0x52   : > { %711 = vrot.lane.b32.xlu1 %v10333_v41, %s10395_s15 }
  0x53   : > { %757 = vrot.lane.b32.xlu0 %v687_v49, %s10396_s16 }
  0x56   : > { %759 = vrot.lane.b32.xlu1 %v688_v55, %s10396_s16 }
  0x57   : > { %805 = vrot.lane.b32.xlu0 %v10585_v50, %s10398_s22 }
  0x5a   : > { %807 = vrot.lane.b32.xlu1 %v10608_v60, %s10398_s22 }
  0x5b   : > { %837 = vrot.lane.b32.xlu0 %v10333_v41, %s10397_s21  ;;  %v692_v41 = vsel %vm10476_vm2, %v648_v36, 0 }
  0x5e   : > { %839 = vrot.lane.b32.xlu1 %v10334_v52, %s10397_s21 }
  0x5f   : > { %870 = vrot.lane.b32.xlu0 %v688_v55, %s10399_s25 }
  0x62   : > { %872 = vrot.lane.b32.xlu1 %v689_v5, %s10399_s25 }
  0x63   : > { %903 = vrot.lane.b32.xlu0 %v10608_v60, %s10400_s30 }
  0x66   : > { %905 = vrot.lane.b32.xlu1 %v10622_v7, %s10400_s30 }
  0x67   : > { %935 = vrot.lane.b32.xlu0 %v10334_v52, %s10401_s11 }
  0x6a   : > { %937 = vrot.lane.b32.xlu1 %v10335_v59, %s10401_s11 }
  0x6b   : > { %967 = vrot.lane.b32.xlu0 %v689_v5, %s10402_s12 }
  0x6e   : > { %713 = vrot.lane.b32.xlu1 %v10334_v52, %s10395_s15  ;;  %v10688_v52 = vld [vmem:[%s10495_s20 + $0x50] sm:$0xff]  }
  0x6f   : > { %969 = vrot.lane.b32.xlu0 %v690_v12, %s10402_s12 }
  0x72   : > { %715 = vrot.lane.b32.xlu1 %v10335_v59, %s10395_s15 }
  0x73   : > { %761 = vrot.lane.b32.xlu0 %v689_v5, %s10396_s16  ;;  %v554_v5 = vshll.u32 %v10688_v52, 16 }
  0x75   : > { %v651_v32 = vrot.slane %v554_v5, 1 }
  0x76   : > { %763 = vrot.lane.b32.xlu1 %v690_v12, %s10396_s16 }
  0x77   : > { %809 = vrot.lane.b32.xlu0 %v10622_v7, %s10398_s22 }
  0x7a   : > { %811 = vrot.lane.b32.xlu1 %v10644_v18, %s10398_s22 }
  0x7b   : > { %841 = vrot.lane.b32.xlu0 %v10335_v59, %s10397_s21  ;;  %v551_v59 = vshrl.u32 %v10688_v52, 16 }
  0x7e   : > { %843 = vrot.lane.b32.xlu1 %v10336_v9, %s10397_s21 }
  0x7f   : > { %874 = vrot.lane.b32.xlu0 %v690_v12, %s10399_s25 }
  0x80   : > { %v702_v26 = vpop.permute.xlu0 %701 }
  0x81   : > { %v994_v49 = vsel %vm991_vm7, %v10680_v46, %v702_v26 }
  0x82   : > { %876 = vrot.lane.b32.xlu1 %v691_v27, %s10399_s25 }
  0x83   : > { %v750_v29 = vpop.permute.xlu1 %749  ;;  %907 = vrot.lane.b32.xlu0 %v10644_v18, %s10400_s30 }
  0x84   : > { %v1042_v55 = vsel %vm1040_vm8, %v994_v49, %v750_v29 }
  0x85   : > { %v704_v33 = vpop.permute.xlu0 %703 }
  0x86   : > { %909 = vrot.lane.b32.xlu1 %v10660_v30, %s10400_s30  ;;  %v997_v62 = vsel %vm991_vm7, %v10520_v21, %v704_v33  ;;  %v650_v21 = vor.u32 %v649_v58, %v544_v38  ;;  %v565_v58 = vshrl.u32 %v10754_v51, 16 }
  0x87   : > { %v832_v34 = vpop.permute.xlu1 %831  ;;  %939 = vrot.lane.b32.xlu0 %v10336_v9, %s10401_s11 }
  0x89   : > { %v830_v37 = vpop.permute.xlu0 %829 }
  0x8a   : > { %941 = vrot.lane.b32.xlu1 %v10637_v17, %s10401_s11 }
  0x8b   : > { %971 = vrot.lane.b32.xlu0 %v691_v27, %s10402_s12 }
  0x8c   : > { %v752_v40 = vpop.permute.xlu1 %751 }
  0x8d   : > { %v798_v42 = vpop.permute.xlu0 %797  ;;  %v1044_v1 = vsel %vm1040_vm8, %v997_v62, %v752_v40 }
  0x8e   : > { %717 = vrot.lane.b32.xlu1 %v10336_v9, %s10395_s15  ;;  %v1075_v56 = vsel %vm1073_vm9, %v1042_v55, %v798_v42  ;;  %v553_v9 = vrot.slane %v551_v59, 7 }
  0x8f   : > { %973 = vrot.lane.b32.xlu0 %v692_v41, %s10402_s12  ;;  %v1108_v4 = vsel %vm1106_vm10, %v1075_v56, %v830_v37  ;;  %v652_v37 = vor.u32 %v651_v32, %v551_v59 }
  0x90   : > { %v800_v47 = vpop.permute.xlu1 %799  ;;  %v556_v20 = vor.u32 %v554_v5, %v553_v9 }
  0x91   : > { %v863_v48 = vpop.permute.xlu0 %862  ;;  %v1077_v6 = vsel %vm1073_vm9, %v1044_v1, %v800_v47 }
  0x92   : > { %719 = vrot.lane.b32.xlu1 %v10637_v17, %s10395_s15  ;;  %v1141_v8 = vsel %vm1139_vm11, %v1108_v4, %v863_v48  ;;  %v1110_v15 = vsel %vm1106_vm10, %v1077_v6, %v832_v34  ;;  %v10731_v28 = vsel %vm10510_vm5, 0, %v556_v20  ;;  %v10738_v34 = vld [vmem:[%s10495_s20 + $0x58] sm:$0xff]   ;;  %v567_v6 = vrot.slane %v565_v58, 7 }
  0x93   : > { %765 = vrot.lane.b32.xlu0 %v691_v27, %s10396_s16  ;;  %v558_v39 = vshrl.u32 %v10738_v34, 16  ;;  %v561_v45 = vshll.u32 %v10738_v34, 16 }
  0x94   : > { %v865_v53 = vpop.permute.xlu1 %864 }
  0x95   : > { %v896_v54 = vpop.permute.xlu0 %895  ;;  %v1143_v19 = vsel %vm1139_vm11, %v1110_v15, %v865_v53  ;;  %v560_v44 = vrot.slane %v558_v39, 7 }
  0x96   : > { %767 = vrot.lane.b32.xlu1 %v692_v41, %s10396_s16  ;;  %v1174_v10 = vsel %vm1172_vm12, %v1141_v8, %v896_v54  ;;  %v568_v8 = vshll.u32 %v10754_v51, 16 }
  0x97   : > { %813 = vrot.lane.b32.xlu0 %v10660_v30, %s10398_s22  ;;  %v563_v49 = vor.u32 %v561_v45, %v560_v44 }
  0x98   : > { %v898_v61 = vpop.permute.xlu1 %897 }
  0x99   : > { %v928_v63 = vpop.permute.xlu0 %927  ;;  %v1176_v22 = vsel %vm1172_vm12, %v1143_v19, %v898_v61  ;;  %v10763_v56 = vsel %vm10510_vm5, 0, %v563_v49  ;;  %v570_v19 = vor.u32 %v568_v8, %v567_v6 }
  0x9a   : > { %815 = vrot.lane.b32.xlu1 %v10697_v57, %s10398_s22  ;;  %v1207_v12 = vsel %vm1205_vm13, %v1174_v10, %v928_v63 }
  0x9b   : > { %845 = vrot.lane.b32.xlu0 %v10637_v17, %s10397_s21  ;;  %v693_v17 = vsel %vm10476_vm2, %v650_v21, 0 }
  0x9c   : > { %v930_v11 = vpop.permute.xlu1 %929 }
  0x9d   : > { %v960_v14 = vpop.permute.xlu0 %959  ;;  %v1209_v25 = vsel %vm1205_vm13, %v1176_v22, %v930_v11 }
  0x9e   : > { %847 = vrot.lane.b32.xlu1 %v10666_v35, %s10397_s21  ;;  %v1240_v16 = vsel %vm14029_vm14, %v1207_v12, %v960_v14 }
  0x9f   : > { %878 = vrot.lane.b32.xlu0 %v692_v41, %s10399_s25  ;;  %9077 = vmatprep.mubr.msk.bf16.mxu0 %vm1298_vm15, %v1240_v16  ;;  %v694_v41 = vsel %vm10476_vm2, %v652_v37, 0 }
  0xa0   : > { %v706_v24 = vpop.permute.xlu1 %705 }
  0xa1   : > { %v962_v26 = vpop.permute.xlu0 %961  ;;  %v1000_v55 = vsel %vm991_vm7, %v10528_v23, %v706_v24 }
  0xa2   : > { %v1242_v27 = vsel %vm14029_vm14, %v1209_v25, %v962_v26  ;;  %880 = vrot.lane.b32.xlu1 %v693_v17, %s10399_s25  ;;  %v10799_v26 = vsel %vm10510_vm5, 0, %v570_v19 }
  0xa3   : > { %911 = vrot.lane.b32.xlu0 %v10697_v57, %s10400_s30  ;;  %9078 = vmatmul.mubr.msk.bf16.vlgmr.msra.gmra.mrb[0].mxu0 %vm1298_vm15, %v1242_v27 }
  0xa4   : > { %v708_v29 = vpop.permute.xlu1 %707 }
  0xa5   : > { %v754_v33 = vpop.permute.xlu0 %753  ;;  %v1003_v4 = vsel %vm991_vm7, %v10549_v31, %v708_v29  ;;  %v655_v29 = vrot.slane %v568_v8, 1 }
  0xa6   : > { %913 = vrot.lane.b32.xlu1 %v10731_v28, %s10400_s30  ;;  %v1046_v59 = vsel %vm1040_vm8, %v1000_v55, %v754_v33  ;;  %v10806_v33 = vld [vmem:[%s10495_s20 + $0x68] sm:$0xff]  }
  0xa7   : > { %943 = vrot.lane.b32.xlu0 %v10666_v35, %s10401_s11  ;;  %v656_v37 = vor.u32 %v655_v29, %v565_v58 }
  0xa8   : > { %v756_v36 = vpop.permute.xlu1 %755 }
  0xa9   : > { %v802_v38 = vpop.permute.xlu0 %801  ;;  %v1048_v21 = vsel %vm1040_vm8, %v1003_v4, %v756_v36 }
  0xaa   : > { %945 = vrot.lane.b32.xlu1 %v10688_v52, %s10401_s11  ;;  %v1079_v62 = vsel %vm1073_vm9, %v1046_v59, %v802_v38 }
  0xab   : > { %975 = vrot.lane.b32.xlu0 %v693_v17, %s10402_s12 }
  0xac   : > { %v804_v40 = vpop.permute.xlu1 %803 }
  0xad   : > { %v834_v42 = vpop.permute.xlu0 %833  ;;  %v1081_v11 = vsel %vm1073_vm9, %v1048_v21, %v804_v40 }
  0xae   : > { %721 = vrot.lane.b32.xlu1 %v10666_v35, %s10395_s15  ;;  %v653_v35 = vrot.slane %v561_v45, 1  ;;  %v1112_v1 = vsel %vm1106_vm10, %v1079_v62, %v834_v42  ;;  %v575_v45 = vshll.u32 %v10806_v33, 16 }
  0xaf   : > { %977 = vrot.lane.b32.xlu0 %v694_v41, %s10402_s12 }
  0xb0   : > { %v836_v47 = vpop.permute.xlu1 %835  ;;  %v654_v23 = vor.u32 %v653_v35, %v558_v39  ;;  %v572_v39 = vshrl.u32 %v10806_v33, 16 }
  0xb1   : > { %v867_v48 = vpop.permute.xlu0 %866  ;;  %v1114_v31 = vsel %vm1106_vm10, %v1081_v11, %v836_v47 }
  0xb2   : > { %723 = vrot.lane.b32.xlu1 %v10688_v52, %s10395_s15  ;;  %v1145_v5 = vsel %vm1139_vm11, %v1112_v1, %v867_v48  ;;  %v695_v16 = vsel %vm10476_vm2, %v654_v23, 0  ;;  %v574_v44 = vrot.slane %v572_v39, 7 }
  0xb3   : > { %769 = vrot.lane.b32.xlu0 %v693_v17, %s10396_s16 }
  0xb4   : > { %v869_v53 = vpop.permute.xlu1 %868  ;;  %v577_v49 = vor.u32 %v575_v45, %v574_v44 }
  0xb5   : > { %v900_v54 = vpop.permute.xlu0 %899 }
  0xb6   : > { %771 = vrot.lane.b32.xlu1 %v694_v41, %s10396_s16  ;;  %v1178_v9 = vsel %vm1172_vm12, %v1145_v5, %v900_v54  ;;  %v10831_v58 = vsel %vm10510_vm5, 0, %v577_v49 }
  0xb7   : > { %817 = vrot.lane.b32.xlu0 %v10731_v28, %s10398_s22 }
  0xb8   : > { %v902_v61 = vpop.permute.xlu1 %901 }
  0xb9   : > { %v932_v63 = vpop.permute.xlu0 %931 }
  0xba   : > { %819 = vrot.lane.b32.xlu1 %v10763_v56, %s10398_s22  ;;  %v1211_v12 = vsel %vm1205_vm13, %v1178_v9, %v932_v63 }
  0xbb   : > { %849 = vrot.lane.b32.xlu0 %v10688_v52, %s10397_s21  ;;  %v1147_v52 = vsel %vm1139_vm11, %v1114_v31, %v869_v53  ;;  %v10822_v53 = vld [vmem:[%s10495_s20 + $0x70] sm:$0xff]  }
  0xbc   : > { %v934_v10 = vpop.permute.xlu1 %933  ;;  %v1180_v17 = vsel %vm1172_vm12, %v1147_v52, %v902_v61  ;;  %v579_v59 = vshrl.u32 %v10822_v53, 16  ;;  %v582_v8 = vshll.u32 %v10822_v53, 16 }
  0xbd   : > { %v964_v14 = vpop.permute.xlu0 %963  ;;  %v1213_v22 = vsel %vm1205_vm13, %v1180_v17, %v934_v10 }
  0xbe   : > { %v1244_v15 = vsel %vm14029_vm14, %v1211_v12, %v964_v14  ;;  %851 = vrot.lane.b32.xlu1 %v10738_v34, %s10397_s21  ;;  %v581_v6 = vrot.slane %v579_v59, 7 }
  0xbf   : > { %882 = vrot.lane.b32.xlu0 %v694_v41, %s10399_s25  ;;  %9081 = vmatprep.mubr.msk.bf16.mxu0 %vm1298_vm15, %v1244_v15  ;;  %v696_v41 = vsel %vm10476_vm2, %v656_v37, 0 }
  0xc0   : > { %v710_v20 = vpop.permute.xlu1 %709  ;;  %v584_v52 = vor.u32 %v582_v8, %v581_v6 }
  0xc1   : > { %v966_v24 = vpop.permute.xlu0 %965  ;;  %v1006_v55 = vsel %vm991_vm7, %v10570_v43, %v710_v20 }
  0xc2   : > { %v1246_v25 = vsel %vm14029_vm14, %v1213_v22, %v966_v24  ;;  %884 = vrot.lane.b32.xlu1 %v695_v16, %s10399_s25  ;;  %v10867_v24 = vsel %vm10510_vm5, 0, %v584_v52 }
  0xc3   : > { %915 = vrot.lane.b32.xlu0 %v10763_v56, %s10400_s30  ;;  %9082 = vmatmul.mubr.msk.bf16.gmra.mrb[4].mxu0 %vm1298_vm15, %v1246_v25 }
  0xc4   : > { %v712_v27 = vpop.permute.xlu1 %711 }
  0xc5   : > { %v758_v32 = vpop.permute.xlu0 %757  ;;  %v1009_v4 = vsel %vm991_vm7, %v10585_v50, %v712_v27  ;;  %v659_v27 = vrot.slane %v582_v8, 1 }
  0xc6   : > { %917 = vrot.lane.b32.xlu1 %v10799_v26, %s10400_s30  ;;  %v1050_v61 = vsel %vm1040_vm8, %v1006_v55, %v758_v32  ;;  %v10347_v32 = vld [vmem:[%s10495_s20 + $0x78] sm:$0xff]  }
  0xc7   : > { %947 = vrot.lane.b32.xlu0 %v10738_v34, %s10401_s11  ;;  %v660_v37 = vor.u32 %v659_v27, %v579_v59 }
  0xc8   : > { %v760_v36 = vpop.permute.xlu1 %759 }
  0xc9   : > { %v806_v38 = vpop.permute.xlu0 %805  ;;  %v1052_v21 = vsel %vm1040_vm8, %v1009_v4, %v760_v36 }
  0xca   : > { %949 = vrot.lane.b32.xlu1 %v10754_v51, %s10401_s11  ;;  %v1083_v63 = vsel %vm1073_vm9, %v1050_v61, %v806_v38 }
  0xcb   : > { %979 = vrot.lane.b32.xlu0 %v695_v16, %s10402_s12 }
  0xcc   : > { %v808_v40 = vpop.permute.xlu1 %807 }
  0xcd   : > { %v838_v42 = vpop.permute.xlu0 %837  ;;  %v1085_v11 = vsel %vm1073_vm9, %v1052_v21, %v808_v40 }
  0xce   : > { %725 = vrot.lane.b32.xlu1 %v10738_v34, %s10395_s15  ;;  %v657_v34 = vrot.slane %v575_v45, 1  ;;  %v1116_v23 = vsel %vm1106_vm10, %v1083_v63, %v838_v42  ;;  %v589_v45 = vshll.u32 %v10347_v32, 16 }
  0xcf   : > { %981 = vrot.lane.b32.xlu0 %v696_v41, %s10402_s12 }
  0xd0   : > { %v840_v47 = vpop.permute.xlu1 %839  ;;  %v658_v43 = vor.u32 %v657_v34, %v572_v39  ;;  %v586_v39 = vshrl.u32 %v10347_v32, 16  ;;  %v661_v55 = vrot.slane %v589_v45, 1 }
  0xd1   : > { %v871_v48 = vpop.permute.xlu0 %870  ;;  %v1118_v50 = vsel %vm1106_vm10, %v1085_v11, %v840_v47 }
  0xd2   : > { %727 = vrot.lane.b32.xlu1 %v10754_v51, %s10395_s15  ;;  %v1149_v5 = vsel %vm1139_vm11, %v1116_v23, %v871_v48  ;;  %v697_v15 = vsel %vm10476_vm2, %v658_v43, 0  ;;  %v588_v44 = vrot.slane %v586_v39, 7  ;;  %v662_v43 = vor.u32 %v661_v55, %v586_v39 }
  0xd3   : > { %773 = vrot.lane.b32.xlu0 %v695_v16, %s10396_s16 }
  0xd4   : > { %v873_v54 = vpop.permute.xlu1 %872  ;;  %v591_v49 = vor.u32 %v589_v45, %v588_v44 }
  0xd5   : > { %v904_v35 = vpop.permute.xlu0 %903 }
  0xd6   : > { %775 = vrot.lane.b32.xlu1 %v696_v41, %s10396_s16  ;;  %v1182_v9 = vsel %vm1172_vm12, %v1149_v5, %v904_v35 }
  0xd7   : > { %821 = vrot.lane.b32.xlu0 %v10799_v26, %s10398_s22 }
  0xd8   : > { %v906_v62 = vpop.permute.xlu1 %905 }
  0xd9   : > { %v936_v1 = vpop.permute.xlu0 %935 }
  0xda   : > { %823 = vrot.lane.b32.xlu1 %v10831_v58, %s10398_s22  ;;  %v1215_v12 = vsel %vm1205_vm13, %v1182_v9, %v936_v1 }
  0xdb   : > { %853 = vrot.lane.b32.xlu0 %v10754_v51, %s10397_s21  ;;  %v1151_v51 = vsel %vm1139_vm11, %v1118_v50, %v873_v54  ;;  %v10917_v50 = vld [vmem:[%s13998_s3 + $0x10] sm:$0xff]  }
  0xdc   : > { %v938_v10 = vpop.permute.xlu1 %937  ;;  %v1184_v16 = vsel %vm1172_vm12, %v1151_v51, %v906_v62  ;;  %9109 = vmatprep.subr.bf16.mxu1 %v10917_v50 }
  0xdd   : > { %v968_v14 = vpop.permute.xlu0 %967  ;;  %v1217_v17 = vsel %vm1205_vm13, %v1184_v16, %v938_v10 }
  0xde   : > { %v1248_v31 = vsel %vm14029_vm14, %v1215_v12, %v968_v14  ;;  %855 = vrot.lane.b32.xlu1 %v10806_v33, %s10397_s21 }
  0xdf   : > { %886 = vrot.lane.b32.xlu0 %v696_v41, %s10399_s25  ;;  %9085 = vmatprep.mubr.msk.bf16.mxu0 %vm1298_vm15, %v1248_v31  ;;  %v698_v41 = vsel %vm10476_vm2, %v660_v37, 0 }
  0xe0   : > { %v714_v19 = vpop.permute.xlu1 %713 }
  0xe1   : > { %v970_v20 = vpop.permute.xlu0 %969  ;;  %v1012_v34 = vsel %vm991_vm7, %v10608_v60, %v714_v19 }
  0xe2   : > { %v1250_v22 = vsel %vm14029_vm14, %v1217_v17, %v970_v20  ;;  %888 = vrot.lane.b32.xlu1 %v697_v15, %s10399_s25 }
  0xe3   : > { %919 = vrot.lane.b32.xlu0 %v10831_v58, %s10400_s30  ;;  %9086 = vmatmul.mubr.msk.bf16.gmra.mrb[8].mxu0 %vm1298_vm15, %v1250_v22 }
  0xe4   : > { %v716_v25 = vpop.permute.xlu1 %715 }
  0xe5   : > { %v762_v29 = vpop.permute.xlu0 %761  ;;  %v1015_v60 = vsel %vm991_vm7, %v10622_v7, %v716_v25 }
  0xe6   : > { %921 = vrot.lane.b32.xlu1 %v10867_v24, %s10400_s30  ;;  %v1054_v59 = vsel %vm1040_vm8, %v1012_v34, %v762_v29 }
  0xe7   : > { %951 = vrot.lane.b32.xlu0 %v10806_v33, %s10401_s11 }
  0xe8   : > { %v764_v36 = vpop.permute.xlu1 %763 }
  0xe9   : > { %v810_v38 = vpop.permute.xlu0 %809  ;;  %v1056_v4 = vsel %vm1040_vm8, %v1015_v60, %v764_v36 }
  0xea   : > { %953 = vrot.lane.b32.xlu1 %v10822_v53, %s10401_s11  ;;  %v1087_v62 = vsel %vm1073_vm9, %v1054_v59, %v810_v38 }
  0xeb   : > { %983 = vrot.lane.b32.xlu0 %v697_v15, %s10402_s12 }
  0xec   : > { %v812_v40 = vpop.permute.xlu1 %811 }
  0xed   : > { %v842_v42 = vpop.permute.xlu0 %841  ;;  %v1089_v8 = vsel %vm1073_vm9, %v1056_v4, %v812_v40 }
  0xee   : > { %729 = vrot.lane.b32.xlu1 %v10806_v33, %s10395_s15  ;;  %v628_v33 = vsel %vm10510_vm5, 0, %v591_v49  ;;  %v1120_v1 = vsel %vm1106_vm10, %v1087_v62, %v842_v42 }
  0xef   : > { %985 = vrot.lane.b32.xlu0 %v698_v41, %s10402_s12 }
  0xf0   : > { %v844_v47 = vpop.permute.xlu1 %843 }
  0xf1   : > { %v875_v48 = vpop.permute.xlu0 %874  ;;  %v1122_v10 = vsel %vm1106_vm10, %v1089_v8, %v844_v47 }
  0xf2   : > { %731 = vrot.lane.b32.xlu1 %v10822_v53, %s10395_s15  ;;  %v1153_v23 = vsel %vm1139_vm11, %v1120_v1, %v875_v48 }
  0xf3   : > { %777 = vrot.lane.b32.xlu0 %v697_v15, %s10396_s16 }
  0xf4   : > { %v877_v54 = vpop.permute.xlu1 %876 }
  0xf5   : > { %v908_v35 = vpop.permute.xlu0 %907  ;;  %v1155_v11 = vsel %vm1139_vm11, %v1122_v10, %v877_v54 }
  0xf6   : > { %779 = vrot.lane.b32.xlu1 %v698_v41, %s10396_s16  ;;  %v1186_v5 = vsel %vm1172_vm12, %v1153_v23, %v908_v35  ;;  %s13928_s16 = scalar_lea.vmem %s14005_s10, %s8698_s17 }
  0xf7   : > { %825 = vrot.lane.b32.xlu0 %v10867_v24, %s10398_s22 }
  0xf8   : > { %v910_v61 = vpop.permute.xlu1 %909 }
  0xf9   : > { %v940_v63 = vpop.permute.xlu0 %939  ;;  %v1188_v12 = vsel %vm1172_vm12, %v1155_v11, %v910_v61 }
  0xfa   : > { %827 = vrot.lane.b32.xlu1 %v628_v33, %s10398_s22  ;;  %v1219_v21 = vsel %vm1205_vm13, %v1186_v5, %v940_v63 }
  0xfb   : > { %857 = vrot.lane.b32.xlu0 %v10822_v53, %s10397_s21  ;;  %v699_v53 = vsel %vm10476_vm2, %v662_v43, 0 }
  0xfc   : > { %v942_v6 = vpop.permute.xlu1 %941 }
  0xfd   : > { %v972_v9 = vpop.permute.xlu0 %971  ;;  %v1221_v31 = vsel %vm1205_vm13, %v1188_v12, %v942_v6 }
  0xfe   : > { %v1252_v7 = vsel %vm14029_vm14, %v1219_v21, %v972_v9  ;;  %859 = vrot.lane.b32.xlu1 %v10347_v32, %s10397_s21 }
  0xff   : > { %890 = vrot.lane.b32.xlu0 %v698_v41, %s10399_s25  ;;  %9089 = vmatprep.mubr.msk.bf16.mxu0 %vm1298_vm15, %v1252_v7 }
 0x100   : > { %v718_v14 = vpop.permute.xlu1 %717 }
 0x101   : > { %v974_v51 = vpop.permute.xlu0 %973  ;;  %v1018_v37 = vsel %vm991_vm7, %v10644_v18, %v718_v14 }
 0x102   : > { %v1254_v15 = vsel %vm14029_vm14, %v1221_v31, %v974_v51  ;;  %892 = vrot.lane.b32.xlu1 %v699_v53, %s10399_s25  ;;  %s10405_s25 = smov 48  }
 0x103   : > { %923 = vrot.lane.b32.xlu0 %v628_v33, %s10400_s30  ;;  %9090 = vmatmul.mubr.msk.bf16.gmra.mrb[12].mxu0 %vm1298_vm15, %v1254_v15 }
 0x104   : > { %v720_v52 = vpop.permute.xlu1 %719 }
 0x105   : > { %v766_v16 = vpop.permute.xlu0 %765  ;;  %v1021_v42 = vsel %vm991_vm7, %v10660_v30, %v720_v52 }
 0x106   : > { %925 = vrot.lane.b32.xlu1 %v10680_v46, %s10400_s30 }
 0x107   : > { %955 = vrot.lane.b32.xlu0 %v10347_v32, %s10401_s11  ;;  %v1058_v32 = vsel %vm1040_vm8, %v1018_v37, %v766_v16 }
 0x108   : > { %v768_v19 = vpop.permute.xlu1 %767 }
 0x109   : > { %v814_v17 = vpop.permute.xlu0 %813  ;;  %v1060_v45 = vsel %vm1040_vm8, %v1021_v42, %v768_v19 }
 0x10a   : > { %957 = vrot.lane.b32.xlu1 %v14006_v0, %s10401_s11  ;;  %v1091_v39 = vsel %vm1073_vm9, %v1058_v32, %v814_v17 }
 0x10b   : > { %987 = vrot.lane.b32.xlu0 %v699_v53, %s10402_s12 }
 0x10c   : > { %v816_v20 = vpop.permute.xlu1 %815 }
 0x10d   : > { %v846_v22 = vpop.permute.xlu0 %845  ;;  %v1093_v18 = vsel %vm1073_vm9, %v1060_v45, %v816_v20 }
 0x10e   : > { %989 = vrot.lane.b32.xlu1 %v10483_v3, %s10402_s12  ;;  %v1124_v41 = vsel %vm1106_vm10, %v1091_v39, %v846_v22 }
 0x110   : > { %v848_v25 = vpop.permute.xlu1 %847 }
 0x111   : > { %v879_v27 = vpop.permute.xlu0 %878  ;;  %v1126_v35 = vsel %vm1106_vm10, %v1093_v18, %v848_v25 }
 0x112   : > { %v1157_v44 = vsel %vm1139_vm11, %v1124_v41, %v879_v27 }
 0x114   : > { %v881_v29 = vpop.permute.xlu1 %880 }
 0x115   : > { %v912_v36 = vpop.permute.xlu0 %911  ;;  %v1159_v33 = vsel %vm1139_vm11, %v1126_v35, %v881_v29 }
 0x116   : > { %v1190_v47 = vsel %vm1172_vm12, %v1157_v44, %v912_v36 }
 0x118   : > { %v914_v38 = vpop.permute.xlu1 %913 }
 0x119   : > { %v944_v40 = vpop.permute.xlu0 %943  ;;  %v1192_v30 = vsel %vm1172_vm12, %v1159_v33, %v914_v38 }
 0x11a   : > { %v1223_v49 = vsel %vm1205_vm13, %v1190_v47, %v944_v40 }
 0x11c   : > { %v946_v48 = vpop.permute.xlu1 %945 }
 0x11d   : > { %v976_v54 = vpop.permute.xlu0 %975  ;;  %v1225_v59 = vsel %vm1205_vm13, %v1192_v30, %v946_v48 }
 0x11e   : > { %v1256_v34 = vsel %vm14029_vm14, %v1223_v49, %v976_v54 }
 0x11f   : > { %9093 = vmatprep.mubr.msk.bf16.mxu0 %vm1298_vm15, %v1256_v34 }
 0x120   : > { %v722_v55 = vpop.permute.xlu1 %721 }
 0x121   : > { %v978_v61 = vpop.permute.xlu0 %977  ;;  %v1024_v9 = vsel %vm991_vm7, %v10697_v57, %v722_v55 }
 0x122   : > { %v1258_v62 = vsel %vm14029_vm14, %v1225_v59, %v978_v61 }
 0x123   : > { %9094 = vmatmul.mubr.msk.bf16.gmra.mrb[16].mxu0 %vm1298_vm15, %v1258_v62 }
 0x124   : > { %v724_v63 = vpop.permute.xlu1 %723 }
 0x125   : > { %v770_v1 = vpop.permute.xlu0 %769  ;;  %v1027_v14 = vsel %vm991_vm7, %v10731_v28, %v724_v63 }
 0x126   : > { %v1062_v10 = vsel %vm1040_vm8, %v1024_v9, %v770_v1 }
 0x128   : > { %v772_v60 = vpop.permute.xlu1 %771 }
 0x129   : > { %v818_v23 = vpop.permute.xlu0 %817  ;;  %v1064_v51 = vsel %vm1040_vm8, %v1027_v14, %v772_v60 }
 0x12a   : > { %v1095_v11 = vsel %vm1073_vm9, %v1062_v10, %v818_v23 }
 0x12c   : > { %v820_v43 = vpop.permute.xlu1 %819 }
 0x12d   : > { %v850_v4 = vpop.permute.xlu0 %849  ;;  %v1097_v57 = vsel %vm1073_vm9, %v1064_v51, %v820_v43 }
 0x12e   : > { %v1128_v12 = vsel %vm1106_vm10, %v1095_v11, %v850_v4 }
 0x130   : > { %v852_v5 = vpop.permute.xlu1 %851 }
 0x131   : > { %v883_v6 = vpop.permute.xlu0 %882  ;;  %v1130_v17 = vsel %vm1106_vm10, %v1097_v57, %v852_v5 }
 0x132   : > { %v1161_v31 = vsel %vm1139_vm11, %v1128_v12, %v883_v6 }
 0x134   : > { %v885_v8 = vpop.permute.xlu1 %884 }
 0x135   : > { %v916_v21 = vpop.permute.xlu0 %915  ;;  %v1163_v22 = vsel %vm1139_vm11, %v1130_v17, %v885_v8 }
 0x136   : > { %v1194_v15 = vsel %vm1172_vm12, %v1161_v31, %v916_v21  ;;  %v10997_v31 = vld [vmem:[%s13997_s2] ss:$0 sm:$0xff] }
 0x138   : > { %v918_v7 = vpop.permute.xlu1 %917 }
 0x139   : > { %v948_v53 = vpop.permute.xlu0 %947  ;;  %v1196_v28 = vsel %vm1172_vm12, %v1163_v22, %v918_v7 }
 0x13a   : > { %v1227_v16 = vsel %vm1205_vm13, %v1194_v15, %v948_v53 }
 0x13c   : > { %v950_v52 = vpop.permute.xlu1 %949 }
 0x13d   : > { %v980_v19 = vpop.permute.xlu0 %979  ;;  %v1229_v27 = vsel %vm1205_vm13, %v1196_v28, %v950_v52 }
 0x13e   : > { %v1260_v20 = vsel %vm14029_vm14, %v1227_v16, %v980_v19 }
 0x13f   : > { %9097 = vmatprep.mubr.msk.bf16.mxu0 %vm1298_vm15, %v1260_v20 }
 0x140   : > { %v726_v25 = vpop.permute.xlu1 %725 }
 0x141   : > { %v982_v29 = vpop.permute.xlu0 %981  ;;  %v1030_v48 = vsel %vm991_vm7, %v10763_v56, %v726_v25 }
 0x142   : > { %v1262_v36 = vsel %vm14029_vm14, %v1229_v27, %v982_v29 }
 0x143   : > { %9098 = vmatmul.mubr.msk.bf16.gmra.mrb[20].mxu0 %vm1298_vm15, %v1262_v36 }
 0x144   : > { %v728_v37 = vpop.permute.xlu1 %727 }
 0x145   : > { %v774_v32 = vpop.permute.xlu0 %773  ;;  %v1033_v33 = vsel %vm991_vm7, %v10799_v26, %v728_v37 }
 0x146   : > { %v1066_v18 = vsel %vm1040_vm8, %v1030_v48, %v774_v32 }
 0x148   : > { %v776_v38 = vpop.permute.xlu1 %775 }
 0x149   : > { %v822_v39 = vpop.permute.xlu0 %821  ;;  %v1068_v55 = vsel %vm1040_vm8, %v1033_v33, %v776_v38 }
 0x14a   : > { %v1099_v54 = vsel %vm1073_vm9, %v1066_v18, %v822_v39 }
 0x14c   : > { %v824_v40 = vpop.permute.xlu1 %823 }
 0x14d   : > { %v854_v41 = vpop.permute.xlu0 %853  ;;  %v1101_v56 = vsel %vm1073_vm9, %v1068_v55, %v824_v40 }
 0x14e   : > { %v1132_v34 = vsel %vm1106_vm10, %v1099_v54, %v854_v41 }
 0x150   : > { %v856_v42 = vpop.permute.xlu1 %855 }
 0x151   : > { %v887_v44 = vpop.permute.xlu0 %886  ;;  %v1134_v1 = vsel %vm1106_vm10, %v1101_v56, %v856_v42 }
 0x152   : > { %v1165_v30 = vsel %vm1139_vm11, %v1132_v34, %v887_v44 }
 0x154   : > { %v889_v45 = vpop.permute.xlu1 %888 }
 0x155   : > { %v920_v47 = vpop.permute.xlu0 %919  ;;  %v1167_v23 = vsel %vm1139_vm11, %v1134_v1, %v889_v45 }
 0x156   : > { %v1198_v59 = vsel %vm1172_vm12, %v1165_v30, %v920_v47 }
 0x158   : > { %v922_v49 = vpop.permute.xlu1 %921 }
 0x159   : > { %v952_v35 = vpop.permute.xlu0 %951  ;;  %v1200_v26 = vsel %vm1172_vm12, %v1167_v23, %v922_v49 }
 0x15a   : > { %v1231_v62 = vsel %vm1205_vm13, %v1198_v59, %v952_v35  ;;  %v10349_v59 = vld [vmem:[%s13998_s3 + $0x18] sm:$0xff]  }
 0x15c   : > { %v954_v61 = vpop.permute.xlu1 %953 }
 0x15d   : > { %v984_v63 = vpop.permute.xlu0 %983  ;;  %v1233_v4 = vsel %vm1205_vm13, %v1200_v26, %v954_v61 }
 0x15e   : > { %v1264_v60 = vsel %vm14029_vm14, %v1231_v62, %v984_v63 }
 0x15f   : > { %9101 = vmatprep.mubr.msk.bf16.mxu0 %vm1298_vm15, %v1264_v60 }
 0x160   : > { %v730_v43 = vpop.permute.xlu1 %729 }
 0x161   : > { %v986_v5 = vpop.permute.xlu0 %985  ;;  %v1036_v52 = vsel %vm991_vm7, %v10831_v58, %v730_v43 }
 0x162   : > { %v1266_v6 = vsel %vm14029_vm14, %v1233_v4, %v986_v5 }
 0x163   : > { %9102 = vmatmul.mubr.msk.bf16.gmra.mrb[24].mxu0 %vm1298_vm15, %v1266_v6 }
 0x164   : > { %v732_v8 = vpop.permute.xlu1 %731  ;;  %9437 = vmatprep.mubr.bf16.mxu0 %v14006_v0 }
 0x165   : > { %v778_v21 = vpop.permute.xlu0 %777  ;;  %v1039_v36 = vsel %vm991_vm7, %v10867_v24, %v732_v8 }
 0x166   : > { %v1070_v19 = vsel %vm1040_vm8, %v1036_v52, %v778_v21 }
 0x168   : > { %v780_v9 = vpop.permute.xlu1 %779 }
 0x169   : > { %v826_v10 = vpop.permute.xlu0 %825  ;;  %v1072_v32 = vsel %vm1040_vm8, %v1039_v36, %v780_v9  ;;  %v10350_v9 = vld [vmem:[%s13998_s3] sm:$0xff]   ;;  %vm14035_vm8 = vcmask 123905  }
 0x16a   : > { %v1103_v28 = vsel %vm1073_vm9, %v1070_v19, %v826_v10 }
 0x16c   : > { %v828_v7 = vpop.permute.xlu1 %827 }
 0x16d   : > { %v858_v11 = vpop.permute.xlu0 %857  ;;  %v1105_v41 = vsel %vm1073_vm9, %v1072_v32, %v828_v7  ;;  %vm6517_vm9 = vsmask.f32 1280 }
 0x16e   : > { %v1136_v58 = vsel %vm1106_vm10, %v1103_v28, %v858_v11 }
 0x170   : > { %v860_v53 = vpop.permute.xlu1 %859 }
 0x171   : > { %v891_v12 = vpop.permute.xlu0 %890  ;;  %v1138_v48 = vsel %vm1106_vm10, %v1105_v41, %v860_v53 }
 0x172   : > { %v1169_v38 = vsel %vm1139_vm11, %v1136_v58, %v891_v12 }
 0x174   : > { %v893_v14 = vpop.permute.xlu1 %892 }
 0x175   : > { %v924_v51 = vpop.permute.xlu0 %923  ;;  %v1171_v54 = vsel %vm1139_vm11, %v1138_v48, %v893_v14  ;;  %vm14030_vm11 = vcmask 128005  }
 0x176   : > { %v9079_v15 = vpop.f32.mrb[0].mxu0  ;;  %v1202_v42 = vsel %vm1172_vm12, %v1169_v38, %v924_v51 }
 0x177   : > { %v1378_v57 = vadd.f32 %v9079_v15, %v10997_v31  ;;  %v1369_v16 = vpop.f32.mrb[1].mxu0 }
 0x178   : > { %v1370_v17 = vadd.f32 %v10997_v31, %v1369_v16  ;;  %v926_v20 = vpop.permute.xlu1 %925  ;;  %v9080_v22 = vpop.f32.mrb[2].mxu0 }
 0x179   : > { %v1381_v25 = vadd.f32 %v9080_v22, %v10997_v31  ;;  %v956_v27 = vpop.permute.xlu0 %955  ;;  %v1372_v29 = vpop.f32.mrb[3].mxu0  ;;  %v1498_v39 = vmax.f32 %v1378_v57, 0.0  ;;  %v1204_v33 = vsel %vm1172_vm12, %v1171_v54, %v926_v20  ;;  %v10351_v22 = vld [vmem:[%s13998_s3 + $0x8] sm:$0xff]   ;;  %vm7431_vm12 = vsmask.f32 5376 }
 0x17a   : > { %v1373_v37 = vadd.f32 %v10997_v31, %v1372_v29  ;;  %v1496_v44 = vmax.f32 %v1370_v17, 0.0  ;;  %v1235_v18 = vsel %vm1205_vm13, %v1202_v42, %v956_v27 }
 0x17b   : > { %v1499_v40 = vmax.f32 %v1381_v25, 0.0 }
 0x17c   : > { %v1497_v45 = vmax.f32 %v1373_v37, 0.0  ;;  %v958_v47 = vpop.permute.xlu1 %957 }
 0x17d   : > { %v11015_v24 = vpack.c.bf16 %v1499_v40, %v1498_v39  ;;  %v988_v49 = vpop.permute.xlu0 %987  ;;  %v1237_v30 = vsel %vm1205_vm13, %v1204_v33, %v958_v47  ;;  %vm12844_vm13 = vmand %vm14030_vm11, %vm7431_vm12  ;;  %vm14036_vm11 = vcmask 125955  }
 0x17e   : > { %v11019_v35 = vpack.c.bf16 %v1497_v45, %v1496_v44  ;;  %v1268_v34 = vsel %vm14029_vm14, %v1235_v18, %v988_v49  ;;  %v11081_v45 = vld [vmem:[%s13998_s3 + $0x20] sm:$0xff]  }
 0x17f   : > { %9105 = vmatprep.mubr.msk.bf16.mxu1 %vm1298_vm15, %v1268_v34 }
 0x180   : > { %v990_v55 = vpop.permute.xlu1 %989 }
 0x181   : > { %v1270_v61 = vsel %vm14029_vm14, %v1237_v30, %v990_v55 }
 0x182   : > { %9106 = vmatmul.mubr.msk.bf16.vlgmr.msra.gmra.mrb[0].mxu1 %vm1298_vm15, %v1270_v61  ;;  %vm14031_vm15 = vcmask 130055  }
 0x183   : > { %9110 = vmatpush3.bf16.msra.mxu1 %v10917_v50  ;;  %9113 = vmatprep.mubr.bf16.mxu1 %v14006_v0 }
 0x184   : > { %9111 = vmatprep.subr.bf16.mxu1 %v10349_v59 }
 0x187   : > { %9112 = vmatpush3.bf16.msra.mxu1 %v10349_v59 }
 0x188   : > { %9145 = vmatprep.subr.bf16.mxu1 %v10350_v9 }
 0x18a   : > { %9114 = vmatmul.mubr.msk.bf16.vlgmr.msra.gmra.mrb[4].mxu1 %vm14029_vm14, %v11019_v35 }
 0x18b   : > { %9117 = vmatprep.mubr.msk.bf16.mxu1 %vm14029_vm14, %v11015_v24  ;;  %9146 = vmatpush3.bf16.msra.mxu1 %v10350_v9 }
 0x18c   : > { %9147 = vmatprep.subr.bf16.mxu1 %v10351_v22 }
 0x18f   : > { %9148 = vmatpush3.bf16.msra.mxu1 %v10351_v22 }
 0x190   : > { %9181 = vmatprep.subr.bf16.mxu1 %v11081_v45 }
 0x196   : > { %v9083_v56 = vpop.f32.mrb[4].mxu0 }
 0x197   : > { %v1394_v62 = vadd.f32 %v9083_v56, %v10997_v31  ;;  %v1385_v63 = vpop.f32.mrb[5].mxu0 }
 0x198   : > { %v1386_v1 = vadd.f32 %v10997_v31, %v1385_v63  ;;  %v9084_v60 = vpop.f32.mrb[6].mxu0 }
 0x199   : > { %v1397_v23 = vadd.f32 %v9084_v60, %v10997_v31  ;;  %v1388_v50 = vpop.f32.mrb[7].mxu0  ;;  %v1502_v43 = vmax.f32 %v1394_v62, 0.0 }
 0x19a   : > { %v1389_v26 = vadd.f32 %v10997_v31, %v1388_v50  ;;  %v1500_v5 = vmax.f32 %v1386_v1, 0.0 }
 0x19b   : > { %v1503_v4 = vmax.f32 %v1397_v23, 0.0 }
 0x19c   : > { %v1501_v6 = vmax.f32 %v1389_v26, 0.0 }
 0x19d   : > { %v11040_v8 = vpack.c.bf16 %v1503_v4, %v1502_v43 }
 0x19e   : > { %v11042_v21 = vpack.c.bf16 %v1501_v6, %v1500_v5 }
 0x1a0   : > { %9118 = vmatmul.mubr.msk.bf16.gmra.mrb[8].mxu1 %vm14029_vm14, %v11042_v21 }
 0x1a1   : > { %9121 = vmatprep.mubr.msk.bf16.mxu1 %vm14029_vm14, %v11040_v8 }
 0x1b6   : > { %v9087_v10 = vpop.f32.mrb[8].mxu0 }
 0x1b7   : > { %v1410_v7 = vadd.f32 %v9087_v10, %v10997_v31  ;;  %v1401_v11 = vpop.f32.mrb[9].mxu0 }
 0x1b8   : > { %v1402_v53 = vadd.f32 %v10997_v31, %v1401_v11  ;;  %v9088_v12 = vpop.f32.mrb[10].mxu0 }
 0x1b9   : > { %v1413_v14 = vadd.f32 %v9088_v12, %v10997_v31  ;;  %v1404_v51 = vpop.f32.mrb[11].mxu0  ;;  %v1506_v52 = vmax.f32 %v1410_v7, 0.0 }
 0x1ba   : > { %v1405_v15 = vadd.f32 %v10997_v31, %v1404_v51  ;;  %v1504_v16 = vmax.f32 %v1402_v53, 0.0 }
 0x1bb   : > { %v1507_v57 = vmax.f32 %v1413_v14, 0.0 }
 0x1bc   : > { %v1505_v19 = vmax.f32 %v1405_v15, 0.0 }
 0x1bd   : > { %v11055_v17 = vpack.c.bf16 %v1507_v57, %v1506_v52 }
 0x1be   : > { %v11057_v20 = vpack.c.bf16 %v1505_v19, %v1504_v16 }
 0x1c0   : > { %9122 = vmatmul.mubr.msk.bf16.gmra.mrb[12].mxu1 %vm14029_vm14, %v11057_v20 }
 0x1c1   : > { %9125 = vmatprep.mubr.msk.bf16.mxu1 %vm14029_vm14, %v11055_v17 }
 0x1d6   : > { %v9091_v28 = vpop.f32.mrb[12].mxu0 }
 0x1d7   : > { %v1426_v25 = vadd.f32 %v9091_v28, %v10997_v31  ;;  %v1417_v27 = vpop.f32.mrb[13].mxu0 }
 0x1d8   : > { %v1418_v29 = vadd.f32 %v10997_v31, %v1417_v27  ;;  %v9092_v36 = vpop.f32.mrb[14].mxu0 }
 0x1d9   : > { %v1429_v58 = vadd.f32 %v9092_v36, %v10997_v31  ;;  %v1420_v37 = vpop.f32.mrb[15].mxu0  ;;  %v1510_v38 = vmax.f32 %v1426_v25, 0.0 }
 0x1da   : > { %v1421_v32 = vadd.f32 %v10997_v31, %v1420_v37  ;;  %v1508_v40 = vmax.f32 %v1418_v29, 0.0 }
 0x1db   : > { %v1511_v39 = vmax.f32 %v1429_v58, 0.0 }
 0x1dc   : > { %v1509_v41 = vmax.f32 %v1421_v32, 0.0 }
 0x1dd   : > { %v11070_v42 = vpack.c.bf16 %v1511_v39, %v1510_v38 }
 0x1de   : > { %v11072_v44 = vpack.c.bf16 %v1509_v41, %v1508_v40 }
 0x1e0   : > { %9126 = vmatmul.mubr.msk.bf16.gmra.mrb[16].mxu1 %vm14029_vm14, %v11072_v44 }
 0x1e1   : > { %9129 = vmatprep.mubr.msk.bf16.mxu1 %vm14029_vm14, %v11070_v42 }
 0x1f6   : > { %v9095_v47 = vpop.f32.mrb[16].mxu0 }
 0x1f7   : > { %v1442_v48 = vadd.f32 %v9095_v47, %v10997_v31  ;;  %v1433_v18 = vpop.f32.mrb[17].mxu0 }
 0x1f8   : > { %v1434_v49 = vadd.f32 %v10997_v31, %v1433_v18  ;;  %v9096_v54 = vpop.f32.mrb[18].mxu0 }
 0x1f9   : > { %v1445_v34 = vadd.f32 %v9096_v54, %v10997_v31  ;;  %v1436_v33 = vpop.f32.mrb[19].mxu0  ;;  %v1514_v55 = vmax.f32 %v1442_v48, 0.0  ;;  %v1545_v48 = vshrl.u32 %v11019_v35, 16 }
 0x1fa   : > { %v1437_v30 = vadd.f32 %v10997_v31, %v1436_v33  ;;  %v1512_v61 = vmax.f32 %v1434_v49, 0.0  ;;  %v1552_v33 = vshrl.u32 %v11015_v24, 16 }
 0x1fb   : > { %v1515_v59 = vmax.f32 %v1445_v34, 0.0 }
 0x1fc   : > { %v1513_v56 = vmax.f32 %v1437_v30, 0.0 }
 0x1fd   : > { %v11088_v62 = vpack.c.bf16 %v1515_v59, %v1514_v55  ;;  %v1547_v59 = vrot.slane %v1545_v48, 7 }
 0x1fe   : > { %v11090_v63 = vpack.c.bf16 %v1513_v56, %v1512_v61  ;;  %v1548_v56 = vshll.u32 %v11019_v35, 16 }
 0x200   : > { %9130 = vmatmul.mubr.msk.bf16.gmra.mrb[20].mxu1 %vm14029_vm14, %v11090_v63 }
 0x201   : > { %9133 = vmatprep.mubr.msk.bf16.mxu1 %vm14029_vm14, %v11088_v62 }
 0x216   : > { %v9099_v1 = vpop.f32.mrb[20].mxu0 }
 0x217   : > { %v1458_v60 = vadd.f32 %v9099_v1, %v10997_v31  ;;  %v1449_v23 = vpop.f32.mrb[21].mxu0 }
 0x218   : > { %v1450_v50 = vadd.f32 %v10997_v31, %v1449_v23  ;;  %v9100_v26 = vpop.f32.mrb[22].mxu0  ;;  %v1555_v23 = vshll.u32 %v11015_v24, 16 }
 0x219   : > { %v1461_v43 = vadd.f32 %v9100_v26, %v10997_v31  ;;  %v1452_v4 = vpop.f32.mrb[23].mxu0  ;;  %v1518_v6 = vmax.f32 %v1458_v60, 0.0  ;;  %v1559_v26 = vshrl.u32 %v11042_v21, 16 }
 0x21a   : > { %v1453_v5 = vadd.f32 %v10997_v31, %v1452_v4  ;;  %v1516_v10 = vmax.f32 %v1450_v50, 0.0  ;;  %v1550_v50 = vor.u32 %v1548_v56, %v1547_v59  ;;  %v1601_v59 = vshrl.u32 %v11090_v63, 16 }
 0x21b   : > { %v1519_v9 = vmax.f32 %v1461_v43, 0.0 }
 0x21c   : > { %v1517_v7 = vmax.f32 %v1453_v5, 0.0  ;;  %v1566_v5 = vshrl.u32 %v11040_v8, 16 }
 0x21d   : > { %v11100_v11 = vpack.c.bf16 %v1519_v9, %v1518_v6  ;;  %v10353_v6 = vld [vmem:[%s13998_s3 + $0x28] sm:$0xff]   ;;  %v11159_v9 = vsel %vm10510_vm5, 0, %v1550_v50 }
 0x21e   : > { %v11102_v53 = vpack.c.bf16 %v1517_v7, %v1516_v10  ;;  %v1561_v10 = vrot.slane %v1559_v26, 7 }
 0x220   : > { %9134 = vmatmul.mubr.msk.bf16.gmra.mrb[24].mxu1 %vm14029_vm14, %v11102_v53 }
 0x221   : > { %9137 = vmatprep.mubr.msk.bf16.mxu1 %vm14029_vm14, %v11100_v11 }
 0x236   : > { %v9103_v12 = vpop.f32.mrb[24].mxu0 }
 0x237   : > { %v1474_v14 = vadd.f32 %v9103_v12, %v10997_v31  ;;  %v1465_v51 = vpop.f32.mrb[25].mxu0  ;;  %v1568_v12 = vrot.slane %v1566_v5, 7 }
 0x238   : > { %v1466_v15 = vadd.f32 %v10997_v31, %v1465_v51  ;;  %v9104_v52 = vpop.f32.mrb[26].mxu0  ;;  %v1569_v51 = vshll.u32 %v11040_v8, 16 }
 0x239   : > { %v1477_v57 = vadd.f32 %v9104_v52, %v10997_v31  ;;  %v1468_v16 = vpop.f32.mrb[27].mxu0  ;;  %v1522_v22 = vmax.f32 %v1474_v14, 0.0  ;;  %v1562_v14 = vshll.u32 %v11042_v21, 16 }
 0x23a   : > { %v1469_v19 = vadd.f32 %v10997_v31, %v1468_v16  ;;  %v1520_v25 = vmax.f32 %v1466_v15, 0.0  ;;  %v11179_v15 = vld [vmem:[%s13998_s3 + $0x30] sm:$0xff]   ;;  %v1571_v16 = vor.u32 %v1569_v51, %v1568_v12  ;;  %v1604_v12 = vshll.u32 %v11090_v63, 16 }
 0x23b   : > { %v1523_v28 = vmax.f32 %v1477_v57, 0.0  ;;  %v1564_v52 = vor.u32 %v1562_v14, %v1561_v10  ;;  %v1573_v57 = vshrl.u32 %v11057_v20, 16 }
 0x23c   : > { %v1521_v27 = vmax.f32 %v1469_v19, 0.0 }
 0x23d   : > { %v11112_v29 = vpack.c.bf16 %v1523_v28, %v1522_v22  ;;  %v11190_v19 = vsel %vm10510_vm5, 0, %v1564_v52  ;;  %v1575_v22 = vrot.slane %v1573_v57, 7  ;;  %v11198_v28 = vsel %vm10510_vm5, 0, %v1571_v16 }
 0x23e   : > { %v11114_v36 = vpack.c.bf16 %v1521_v27, %v1520_v25  ;;  %v1576_v27 = vshll.u32 %v11057_v20, 16  ;;  %v1611_v52 = vshll.u32 %v11088_v62, 16 }
 0x240   : > { %9138 = vmatmul.mubr.msk.bf16.gmra.mrb[28].mxu1 %vm14029_vm14, %v11114_v36 }
 0x241   : > { %9141 = vmatprep.mubr.msk.bf16.mxu1 %vm14029_vm14, %v11112_v29 }
 0x255   : > { %v9107_v58 = vpop.f32.mrb[0].mxu1 }
 0x256   : > { %v1490_v37 = vadd.f32 %v9107_v58, %v10997_v31  ;;  %v1481_v32 = vpop.f32.mrb[1].mxu1  ;;  %v1583_v58 = vshll.u32 %v11055_v17, 16 }
 0x257   : > { %v1482_v38 = vadd.f32 %v10997_v31, %v1481_v32  ;;  %v9108_v39 = vpop.f32.mrb[2].mxu1  ;;  %v1587_v32 = vshrl.u32 %v11072_v44, 16 }
 0x258   : > { %v1493_v40 = vadd.f32 %v9108_v39, %v10997_v31  ;;  %v1484_v41 = vpop.f32.mrb[3].mxu1  ;;  %v1526_v18 = vmax.f32 %v1490_v37, 0.0  ;;  %v1578_v37 = vor.u32 %v1576_v27, %v1575_v22  ;;  %v1594_v39 = vshrl.u32 %v11070_v42, 16 }
 0x259   : > { %v1485_v47 = vadd.f32 %v10997_v31, %v1484_v41  ;;  %v1524_v54 = vmax.f32 %v1482_v38, 0.0  ;;  %v1554_v31 = vrot.slane %v1552_v33, 7  ;;  %v1589_v41 = vrot.slane %v1587_v32, 7 }
 0x25a   : > { %v1527_v49 = vmax.f32 %v1493_v40, 0.0  ;;  %v11214_v40 = vsel %vm10510_vm5, 0, %v1578_v37  ;;  %v14012_v22 = vshrl.u32 %v11102_v53, 16  ;;  %v14010_v37 = vshrl.u32 %v11100_v11, 16 }
 0x25b   : > { %v1525_v34 = vmax.f32 %v1485_v47, 0.0  ;;  %v1557_v4 = vor.u32 %v1555_v23, %v1554_v31 }
 0x25c   : > { %v11126_v30 = vpack.c.bf16 %v1527_v49, %v1526_v18  ;;  %v1596_v18 = vrot.slane %v1594_v39, 7  ;;  %v1590_v49 = vshll.u32 %v11072_v44, 16 }
 0x25d   : > { %v11128_v55 = vpack.c.bf16 %v1525_v34, %v1524_v54  ;;  %v11167_v7 = vsel %vm10510_vm5, 0, %v1557_v4  ;;  %v1597_v54 = vshll.u32 %v11070_v42, 16  ;;  %v1603_v4 = vrot.slane %v1601_v59, 7 }
 0x25e   : > { %v14008_v61 = vshll.u32 %v11126_v30, 16  ;;  %v14009_v1 = vshrl.u32 %v11126_v30, 16  ;;  %v1592_v34 = vor.u32 %v1590_v49, %v1589_v41  ;;  %v1617_v41 = vrot.slane %v14012_v22, 7 }
 0x25f   : > { %9142 = vmatmul.mubr.msk.bf16.gmra.mrb[32].mxu1 %vm14029_vm14, %v11128_v55  ;;  %v1599_v31 = vor.u32 %v1597_v54, %v1596_v18  ;;  %v1606_v16 = vor.u32 %v1604_v12, %v1603_v4  ;;  %v14013_v4 = vshll.u32 %v11100_v11, 16  ;;  %v14016_v22 = vshrl.u32 %v11128_v55, 16 }
 0x260   : > { %9149 = vmatprep.mubr.msk.bf16.mxu1 %vm14029_vm14, %v10680_v46  ;;  %v1718_v60 = vrot.slane %v14008_v61, 1  ;;  %v11238_v50 = vsel %vm10510_vm5, 0, %v1592_v34  ;;  %v1624_v34 = vrot.slane %v14010_v37, 7 }
 0x262   : > { %v11149_v43 = vor.u32 %v1718_v60, %v14009_v1  ;;  %v1608_v60 = vshrl.u32 %v11088_v62, 16  ;;  %v1627_v0 = vor.u32 %v14013_v4, %v1624_v34  ;;  %v1632_v34 = vshll.u32 %v11114_v36, 16 }
 0x264   : > { %v1610_v10 = vrot.slane %v1608_v60, 7 }
 0x267   : > { %9150 = vmatmul.mubr.msk.bf16.vlgmr.msra.gmra.mrb[4].mxu1 %vm14029_vm14, %v11159_v9 }
 0x268   : > { %9153 = vmatprep.mubr.msk.bf16.mxu1 %vm14029_vm14, %v11167_v7  ;;  %9182 = vmatpush3.bf16.msra.mxu1 %v11081_v45  ;;  %v1580_v45 = vshrl.u32 %v11055_v17, 16 }
 0x269   : > { %9183 = vmatprep.subr.bf16.mxu1 %v10353_v6 }
 0x26a   : > { %v1582_v25 = vrot.slane %v1580_v45, 7 }
 0x26c   : > { %9184 = vmatpush3.bf16.msra.mxu1 %v10353_v6  ;;  %v1585_v38 = vor.u32 %v1583_v58, %v1582_v25  ;;  %v11246_v6 = vsel %vm10510_vm5, 0, %v1599_v31  ;;  %v1613_v25 = vor.u32 %v1611_v52, %v1610_v10  ;;  %v14015_v31 = vshll.u32 %v11102_v53, 16 }
 0x26d   : > { %9217 = vmatprep.subr.bf16.mxu1 %v11179_v15 }
 0x26e   : > { %v11222_v47 = vsel %vm10510_vm5, 0, %v1585_v38  ;;  %v11262_v38 = vsel %vm10510_vm5, 0, %v1606_v16  ;;  %v11270_v18 = vsel %vm10510_vm5, 0, %v1613_v25  ;;  %v1620_v10 = vor.u32 %v14015_v31, %v1617_v41 }
 0x26f   : > { %9154 = vmatmul.mubr.msk.bf16.gmra.mrb[8].mxu1 %vm14029_vm14, %v11190_v19  ;;  %v14011_v16 = vshrl.u32 %v11114_v36, 16  ;;  %v14014_v25 = vshrl.u32 %v11112_v29, 16  ;;  %v11294_v41 = vsel %vm10510_vm5, 0, %v1627_v0 }
 0x270   : > { %9157 = vmatprep.mubr.msk.bf16.mxu1 %vm14029_vm14, %v11198_v28  ;;  %v11286_v61 = vsel %vm10510_vm5, 0, %v1620_v10  ;;  %v14017_v10 = vshll.u32 %v11112_v29, 16 }
 0x271   : > { %v1631_v1 = vrot.slane %v14011_v16, 7  ;;  %v1638_v37 = vrot.slane %v14014_v25, 7  ;;  %v1645_v25 = vrot.slane %v14016_v22, 7  ;;  %v1688_v22 = vrot.slane %v1548_v56, 1 }
 0x273   : > { %v1634_v16 = vor.u32 %v1632_v34, %v1631_v1  ;;  %v1641_v4 = vor.u32 %v14017_v10, %v1638_v37  ;;  %v1646_v1 = vshll.u32 %v11128_v55, 16  ;;  %v1689_v10 = vor.u32 %v1688_v22, %v1545_v48 }
 0x275   : > { %v11309_v0 = vsel %vm10510_vm5, 0, %v1634_v16  ;;  %v11317_v31 = vsel %vm10510_vm5, 0, %v1641_v4  ;;  %v1648_v37 = vor.u32 %v1646_v1, %v1645_v25  ;;  %v1690_v4 = vrot.slane %v1555_v23, 1 }
 0x276   : > { %v11345_v56 = vsel %vm10476_vm2, %v1689_v10, 0  ;;  %v1692_v23 = vrot.slane %v1562_v14, 1  ;;  %v10356_v14 = vld [vmem:[%s13998_s3 + $0x40] sm:$0xff]  }
 0x277   : > { %9158 = vmatmul.mubr.msk.bf16.gmra.mrb[12].mxu1 %vm14029_vm14, %v11214_v40  ;;  %v11326_v16 = vsel %vm10510_vm5, 0, %v1648_v37  ;;  %v1691_v25 = vor.u32 %v1690_v4, %v1552_v33  ;;  %v10355_v37 = vld [vmem:[%s13998_s3 + $0x38] sm:$0xff]   ;;  %v1694_v33 = vrot.slane %v1569_v51, 1 }
 0x278   : > { %9161 = vmatprep.mubr.msk.bf16.mxu1 %vm14029_vm14, %v11222_v47  ;;  %v1693_v22 = vor.u32 %v1692_v23, %v1559_v26  ;;  %v1698_v26 = vrot.slane %v1583_v58, 1 }
 0x279   : > { %v11353_v48 = vsel %vm10476_vm2, %v1691_v25, 0  ;;  %v1695_v10 = vor.u32 %v1694_v33, %v1566_v5  ;;  %v1704_v33 = vrot.slane %v1604_v12, 1 }
 0x27a   : > { %v11369_v51 = vsel %vm10476_vm2, %v1693_v22, 0  ;;  %v1699_v25 = vor.u32 %v1698_v26, %v1580_v45  ;;  %v14170_v26 = vshll.u32 %v11100_v11, 16 }
 0x27b   : > { %v11377_v4 = vsel %vm10476_vm2, %v1695_v10, 0  ;;  %v14169_v10 = vshll.u32 %v11102_v53, 16 }
 0x27c   : > { %v11397_v58 = vsel %vm10476_vm2, %v1699_v25, 0  ;;  %v14172_v25 = vshrl.u32 %v11100_v11, 16 }
 0x27f   : > { %9162 = vmatmul.mubr.msk.bf16.gmra.mrb[16].mxu1 %vm14029_vm14, %v11238_v50 }
 0x280   : > { %9165 = vmatprep.mubr.msk.bf16.mxu1 %vm14029_vm14, %v11246_v6 }
 0x287   : > { %9166 = vmatmul.mubr.msk.bf16.gmra.mrb[20].mxu1 %vm14029_vm14, %v11262_v38 }
 0x288   : > { %9169 = vmatprep.mubr.msk.bf16.mxu1 %vm14029_vm14, %v11270_v18 }
 0x28f   : > { %9170 = vmatmul.mubr.msk.bf16.gmra.mrb[24].mxu1 %vm14029_vm14, %v11286_v61 }
 0x290   : > { %9173 = vmatprep.mubr.msk.bf16.mxu1 %vm14029_vm14, %v11294_v41 }
 0x297   : > { %9174 = vmatmul.mubr.msk.bf16.gmra.mrb[28].mxu1 %vm14029_vm14, %v11309_v0 }
 0x298   : > { %9177 = vmatprep.mubr.msk.bf16.mxu1 %vm14029_vm14, %v11317_v31 }
 0x29f   : > { %9178 = vmatmul.mubr.msk.bf16.gmra.mrb[32].mxu1 %vm14029_vm14, %v11326_v16 }
 0x2a0   : > { %9185 = vmatprep.mubr.msk.bf16.mxu1 %vm14029_vm14, %v10483_v3 }
 0x2a7   : > { %9186 = vmatmul.mubr.msk.bf16.vlgmr.msra.gmra.mrb[4].mxu1 %vm14029_vm14, %v11345_v56 }
 0x2a8   : > { %9189 = vmatprep.mubr.msk.bf16.mxu1 %vm14029_vm14, %v11353_v48  ;;  %9218 = vmatpush3.bf16.msra.mxu1 %v11179_v15  ;;  %v1696_v15 = vrot.slane %v1576_v27, 1 }
 0x2a9   : > { %9219 = vmatprep.subr.bf16.mxu1 %v10355_v37 }
 0x2aa   : > { %v1697_v5 = vor.u32 %v1696_v15, %v1573_v57  ;;  %v1702_v57 = vrot.slane %v1597_v54, 1  ;;  %v1708_v15 = vrot.slane %v14169_v10, 1  ;;  %v14175_v10 = vshrl.u32 %v11112_v29, 16 }
 0x2ac   : > { %9220 = vmatpush3.bf16.msra.mxu1 %v10355_v37  ;;  %v11389_v27 = vsel %vm10476_vm2, %v1697_v5, 0  ;;  %v1700_v37 = vrot.slane %v1590_v49, 1  ;;  %v1703_v23 = vor.u32 %v1702_v57, %v1594_v39  ;;  %v1705_v39 = vor.u32 %v1704_v33, %v1601_v59 }
 0x2ad   : > { %9253 = vmatprep.subr.bf16.mxu1 %v10356_v14  ;;  %v1710_v59 = vrot.slane %v14170_v26, 1  ;;  %v14173_v33 = vshll.u32 %v11112_v29, 16  ;;  %v1716_v26 = vrot.slane %v1646_v1, 1  ;;  %v10357_v1 = vld [vmem:[%s13998_s3 + $0x48] sm:$0xff]  }
 0x2ae   : > { %v1701_v45 = vor.u32 %v1700_v37, %v1587_v32  ;;  %v11417_v54 = vsel %vm10476_vm2, %v1703_v23, 0  ;;  %v1706_v32 = vrot.slane %v1611_v52, 1  ;;  %v11429_v12 = vsel %vm10476_vm2, %v1705_v39, 0 }
 0x2af   : > { %9190 = vmatmul.mubr.msk.bf16.gmra.mrb[8].mxu1 %vm14029_vm14, %v11369_v51  ;;  %v1711_v37 = vor.u32 %v1710_v59, %v14172_v25  ;;  %v14174_v39 = vshrl.u32 %v11114_v36, 16 }
 0x2b0   : > { %9193 = vmatprep.mubr.msk.bf16.mxu1 %vm14029_vm14, %v11377_v4  ;;  %v11409_v49 = vsel %vm10476_vm2, %v1701_v45, 0  ;;  %v1707_v22 = vor.u32 %v1706_v32, %v1608_v60  ;;  %v14171_v60 = vshrl.u32 %v11102_v53, 16  ;;  %v1712_v45 = vrot.slane %v1632_v34, 1 }
 0x2b1   : > { %v11457_v23 = vsel %vm10476_vm2, %v1711_v37, 0  ;;  %v1714_v32 = vrot.slane %v14173_v33, 1  ;;  %v10358_v37 = vld [vmem:[%s13998_s3 + $0x50] sm:$0xff]  }
 0x2b2   : > { %v11437_v52 = vsel %vm10476_vm2, %v1707_v22, 0  ;;  %v1709_v5 = vor.u32 %v1708_v15, %v14171_v60  ;;  %v1713_v22 = vor.u32 %v1712_v45, %v14174_v39  ;;  %v14176_v60 = vshrl.u32 %v11128_v55, 16  ;;  %v10359_v39 = vld [vmem:[%s13998_s3 + $0x58] sm:$0xff]  }
 0x2b3   : > { %v1715_v15 = vor.u32 %v1714_v32, %v14175_v10  ;;  %v14178_v45 = vshll.u32 %v11126_v30, 16  ;;  %v10362_v10 = vld [vmem:[%s13998_s3 + $0x70] sm:$0xff]  }
 0x2b4   : > { %v11449_v57 = vsel %vm10476_vm2, %v1709_v5, 0  ;;  %v11469_v34 = vsel %vm10476_vm2, %v1713_v22, 0  ;;  %v1717_v5 = vor.u32 %v1716_v26, %v14176_v60  ;;  %v10360_v22 = vld [vmem:[%s13998_s3 + $0x60] sm:$0xff]  }
 0x2b5   : > { %v11477_v59 = vsel %vm10476_vm2, %v1715_v15, 0  ;;  %v10363_v15 = vld [vmem:[%s13998_s3 + $0x78] sm:$0xff]  }
 0x2b6   : > { %v11485_v25 = vsel %vm10476_vm2, %v1717_v5, 0 }
 0x2b7   : > { %9194 = vmatmul.mubr.msk.bf16.gmra.mrb[12].mxu1 %vm14029_vm14, %v11389_v27 }
 0x2b8   : > { %9197 = vmatprep.mubr.msk.bf16.mxu1 %vm14029_vm14, %v11397_v58 }
 0x2bf   : > { %9198 = vmatmul.mubr.msk.bf16.gmra.mrb[16].mxu1 %vm14029_vm14, %v11409_v49 }
 0x2c0   : > { %9201 = vmatprep.mubr.msk.bf16.mxu1 %vm14029_vm14, %v11417_v54 }
 0x2c7   : > { %9202 = vmatmul.mubr.msk.bf16.gmra.mrb[20].mxu1 %vm14029_vm14, %v11429_v12 }
 0x2c8   : > { %9205 = vmatprep.mubr.msk.bf16.mxu1 %vm14029_vm14, %v11437_v52 }
 0x2cf   : > { %9206 = vmatmul.mubr.msk.bf16.gmra.mrb[24].mxu1 %vm14029_vm14, %v11449_v57 }
 0x2d0   : > { %9209 = vmatprep.mubr.msk.bf16.mxu1 %vm14029_vm14, %v11457_v23 }
 0x2d7   : > { %9210 = vmatmul.mubr.msk.bf16.gmra.mrb[28].mxu1 %vm14029_vm14, %v11469_v34 }
 0x2d8   : > { %9213 = vmatprep.mubr.msk.bf16.mxu1 %vm14029_vm14, %v11477_v59 }
 0x2df   : > { %9214 = vmatmul.mubr.msk.bf16.gmra.mrb[32].mxu1 %vm14029_vm14, %v11485_v25 }
 0x2e0   : > { %9221 = vmatprep.mubr.msk.bf16.mxu1 %vm14029_vm14, %v11159_v9  ;;  %v14177_v9 = vshrl.u32 %v11126_v30, 16 }
 0x2e7   : > { %9222 = vmatmul.mubr.msk.bf16.vlgmr.msra.gmra.mrb[4].mxu1 %vm14029_vm14, %v11167_v7 }
 0x2e8   : > { %9225 = vmatprep.mubr.msk.bf16.mxu1 %vm14029_vm14, %v11190_v19  ;;  %9254 = vmatpush3.bf16.msra.mxu1 %v10356_v14  ;;  %v1652_v14 = vrot.slane %v14177_v9, 7 }
 0x2e9   : > { %9255 = vmatprep.subr.bf16.mxu1 %v10357_v1 }
 0x2ea   : > { %v1655_v33 = vor.u32 %v14178_v45, %v1652_v14 }
 0x2ec   : > { %9256 = vmatpush3.bf16.msra.mxu1 %v10357_v1  ;;  %v11531_v32 = vsel %vm10510_vm5, 0, %v1655_v33 }
 0x2ed   : > { %9289 = vmatprep.subr.bf16.mxu1 %v10358_v37 }
 0x2ef   : > { %9226 = vmatmul.mubr.msk.bf16.gmra.mrb[8].mxu1 %vm14029_vm14, %v11198_v28 }
 0x2f0   : > { %9229 = vmatprep.mubr.msk.bf16.mxu1 %vm14029_vm14, %v11214_v40 }
 0x2f7   : > { %9230 = vmatmul.mubr.msk.bf16.gmra.mrb[12].mxu1 %vm14029_vm14, %v11222_v47 }
 0x2f8   : > { %9233 = vmatprep.mubr.msk.bf16.mxu1 %vm14029_vm14, %v11238_v50 }
 0x2ff   : > { %9234 = vmatmul.mubr.msk.bf16.gmra.mrb[16].mxu1 %vm14029_vm14, %v11246_v6 }
 0x300   : > { %9237 = vmatprep.mubr.msk.bf16.mxu1 %vm14029_vm14, %v11262_v38 }
 0x307   : > { %9238 = vmatmul.mubr.msk.bf16.gmra.mrb[20].mxu1 %vm14029_vm14, %v11270_v18 }
 0x308   : > { %9241 = vmatprep.mubr.msk.bf16.mxu1 %vm14029_vm14, %v11286_v61 }
 0x30f   : > { %9242 = vmatmul.mubr.msk.bf16.gmra.mrb[24].mxu1 %vm14029_vm14, %v11294_v41 }
 0x310   : > { %9245 = vmatprep.mubr.msk.bf16.mxu1 %vm14029_vm14, %v11309_v0 }
 0x317   : > { %9246 = vmatmul.mubr.msk.bf16.gmra.mrb[28].mxu1 %vm14029_vm14, %v11317_v31 }
 0x318   : > { %9249 = vmatprep.mubr.msk.bf16.mxu1 %vm14029_vm14, %v11326_v16 }
 0x31f   : > { %9250 = vmatmul.mubr.msk.bf16.gmra.mrb[32].mxu1 %vm14029_vm14, %v11531_v32 }
 0x320   : > { %9257 = vmatprep.mubr.msk.bf16.mxu1 %vm14029_vm14, %v11019_v35  ;;  %v10361_v35 = vld [vmem:[%s13998_s3 + $0x68] sm:$0xff]  }
 0x327   : > { %9258 = vmatmul.mubr.msk.bf16.vlgmr.msra.gmra.mrb[4].mxu1 %vm14029_vm14, %v11015_v24 }
 0x328   : > { %9261 = vmatprep.mubr.msk.bf16.mxu1 %vm14029_vm14, %v11042_v21  ;;  %9290 = vmatpush3.bf16.msra.mxu1 %v10358_v37 }
 0x329   : > { %9291 = vmatprep.subr.bf16.mxu1 %v10359_v39 }
 0x32c   : > { %9292 = vmatpush3.bf16.msra.mxu1 %v10359_v39 }
 0x32d   : > { %9325 = vmatprep.subr.bf16.mxu1 %v10360_v22 }
 0x32f   : > { %9262 = vmatmul.mubr.msk.bf16.gmra.mrb[8].mxu1 %vm14029_vm14, %v11040_v8 }
 0x330   : > { %9265 = vmatprep.mubr.msk.bf16.mxu1 %vm14029_vm14, %v11057_v20 }
 0x337   : > { %9266 = vmatmul.mubr.msk.bf16.gmra.mrb[12].mxu1 %vm14029_vm14, %v11055_v17 }
 0x338   : > { %9269 = vmatprep.mubr.msk.bf16.mxu1 %vm14029_vm14, %v11072_v44 }
 0x33f   : > { %9270 = vmatmul.mubr.msk.bf16.gmra.mrb[16].mxu1 %vm14029_vm14, %v11070_v42 }
 0x340   : > { %9273 = vmatprep.mubr.msk.bf16.mxu1 %vm14029_vm14, %v11090_v63 }
 0x347   : > { %9274 = vmatmul.mubr.msk.bf16.gmra.mrb[20].mxu1 %vm14029_vm14, %v11088_v62 }
 0x348   : > { %9277 = vmatprep.mubr.msk.bf16.mxu1 %vm14029_vm14, %v11102_v53 }
 0x34f   : > { %9278 = vmatmul.mubr.msk.bf16.gmra.mrb[24].mxu1 %vm14029_vm14, %v11100_v11 }
 0x350   : > { %9281 = vmatprep.mubr.msk.bf16.mxu1 %vm14029_vm14, %v11114_v36 }
 0x357   : > { %9282 = vmatmul.mubr.msk.bf16.gmra.mrb[28].mxu1 %vm14029_vm14, %v11112_v29 }
 0x358   : > { %9285 = vmatprep.mubr.msk.bf16.mxu1 %vm14029_vm14, %v11128_v55 }
 0x35f   : > { %9286 = vmatmul.mubr.msk.bf16.gmra.mrb[32].mxu1 %vm14029_vm14, %v11126_v30 }
 0x360   : > { %9293 = vmatprep.mubr.msk.bf16.mxu1 %vm14029_vm14, %v11345_v56  ;;  %v11612_v56 = vsel %vm10476_vm2, %v11149_v43, 0  ;;  %v10364_v43 = vld [vmem:[%s13998_s3 + $0x80] sm:$0xff]  }
 0x367   : > { %9294 = vmatmul.mubr.msk.bf16.vlgmr.msra.gmra.mrb[4].mxu1 %vm14029_vm14, %v11353_v48 }
 0x368   : > { %9297 = vmatprep.mubr.msk.bf16.mxu1 %vm14029_vm14, %v11369_v51  ;;  %9326 = vmatpush3.bf16.msra.mxu1 %v10360_v22 }
 0x369   : > { %9327 = vmatprep.subr.bf16.mxu1 %v10361_v35 }
 0x36c   : > { %9328 = vmatpush3.bf16.msra.mxu1 %v10361_v35 }
 0x36d   : > { %9361 = vmatprep.subr.bf16.mxu1 %v10362_v10 }
 0x36f   : > { %9298 = vmatmul.mubr.msk.bf16.gmra.mrb[8].mxu1 %vm14029_vm14, %v11377_v4 }
 0x370   : > { %9301 = vmatprep.mubr.msk.bf16.mxu1 %vm14029_vm14, %v11389_v27 }
 0x377   : > { %9302 = vmatmul.mubr.msk.bf16.gmra.mrb[12].mxu1 %vm14029_vm14, %v11397_v58 }
 0x378   : > { %9305 = vmatprep.mubr.msk.bf16.mxu1 %vm14029_vm14, %v11409_v49 }
 0x37f   : > { %9306 = vmatmul.mubr.msk.bf16.gmra.mrb[16].mxu1 %vm14029_vm14, %v11417_v54 }
 0x380   : > { %9309 = vmatprep.mubr.msk.bf16.mxu1 %vm14029_vm14, %v11429_v12 }
 0x387   : > { %9310 = vmatmul.mubr.msk.bf16.gmra.mrb[20].mxu1 %vm14029_vm14, %v11437_v52 }
 0x388   : > { %9313 = vmatprep.mubr.msk.bf16.mxu1 %vm14029_vm14, %v11449_v57 }
 0x38f   : > { %9314 = vmatmul.mubr.msk.bf16.gmra.mrb[24].mxu1 %vm14029_vm14, %v11457_v23 }
 0x390   : > { %9317 = vmatprep.mubr.msk.bf16.mxu1 %vm14029_vm14, %v11469_v34 }
 0x397   : > { %9318 = vmatmul.mubr.msk.bf16.gmra.mrb[28].mxu1 %vm14029_vm14, %v11477_v59 }
 0x398   : > { %9321 = vmatprep.mubr.msk.bf16.mxu1 %vm14029_vm14, %v11485_v25 }
 0x39f   : > { %9322 = vmatmul.mubr.msk.bf16.gmra.mrb[32].mxu1 %vm14029_vm14, %v11612_v56 }
 0x3a0   : > { %9329 = vmatprep.mubr.msk.bf16.mxu1 %vm14029_vm14, %v11167_v7  ;;  %v10367_v7 = vld [vmem:[%s14000_s5 + $0x18] sm:$0xff]  }
 0x3a7   : > { %9330 = vmatmul.mubr.msk.bf16.vlgmr.msra.gmra.mrb[4].mxu1 %vm14029_vm14, %v11190_v19  ;;  %v10365_v19 = vld [vmem:[%s13998_s3 + $0x88] sm:$0xff]  }
 0x3a8   : > { %9333 = vmatprep.mubr.msk.bf16.mxu1 %vm14029_vm14, %v11198_v28  ;;  %9362 = vmatpush3.bf16.msra.mxu1 %v10362_v10 }
 0x3a9   : > { %9363 = vmatprep.subr.bf16.mxu1 %v10363_v15 }
 0x3ac   : > { %9364 = vmatpush3.bf16.msra.mxu1 %v10363_v15 }
 0x3ad   : > { %9397 = vmatprep.subr.bf16.mxu1 %v10364_v43 }
 0x3af   : > { %9334 = vmatmul.mubr.msk.bf16.gmra.mrb[8].mxu1 %vm14029_vm14, %v11214_v40 }
 0x3b0   : > { %9337 = vmatprep.mubr.msk.bf16.mxu1 %vm14029_vm14, %v11222_v47 }
 0x3b7   : > { %9338 = vmatmul.mubr.msk.bf16.gmra.mrb[12].mxu1 %vm14029_vm14, %v11238_v50  ;;  %v10369_v50 = vld [vmem:[%s14000_s5 + $0x8] sm:$0xff]  }
 0x3b8   : > { %9341 = vmatprep.mubr.msk.bf16.mxu1 %vm14029_vm14, %v11246_v6 }
 0x3bf   : > { %9342 = vmatmul.mubr.msk.bf16.gmra.mrb[16].mxu1 %vm14029_vm14, %v11262_v38 }
 0x3c0   : > { %9345 = vmatprep.mubr.msk.bf16.mxu1 %vm14029_vm14, %v11270_v18 }
 0x3c7   : > { %9346 = vmatmul.mubr.msk.bf16.gmra.mrb[20].mxu1 %vm14029_vm14, %v11286_v61  ;;  %v10366_v61 = vld [vmem:[%s14000_s5 + $0x10] sm:$0xff]  }
 0x3c8   : > { %9349 = vmatprep.mubr.msk.bf16.mxu1 %vm14029_vm14, %v11294_v41  ;;  %9433 = vmatprep.subr.bf16.mxu0 %v10366_v61 }
 0x3c9   : > { %9434 = vmatpush3.bf16.msra.mxu0 %v10366_v61 }
 0x3ca   : > { %9435 = vmatprep.subr.bf16.mxu0 %v10367_v7 }
 0x3cd   : > { %9436 = vmatpush3.bf16.msra.mxu0 %v10367_v7 }
 0x3cf   : > { %9350 = vmatmul.mubr.msk.bf16.gmra.mrb[24].mxu1 %vm14029_vm14, %v11309_v0 }
 0x3d0   : > { %9353 = vmatprep.mubr.msk.bf16.mxu1 %vm14029_vm14, %v11317_v31 }
 0x3d7   : > { %9354 = vmatmul.mubr.msk.bf16.gmra.mrb[28].mxu1 %vm14029_vm14, %v11326_v16 }
 0x3d8   : > { %9357 = vmatprep.mubr.msk.bf16.mxu1 %vm14029_vm14, %v11531_v32 }
 0x3df   : > { %9358 = vmatmul.mubr.msk.bf16.gmra.mrb[32].mxu1 %vm14029_vm14, %v10680_v46 }
 0x3e0   : > { %9365 = vmatprep.mubr.msk.bf16.mxu1 %vm14029_vm14, %v11015_v24  ;;  %v14179_v24 = vmov 0  }
 0x3e7   : > { %9366 = vmatmul.mubr.msk.bf16.vlgmr.msra.gmra.mrb[4].mxu1 %vm14029_vm14, %v11042_v21  ;;  %v11732_v21 = vld [vmem:[%s13999_s4] ss:$0 sm:$0xff] }
 0x3e8   : > { %9369 = vmatprep.mubr.msk.bf16.mxu1 %vm14029_vm14, %v11040_v8  ;;  %9398 = vmatpush3.bf16.msra.mxu1 %v10364_v43  ;;  %v10368_v8 = vld [vmem:[%s14000_s5] sm:$0xff]  }
 0x3e9   : > { %9399 = vmatprep.subr.bf16.mxu1 %v10365_v19  ;;  %9469 = vmatprep.subr.bf16.mxu0 %v10368_v8 }
 0x3ec   : > { %9400 = vmatpush3.bf16.msra.mxu1 %v10365_v19 }
 0x3ef   : > { %9370 = vmatmul.mubr.msk.bf16.gmra.mrb[8].mxu1 %vm14029_vm14, %v11057_v20 }
 0x3f0   : > { %9373 = vmatprep.mubr.msk.bf16.mxu1 %vm14029_vm14, %v11055_v17 }
 0x3f7   : > { %9374 = vmatmul.mubr.msk.bf16.gmra.mrb[12].mxu1 %vm14029_vm14, %v11072_v44 }
 0x3f8   : > { %9377 = vmatprep.mubr.msk.bf16.mxu1 %vm14029_vm14, %v11070_v42 }
 0x3ff   : > { %9378 = vmatmul.mubr.msk.bf16.gmra.mrb[16].mxu1 %vm14029_vm14, %v11090_v63 }
 0x400   : > { %9381 = vmatprep.mubr.msk.bf16.mxu1 %vm14029_vm14, %v11088_v62 }
 0x407   : > { %9382 = vmatmul.mubr.msk.bf16.gmra.mrb[20].mxu1 %vm14029_vm14, %v11102_v53 }
 0x408   : > { %9385 = vmatprep.mubr.msk.bf16.mxu1 %vm14029_vm14, %v11100_v11 }
 0x40f   : > { %9386 = vmatmul.mubr.msk.bf16.gmra.mrb[24].mxu1 %vm14029_vm14, %v11114_v36 }
 0x410   : > { %9389 = vmatprep.mubr.msk.bf16.mxu1 %vm14029_vm14, %v11112_v29 }
 0x417   : > { %9390 = vmatmul.mubr.msk.bf16.gmra.mrb[28].mxu1 %vm14029_vm14, %v11128_v55 }
 0x418   : > { %9393 = vmatprep.mubr.msk.bf16.mxu1 %vm14029_vm14, %v11126_v30 }
 0x41f   : > { %9394 = vmatmul.mubr.bf16.gmra.mrb[32].mxu1 %v14179_v24 }
 0x420   : > { %9401 = vmatprep.mubr.msk.bf16.mxu1 %vm14029_vm14, %v11353_v48  ;;  %v11756_v48 = vld [vmem:[%s14000_s5 + $0x20] sm:$0xff]  }
 0x427   : > { %9402 = vmatmul.mubr.msk.bf16.vlgmr.msra.gmra.mrb[4].mxu1 %vm14029_vm14, %v11369_v51 }
 0x428   : > { %9405 = vmatprep.mubr.msk.bf16.mxu1 %vm14029_vm14, %v11377_v4 }
 0x42f   : > { %9406 = vmatmul.mubr.msk.bf16.gmra.mrb[8].mxu1 %vm14029_vm14, %v11389_v27 }
 0x430   : > { %9409 = vmatprep.mubr.msk.bf16.mxu1 %vm14029_vm14, %v11397_v58 }
 0x437   : > { %9410 = vmatmul.mubr.msk.bf16.gmra.mrb[12].mxu1 %vm14029_vm14, %v11409_v49 }
 0x438   : > { %9413 = vmatprep.mubr.msk.bf16.mxu1 %vm14029_vm14, %v11417_v54 }
 0x43f   : > { %9414 = vmatmul.mubr.msk.bf16.gmra.mrb[16].mxu1 %vm14029_vm14, %v11429_v12 }
 0x440   : > { %9417 = vmatprep.mubr.msk.bf16.mxu1 %vm14029_vm14, %v11437_v52 }
 0x447   : > { %9418 = vmatmul.mubr.msk.bf16.gmra.mrb[20].mxu1 %vm14029_vm14, %v11449_v57 }
 0x448   : > { %9421 = vmatprep.mubr.msk.bf16.mxu1 %vm14029_vm14, %v11457_v23 }
 0x44f   : > { %9422 = vmatmul.mubr.msk.bf16.gmra.mrb[24].mxu1 %vm14029_vm14, %v11469_v34 }
 0x450   : > { %9425 = vmatprep.mubr.msk.bf16.mxu1 %vm14029_vm14, %v11477_v59 }
 0x457   : > { %9426 = vmatmul.mubr.msk.bf16.gmra.mrb[28].mxu1 %vm14029_vm14, %v11485_v25 }
 0x458   : > { %9429 = vmatprep.mubr.msk.bf16.mxu1 %vm14029_vm14, %v11612_v56 }
 0x45f   : > { %9430 = vmatmul.mubr.msk.bf16.gmra.mrb[32].mxu1 %vm14029_vm14, %v10483_v3 }
 0x4fa   : > { %v9403_v17 = vpop.f32.mrb[4].mxu1 }
 0x4fb   : > { %v3721_v20 = vadd.f32 %v9403_v17, %v11732_v21  ;;  %v3553_v42 = vpop.f32.mrb[5].mxu1 }
 0x4fc   : > { %v3719_v44 = vadd.f32 %v11732_v21, %v3553_v42  ;;  %v9404_v62 = vpop.f32.mrb[6].mxu1 }
 0x4fd   : > { %v3722_v63 = vadd.f32 %v9404_v62, %v11732_v21  ;;  %v3556_v11 = vpop.f32.mrb[7].mxu1  ;;  %v3753_v29 = vmax.f32 %v3721_v20, 0.0 }
 0x4fe   : > { %v3720_v53 = vadd.f32 %v11732_v21, %v3556_v11  ;;  %v3751_v30 = vmax.f32 %v3719_v44, 0.0 }
 0x4ff   : > { %v3754_v36 = vmax.f32 %v3722_v63, 0.0 }
 0x500   : > { %v3752_v55 = vmax.f32 %v3720_v53, 0.0 }
 0x501   : > { %v11738_v28 = vpack.c.bf16 %v3754_v36, %v3753_v29 }
 0x502   : > { %v11740_v40 = vpack.c.bf16 %v3752_v55, %v3751_v30  ;;  %v9407_v47 = vpop.f32.mrb[8].mxu1 }
 0x503   : > { %v3725_v6 = vadd.f32 %v9407_v47, %v11732_v21  ;;  %v3569_v38 = vpop.f32.mrb[9].mxu1 }
 0x504   : > { %v3723_v18 = vadd.f32 %v11732_v21, %v3569_v38  ;;  %v9408_v31 = vpop.f32.mrb[10].mxu1  ;;  %9438 = vmatmul.mubr.msk.bf16.vlgmr.msra.gmra.mrb[28].mxu0 %vm14029_vm14, %v11740_v40 }
 0x505   : > { %v3726_v41 = vadd.f32 %v9408_v31, %v11732_v21  ;;  %v3572_v0 = vpop.f32.mrb[11].mxu1  ;;  %9441 = vmatprep.mubr.msk.bf16.mxu0 %vm14029_vm14, %v11738_v28  ;;  %9470 = vmatpush3.bf16.msra.mxu0 %v10368_v8  ;;  %v3757_v51 = vmax.f32 %v3725_v6, 0.0 }
 0x506   : > { %v3724_v16 = vadd.f32 %v11732_v21, %v3572_v0  ;;  %9471 = vmatprep.subr.bf16.mxu0 %v10369_v50  ;;  %v3755_v27 = vmax.f32 %v3723_v18, 0.0 }
 0x507   : > { %v3758_v4 = vmax.f32 %v3726_v41, 0.0 }
 0x508   : > { %v3756_v58 = vmax.f32 %v3724_v16, 0.0 }
 0x509   : > { %v11758_v49 = vpack.c.bf16 %v3758_v4, %v3757_v51  ;;  %9472 = vmatpush3.bf16.msra.mxu0 %v10369_v50 }
 0x50a   : > { %v11760_v54 = vpack.c.bf16 %v3756_v58, %v3755_v27  ;;  %v9411_v12 = vpop.f32.mrb[12].mxu1  ;;  %9505 = vmatprep.subr.bf16.mxu0 %v11756_v48 }
 0x50b   : > { %v3729_v52 = vadd.f32 %v9411_v12, %v11732_v21  ;;  %v3585_v57 = vpop.f32.mrb[13].mxu1 }
 0x50c   : > { %v3727_v23 = vadd.f32 %v11732_v21, %v3585_v57  ;;  %v9412_v34 = vpop.f32.mrb[14].mxu1  ;;  %9442 = vmatmul.mubr.msk.bf16.gmra.mrb[32].mxu0 %vm14029_vm14, %v11760_v54 }
 0x50d   : > { %v3730_v26 = vadd.f32 %v9412_v34, %v11732_v21  ;;  %v3588_v59 = vpop.f32.mrb[15].mxu1  ;;  %9445 = vmatprep.mubr.msk.bf16.mxu0 %vm14029_vm14, %v11758_v49  ;;  %v3761_v5 = vmax.f32 %v3729_v52, 0.0 }
 0x50e   : > { %v3728_v60 = vadd.f32 %v11732_v21, %v3588_v59  ;;  %v3759_v1 = vmax.f32 %v3727_v23, 0.0 }
 0x50f   : > { %v3762_v25 = vmax.f32 %v3730_v26, 0.0 }
 0x510   : > { %v3760_v37 = vmax.f32 %v3728_v60, 0.0 }
 0x511   : > { %v11771_v9 = vpack.c.bf16 %v3762_v25, %v3761_v5 }
 0x512   : > { %v11773_v14 = vpack.c.bf16 %v3760_v37, %v3759_v1  ;;  %v9415_v45 = vpop.f32.mrb[16].mxu1 }
 0x513   : > { %v3733_v33 = vadd.f32 %v9415_v45, %v11732_v21  ;;  %v3601_v32 = vpop.f32.mrb[17].mxu1 }
 0x514   : > { %v3731_v39 = vadd.f32 %v11732_v21, %v3601_v32  ;;  %v9416_v22 = vpop.f32.mrb[18].mxu1  ;;  %9446 = vmatmul.mubr.msk.bf16.gmra.mrb[36].mxu0 %vm14029_vm14, %v11773_v14 }
 0x515   : > { %v3734_v35 = vadd.f32 %v9416_v22, %v11732_v21  ;;  %v3604_v10 = vpop.f32.mrb[19].mxu1  ;;  %9449 = vmatprep.mubr.msk.bf16.mxu0 %vm14029_vm14, %v11771_v9  ;;  %v3765_v15 = vmax.f32 %v3733_v33, 0.0 }
 0x516   : > { %v3732_v56 = vadd.f32 %v11732_v21, %v3604_v10  ;;  %v3763_v61 = vmax.f32 %v3731_v39, 0.0 }
 0x517   : > { %v3766_v43 = vmax.f32 %v3734_v35, 0.0 }
 0x518   : > { %v3764_v7 = vmax.f32 %v3732_v56, 0.0 }
 0x519   : > { %v11783_v19 = vpack.c.bf16 %v3766_v43, %v3765_v15 }
 0x51a   : > { %v11785_v8 = vpack.c.bf16 %v3764_v7, %v3763_v61  ;;  %v9419_v17 = vpop.f32.mrb[20].mxu1 }
 0x51b   : > { %v3737_v20 = vadd.f32 %v9419_v17, %v11732_v21  ;;  %v3617_v42 = vpop.f32.mrb[21].mxu1 }
 0x51c   : > { %v3735_v44 = vadd.f32 %v11732_v21, %v3617_v42  ;;  %v9420_v62 = vpop.f32.mrb[22].mxu1  ;;  %9450 = vmatmul.mubr.msk.bf16.gmra.mrb[40].mxu0 %vm14029_vm14, %v11785_v8 }
 0x51d   : > { %v3738_v63 = vadd.f32 %v9420_v62, %v11732_v21  ;;  %v3620_v11 = vpop.f32.mrb[23].mxu1  ;;  %9453 = vmatprep.mubr.msk.bf16.mxu0 %vm14029_vm14, %v11783_v19  ;;  %v3769_v29 = vmax.f32 %v3737_v20, 0.0  ;;  %v3800_v20 = vshrl.u32 %v11740_v40, 16 }
 0x51e   : > { %v3736_v53 = vadd.f32 %v11732_v21, %v3620_v11  ;;  %v3767_v30 = vmax.f32 %v3735_v44, 0.0  ;;  %v3807_v11 = vshrl.u32 %v11738_v28, 16 }
 0x51f   : > { %v3770_v36 = vmax.f32 %v3738_v63, 0.0 }
 0x520   : > { %v3768_v55 = vmax.f32 %v3736_v53, 0.0 }
 0x521   : > { %v11795_v47 = vpack.c.bf16 %v3770_v36, %v3769_v29  ;;  %v3802_v36 = vrot.slane %v3800_v20, 7 }
 0x522   : > { %v11797_v50 = vpack.c.bf16 %v3768_v55, %v3767_v30  ;;  %v9423_v6 = vpop.f32.mrb[24].mxu1  ;;  %v3803_v55 = vshll.u32 %v11740_v40, 16 }
 0x523   : > { %v3741_v38 = vadd.f32 %v9423_v6, %v11732_v21  ;;  %v3633_v18 = vpop.f32.mrb[25].mxu1 }
 0x524   : > { %v3739_v31 = vadd.f32 %v11732_v21, %v3633_v18  ;;  %v9424_v41 = vpop.f32.mrb[26].mxu1  ;;  %9454 = vmatmul.mubr.msk.bf16.gmra.mrb[44].mxu0 %vm14029_vm14, %v11797_v50  ;;  %v3810_v18 = vshll.u32 %v11738_v28, 16 }
 0x525   : > { %v3742_v0 = vadd.f32 %v9424_v41, %v11732_v21  ;;  %v3636_v16 = vpop.f32.mrb[27].mxu1  ;;  %9457 = vmatprep.mubr.msk.bf16.mxu0 %vm14029_vm14, %v11795_v47  ;;  %v3773_v4 = vmax.f32 %v3741_v38, 0.0  ;;  %v3814_v41 = vshrl.u32 %v11760_v54, 16 }
 0x526   : > { %v3740_v51 = vadd.f32 %v11732_v21, %v3636_v16  ;;  %v3771_v58 = vmax.f32 %v3739_v31, 0.0  ;;  %v3805_v31 = vor.u32 %v3803_v55, %v3802_v36  ;;  %v3856_v36 = vshrl.u32 %v11797_v50, 16 }
 0x527   : > { %v3774_v27 = vmax.f32 %v3742_v0, 0.0 }
 0x528   : > { %v3772_v12 = vmax.f32 %v3740_v51, 0.0  ;;  %v3821_v51 = vshrl.u32 %v11758_v49, 16 }
 0x529   : > { %v11807_v52 = vpack.c.bf16 %v3774_v27, %v3773_v4  ;;  %v10371_v4 = vld [vmem:[%s14000_s5 + $0x28] sm:$0xff]   ;;  %v11866_v27 = vsel %vm10510_vm5, 0, %v3805_v31 }
 0x52a   : > { %v11809_v57 = vpack.c.bf16 %v3772_v12, %v3771_v58  ;;  %v9427_v23 = vpop.f32.mrb[28].mxu1  ;;  %v3816_v58 = vrot.slane %v3814_v41, 7 }
 0x52b   : > { %v3745_v34 = vadd.f32 %v9427_v23, %v11732_v21  ;;  %v3649_v26 = vpop.f32.mrb[29].mxu1  ;;  %v3823_v23 = vrot.slane %v3821_v51, 7 }
 0x52c   : > { %v3743_v59 = vadd.f32 %v11732_v21, %v3649_v26  ;;  %v9428_v60 = vpop.f32.mrb[30].mxu1  ;;  %9458 = vmatmul.mubr.msk.bf16.gmra.mrb[48].mxu0 %vm14029_vm14, %v11809_v57  ;;  %v3824_v26 = vshll.u32 %v11758_v49, 16 }
 0x52d   : > { %v3746_v5 = vadd.f32 %v9428_v60, %v11732_v21  ;;  %v3652_v25 = vpop.f32.mrb[31].mxu1  ;;  %9461 = vmatprep.mubr.msk.bf16.mxu0 %vm14029_vm14, %v11807_v52  ;;  %v3777_v37 = vmax.f32 %v3745_v34, 0.0  ;;  %v3817_v34 = vshll.u32 %v11760_v54, 16 }
 0x52e   : > { %v3744_v1 = vadd.f32 %v11732_v21, %v3652_v25  ;;  %v3775_v33 = vmax.f32 %v3743_v59, 0.0  ;;  %v11886_v59 = vld [vmem:[%s14000_s5 + $0x30] sm:$0xff]   ;;  %v3826_v25 = vor.u32 %v3824_v26, %v3823_v23  ;;  %v3859_v23 = vshll.u32 %v11797_v50, 16 }
 0x52f   : > { %v3778_v45 = vmax.f32 %v3746_v5, 0.0  ;;  %v3819_v60 = vor.u32 %v3817_v34, %v3816_v58  ;;  %v3828_v5 = vshrl.u32 %v11773_v14, 16 }
 0x530   : > { %v3776_v32 = vmax.f32 %v3744_v1, 0.0 }
 0x531   : > { %v11819_v39 = vpack.c.bf16 %v3778_v45, %v3777_v37  ;;  %v11897_v1 = vsel %vm10510_vm5, 0, %v3819_v60  ;;  %v3830_v37 = vrot.slane %v3828_v5, 7  ;;  %v11905_v45 = vsel %vm10510_vm5, 0, %v3826_v25 }
 0x532   : > { %v11821_v22 = vpack.c.bf16 %v3776_v32, %v3775_v33  ;;  %v9431_v35 = vpop.f32.mrb[32].mxu1  ;;  %v3831_v32 = vshll.u32 %v11773_v14, 16  ;;  %v3866_v60 = vshll.u32 %v11795_v47, 16 }
 0x533   : > { %v3749_v10 = vadd.f32 %v9431_v35, %v11732_v21  ;;  %v3665_v56 = vpop.f32.mrb[33].mxu1  ;;  %v3838_v35 = vshll.u32 %v11771_v9, 16 }
 0x534   : > { %v3747_v15 = vadd.f32 %v11732_v21, %v3665_v56  ;;  %v9432_v43 = vpop.f32.mrb[34].mxu1  ;;  %9462 = vmatmul.mubr.msk.bf16.gmra.mrb[52].mxu0 %vm14029_vm14, %v11821_v22  ;;  %v3842_v56 = vshrl.u32 %v11785_v8, 16 }
 0x535   : > { %v3750_v61 = vadd.f32 %v9432_v43, %v11732_v21  ;;  %v3668_v7 = vpop.f32.mrb[35].mxu1  ;;  %9465 = vmatprep.mubr.msk.bf16.mxu0 %vm14029_vm14, %v11819_v39  ;;  %v3781_v42 = vmax.f32 %v3749_v10, 0.0  ;;  %v3833_v10 = vor.u32 %v3831_v32, %v3830_v37  ;;  %v3849_v43 = vshrl.u32 %v11783_v19, 16 }
 0x536   : > { %v3748_v17 = vadd.f32 %v11732_v21, %v3668_v7  ;;  %v3779_v62 = vmax.f32 %v3747_v15, 0.0  ;;  %v3809_v21 = vrot.slane %v3807_v11, 7  ;;  %v3844_v7 = vrot.slane %v3842_v56, 7 }
 0x537   : > { %v3782_v44 = vmax.f32 %v3750_v61, 0.0  ;;  %v11921_v61 = vsel %vm10510_vm5, 0, %v3833_v10  ;;  %v14021_v37 = vshrl.u32 %v11809_v57, 16  ;;  %v14020_v10 = vshrl.u32 %v11807_v52, 16 }
 0x538   : > { %v3780_v63 = vmax.f32 %v3748_v17, 0.0  ;;  %v3812_v16 = vor.u32 %v3810_v18, %v3809_v21 }
 0x539   : > { %v11833_v53 = vpack.c.bf16 %v3782_v44, %v3781_v42  ;;  %v3851_v42 = vrot.slane %v3849_v43, 7  ;;  %v3845_v44 = vshll.u32 %v11785_v8, 16 }
 0x53a   : > { %v11835_v29 = vpack.c.bf16 %v3780_v63, %v3779_v62  ;;  %v11874_v12 = vsel %vm10510_vm5, 0, %v3812_v16  ;;  %v3852_v62 = vshll.u32 %v11783_v19, 16  ;;  %v3858_v16 = vrot.slane %v3856_v36, 7 }
 0x53b   : > { %v14018_v30 = vshll.u32 %v11833_v53, 16  ;;  %v14019_v6 = vshrl.u32 %v11833_v53, 16  ;;  %v3847_v63 = vor.u32 %v3845_v44, %v3844_v7  ;;  %v3872_v7 = vrot.slane %v14021_v37, 7 }
 0x53c   : > { %9466 = vmatmul.mubr.msk.bf16.gmra.mrb[56].mxu0 %vm14029_vm14, %v11835_v29  ;;  %v3854_v21 = vor.u32 %v3852_v62, %v3851_v42  ;;  %v3861_v25 = vor.u32 %v3859_v23, %v3858_v16  ;;  %v14023_v16 = vshll.u32 %v11807_v52, 16 }
 0x53d   : > { %9473 = vmatprep.mubr.msk.bf16.mxu0 %vm14029_vm14, %v10680_v46  ;;  %v3973_v38 = vrot.slane %v14018_v30, 1  ;;  %v11945_v31 = vsel %vm10510_vm5, 0, %v3847_v63  ;;  %v3879_v63 = vrot.slane %v14020_v10, 7 }
 0x53f   : > { %v11856_v0 = vor.u32 %v3973_v38, %v14019_v6  ;;  %v14026_v38 = vshrl.u32 %v11795_v47, 16  ;;  %v3882_v30 = vor.u32 %v14023_v16, %v3879_v63  ;;  %v3887_v63 = vshll.u32 %v11821_v22, 16 }
 0x540   : > { %v14027_v16 = vshrl.u32 %v11835_v29, 16 }
 0x541   : > { %v3865_v58 = vrot.slane %v14026_v38, 7 }
 0x544   : > { %9474 = vmatmul.mubr.msk.bf16.vlgmr.msra.gmra.mrb[28].mxu0 %vm14029_vm14, %v11866_v27 }
 0x545   : > { %9477 = vmatprep.mubr.msk.bf16.mxu0 %vm14029_vm14, %v11874_v12  ;;  %9506 = vmatpush3.bf16.msra.mxu0 %v11756_v48  ;;  %v3835_v48 = vshrl.u32 %v11771_v9, 16 }
 0x546   : > { %9507 = vmatprep.subr.bf16.mxu0 %v10371_v4 }
 0x547   : > { %v3837_v33 = vrot.slane %v3835_v48, 7 }
 0x549   : > { %9508 = vmatpush3.bf16.msra.mxu0 %v10371_v4  ;;  %v3840_v15 = vor.u32 %v3838_v35, %v3837_v33  ;;  %v11953_v4 = vsel %vm10510_vm5, 0, %v3854_v21  ;;  %v3868_v33 = vor.u32 %v3866_v60, %v3865_v58  ;;  %v14024_v21 = vshll.u32 %v11809_v57, 16 }
 0x54a   : > { %9541 = vmatprep.subr.bf16.mxu0 %v11886_v59 }
 0x54b   : > { %v11929_v17 = vsel %vm10510_vm5, 0, %v3840_v15  ;;  %v11969_v15 = vsel %vm10510_vm5, 0, %v3861_v25  ;;  %v11977_v42 = vsel %vm10510_vm5, 0, %v3868_v33  ;;  %v3875_v58 = vor.u32 %v14024_v21, %v3872_v7 }
 0x54c   : > { %9478 = vmatmul.mubr.msk.bf16.gmra.mrb[32].mxu0 %vm14029_vm14, %v11897_v1  ;;  %v14022_v25 = vshrl.u32 %v11821_v22, 16  ;;  %v14025_v33 = vshrl.u32 %v11819_v39, 16  ;;  %v12001_v7 = vsel %vm10510_vm5, 0, %v3882_v30 }
 0x54d   : > { %9481 = vmatprep.mubr.msk.bf16.mxu0 %vm14029_vm14, %v11905_v45  ;;  %v11993_v6 = vsel %vm10510_vm5, 0, %v3875_v58  ;;  %v14028_v58 = vshll.u32 %v11819_v39, 16 }
 0x54e   : > { %v3886_v10 = vrot.slane %v14022_v25, 7  ;;  %v3893_v37 = vrot.slane %v14025_v33, 7  ;;  %v3900_v33 = vrot.slane %v14027_v16, 7  ;;  %v3943_v16 = vrot.slane %v3803_v55, 1 }
 0x550   : > { %v3889_v25 = vor.u32 %v3887_v63, %v3886_v10  ;;  %v3896_v21 = vor.u32 %v14028_v58, %v3893_v37  ;;  %v3901_v10 = vshll.u32 %v11835_v29, 16  ;;  %v3944_v58 = vor.u32 %v3943_v16, %v3800_v20 }
 0x552   : > { %v12016_v30 = vsel %vm10510_vm5, 0, %v3889_v25  ;;  %v12024_v38 = vsel %vm10510_vm5, 0, %v3896_v21  ;;  %v3903_v37 = vor.u32 %v3901_v10, %v3900_v33  ;;  %v3945_v21 = vrot.slane %v3810_v18, 1 }
 0x553   : > { %v12052_v55 = vsel %vm10476_vm2, %v3944_v58, 0  ;;  %v3947_v18 = vrot.slane %v3817_v34, 1  ;;  %v10374_v34 = vld [vmem:[%s14000_s5 + $0x40] sm:$0xff]  }
 0x554   : > { %9482 = vmatmul.mubr.msk.bf16.gmra.mrb[36].mxu0 %vm14029_vm14, %v11921_v61  ;;  %v12033_v25 = vsel %vm10510_vm5, 0, %v3903_v37  ;;  %v3946_v33 = vor.u32 %v3945_v21, %v3807_v11  ;;  %v10373_v37 = vld [vmem:[%s14000_s5 + $0x38] sm:$0xff]   ;;  %v3949_v11 = vrot.slane %v3824_v26, 1 }
 0x555   : > { %9485 = vmatprep.mubr.msk.bf16.mxu0 %vm14029_vm14, %v11929_v17  ;;  %v3948_v16 = vor.u32 %v3947_v18, %v3814_v41  ;;  %v3953_v41 = vrot.slane %v3838_v35, 1 }
 0x556   : > { %v12060_v20 = vsel %vm10476_vm2, %v3946_v33, 0  ;;  %v3950_v58 = vor.u32 %v3949_v11, %v3821_v51  ;;  %v3959_v11 = vrot.slane %v3859_v23, 1 }
 0x557   : > { %v12076_v26 = vsel %vm10476_vm2, %v3948_v16, 0  ;;  %v3954_v33 = vor.u32 %v3953_v41, %v3835_v48  ;;  %v14180_v16 = vshrl.u32 %v11795_v47, 16 }
 0x558   : > { %v12084_v21 = vsel %vm10476_vm2, %v3950_v58, 0 }
 0x559   : > { %v12104_v35 = vsel %vm10476_vm2, %v3954_v33, 0  ;;  %v14183_v33 = vshrl.u32 %v11809_v57, 16 }
 0x55c   : > { %9486 = vmatmul.mubr.msk.bf16.gmra.mrb[40].mxu0 %vm14029_vm14, %v11945_v31 }
 0x55d   : > { %9489 = vmatprep.mubr.msk.bf16.mxu0 %vm14029_vm14, %v11953_v4 }
 0x564   : > { %9490 = vmatmul.mubr.msk.bf16.gmra.mrb[44].mxu0 %vm14029_vm14, %v11969_v15 }
 0x565   : > { %9493 = vmatprep.mubr.msk.bf16.mxu0 %vm14029_vm14, %v11977_v42 }
 0x56c   : > { %9494 = vmatmul.mubr.msk.bf16.gmra.mrb[48].mxu0 %vm14029_vm14, %v11993_v6 }
 0x56d   : > { %9497 = vmatprep.mubr.msk.bf16.mxu0 %vm14029_vm14, %v12001_v7 }
 0x574   : > { %9498 = vmatmul.mubr.msk.bf16.gmra.mrb[52].mxu0 %vm14029_vm14, %v12016_v30 }
 0x575   : > { %9501 = vmatprep.mubr.msk.bf16.mxu0 %vm14029_vm14, %v12024_v38 }
 0x57c   : > { %9502 = vmatmul.mubr.msk.bf16.gmra.mrb[56].mxu0 %vm14029_vm14, %v12033_v25 }
 0x57d   : > { %9509 = vmatprep.mubr.msk.bf16.mxu0 %vm14029_vm14, %v10483_v3 }
 0x584   : > { %9510 = vmatmul.mubr.msk.bf16.vlgmr.msra.gmra.mrb[28].mxu0 %vm14029_vm14, %v12052_v55 }
 0x585   : > { %9513 = vmatprep.mubr.msk.bf16.mxu0 %vm14029_vm14, %v12060_v20  ;;  %9542 = vmatpush3.bf16.msra.mxu0 %v11886_v59  ;;  %v3951_v59 = vrot.slane %v3831_v32, 1 }
 0x586   : > { %9543 = vmatprep.subr.bf16.mxu0 %v10373_v37 }
 0x587   : > { %v3952_v51 = vor.u32 %v3951_v59, %v3828_v5  ;;  %v3957_v5 = vrot.slane %v3852_v62, 1  ;;  %v14181_v59 = vshll.u32 %v11809_v57, 16 }
 0x589   : > { %9544 = vmatpush3.bf16.msra.mxu0 %v10373_v37  ;;  %v12096_v32 = vsel %vm10476_vm2, %v3952_v51, 0  ;;  %v3955_v37 = vrot.slane %v3845_v44, 1  ;;  %v3958_v18 = vor.u32 %v3957_v5, %v3849_v43  ;;  %v3960_v43 = vor.u32 %v3959_v11, %v3856_v36 }
 0x58a   : > { %9577 = vmatprep.subr.bf16.mxu0 %v10374_v34  ;;  %v3963_v41 = vrot.slane %v14181_v59, 1  ;;  %v14182_v51 = vshll.u32 %v11807_v52, 16  ;;  %v14184_v5 = vshrl.u32 %v11807_v52, 16  ;;  %v3967_v11 = vrot.slane %v3887_v63, 1 }
 0x58b   : > { %v3956_v48 = vor.u32 %v3955_v37, %v3842_v56  ;;  %v12124_v62 = vsel %vm10476_vm2, %v3958_v18, 0  ;;  %v3961_v56 = vrot.slane %v3866_v60, 1  ;;  %v12136_v23 = vsel %vm10476_vm2, %v3960_v43, 0 }
 0x58c   : > { %9514 = vmatmul.mubr.msk.bf16.gmra.mrb[32].mxu0 %vm14029_vm14, %v12076_v26  ;;  %v3965_v36 = vrot.slane %v14182_v51, 1  ;;  %v3964_v37 = vor.u32 %v3963_v41, %v14183_v33  ;;  %v14185_v43 = vshll.u32 %v11819_v39, 16  ;;  %v14187_v41 = vshrl.u32 %v11819_v39, 16 }
 0x58d   : > { %9517 = vmatprep.mubr.msk.bf16.mxu0 %vm14029_vm14, %v12084_v21  ;;  %v12116_v44 = vsel %vm10476_vm2, %v3956_v48, 0  ;;  %v3962_v58 = vor.u32 %v3961_v56, %v14180_v16 }
 0x58e   : > { %v3966_v48 = vor.u32 %v3965_v36, %v14184_v5  ;;  %v12156_v18 = vsel %vm10476_vm2, %v3964_v37, 0  ;;  %v3969_v16 = vrot.slane %v14185_v43, 1  ;;  %v3971_v36 = vrot.slane %v3901_v10, 1  ;;  %v10375_v10 = vld [vmem:[%s14000_s5 + $0x48] sm:$0xff]  }
 0x58f   : > { %v12144_v60 = vsel %vm10476_vm2, %v3962_v58, 0  ;;  %v14186_v58 = vshrl.u32 %v11821_v22, 16  ;;  %v14188_v37 = vshrl.u32 %v11835_v29, 16  ;;  %v14190_v43 = vshll.u32 %v11833_v53, 16 }
 0x590   : > { %v12164_v56 = vsel %vm10476_vm2, %v3966_v48, 0  ;;  %v3970_v51 = vor.u32 %v3969_v16, %v14187_v41  ;;  %v10380_v41 = vld [vmem:[%s14000_s5 + $0x70] sm:$0xff]  }
 0x591   : > { %v3968_v59 = vor.u32 %v3967_v11, %v14186_v58  ;;  %v3972_v5 = vor.u32 %v3971_v36, %v14188_v37  ;;  %v10376_v11 = vld [vmem:[%s14000_s5 + $0x50] sm:$0xff]  }
 0x592   : > { %v12184_v33 = vsel %vm10476_vm2, %v3970_v51, 0  ;;  %v10381_v51 = vld [vmem:[%s14000_s5 + $0x78] sm:$0xff]  }
 0x593   : > { %v12176_v63 = vsel %vm10476_vm2, %v3968_v59, 0  ;;  %v12192_v48 = vsel %vm10476_vm2, %v3972_v5, 0  ;;  %v10377_v59 = vld [vmem:[%s14000_s5 + $0x58] sm:$0xff]  }
 0x594   : > { %9518 = vmatmul.mubr.msk.bf16.gmra.mrb[36].mxu0 %vm14029_vm14, %v12096_v32 }
 0x595   : > { %9521 = vmatprep.mubr.msk.bf16.mxu0 %vm14029_vm14, %v12104_v35 }
 0x59c   : > { %9522 = vmatmul.mubr.msk.bf16.gmra.mrb[40].mxu0 %vm14029_vm14, %v12116_v44 }
 0x59d   : > { %9525 = vmatprep.mubr.msk.bf16.mxu0 %vm14029_vm14, %v12124_v62 }
 0x5a4   : > { %9526 = vmatmul.mubr.msk.bf16.gmra.mrb[44].mxu0 %vm14029_vm14, %v12136_v23 }
 0x5a5   : > { %9529 = vmatprep.mubr.msk.bf16.mxu0 %vm14029_vm14, %v12144_v60 }
 0x5ac   : > { %9530 = vmatmul.mubr.msk.bf16.gmra.mrb[48].mxu0 %vm14029_vm14, %v12156_v18 }
 0x5ad   : > { %9533 = vmatprep.mubr.msk.bf16.mxu0 %vm14029_vm14, %v12164_v56 }
 0x5b4   : > { %9534 = vmatmul.mubr.msk.bf16.gmra.mrb[52].mxu0 %vm14029_vm14, %v12176_v63 }
 0x5b5   : > { %9537 = vmatprep.mubr.msk.bf16.mxu0 %vm14029_vm14, %v12184_v33 }
 0x5bc   : > { %9538 = vmatmul.mubr.msk.bf16.gmra.mrb[56].mxu0 %vm14029_vm14, %v12192_v48 }
 0x5bd   : > { %9545 = vmatprep.mubr.msk.bf16.mxu0 %vm14029_vm14, %v11866_v27  ;;  %v14189_v27 = vshrl.u32 %v11833_v53, 16 }
 0x5c4   : > { %9546 = vmatmul.mubr.msk.bf16.vlgmr.msra.gmra.mrb[28].mxu0 %vm14029_vm14, %v11874_v12 }
 0x5c5   : > { %9549 = vmatprep.mubr.msk.bf16.mxu0 %vm14029_vm14, %v11897_v1  ;;  %9578 = vmatpush3.bf16.msra.mxu0 %v10374_v34  ;;  %v3907_v34 = vrot.slane %v14189_v27, 7 }
 0x5c6   : > { %9579 = vmatprep.subr.bf16.mxu0 %v10375_v10 }
 0x5c7   : > { %v3910_v16 = vor.u32 %v14190_v43, %v3907_v34 }
 0x5c9   : > { %9580 = vmatpush3.bf16.msra.mxu0 %v10375_v10  ;;  %v12238_v58 = vsel %vm10510_vm5, 0, %v3910_v16  ;;  %vm6260_vm5 = vcmask 122880  }
 0x5ca   : > { %9613 = vmatprep.subr.bf16.mxu0 %v10376_v11  ;;  %vm12636_vm7 = vmand %vm6260_vm5, %vm610_vm3 }
 0x5cc   : > { %9550 = vmatmul.mubr.msk.bf16.gmra.mrb[32].mxu0 %vm14029_vm14, %v11905_v45 }
 0x5cd   : > { %9553 = vmatprep.mubr.msk.bf16.mxu0 %vm14029_vm14, %v11921_v61 }
 0x5d4   : > { %9554 = vmatmul.mubr.msk.bf16.gmra.mrb[36].mxu0 %vm14029_vm14, %v11929_v17 }
 0x5d5   : > { %9557 = vmatprep.mubr.msk.bf16.mxu0 %vm14029_vm14, %v11945_v31 }
 0x5dc   : > { %9558 = vmatmul.mubr.msk.bf16.gmra.mrb[40].mxu0 %vm14029_vm14, %v11953_v4 }
 0x5dd   : > { %9561 = vmatprep.mubr.msk.bf16.mxu0 %vm14029_vm14, %v11969_v15 }
 0x5e4   : > { %9562 = vmatmul.mubr.msk.bf16.gmra.mrb[44].mxu0 %vm14029_vm14, %v11977_v42 }
 0x5e5   : > { %9565 = vmatprep.mubr.msk.bf16.mxu0 %vm14029_vm14, %v11993_v6 }
 0x5ec   : > { %9566 = vmatmul.mubr.msk.bf16.gmra.mrb[48].mxu0 %vm14029_vm14, %v12001_v7 }
 0x5ed   : > { %9569 = vmatprep.mubr.msk.bf16.mxu0 %vm14029_vm14, %v12016_v30 }
 0x5f4   : > { %9570 = vmatmul.mubr.msk.bf16.gmra.mrb[52].mxu0 %vm14029_vm14, %v12024_v38 }
 0x5f5   : > { %9573 = vmatprep.mubr.msk.bf16.mxu0 %vm14029_vm14, %v12033_v25 }
 0x5fc   : > { %9574 = vmatmul.mubr.msk.bf16.gmra.mrb[56].mxu0 %vm14029_vm14, %v12238_v58 }
 0x5fd   : > { %9581 = vmatprep.mubr.msk.bf16.mxu0 %vm14029_vm14, %v11740_v40  ;;  %v10379_v40 = vld [vmem:[%s14000_s5 + $0x68] sm:$0xff]  }
 0x604   : > { %9582 = vmatmul.mubr.msk.bf16.vlgmr.msra.gmra.mrb[28].mxu0 %vm14029_vm14, %v11738_v28 }
 0x605   : > { %9585 = vmatprep.mubr.msk.bf16.mxu0 %vm14029_vm14, %v11760_v54  ;;  %9614 = vmatpush3.bf16.msra.mxu0 %v10376_v11 }
 0x606   : > { %9615 = vmatprep.subr.bf16.mxu0 %v10377_v59 }
 0x609   : > { %9616 = vmatpush3.bf16.msra.mxu0 %v10377_v59 }
 0x60a   : > { %9649 = vmatprep.subr.bf16.mxu0 %v10378_v13 }
 0x60c   : > { %9586 = vmatmul.mubr.msk.bf16.gmra.mrb[32].mxu0 %vm14029_vm14, %v11758_v49 }
 0x60d   : > { %9589 = vmatprep.mubr.msk.bf16.mxu0 %vm14029_vm14, %v11773_v14 }
 0x614   : > { %9590 = vmatmul.mubr.msk.bf16.gmra.mrb[36].mxu0 %vm14029_vm14, %v11771_v9 }
 0x615   : > { %9593 = vmatprep.mubr.msk.bf16.mxu0 %vm14029_vm14, %v11785_v8 }
 0x61c   : > { %9594 = vmatmul.mubr.msk.bf16.gmra.mrb[40].mxu0 %vm14029_vm14, %v11783_v19 }
 0x61d   : > { %9597 = vmatprep.mubr.msk.bf16.mxu0 %vm14029_vm14, %v11797_v50 }
 0x624   : > { %9598 = vmatmul.mubr.msk.bf16.gmra.mrb[44].mxu0 %vm14029_vm14, %v11795_v47 }
 0x625   : > { %9601 = vmatprep.mubr.msk.bf16.mxu0 %vm14029_vm14, %v11809_v57 }
 0x62c   : > { %9602 = vmatmul.mubr.msk.bf16.gmra.mrb[48].mxu0 %vm14029_vm14, %v11807_v52 }
 0x62d   : > { %9605 = vmatprep.mubr.msk.bf16.mxu0 %vm14029_vm14, %v11821_v22 }
 0x634   : > { %9606 = vmatmul.mubr.msk.bf16.gmra.mrb[52].mxu0 %vm14029_vm14, %v11819_v39 }
 0x635   : > { %9609 = vmatprep.mubr.msk.bf16.mxu0 %vm14029_vm14, %v11835_v29 }
 0x63c   : > { %9610 = vmatmul.mubr.msk.bf16.gmra.mrb[56].mxu0 %vm14029_vm14, %v11833_v53 }
 0x63d   : > { %9617 = vmatprep.mubr.msk.bf16.mxu0 %vm14029_vm14, %v12052_v55  ;;  %v4006_v55 = vsel %vm10476_vm2, %v11856_v0, 0  ;;  %vm14034_vm2 = vcmask 126980  }
 0x63e   : > { %vm12616_vm6 = vmand %vm14034_vm2, %vm7174_vm4  ;;  %vm14041_vm2 = vcmask 254080  }
 0x644   : > { %9618 = vmatmul.mubr.msk.bf16.vlgmr.msra.gmra.mrb[28].mxu0 %vm14029_vm14, %v12060_v20 }
 0x645   : > { %9621 = vmatprep.mubr.msk.bf16.mxu0 %vm14029_vm14, %v12076_v26  ;;  %9650 = vmatpush3.bf16.msra.mxu0 %v10378_v13 }
 0x646   : > { %9651 = vmatprep.subr.bf16.mxu0 %v10379_v40 }
 0x649   : > { %9652 = vmatpush3.bf16.msra.mxu0 %v10379_v40 }
 0x64a   : > { %9685 = vmatprep.subr.bf16.mxu0 %v10380_v41 }
 0x64c   : > { %9622 = vmatmul.mubr.msk.bf16.gmra.mrb[32].mxu0 %vm14029_vm14, %v12084_v21 }
 0x64d   : > { %9625 = vmatprep.mubr.msk.bf16.mxu0 %vm14029_vm14, %v12096_v32 }
 0x654   : > { %9626 = vmatmul.mubr.msk.bf16.gmra.mrb[36].mxu0 %vm14029_vm14, %v12104_v35 }
 0x655   : > { %9629 = vmatprep.mubr.msk.bf16.mxu0 %vm14029_vm14, %v12116_v44 }
 0x65c   : > { %9630 = vmatmul.mubr.msk.bf16.gmra.mrb[40].mxu0 %vm14029_vm14, %v12124_v62 }
 0x65d   : > { %9633 = vmatprep.mubr.msk.bf16.mxu0 %vm14029_vm14, %v12136_v23 }
 0x664   : > { %9634 = vmatmul.mubr.msk.bf16.gmra.mrb[44].mxu0 %vm14029_vm14, %v12144_v60 }
 0x665   : > { %9637 = vmatprep.mubr.msk.bf16.mxu0 %vm14029_vm14, %v12156_v18 }
 0x66c   : > { %9638 = vmatmul.mubr.msk.bf16.gmra.mrb[48].mxu0 %vm14029_vm14, %v12164_v56 }
 0x66d   : > { %9641 = vmatprep.mubr.msk.bf16.mxu0 %vm14029_vm14, %v12176_v63 }
 0x674   : > { %9642 = vmatmul.mubr.msk.bf16.gmra.mrb[52].mxu0 %vm14029_vm14, %v12184_v33 }
 0x675   : > { %9645 = vmatprep.mubr.msk.bf16.mxu0 %vm14029_vm14, %v12192_v48 }
 0x67c   : > { %9646 = vmatmul.mubr.msk.bf16.gmra.mrb[56].mxu0 %vm14029_vm14, %v4006_v55 }
 0x67d   : > { %9653 = vmatprep.mubr.msk.bf16.mxu0 %vm14029_vm14, %v11874_v12 }
 0x684   : > { %9654 = vmatmul.mubr.msk.bf16.vlgmr.msra.gmra.mrb[28].mxu0 %vm14029_vm14, %v11897_v1 }
 0x685   : > { %9657 = vmatprep.mubr.msk.bf16.mxu0 %vm14029_vm14, %v11905_v45  ;;  %9686 = vmatpush3.bf16.msra.mxu0 %v10380_v41 }
 0x686   : > { %9687 = vmatprep.subr.bf16.mxu0 %v10381_v51 }
 0x689   : > { %9688 = vmatpush3.bf16.msra.mxu0 %v10381_v51 }
 0x68a   : > { %9721 = vmatprep.subr.bf16.mxu0 %v10382_v2 }
 0x68c   : > { %9658 = vmatmul.mubr.msk.bf16.gmra.mrb[32].mxu0 %vm14029_vm14, %v11921_v61 }
 0x68d   : > { %9661 = vmatprep.mubr.msk.bf16.mxu0 %vm14029_vm14, %v11929_v17 }
 0x694   : > { %9662 = vmatmul.mubr.msk.bf16.gmra.mrb[36].mxu0 %vm14029_vm14, %v11945_v31 }
 0x695   : > { %9665 = vmatprep.mubr.msk.bf16.mxu0 %vm14029_vm14, %v11953_v4 }
 0x69c   : > { %9666 = vmatmul.mubr.msk.bf16.gmra.mrb[40].mxu0 %vm14029_vm14, %v11969_v15 }
 0x69d   : > { %9669 = vmatprep.mubr.msk.bf16.mxu0 %vm14029_vm14, %v11977_v42 }
 0x6a4   : > { %9670 = vmatmul.mubr.msk.bf16.gmra.mrb[44].mxu0 %vm14029_vm14, %v11993_v6  ;;  %v10383_v6 = vld [vmem:[%s14000_s5 + $0x88] sm:$0xff]  }
 0x6a5   : > { %9673 = vmatprep.mubr.msk.bf16.mxu0 %vm14029_vm14, %v12001_v7 }
 0x6ac   : > { %9674 = vmatmul.mubr.msk.bf16.gmra.mrb[48].mxu0 %vm14029_vm14, %v12016_v30 }
 0x6ad   : > { %9677 = vmatprep.mubr.msk.bf16.mxu0 %vm14029_vm14, %v12024_v38 }
 0x6b4   : > { %9678 = vmatmul.mubr.msk.bf16.gmra.mrb[52].mxu0 %vm14029_vm14, %v12033_v25 }
 0x6b5   : > { %9681 = vmatprep.mubr.msk.bf16.mxu0 %vm14029_vm14, %v12238_v58 }
 0x6bc   : > { %9682 = vmatmul.mubr.msk.bf16.gmra.mrb[56].mxu0 %vm14029_vm14, %v10680_v46  ;;  %v12426_v46 = vld [vmem:[%s14003_s8] sm:$0xf] }
 0x6bd   : > { %9689 = vmatprep.mubr.msk.bf16.mxu0 %vm14029_vm14, %v11738_v28  ;;  %9059 = vmatprep.mubr.msk.bf16.mxu1 %vm14029_vm14, %v12426_v46  ;;  %v12436_v28 = vld [vmem:[%s14001_s6] ss:$0 sm:$0xff] }
 0x6c4   : > { %9690 = vmatmul.mubr.msk.bf16.vlgmr.msra.gmra.mrb[28].mxu0 %vm14029_vm14, %v11760_v54 }
 0x6c5   : > { %9693 = vmatprep.mubr.msk.bf16.mxu0 %vm14029_vm14, %v11758_v49  ;;  %9722 = vmatpush3.bf16.msra.mxu0 %v10382_v2 }
 0x6c6   : > { %9723 = vmatprep.subr.bf16.mxu0 %v10383_v6 }
 0x6c9   : > { %9724 = vmatpush3.bf16.msra.mxu0 %v10383_v6 }
 0x6cc   : > { %9694 = vmatmul.mubr.msk.bf16.gmra.mrb[32].mxu0 %vm14029_vm14, %v11773_v14 }
 0x6cd   : > { %9697 = vmatprep.mubr.msk.bf16.mxu0 %vm14029_vm14, %v11771_v9 }
 0x6d4   : > { %9698 = vmatmul.mubr.msk.bf16.gmra.mrb[36].mxu0 %vm14029_vm14, %v11785_v8 }
 0x6d5   : > { %9701 = vmatprep.mubr.msk.bf16.mxu0 %vm14029_vm14, %v11783_v19 }
 0x6dc   : > { %9702 = vmatmul.mubr.msk.bf16.gmra.mrb[40].mxu0 %vm14029_vm14, %v11797_v50 }
 0x6dd   : > { %9705 = vmatprep.mubr.msk.bf16.mxu0 %vm14029_vm14, %v11795_v47 }
 0x6e4   : > { %9706 = vmatmul.mubr.msk.bf16.gmra.mrb[44].mxu0 %vm14029_vm14, %v11809_v57 }
 0x6e5   : > { %9709 = vmatprep.mubr.msk.bf16.mxu0 %vm14029_vm14, %v11807_v52 }
 0x6ec   : > { %9710 = vmatmul.mubr.msk.bf16.gmra.mrb[48].mxu0 %vm14029_vm14, %v11821_v22 }
 0x6ed   : > { %9713 = vmatprep.mubr.msk.bf16.mxu0 %vm14029_vm14, %v11819_v39 }
 0x6f4   : > { %9714 = vmatmul.mubr.msk.bf16.gmra.mrb[52].mxu0 %vm14029_vm14, %v11835_v29 }
 0x6f5   : > { %9717 = vmatprep.mubr.msk.bf16.mxu0 %vm14029_vm14, %v11833_v53 }
 0x6fc   : > { %9718 = vmatmul.mubr.bf16.gmra.mrb[56].mxu0 %v14179_v24  ;;  %v6048_v24 = vld [vmem:[%s14004_s9] sm:$0xff] }
 0x6fd   : > { %9725 = vmatprep.mubr.msk.bf16.mxu0 %vm14029_vm14, %v12060_v20  ;;  %6051 = vperm.xlu0 %10328, %v6048_v24  }
 0x704   : > { %9726 = vmatmul.mubr.msk.bf16.vlgmr.msra.gmra.mrb[28].mxu0 %vm14029_vm14, %v12076_v26 }
 0x705   : > { %9729 = vmatprep.mubr.msk.bf16.mxu0 %vm14029_vm14, %v12084_v21 }
 0x70c   : > { %9730 = vmatmul.mubr.msk.bf16.gmra.mrb[32].mxu0 %vm14029_vm14, %v12096_v32 }
 0x70d   : > { %9733 = vmatprep.mubr.msk.bf16.mxu0 %vm14029_vm14, %v12104_v35 }
 0x714   : > { %9734 = vmatmul.mubr.msk.bf16.gmra.mrb[36].mxu0 %vm14029_vm14, %v12116_v44 }
 0x715   : > { %9737 = vmatprep.mubr.msk.bf16.mxu0 %vm14029_vm14, %v12124_v62 }
 0x71c   : > { %9738 = vmatmul.mubr.msk.bf16.gmra.mrb[40].mxu0 %vm14029_vm14, %v12136_v23 }
 0x71d   : > { %9741 = vmatprep.mubr.msk.bf16.mxu0 %vm14029_vm14, %v12144_v60 }
 0x724   : > { %9742 = vmatmul.mubr.msk.bf16.gmra.mrb[44].mxu0 %vm14029_vm14, %v12156_v18 }
 0x725   : > { %9745 = vmatprep.mubr.msk.bf16.mxu0 %vm14029_vm14, %v12164_v56 }
 0x72c   : > { %9746 = vmatmul.mubr.msk.bf16.gmra.mrb[48].mxu0 %vm14029_vm14, %v12176_v63 }
 0x72d   : > { %9749 = vmatprep.mubr.msk.bf16.mxu0 %vm14029_vm14, %v12184_v33 }
 0x734   : > { %9750 = vmatmul.mubr.msk.bf16.gmra.mrb[52].mxu0 %vm14029_vm14, %v12192_v48 }
 0x735   : > { %9753 = vmatprep.mubr.msk.bf16.mxu0 %vm14029_vm14, %v4006_v55 }
 0x73c   : > { %9754 = vmatmul.mubr.msk.bf16.gmra.mrb[56].mxu0 %vm14029_vm14, %v10483_v3 }
 0x7d7   : > { %v9727_v49 = vpop.f32.mrb[28].mxu0 }
 0x7d8   : > { %v5969_v3 = vadd.f32 %v9727_v49, %v12436_v28  ;;  %v5801_v54 = vpop.f32.mrb[29].mxu0 }
 0x7d9   : > { %v5967_v9 = vadd.f32 %v12436_v28, %v5801_v54  ;;  %v9728_v14 = vpop.f32.mrb[30].mxu0 }
 0x7da   : > { %v5970_v19 = vadd.f32 %v9728_v14, %v12436_v28  ;;  %v5804_v8 = vpop.f32.mrb[31].mxu0  ;;  %v6001_v50 = vmax.f32 %v5969_v3, 0.0 }
 0x7db   : > { %v5968_v47 = vadd.f32 %v12436_v28, %v5804_v8  ;;  %v5999_v57 = vmax.f32 %v5967_v9, 0.0 }
 0x7dc   : > { %v6002_v52 = vmax.f32 %v5970_v19, 0.0 }
 0x7dd   : > { %v6000_v39 = vmax.f32 %v5968_v47, 0.0 }
 0x7de   : > { %v12442_v22 = vpack.c.bf16 %v6002_v52, %v6001_v50 }
 0x7df   : > { %v12444_v53 = vpack.c.bf16 %v6000_v39, %v5999_v57  ;;  %v9731_v29 = vpop.f32.mrb[32].mxu0 }
 0x7e0   : > { %v5973_v0 = vadd.f32 %v9731_v29, %v12436_v28  ;;  %v5817_v12 = vpop.f32.mrb[33].mxu0 }
 0x7e1   : > { %v5971_v1 = vadd.f32 %v12436_v28, %v5817_v12  ;;  %v9732_v45 = vpop.f32.mrb[34].mxu0 }
 0x7e2   : > { %v5974_v61 = vadd.f32 %v9732_v45, %v12436_v28  ;;  %v5820_v17 = vpop.f32.mrb[35].mxu0  ;;  %v6005_v31 = vmax.f32 %v5973_v0, 0.0  ;;  %v6058_v0 = vsel %vm14029_vm14, %v12444_v53, 0 }
 0x7e3   : > { %v5972_v38 = vadd.f32 %v12436_v28, %v5820_v17  ;;  %v6003_v15 = vmax.f32 %v5971_v1, 0.0 }
 0x7e4   : > { %v6006_v4 = vmax.f32 %v5974_v61, 0.0 }
 0x7e5   : > { %v6004_v42 = vmax.f32 %v5972_v38, 0.0 }
 0x7e6   : > { %v12450_v7 = vpack.c.bf16 %v6006_v4, %v6005_v31 }
 0x7e7   : > { %v12452_v30 = vpack.c.bf16 %v6004_v42, %v6003_v15  ;;  %v9735_v25 = vpop.f32.mrb[36].mxu0 }
 0x7e8   : > { %v5977_v20 = vadd.f32 %v9735_v25, %v12436_v28  ;;  %v5833_v26 = vpop.f32.mrb[37].mxu0 }
 0x7e9   : > { %v5975_v21 = vadd.f32 %v12436_v28, %v5833_v26  ;;  %v9736_v32 = vpop.f32.mrb[38].mxu0 }
 0x7ea   : > { %v5978_v35 = vadd.f32 %v9736_v32, %v12436_v28  ;;  %v5836_v44 = vpop.f32.mrb[39].mxu0  ;;  %v6009_v23 = vmax.f32 %v5977_v20, 0.0 }
 0x7eb   : > { %v5976_v62 = vadd.f32 %v12436_v28, %v5836_v44  ;;  %v6007_v18 = vmax.f32 %v5975_v21, 0.0  ;;  %v6061_v21 = vsel %vm14029_vm14, %v12442_v22, 0 }
 0x7ec   : > { %v6010_v60 = vmax.f32 %v5978_v35, 0.0 }
 0x7ed   : > { %v6008_v56 = vmax.f32 %v5976_v62, 0.0 }
 0x7ee   : > { %v12458_v63 = vpack.c.bf16 %v6010_v60, %v6009_v23 }
 0x7ef   : > { %v12460_v36 = vpack.c.bf16 %v6008_v56, %v6007_v18  ;;  %v9739_v33 = vpop.f32.mrb[40].mxu0 }
 0x7f0   : > { %v5981_v37 = vadd.f32 %v9739_v33, %v12436_v28  ;;  %v5849_v5 = vpop.f32.mrb[41].mxu0 }
 0x7f1   : > { %v5979_v48 = vadd.f32 %v12436_v28, %v5849_v5  ;;  %v9740_v10 = vpop.f32.mrb[42].mxu0 }
 0x7f2   : > { %v5982_v11 = vadd.f32 %v9740_v10, %v12436_v28  ;;  %v5852_v27 = vpop.f32.mrb[43].mxu0  ;;  %v6013_v43 = vmax.f32 %v5981_v37, 0.0 }
 0x7f3   : > { %v5980_v34 = vadd.f32 %v12436_v28, %v5852_v27  ;;  %v6011_v58 = vmax.f32 %v5979_v48, 0.0 }
 0x7f4   : > { %v6014_v16 = vmax.f32 %v5982_v11, 0.0  ;;  %v6064_v11 = vsel %vm14029_vm14, %v12452_v30, 0  ;;  %v6070_v30 = vsel %vm14029_vm14, %v12460_v36, 0  ;;  %v6052_v36 = vpop.permute.xlu0 %6051 }
 0x7f5   : > { %v6012_v59 = vmax.f32 %v5980_v34, 0.0 }
 0x7f6   : > { %v12466_v13 = vpack.c.bf16 %v6014_v16, %v6013_v43 }
 0x7f7   : > { %v12468_v40 = vpack.c.bf16 %v6012_v59, %v6011_v58  ;;  %v9743_v41 = vpop.f32.mrb[44].mxu0 }
 0x7f8   : > { %v5985_v55 = vadd.f32 %v9743_v41, %v12436_v28  ;;  %v5865_v51 = vpop.f32.mrb[45].mxu0 }
 0x7f9   : > { %v5983_v2 = vadd.f32 %v12436_v28, %v5865_v51  ;;  %v9744_v6 = vpop.f32.mrb[46].mxu0 }
 0x7fa   : > { %v5986_v24 = vadd.f32 %v9744_v6, %v12436_v28  ;;  %v5868_v49 = vpop.f32.mrb[47].mxu0  ;;  %v6017_v54 = vmax.f32 %v5985_v55, 0.0  ;;  %v6076_v6 = vsel %vm14029_vm14, %v12468_v40, 0 }
 0x7fb   : > { %v5984_v3 = vadd.f32 %v12436_v28, %v5868_v49  ;;  %v6015_v14 = vmax.f32 %v5983_v2, 0.0  ;;  %v6067_v2 = vsel %vm14029_vm14, %v12450_v7, 0  ;;  %v6079_v7 = vsel %vm14029_vm14, %v12466_v13, 0 }
 0x7fc   : > { %v6018_v9 = vmax.f32 %v5986_v24, 0.0  ;;  %v10404_v13 = vmov 1966171168  }
 0x7fd   : > { %v6016_v19 = vmax.f32 %v5984_v3, 0.0 }
 0x7fe   : > { %v6041_v8 = vpack.c.bf16 %v6018_v9, %v6017_v54  ;;  %v6181_v9 = vunpack.c.l.s4 %v10404_v13 }
 0x7ff   : > { %v6040_v47 = vpack.c.bf16 %v6016_v19, %v6015_v14  ;;  %v9747_v50 = vpop.f32.mrb[48].mxu0  ;;  %v6183_v14 = vlaneseq }
 0x800   : > { %v5989_v52 = vadd.f32 %v9747_v50, %v12436_v28  ;;  %v5881_v57 = vpop.f32.mrb[49].mxu0 }
 0x801   : > { %v5987_v39 = vadd.f32 %v12436_v28, %v5881_v57  ;;  %v9748_v29 = vpop.f32.mrb[50].mxu0  ;;  %10297 = vmatprep.subr.msk.bf16.mxu1 %vm14029_vm14, %v6040_v47  ;;  %v6184_v19 = vshrl.u32 %v6183_v14, 7 }
 0x802   : > { %v5990_v12 = vadd.f32 %v9748_v29, %v12436_v28  ;;  %v5884_v1 = vpop.f32.mrb[51].mxu0  ;;  %9044 = vmatpush3.bf16.xpose.msra.mxu1 %v6058_v0  ;;  %v6021_v61 = vmax.f32 %v5989_v52, 0.0 }
 0x803   : > { %v5988_v45 = vadd.f32 %v12436_v28, %v5884_v1  ;;  %10298 = vmatprep.subr.msk.bf16.mxu1 %vm14029_vm14, %v6041_v8  ;;  %v6019_v38 = vmax.f32 %v5987_v39, 0.0 }
 0x804   : > { %v6022_v17 = vmax.f32 %v5990_v12, 0.0 }
 0x805   : > { %v6020_v31 = vmax.f32 %v5988_v45, 0.0 }
 0x806   : > { %v6043_v4 = vpack.c.bf16 %v6022_v17, %v6021_v61 }
 0x807   : > { %v6042_v15 = vpack.c.bf16 %v6020_v31, %v6019_v38  ;;  %v9751_v42 = vpop.f32.mrb[52].mxu0 }
 0x808   : > { %v5993_v25 = vadd.f32 %v9751_v42, %v12436_v28  ;;  %v5897_v20 = vpop.f32.mrb[53].mxu0 }
 0x809   : > { %v5991_v53 = vadd.f32 %v12436_v28, %v5897_v20  ;;  %v9752_v26 = vpop.f32.mrb[54].mxu0  ;;  %v12522_v20 = vsub.s32 0, %v6184_v19 }
 0x80a   : > { %v5994_v32 = vadd.f32 %v9752_v26, %v12436_v28  ;;  %v5900_v35 = vpop.f32.mrb[55].mxu0  ;;  %9046 = vmatpush3.bf16.xpose.msra.mxu1 %v6061_v21  ;;  %v6025_v62 = vmax.f32 %v5993_v25, 0.0 }
 0x80b   : > { %v5992_v44 = vadd.f32 %v12436_v28, %v5900_v35  ;;  %10299 = vmatprep.subr.msk.bf16.mxu1 %vm14029_vm14, %v6042_v15  ;;  %v6023_v60 = vmax.f32 %v5991_v53, 0.0 }
 0x80c   : > { %v6026_v23 = vmax.f32 %v5994_v32, 0.0 }
 0x80d   : > { %v6024_v18 = vmax.f32 %v5992_v44, 0.0 }
 0x80e   : > { %v6045_v56 = vpack.c.bf16 %v6026_v23, %v6025_v62 }
 0x80f   : > { %v6044_v33 = vpack.c.bf16 %v6024_v18, %v6023_v60  ;;  %v9755_v37 = vpop.f32.mrb[56].mxu0 }
 0x810   : > { %v5997_v5 = vadd.f32 %v9755_v37, %v12436_v28  ;;  %v5913_v48 = vpop.f32.mrb[57].mxu0 }
 0x811   : > { %v5995_v22 = vadd.f32 %v12436_v28, %v5913_v48  ;;  %v9756_v10 = vpop.f32.mrb[58].mxu0 }
 0x812   : > { %v5998_v27 = vadd.f32 %v9756_v10, %v12436_v28  ;;  %v5916_v34 = vpop.f32.mrb[59].mxu0  ;;  %9048 = vmatpush3.bf16.xpose.msra.mxu1 %v6064_v11  ;;  %v6029_v16 = vmax.f32 %v5997_v5, 0.0 }
 0x813   : > { %v5996_v43 = vadd.f32 %v12436_v28, %v5916_v34  ;;  %10300 = vmatprep.subr.msk.bf16.mxu1 %vm14029_vm14, %v6043_v4  ;;  %v6027_v59 = vmax.f32 %v5995_v22, 0.0  ;;  %v6073_v28 = vsel %vm14029_vm14, %v12458_v63, 0 }
 0x814   : > { %v6030_v58 = vmax.f32 %v5998_v27, 0.0 }
 0x815   : > { %v6028_v41 = vmax.f32 %v5996_v43, 0.0 }
 0x816   : > { %v6047_v55 = vpack.c.bf16 %v6030_v58, %v6029_v16 }
 0x817   : > { %v6046_v51 = vpack.c.bf16 %v6028_v41, %v6027_v59 }
 0x81a   : > { %9050 = vmatpush3.bf16.xpose.msra.mxu1 %v6067_v2 }
 0x81b   : > { %10301 = vmatprep.subr.msk.bf16.mxu1 %vm14029_vm14, %v6044_v33 }
 0x822   : > { %9052 = vmatpush3.bf16.xpose.msra.mxu1 %v6070_v30 }
 0x823   : > { %10302 = vmatprep.subr.msk.bf16.mxu1 %vm14029_vm14, %v6045_v56 }
 0x82a   : > { %9054 = vmatpush3.bf16.xpose.msra.mxu1 %v6073_v28 }
 0x82b   : > { %10303 = vmatprep.subr.msk.bf16.mxu1 %vm14029_vm14, %v6046_v51 }
 0x832   : > { %9056 = vmatpush3.bf16.xpose.msra.mxu1 %v6076_v6 }
 0x833   : > { %10304 = vmatprep.subr.msk.bf16.mxu1 %vm14029_vm14, %v6047_v55 }
 0x83a   : > { %9058 = vmatpush3.bf16.xpose.msra.mxu1 %v6079_v7 }
 0x841   : > { %9060 = vmatmul.mubr.msk.bf16.vlgmr.msra.gmra.mrb[36].mxu1 %vm14029_vm14, %v12426_v46  ;;  %v6182_v46 = vunpack.c.0.s8 %v6181_v9 }
 0x843   : > { %v12517_v57 = vsub.s32 %v6182_v46, %v6184_v19 }
 0x914   : > { %v6139_v24 = vpop.f32.mrb[36].mxu1 }
 0x915   : > { %v6140_v49 = vadd.f32 %v6139_v24, %v6052_v36  ;;  %v6141_v63 = vpop.f32.mrb[37].mxu1 }
 0x916   : > { %v6143_v3 = vpop.f32.mrb[38].mxu1  ;;  %v6142_v40 = vadd.f32 %v6141_v63, %v6052_v36 }
 0x917   : > { %v6144_v54 = vpop.f32.mrb[39].mxu1  ;;  %6148 = vrot.lane.b32.xlu1 %v6140_v49, %s10397_s21  ;;  %6156 = vrot.lane.b32.xlu0 %v6140_v49, %s10403_s24  ;;  %v6167_v52 = vmul.f32 0.75, %v6140_v49 }
 0x918   : > { %v6168_v1 = vmul.f32 0.75, %v6142_v40 }
 0x91b   : > { %6150 = vrot.lane.b32.xlu1 %v6142_v40, %s10397_s21 }
 0x91f   : > { %6158 = vrot.lane.b32.xlu1 %v6142_v40, %s10403_s24 }
 0x989   : > { %v6149_v8 = vpop.permute.xlu1 %6148  ;;  %v6157_v17 = vpop.permute.xlu0 %6156 }
 0x98a   : > { %v6155_v47 = vsel %vm1106_vm10, %v6140_v49, %v6149_v8 }
 0x98b   : > { %v6165_v50 = vmul.f32 0.25, %v6155_v47 }
 0x98d   : > { %v6169_v39 = vadd.f32 %v6167_v52, %v6165_v50  ;;  %v6151_v29 = vpop.permute.xlu1 %6150 }
 0x98e   : > { %v6152_v0 = vsel %vm1106_vm10, %v6149_v8, %v6151_v29  ;;  %vm12834_vm10 = vmand %vm14035_vm8, %vm6517_vm9 }
 0x98f   : > { %v6171_v12 = vpack.c.bf16 %v6169_v39, %v6169_v39  ;;  %v6166_v45 = vmul.f32 0.25, %v6152_v0 }
 0x991   : > { %v6186_v61 = vrot.slane %v6171_v12, %v12517_v57  ;;  %v6170_v38 = vadd.f32 %v6168_v1, %v6166_v45  ;;  %v6159_v31 = vpop.permute.xlu1 %6158 }
 0x992   : > { %v6161_v4 = vsel %vm6160_vm0, %v6157_v17, %v6159_v31  ;;  %v6164_v53 = vsel %vm6160_vm0, %v6159_v31, %v6142_v40  ;;  %vm14032_vm0 = vcmask 124930  }
 0x993   : > { %v6187_v15 = vcombine.high %v6186_v61, %v6186_v61  ;;  %v6194_v42 = vrot.slane %v6186_v61, %v12517_v57  ;;  %v6172_v25 = vpack.c.bf16 %v6170_v38, %v6170_v38  ;;  %v6173_v35 = vmul.f32 0.25, %v6161_v4 }
 0x994   : > { %v6174_v60 = vmul.f32 0.25, %v6164_v53 }
 0x995   : > { %v6201_v26 = vrot.slane %v6187_v15, %v12517_v57  ;;  %v6202_v21 = vcombine.high %v6194_v42, %v6194_v42  ;;  %v8670_v32 = vpack.i.b16 %v6194_v42, %v6194_v42  ;;  %v6205_v44 = vunpack.i.h.s16 %v6194_v42 }
 0x996   : > { %v7099_v62 = vrot.slane %v6172_v25, %v12517_v57  ;;  %v6175_v5 = vadd.f32 %v6173_v35, %v6167_v52  ;;  %v6176_v34 = vadd.f32 %v6174_v60, %v6168_v1 }
 0x997   : > { %v6203_v23 = vcombine.high %v6201_v26, %v6201_v26  ;;  %v12527_v18 = vrot.slane %v8670_v32, %v12522_v20  ;;  %v6207_v33 = vunpack.i.h.s16 %v6201_v26  ;;  %v6209_v37 = vunpack.i.h.s16 %v6202_v21 }
 0x998   : > { %v7100_v56 = vcombine.high %v7099_v62, %v7099_v62  ;;  %v6213_v48 = vpack.i.b16 %v6205_v44, %v6205_v44  ;;  %v7107_v22 = vrot.slane %v7099_v62, %v12517_v57  ;;  %v8671_v11 = vpack.i.b16 %v6201_v26, %v6201_v26 }
 0x999   : > { %6793 = vrot.lane.b32.xlu1 %v12527_v18, %s10405_s25  ;;  %v6211_v10 = vunpack.i.h.s16 %v6203_v23  ;;  %v8672_v27 = vpack.i.b16 %v6202_v21, %v6202_v21  ;;  %6409 = vrot.lane.b32.xlu0 %v12527_v18, %s10403_s24  ;;  %v6215_v41 = vpack.i.b16 %v6207_v33, %v6207_v33  ;;  %v6217_v55 = vpack.i.b16 %v6209_v37, %v6209_v37 }
 0x99a   : > { %v7114_v43 = vrot.slane %v7100_v56, %v12517_v57  ;;  %v7115_v16 = vcombine.high %v7107_v22, %v7107_v22  ;;  %v7118_v58 = vunpack.i.h.s16 %v7107_v22  ;;  %v8678_v59 = vpack.i.b16 %v7107_v22, %v7107_v22 }
 0x99b   : > { %v8673_v51 = vpack.i.b16 %v6203_v23, %v6203_v23  ;;  %v6177_v2 = vpack.c.bf16 %v6175_v5, %v6175_v5  ;;  %v12536_v30 = vrot.slane %v6213_v48, %v12522_v20  ;;  %v12543_v36 = vrot.slane %v8671_v11, %v12522_v20 }
 0x99c   : > { %v12538_v28 = vcombine.high %v7114_v43, %v7114_v43  ;;  %v7120_v6 = vunpack.i.h.s16 %v7114_v43  ;;  %v7122_v7 = vunpack.i.h.s16 %v7115_v16  ;;  %v7126_v24 = vpack.i.b16 %v7118_v58, %v7118_v58 }
 0x99d   : > { %6993 = vrot.lane.b32.xlu1 %v12527_v18, %s10397_s21  ;;  %v6178_v49 = vpack.c.bf16 %v6176_v34, %v6176_v34  ;;  %v6293_v63 = vrot.slane %v6177_v2, %v12517_v57  ;;  %6492 = vrot.lane.b32.xlu0 %v12527_v18, %s10406_s26  ;;  %v8679_v54 = vpack.i.b16 %v7114_v43, %v7114_v43  ;;  %v7176_v43 = vld [vmem:[#allocation2] sm:$0x10] }
 0x99e   : > { %v7124_v3 = vunpack.i.h.s16 %v12538_v28  ;;  %v8680_v40 = vpack.i.b16 %v7115_v16, %v7115_v16  ;;  %v12550_v13 = vrot.slane %v8678_v59, %v12522_v20  ;;  %v12552_v9 = vpack.i.b16 %v6211_v10, %v6211_v10 }
 0x99f   : > { %v12555_v14 = vrot.slane %v6215_v41, %v12522_v20  ;;  %v12558_v46 = vrot.slane %v8672_v27, %v12522_v20  ;;  %v6294_v19 = vcombine.high %v6293_v63, %v6293_v63  ;;  %v12561_v8 = vrot.slane %v6217_v55, %v12522_v20 }
 0x9a0   : > { %v12564_v47 = vrot.slane %v8673_v51, %v12522_v20  ;;  %v12566_v50 = vpack.i.b16 %v7120_v6, %v7120_v6  ;;  %v12568_v52 = vpack.i.b16 %v7122_v7, %v7122_v7  ;;  %v8681_v39 = vpack.i.b16 %v12538_v28, %v12538_v28 }
 0x9a1   : > { %7406 = vrot.lane.b32.xlu1 %v12550_v13, %s10406_s26  ;;  %v6301_v29 = vrot.slane %v6293_v63, %v12517_v57  ;;  %v6308_v0 = vrot.slane %v6294_v19, %v12517_v57  ;;  %v7207_v12 = vrot.slane %v6178_v49, %v12517_v57  ;;  %6593 = vrot.lane.b32.xlu0 %v12527_v18, %s10407_s27 }
 0x9a2   : > { %v12579_v1 = vpack.i.b16 %v7124_v3, %v7124_v3  ;;  %v12582_v45 = vrot.slane %v7126_v24, %v12522_v20  ;;  %v12585_v61 = vrot.slane %v8679_v54, %v12522_v20  ;;  %v12588_v17 = vrot.slane %v8680_v40, %v12522_v20 }
 0x9a3   : > { %v6309_v38 = vcombine.high %v6301_v29, %v6301_v29  ;;  %v6310_v31 = vcombine.high %v6308_v0, %v6308_v0  ;;  %v6312_v4 = vunpack.i.h.s16 %v6301_v29  ;;  %v6314_v15 = vunpack.i.h.s16 %v6308_v0 }
 0x9a4   : > { %v8674_v42 = vpack.i.b16 %v6301_v29, %v6301_v29  ;;  %v8675_v25 = vpack.i.b16 %v6308_v0, %v6308_v0  ;;  %v7208_v53 = vcombine.high %v7207_v12, %v7207_v12  ;;  %v7215_v26 = vrot.slane %v7207_v12, %v12517_v57 }
 0x9a5   : > { %7806 = vrot.lane.b32.xlu1 %v12550_v13, %s10402_s12  ;;  %v6316_v21 = vunpack.i.h.s16 %v6309_v38  ;;  %v6318_v32 = vunpack.i.h.s16 %v6310_v31  ;;  %v6320_v35 = vpack.i.b16 %v6312_v4, %v6312_v4  ;;  %v6322_v44 = vpack.i.b16 %v6314_v15, %v6314_v15  ;;  %6692 = vrot.lane.b32.xlu0 %v12527_v18, %s10408_s28  ;;  %v6268_v4 = vld [vmem:[#allocation2 + $0x10] sm:$0x1] }
 0x9a6   : > { %v8676_v62 = vpack.i.b16 %v6309_v38, %v6309_v38  ;;  %v8677_v23 = vpack.i.b16 %v6310_v31, %v6310_v31  ;;  %v12596_v60 = vrot.slane %v8674_v42, %v12522_v20  ;;  %v12599_v56 = vrot.slane %v8675_v25, %v12522_v20  ;;  %v6262_v38 = vld [vmem:[#allocation2] sm:$0x1]  ;;  %v6265_v31 = vld [vmem:[#allocation2 + $0x8] sm:$0x1] }
 0x9a7   : > { %v6324_v33 = vpack.i.b16 %v6316_v21, %v6316_v21  ;;  %v6326_v37 = vpack.i.b16 %v6318_v32, %v6318_v32  ;;  %v12602_v5 = vrot.slane %v6320_v35, %v12522_v20  ;;  %v12605_v48 = vrot.slane %v6322_v44, %v12522_v20  ;;  %v7182_v21 = vld [vmem:[#allocation2 + $0x10] sm:$0x10]  ;;  %v6280_v32 = vld [vmem:[#allocation2 + $0x30] sm:$0x1] }
 0x9a8   : > { %v12608_v22 = vrot.slane %v8676_v62, %v12522_v20  ;;  %v12611_v10 = vrot.slane %v8677_v23, %v12522_v20  ;;  %v7222_v11 = vrot.slane %v7208_v53, %v12517_v57  ;;  %v7223_v27 = vcombine.high %v7215_v26, %v7215_v26 }
 0x9a9   : > { %v12621_v16 = vrot.slane %v6324_v33, %v12522_v20  ;;  %v12624_v58 = vrot.slane %v6326_v37, %v12522_v20  ;;  %v7226_v59 = vunpack.i.h.s16 %v7215_v26  ;;  %v8682_v41 = vpack.i.b16 %v7215_v26, %v7215_v26  ;;  %6892 = vrot.lane.b32.xlu0 %v12527_v18, %s10402_s12  ;;  %v6274_v26 = vld [vmem:[#allocation2 + $0x20] sm:$0x1]  ;;  %v7179_v33 = vld [vmem:[#allocation2 + $0x8] sm:$0x10]  ;;  %v7188_v37 = vld [vmem:[#allocation2 + $0x20] sm:$0x10] }
 0x9aa   : > { %v7224_v57 = vcombine.high %v7222_v11, %v7222_v11  ;;  %v7228_v55 = vunpack.i.h.s16 %v7222_v11  ;;  %v7230_v51 = vunpack.i.h.s16 %v7223_v27  ;;  %v8683_v2 = vpack.i.b16 %v7222_v11, %v7222_v11  ;;  %v6271_v11 = vld [vmem:[#allocation2 + $0x18] sm:$0x1] }
 0x9ab   : > { %14193 = vst [vmem:[#allocation3_spill] sm:$0xff] %v12624_v58  ;;  %v7234_v6 = vpack.i.b16 %v7226_v59, %v7226_v59  ;;  %v8684_v7 = vpack.i.b16 %v7223_v27, %v7223_v27  ;;  %v12629_v24 = vrot.slane %v8682_v41, %v12522_v20  ;;  %v7177_v49 = vsel %vm12616_vm6, %v12550_v13, %v7176_v43  ;;  %v6283_v27 = vld [vmem:[#allocation2 + $0x38] sm:$0x1]  ;;  %v7185_v43 = vld [vmem:[#allocation2 + $0x18] sm:$0x10] }
 0x9ac   : > { %v7232_v63 = vunpack.i.h.s16 %v7224_v57  ;;  %v7236_v3 = vpack.i.b16 %v7228_v55, %v7228_v55  ;;  %v7238_v54 = vpack.i.b16 %v7230_v51, %v7230_v51  ;;  %v8685_v40 = vpack.i.b16 %v7224_v57, %v7224_v57  ;;  %7178 = vst [vmem:[#allocation2] sm:$0x10] %v7177_v49  ;;  %v7191_v59 = vld [vmem:[#allocation2 + $0x28] sm:$0x10]  ;;  %v7194_v41 = vld [vmem:[#allocation2 + $0x30] sm:$0x10] }
 0x9ad   : > { %v12641_v29 = vrot.slane %v7234_v6, %v12522_v20  ;;  %v12644_v0 = vrot.slane %v8683_v2, %v12522_v20  ;;  %v12647_v12 = vrot.slane %v8684_v7, %v12522_v20  ;;  %7273 = vrot.lane.b32.xlu1 %v12629_v24, %s10397_s21  ;;  %6359 = vrot.lane.b32.xlu0 %v12596_v60, %s10397_s21  ;;  %v7197_v6 = vld [vmem:[#allocation2 + $0x38] sm:$0x10] }
 0x9ae   : > { %v7240_v15 = vpack.i.b16 %v7232_v63, %v7232_v63  ;;  %v12654_v42 = vrot.slane %v7236_v3, %v12522_v20  ;;  %v12657_v25 = vrot.slane %v7238_v54, %v12522_v20  ;;  %v12660_v53 = vrot.slane %v8685_v40, %v12522_v20 }
 0x9af   : > { %14196 = vst [vmem:[#allocation4_spill] sm:$0xff] %v12647_v12  ;;  %v12664_v35 = vrot.slane %v12552_v9, %v12522_v20  ;;  %v12668_v44 = vrot.slane %v12566_v50, %v12522_v20  ;;  %v12672_v62 = vrot.slane %v12568_v52, %v12522_v20  ;;  %v12678_v23 = vrot.slane %v8681_v39, %v12522_v20  ;;  %v6277_v39 = vld [vmem:[#allocation2 + $0x28] sm:$0x1] }
 0x9b0   : > { %14197 = vst [vmem:[#allocation5_spill] sm:$0xff] %v12657_v25  ;;  %14198 = vst [vmem:[#allocation6_spill] sm:$0xff] %v12660_v53  ;;  %v12682_v9 = vrot.slane %v12579_v1, %v12522_v20  ;;  %v12685_v50 = vrot.slane %v7240_v15, %v12522_v20  ;;  %v6263_v52 = vsel %vm12636_vm7, %v12527_v18, %v6262_v38 }
 0x9b1   : > { %14199 = vst [vmem:[#allocation7_spill] sm:$0xff] %v12664_v35  ;;  %v6266_v28 = vsel %vm12636_vm7, %v12536_v30, %v6265_v31  ;;  %7457 = vrot.lane.b32.xlu1 %v12629_v24, %s10403_s24  ;;  %6543 = vrot.lane.b32.xlu0 %v12596_v60, %s10403_s24  ;;  %6264 = vst [vmem:[#allocation2] sm:$0x1] %v6263_v52  ;;  %v6269_v20 = vsel %vm12636_vm7, %v12543_v36, %v6268_v4  ;;  %v14205_v31 = vmov 0  ;;  %v7433_v4 = vld [vmem:[#allocation2] sm:$0x20] }
 0x9b2   : > { %14200 = vst [vmem:[#allocation8_spill] sm:$0xff] %v12682_v9  ;;  %14201 = vst [vmem:[#allocation9_spill] sm:$0xff] %v12685_v50  ;;  %v6275_v18 = vsel %vm12636_vm7, %v12558_v46, %v6274_v26  ;;  %v7183_v1 = vsel %vm12616_vm6, %v12585_v61, %v7182_v21  ;;  %v7180_v57 = vsel %vm12616_vm6, %v12582_v45, %v7179_v33  ;;  %v14206_v31 = vsel %vm12844_vm13, 4294967295, %v14205_v31  ;;  %v7832_v33 = vld [vmem:[#allocation2] sm:$0x80] }
 0x9b3   : > { %6267 = vst [vmem:[#allocation2 + $0x8] sm:$0x1] %v6266_v28  ;;  %6270 = vst [vmem:[#allocation2 + $0x10] sm:$0x1] %v6269_v20  ;;  %v7189_v55 = vsel %vm12616_vm6, %v12588_v17, %v7188_v37  ;;  %v6281_v51 = vsel %vm12636_vm7, %v12564_v47, %v6280_v32  ;;  %v6272_v2 = vsel %vm12636_vm7, %v12555_v14, %v6271_v11  ;;  %v14207_v32 = vmov 0 }
 0x9b4   : > { %6276 = vst [vmem:[#allocation2 + $0x20] sm:$0x1] %v6275_v18  ;;  %7184 = vst [vmem:[#allocation2 + $0x10] sm:$0x10] %v7183_v1  ;;  %v6278_v7 = vsel %vm12636_vm7, %v12561_v8, %v6277_v39  ;;  %v7186_v49 = vsel %vm12616_vm6, %v12668_v44, %v7185_v43  ;;  %v7192_v63 = vsel %vm12616_vm6, %v12672_v62, %v7191_v59  ;;  %v14209_v37 = vmov 0 }
 0x9b5   : > { %7181 = vst [vmem:[#allocation2 + $0x8] sm:$0x10] %v7180_v57  ;;  %7190 = vst [vmem:[#allocation2 + $0x20] sm:$0x10] %v7189_v55  ;;  %v7195_v3 = vsel %vm12616_vm6, %v12678_v23, %v7194_v41  ;;  %v6284_v54 = vsel %vm12636_vm7, %v12664_v35, %v6283_v27  ;;  %7657 = vrot.lane.b32.xlu1 %v12629_v24, %s10407_s27  ;;  %6643 = vrot.lane.b32.xlu0 %v12596_v60, %s10406_s26  ;;  %v6719_v11 = vld [vmem:[#allocation2] sm:$0x4] }
 0x9b6   : > { %6282 = vst [vmem:[#allocation2 + $0x30] sm:$0x1] %v6281_v51  ;;  %6273 = vst [vmem:[#allocation2 + $0x18] sm:$0x1] %v6272_v2  ;;  %v7198_v40 = vsel %vm12616_vm6, %v12682_v9, %v7197_v6  ;;  %vm14033_vm6 = vsmask.f32 2304 }
 0x9b7   : > { %6279 = vst [vmem:[#allocation2 + $0x28] sm:$0x1] %v6278_v7  ;;  %7187 = vst [vmem:[#allocation2 + $0x18] sm:$0x10] %v7186_v49  ;;  %v14212_v20 = vmov 0  ;;  %v14215_v43 = vmov 0 }
 0x9b8   : > { %7193 = vst [vmem:[#allocation2 + $0x28] sm:$0x10] %v7192_v63  ;;  %7196 = vst [vmem:[#allocation2 + $0x30] sm:$0x10] %v7195_v3  ;;  %v6919_v18 = vld [vmem:[#allocation2] sm:$0x8] }
 0x9b9   : > { %6285 = vst [vmem:[#allocation2 + $0x38] sm:$0x1] %v6284_v54  ;;  %7199 = vst [vmem:[#allocation2 + $0x38] sm:$0x10] %v7198_v40  ;;  %7856 = vrot.lane.b32.xlu1 %v12629_v24, %s10405_s25  ;;  %7606 = vrot.lane.b32.xlu0 %v12550_v13, %s10408_s28  ;;  %v14217_v41 = vmov 0  ;;  %v14219_v7 = vmov 0 }
 0x9ba   : > { %vm12858_vm7 = vmand %vm14031_vm15, %vm14042_vm1  ;;  %vm14037_vm15 = vsmask.f32 3328  ;;  %v7299_v57 = vld [vmem:[#allocation2] sm:$0x10]  ;;  %v6385_v2 = vld [vmem:[#allocation2] sm:$0x1] }
 0x9bb   : > { %v14208_v32 = vsel %vm12858_vm7, 4294967295, %v14207_v32  ;;  %vm12868_vm14 = vmand %vm14032_vm0, %vm14033_vm6  ;;  %vm14038_vm0 = vcmask 258180   ;;  %v14221_v63 = vmov 0  ;;  %vm14054_vm1 = vsmask.f32 7942 }
 0x9bc   : > { %v14210_v37 = vsel %vm12868_vm14, 4294967295, %v14209_v37  ;;  %vm12882_vm6 = vmand %vm14036_vm11, %vm14037_vm15  ;;  %vm14039_vm11 = vcmask 259205  }
 0x9bd   : > { %7323 = vrot.lane.b32.xlu1 %v12550_v13, %s10403_s24  ;;  %6743 = vrot.lane.b32.xlu0 %v12596_v60, %s10407_s27  ;;  %14211 = vst [vmem:[#allocation11_spill] sm:$0xff] %v14210_v37  ;;  %v14213_v20 = vsel %vm12882_vm6, 4294967295, %v14212_v20  ;;  %vm12888_vm8 = vmand %vm14038_vm0, %vm7174_vm4  ;;  %vm14040_vm4 = vcmask 255105  }
 0x9be   : > { %14214 = vst [vmem:[#allocation12_spill] sm:$0xff] %v14213_v20  ;;  %v14216_v43 = vsel %vm12888_vm8, 4294967295, %v14215_v43  ;;  %vm12900_vm15 = vmand %vm14041_vm2, %vm610_vm3  ;;  %vm14052_vm2 = vsmask.f32 6400 }
 0x9bf   : > { %v14218_v41 = vsel %vm12900_vm15, 4294967295, %v14217_v41  ;;  %vm12908_vm0 = vmand %vm14039_vm11, %vm7431_vm12  ;;  %vm14047_vm12 = vsmask.f32 7938 }
 0x9c0   : > { %v14220_v7 = vsel %vm12908_vm0, 4294967295, %v14219_v7  ;;  %vm12920_vm3 = vmand %vm14040_vm4, %vm6517_vm9  ;;  %vm14048_vm9 = vcmask 261255   ;;  %vm14051_vm4 = vcmask 129030  }
 0x9c1   : > { %7507 = vrot.lane.b32.xlu1 %v12550_v13, %s10407_s27  ;;  %6943 = vrot.lane.b32.xlu0 %v12596_v60, %s10405_s25  ;;  %v14222_v63 = vsel %vm12920_vm3, 4294967295, %v14221_v63  ;;  %vm12934_vm11 = vmand %vm6260_vm5, %vm14047_vm12  ;;  %vm14053_vm5 = vsmask.f32 7954 }
 0x9c2   : > { %vm12957_vm12 = vmand %vm14051_vm4, %vm14052_vm2  ;;  %vm14233_vm4 = vcmask 126980  }
 0x9c3   : > { %vm12971_vm2 = vmand %vm14233_vm4, %vm14053_vm5  ;;  %vm14236_vm4 = vsmask.f32 2304 }
 0x9c5   : > { %7707 = vrot.lane.b32.xlu1 %v12550_v13, %s10405_s25  ;;  %7557 = vrot.lane.b32.xlu0 %v12629_v24, %s10406_s26 }
 0x9c9   : > { %7906 = vrot.lane.b32.xlu1 %v12550_v13, %s10397_s21  ;;  %7757 = vrot.lane.b32.xlu0 %v12629_v24, %s10408_s28  ;;  %v14202_v13 = vmov 0 }
 0x9ca   : > { %v14203_v13 = vsel %vm12834_vm10, 4294967295, %v14202_v13 }
 0x9cb   : > { %14204 = vst [vmem:[#allocation10_spill] sm:$0xff] %v14203_v13 }
 0x9cd   : > { %6843 = vrot.lane.b32.xlu1 %v12596_v60, %s10408_s28  ;;  %7956 = vrot.lane.b32.xlu0 %v12629_v24, %s10402_s12 }
 0x9d1   : > { %7043 = vrot.lane.b32.xlu1 %v12596_v60, %s10402_s12  ;;  %6413 = vrot.lane.b32.xlu0 %v12543_v36, %s10403_s24 }
 0x9d5   : > { %6411 = vrot.lane.b32.xlu1 %v12536_v30, %s10403_s24  ;;  %6417 = vrot.lane.b32.xlu0 %v12558_v46, %s10403_s24 }
 0x9d9   : > { %6494 = vrot.lane.b32.xlu1 %v12536_v30, %s10406_s26  ;;  %6496 = vrot.lane.b32.xlu0 %v12543_v36, %s10406_s26 }
 0x9dd   : > { %6595 = vrot.lane.b32.xlu1 %v12536_v30, %s10407_s27  ;;  %6500 = vrot.lane.b32.xlu0 %v12558_v46, %s10406_s26 }
 0x9e1   : > { %6694 = vrot.lane.b32.xlu1 %v12536_v30, %s10408_s28  ;;  %6597 = vrot.lane.b32.xlu0 %v12543_v36, %s10407_s27 }
 0x9e5   : > { %6995 = vrot.lane.b32.xlu1 %v12536_v30, %s10397_s21  ;;  %6601 = vrot.lane.b32.xlu0 %v12558_v46, %s10407_s27 }
 0x9e9   : > { %6797 = vrot.lane.b32.xlu1 %v12543_v36, %s10405_s25  ;;  %6696 = vrot.lane.b32.xlu0 %v12543_v36, %s10408_s28 }
 0x9ed   : > { %6997 = vrot.lane.b32.xlu1 %v12543_v36, %s10397_s21  ;;  %6700 = vrot.lane.b32.xlu0 %v12558_v46, %s10408_s28 }
 0x9f1   : > { %6801 = vrot.lane.b32.xlu1 %v12558_v46, %s10405_s25  ;;  %6894 = vrot.lane.b32.xlu0 %v12536_v30, %s10402_s12 }
 0x9f5   : > { %7001 = vrot.lane.b32.xlu1 %v12558_v46, %s10397_s21  ;;  %6896 = vrot.lane.b32.xlu0 %v12543_v36, %s10402_s12 }
 0x9f9   : > { %6361 = vrot.lane.b32.xlu1 %v12602_v5, %s10397_s21  ;;  %6900 = vrot.lane.b32.xlu0 %v12558_v46, %s10402_s12  ;;  %v6519_v46 = vld [vmem:[#allocation2] sm:$0x2] }
 0x9fd   : > { %6545 = vrot.lane.b32.xlu1 %v12602_v5, %s10403_s24  ;;  %6795 = vrot.lane.b32.xlu0 %v12536_v30, %s10405_s25 }
 0xa01   : > { %6645 = vrot.lane.b32.xlu1 %v12602_v5, %s10406_s26  ;;  %6363 = vrot.lane.b32.xlu0 %v12599_v56, %s10397_s21 }
 0xa05   : > { %7408 = vrot.lane.b32.xlu1 %v12582_v45, %s10406_s26  ;;  %6367 = vrot.lane.b32.xlu0 %v12608_v22, %s10397_s21 }
 0xa09   : > { %7808 = vrot.lane.b32.xlu1 %v12582_v45, %s10402_s12  ;;  %6547 = vrot.lane.b32.xlu0 %v12599_v56, %s10403_s24 }
 0xa0b   : > { %v12824_v36 = vpop.permute.xlu1 %6793  ;;  %v12826_v30 = vpop.permute.xlu0 %6409 }
 0xa0d   : > { %7410 = vrot.lane.b32.xlu1 %v12585_v61, %s10406_s26  ;;  %6551 = vrot.lane.b32.xlu0 %v12608_v22, %s10403_s24 }
 0xa0f   : > { %v12838_v34 = vpop.permute.xlu1 %6993  ;;  %v6493_v19 = vpop.permute.xlu0 %6492 }
 0xa10   : > { %v6520_v38 = vsel %vm12834_vm10, %v6493_v19, %v6519_v46 }
 0xa11   : > { %7810 = vrot.lane.b32.xlu1 %v12585_v61, %s10402_s12  ;;  %6521 = vst [vmem:[#allocation2] sm:$0x2] %v6520_v38  ;;  %6647 = vrot.lane.b32.xlu0 %v12599_v56, %s10406_s26 }
 0xa13   : > { %v7407_v15 = vpop.permute.xlu1 %7406  ;;  %v12854_v21 = vpop.permute.xlu0 %6593 }
 0xa14   : > { %v7434_v26 = vsel %vm12844_vm13, %v7407_v15, %v7433_v4  ;;  %v14223_v4 = vmov 0  ;;  %vm14071_vm13 = vcmask 260230  }
 0xa15   : > { %7435 = vst [vmem:[#allocation2] sm:$0x20] %v7434_v26  ;;  %6945 = vrot.lane.b32.xlu1 %v12602_v5, %s10405_s25  ;;  %6651 = vrot.lane.b32.xlu0 %v12608_v22, %s10406_s26  ;;  %v14224_v4 = vsel %vm12934_vm11, 4294967295, %v14223_v4 }
 0xa17   : > { %v7807_v52 = vpop.permute.xlu1 %7806  ;;  %v6693_v39 = vpop.permute.xlu0 %6692 }
 0xa18   : > { %v7833_v28 = vsel %vm12858_vm7, %v7807_v52, %v7832_v33  ;;  %v6720_v27 = vsel %vm12868_vm14, %v6693_v39, %v6719_v11  ;;  %v6569_v40 = vld [vmem:[#allocation2] sm:$0x2]  ;;  %v14226_v11 = vmov 0  ;;  %v7633_v39 = vld [vmem:[#allocation2] sm:$0x40]  ;;  %vm14063_vm7 = vcmask 256130  }
 0xa19   : > { %7834 = vst [vmem:[#allocation2] sm:$0x80] %v7833_v28  ;;  %7459 = vrot.lane.b32.xlu1 %v12641_v29, %s10403_s24  ;;  %6721 = vst [vmem:[#allocation2] sm:$0x4] %v6720_v27  ;;  %7608 = vrot.lane.b32.xlu0 %v12582_v45, %s10408_s28  ;;  %v14228_v28 = vmov 0  ;;  %v14231_v27 = vmov 0 }
 0xa1a   : > { %v14229_v28 = vsel %vm12957_vm12, 4294967295, %v14228_v28  ;;  %vm12986_vm5 = vmand %vm14063_vm7, %vm14236_vm4  ;;  %vm14243_vm4 = vcmask 128005  }
 0xa1b   : > { %v6893_v1 = vpop.permute.xlu0 %6892 }
 0xa1c   : > { %v6920_v59 = vsel %vm12882_vm6, %v6893_v1, %v6919_v18  ;;  %v7483_v3 = vld [vmem:[#allocation2] sm:$0x20] }
 0xa1d   : > { %7858 = vrot.lane.b32.xlu1 %v12641_v29, %s10405_s25  ;;  %6921 = vst [vmem:[#allocation2] sm:$0x8] %v6920_v59  ;;  %7610 = vrot.lane.b32.xlu0 %v12585_v61, %s10408_s28 }
 0xa1f   : > { %v7274_v55 = vpop.permute.xlu1 %7273  ;;  %v6360_v51 = vpop.permute.xlu0 %6359 }
 0xa20   : > { %v7300_v6 = vsel %vm12888_vm8, %v7274_v55, %v7299_v57  ;;  %v6386_v49 = vsel %vm12900_vm15, %v6360_v51, %v6385_v2  ;;  %vm14225_vm8 = vsmask.f32 7424  ;;  %v14234_v55 = vmov 0 }
 0xa21   : > { %7301 = vst [vmem:[#allocation2] sm:$0x10] %v7300_v6  ;;  %7414 = vrot.lane.b32.xlu1 %v12588_v17, %s10406_s26  ;;  %6387 = vst [vmem:[#allocation2] sm:$0x1] %v6386_v49  ;;  %6745 = vrot.lane.b32.xlu0 %v12602_v5, %s10407_s27  ;;  %v14235_v55 = vsel %vm12971_vm2, 4294967295, %v14234_v55  ;;  %v14237_v6 = vmov 0 }
 0xa22   : > { %v14238_v6 = vsel %vm12986_vm5, 4294967295, %v14237_v6 }
 0xa23   : > { %v7458_v54 = vpop.permute.xlu1 %7457  ;;  %v6544_v46 = vpop.permute.xlu0 %6543 }
 0xa24   : > { %v7484_v19 = vsel %vm12908_vm0, %v7458_v54, %v7483_v3  ;;  %v6570_v38 = vsel %vm12920_vm3, %v6544_v46, %v6569_v40  ;;  %vm12944_vm0 = vmand %vm14048_vm9, %vm14225_vm8  ;;  %vm14230_vm8 = vcmask 123905   ;;  %v6769_v54 = vld [vmem:[#allocation2] sm:$0x4] }
 0xa25   : > { %7485 = vst [vmem:[#allocation2] sm:$0x20] %v7484_v19  ;;  %7814 = vrot.lane.b32.xlu1 %v12588_v17, %s10402_s12  ;;  %6571 = vst [vmem:[#allocation2] sm:$0x2] %v6570_v38  ;;  %7275 = vrot.lane.b32.xlu0 %v12641_v29, %s10397_s21  ;;  %v14227_v11 = vsel %vm12944_vm0, 4294967295, %v14226_v11  ;;  %v14244_v19 = vmov 0 }
 0xa26   : > { %vm12963_vm9 = vmand %vm14230_vm8, %vm14054_vm1  ;;  %vm14064_vm8 = vsmask.f32 7958  ;;  %vm14072_vm1 = vcmask 257155  }
 0xa27   : > { %v12938_v15 = vpop.permute.xlu1 %7657  ;;  %v12940_v26 = vpop.permute.xlu0 %6643  ;;  %v14232_v27 = vsel %vm12963_vm9, 4294967295, %v14231_v27  ;;  %vm13000_vm7 = vmand %vm14243_vm4, %vm14064_vm8  ;;  %vm14249_vm4 = vsmask.f32 6400 }
 0xa28   : > { %v6435_v33 = vld [vmem:[#allocation2] sm:$0x1]  ;;  %v7349_v49 = vld [vmem:[#allocation2] sm:$0x10]  ;;  %v14245_v19 = vsel %vm13000_vm7, 4294967295, %v14244_v19  ;;  %vm13021_vm8 = vmand %vm14071_vm13, %vm14249_vm4  ;;  %vm14257_vm13 = vcmask 258180  }
 0xa29   : > { %v6436_v52 = vsel %vm12934_vm11, %v12826_v30, %v6435_v33  ;;  %7277 = vrot.lane.b32.xlu1 %v12644_v0, %s10397_s21  ;;  %7659 = vrot.lane.b32.xlu0 %v12641_v29, %s10407_s27  ;;  %v7882_v30 = vld [vmem:[#allocation2] sm:$0x80]  ;;  %vm14256_vm4 = vsmask.f32 7954 }
 0xa2a   : > { %6437 = vst [vmem:[#allocation2] sm:$0x1] %v6436_v52  ;;  %v14247_v52 = vmov 0 }
 0xa2b   : > { %v7857_v18 = vpop.permute.xlu1 %7856  ;;  %v7607_v1 = vpop.permute.xlu0 %7606 }
 0xa2c   : > { %v6619_v59 = vld [vmem:[#allocation2] sm:$0x2]  ;;  %v7883_v57 = vsel %vm12944_vm0, %v7857_v18, %v7882_v30  ;;  %v7634_v51 = vsel %vm12957_vm12, %v7607_v1, %v7633_v39  ;;  %vm14239_vm0 = vsmask.f32 7938  ;;  %vm14240_vm12 = vcmask 254080  }
 0xa2d   : > { %v6620_v2 = vsel %vm12963_vm9, %v12854_v21, %v6619_v59  ;;  %7884 = vst [vmem:[#allocation2] sm:$0x80] %v7883_v57  ;;  %7461 = vrot.lane.b32.xlu1 %v12644_v0, %s10403_s24  ;;  %7635 = vst [vmem:[#allocation2] sm:$0x40] %v7634_v51  ;;  %7614 = vrot.lane.b32.xlu0 %v12588_v17, %s10408_s28  ;;  %v14241_v21 = vmov 0  ;;  %v14250_v30 = vmov 0 }
 0xa2e   : > { %6621 = vst [vmem:[#allocation2] sm:$0x2] %v6620_v2  ;;  %vm12992_vm9 = vmand %vm14240_vm12, %vm14239_vm0  ;;  %vm14246_vm0 = vsmask.f32 3328  ;;  %v14251_v30 = vsel %vm13021_vm8, 4294967295, %v14250_v30  ;;  %v14254_v18 = vmov 0 }
 0xa2f   : > { %v14242_v21 = vsel %vm12992_vm9, 4294967295, %v14241_v21  ;;  %v7324_v3 = vpop.permute.xlu1 %7323  ;;  %v6744_v40 = vpop.permute.xlu0 %6743  ;;  %vm13012_vm12 = vmand %vm14072_vm1, %vm14246_vm0  ;;  %v7533_v1 = vld [vmem:[#allocation2] sm:$0x20]  ;;  %vm14079_vm0 = vsmask.f32 7946 }
 0xa30   : > { %v7350_v46 = vsel %vm12971_vm2, %v7324_v3, %v7349_v49  ;;  %v6770_v38 = vsel %vm12986_vm5, %v6744_v40, %v6769_v54  ;;  %v14248_v52 = vsel %vm13012_vm12, 4294967295, %v14247_v52  ;;  %vm14252_vm2 = vsmask.f32 7942  ;;  %v6969_v57 = vld [vmem:[#allocation2] sm:$0x8]  ;;  %vm13037_vm1 = vmand %vm14257_vm13, %vm14256_vm4 }
 0xa31   : > { %v6468_v33 = vld [vmem:[#allocation2] sm:$0x1]  ;;  %7351 = vst [vmem:[#allocation2] sm:$0x10] %v7350_v46  ;;  %7661 = vrot.lane.b32.xlu1 %v12644_v0, %s10407_s27  ;;  %6771 = vst [vmem:[#allocation2] sm:$0x4] %v6770_v38  ;;  %6747 = vrot.lane.b32.xlu0 %v12599_v56, %s10407_s27 }
 0xa32   : > { %v6469_v39 = vsel %vm12992_vm9, %v12596_v60, %v6468_v33  ;;  %vm14253_vm5 = vcmask 255105   ;;  %v14258_v54 = vmov 0  ;;  %vm14260_vm13 = vcmask 124930  }
 0xa33   : > { %6470 = vst [vmem:[#allocation2] sm:$0x1] %v6469_v39  ;;  %vm13027_vm11 = vmand %vm14253_vm5, %vm14252_vm2  ;;  %v7508_v59 = vpop.permute.xlu1 %7507  ;;  %v6944_v51 = vpop.permute.xlu0 %6943  ;;  %v14259_v54 = vsel %vm13037_vm1, 4294967295, %v14258_v54  ;;  %v14261_v38 = vmov 0  ;;  %vm7930_vm4 = vsmask.f32 7966 }
 0xa34   : > { %v14255_v18 = vsel %vm13027_vm11, 4294967295, %v14254_v18  ;;  %v7683_v2 = vld [vmem:[#allocation2] sm:$0x40]  ;;  %v7534_v60 = vsel %vm13000_vm7, %v7508_v59, %v7533_v1  ;;  %v6970_v49 = vsel %vm13012_vm12, %v6944_v51, %v6969_v57  ;;  %vm13053_vm5 = vmand %vm14260_vm13, %vm14079_vm0  ;;  %vm14263_vm7 = vsmask.f32 7950 }
 0xa35   : > { %v6668_v3 = vld [vmem:[#allocation2] sm:$0x2]  ;;  %v7684_v40 = vsel %vm13021_vm8, %v12938_v15, %v7683_v2  ;;  %7535 = vst [vmem:[#allocation2] sm:$0x20] %v7534_v60  ;;  %7860 = vrot.lane.b32.xlu1 %v12644_v0, %s10405_s25  ;;  %6971 = vst [vmem:[#allocation2] sm:$0x8] %v6970_v49  ;;  %6947 = vrot.lane.b32.xlu0 %v12599_v56, %s10405_s25 }
 0xa36   : > { %v6669_v46 = vsel %vm13027_vm11, %v12940_v26, %v6668_v3  ;;  %7685 = vst [vmem:[#allocation2] sm:$0x40] %v7684_v40  ;;  %v14262_v38 = vsel %vm13053_vm5, 4294967295, %v14261_v38  ;;  %vm14264_vm8 = vcmask 125955   ;;  %v14265_v59 = vmov 0 }
 0xa37   : > { %6670 = vst [vmem:[#allocation2] sm:$0x2] %v6669_v46  ;;  %v7708_v15 = vpop.permute.xlu1 %7707  ;;  %v7558_v33 = vpop.permute.xlu0 %7557  ;;  %vm13059_vm12 = vmand %vm14264_vm8, %vm14263_vm7  ;;  %vm14267_vm13 = vcmask 130055   ;;  %v14268_v51 = vmov 0  ;;  %vm14270_vm7 = vsmask.f32 7958 }
 0xa38   : > { %v7382_v39 = vld [vmem:[#allocation2] sm:$0x10]  ;;  %v6819_v1 = vld [vmem:[#allocation2] sm:$0x4]  ;;  %v14266_v59 = vsel %vm13059_vm12, 4294967295, %v14265_v59  ;;  %vm13073_vm0 = vmand %vm14267_vm13, %vm7930_vm4  ;;  %vm14271_vm8 = vcmask 259205  }
 0xa39   : > { %v7383_v26 = vsel %vm13037_vm1, %v12629_v24, %v7382_v39  ;;  %v6820_v57 = vsel %vm13053_vm5, %v12824_v36, %v6819_v1  ;;  %7509 = vrot.lane.b32.xlu1 %v12582_v45, %s10407_s27  ;;  %v14269_v51 = vsel %vm13073_vm0, 4294967295, %v14268_v51  ;;  %7325 = vrot.lane.b32.xlu0 %v12582_v45, %s10403_s24  ;;  %vm13081_vm2 = vmand %vm14271_vm8, %vm14270_vm7  ;;  %v14272_v24 = vmov 0  ;;  %v7932_v2 = vld [vmem:[#allocation2] sm:$0x80] }
 0xa3a   : > { %7384 = vst [vmem:[#allocation2] sm:$0x10] %v7383_v26  ;;  %6821 = vst [vmem:[#allocation2] sm:$0x4] %v6820_v57  ;;  %v14273_v24 = vsel %vm13081_vm2, 4294967295, %v14272_v24  ;;  %vm14275_vm5 = vcmask 129030  }
 0xa3b   : > { %vm14274_vm1 = vsmask.f32 7962  ;;  %v14276_v36 = vmov 0  ;;  %v7907_v60 = vpop.permute.xlu1 %7906  ;;  %v7758_v49 = vpop.permute.xlu0 %7757  ;;  %vm14283_vm7 = vcmask 261255  }
 0xa3c   : > { %vm13087_vm11 = vmand %vm14275_vm5, %vm14274_vm1  ;;  %v7019_v3 = vld [vmem:[#allocation2] sm:$0x8]  ;;  %v7933_v40 = vsel %vm13073_vm0, %v7907_v60, %v7932_v2  ;;  %v7582_v46 = vld [vmem:[#allocation2] sm:$0x20]  ;;  %vm14278_vm1 = vsmask.f32 7946 }
 0xa3d   : > { %v14277_v36 = vsel %vm13087_vm11, 4294967295, %v14276_v36  ;;  %v7733_v39 = vld [vmem:[#allocation2] sm:$0x40]  ;;  %v7020_v1 = vsel %vm13059_vm12, %v12838_v34, %v7019_v3  ;;  %7934 = vst [vmem:[#allocation2] sm:$0x80] %v7933_v40  ;;  %v7583_v26 = vsel %vm13081_vm2, %v7558_v33, %v7582_v46  ;;  %7908 = vrot.lane.b32.xlu1 %v12582_v45, %s10397_s21  ;;  %7709 = vrot.lane.b32.xlu0 %v12582_v45, %s10405_s25  ;;  %vm14279_vm5 = vcmask 256130   ;;  %vm13118_vm8 = vmand %vm14283_vm7, %vm7930_vm4 }
 0xa3e   : > { %v7734_v57 = vsel %vm13087_vm11, %v7708_v15, %v7733_v39  ;;  %7021 = vst [vmem:[#allocation2] sm:$0x8] %v7020_v1  ;;  %7584 = vst [vmem:[#allocation2] sm:$0x20] %v7583_v26  ;;  %v14280_v34 = vmov 0  ;;  %v14284_v15 = vmov 0  ;;  %vm14297_vm4 = vnez %v14206_v31 }
 0xa3f   : > { %7735 = vst [vmem:[#allocation2] sm:$0x40] %v7734_v57  ;;  %vm13106_vm13 = vmand %vm14279_vm5, %vm14278_vm1  ;;  %v6844_v2 = vpop.permute.xlu1 %6843  ;;  %v7957_v33 = vpop.permute.xlu0 %7956  ;;  %v14285_v15 = vsel %vm13118_vm8, 4294967295, %v14284_v15  ;;  %vm14287_vm1 = vsmask.f32 7950  ;;  %vm14288_vm5 = vcmask 257155   ;;  %vm14298_vm7 = vnez %v14232_v27 }
 0xa40   : > { %v14281_v34 = vsel %vm13106_vm13, 4294967295, %v14280_v34  ;;  %14286 = vst [vmem:[#allocation14_spill] sm:$0xff] %v14285_v15  ;;  %vm13124_vm2 = vmand %vm14288_vm5, %vm14287_vm1  ;;  %v14289_v3 = vmov 0  ;;  %vm14291_vm11 = vsmask.f32 7962  ;;  %vm14292_vm0 = vcmask 260230  }
 0xa41   : > { %14282 = vst [vmem:[#allocation13_spill] sm:$0xff] %v14281_v34  ;;  %v6868_v60 = vld [vmem:[#allocation2] sm:$0x4]  ;;  %7281 = vrot.lane.b32.xlu1 %v12647_v12, %s10397_s21  ;;  %6751 = vrot.lane.b32.xlu0 %v12608_v22, %s10407_s27  ;;  %v14290_v3 = vsel %vm13124_vm2, 4294967295, %v14289_v3  ;;  %vm13132_vm12 = vmand %vm14292_vm0, %vm14291_vm11  ;;  %v14293_v39 = vmov 0  ;;  %vm14295_vm11 = vcmask 261120   ;;  %vm14296_vm0 = vnez %v14224_v4 }
 0xa42   : > { %v6869_v45 = vsel %vm13106_vm13, %v6844_v2, %v6868_v60  ;;  %v14294_v39 = vsel %vm13132_vm12, 4294967295, %v14293_v39  ;;  %vm14299_vm1 = vnez %v14208_v32  ;;  %vm14300_vm5 = vnez %v14255_v18 }
 0xa43   : > { %6870 = vst [vmem:[#allocation2] sm:$0x4] %v6869_v45  ;;  %v7044_v40 = vpop.permute.xlu1 %7043  ;;  %v13128_v46 = vpop.permute.xlu0 %6413 }
 0xa44   : > { %v7981_v1 = vld [vmem:[#allocation2] sm:$0x80] }
 0xa45   : > { %v7068_v26 = vld [vmem:[#allocation2] sm:$0x8]  ;;  %v7982_v57 = vsel %vm13118_vm8, %v7957_v33, %v7981_v1  ;;  %7465 = vrot.lane.b32.xlu1 %v12647_v12, %s10403_s24  ;;  %6951 = vrot.lane.b32.xlu0 %v12608_v22, %s10405_s25  ;;  %v6522_v33 = vld [vmem:[#allocation2 + $0x8] sm:$0x2]  ;;  %v6525_v1 = vld [vmem:[#allocation2 + $0x10] sm:$0x2]  ;;  %vm14314_vm8 = vnez %v14259_v54 }
 0xa46   : > { %v7782_v2 = vld [vmem:[#allocation2] sm:$0x40]  ;;  %v7069_v60 = vsel %vm13124_vm2, %v7044_v40, %v7068_v26  ;;  %7983 = vst [vmem:[#allocation2] sm:$0x80] %v7982_v57  ;;  %v6531_v57 = vld [vmem:[#allocation2 + $0x20] sm:$0x2] }
 0xa47   : > { %v7783_v45 = vsel %vm13132_vm12, %v7758_v49, %v7782_v2  ;;  %7070 = vst [vmem:[#allocation2] sm:$0x8] %v7069_v60  ;;  %v13146_v50 = vpop.permute.xlu1 %6411  ;;  %v13148_v58 = vpop.permute.xlu0 %6417 }
 0xa48   : > { %7784 = vst [vmem:[#allocation2] sm:$0x40] %v7783_v45 }
 0xa49   : > { %7665 = vrot.lane.b32.xlu1 %v12647_v12, %s10407_s27  ;;  %7045 = vrot.lane.b32.xlu0 %v12602_v5, %s10402_s12 }
 0xa4b   : > { %v6495_v9 = vpop.permute.xlu1 %6494  ;;  %v6497_v40 = vpop.permute.xlu0 %6496 }
 0xa4c   : > { %v6523_v26 = vsel %vm12834_vm10, %v6495_v9, %v6522_v33  ;;  %v6526_v49 = vsel %vm12834_vm10, %v6497_v40, %v6525_v1  ;;  %v6722_v9 = vld [vmem:[#allocation2 + $0x8] sm:$0x4] }
 0xa4d   : > { %6524 = vst [vmem:[#allocation2 + $0x8] sm:$0x2] %v6523_v26  ;;  %7864 = vrot.lane.b32.xlu1 %v12647_v12, %s10405_s25  ;;  %6527 = vst [vmem:[#allocation2 + $0x10] sm:$0x2] %v6526_v49  ;;  %7759 = vrot.lane.b32.xlu0 %v12641_v29, %s10408_s28 }
 0xa4f   : > { %v13162_v2 = vpop.permute.xlu1 %6595  ;;  %v6501_v60 = vpop.permute.xlu0 %6500  ;;  %v8005_v45 = vld [vmem:[#allocation2] sm:$0xff] }
 0xa50   : > { %v6532_v35 = vsel %vm12834_vm10, %v6501_v60, %v6531_v57  ;;  %9761 = vmatprep.mubr.msk.bf16.mxu1 %vm14295_vm11, %v8005_v45  ;;  %vm14301_vm11 = vnez %v14248_v52  ;;  %vm14313_vm10 = vnez %v14277_v36 }
 0xa51   : > { %7327 = vrot.lane.b32.xlu1 %v12585_v61, %s10403_s24  ;;  %6533 = vst [vmem:[#allocation2 + $0x20] sm:$0x2] %v6532_v35  ;;  %7561 = vrot.lane.b32.xlu0 %v12644_v0, %s10406_s26  ;;  %v6725_v35 = vld [vmem:[#allocation2 + $0x10] sm:$0x4] }
 0xa53   : > { %v6695_v33 = vpop.permute.xlu1 %6694  ;;  %v13171_v1 = vpop.permute.xlu0 %6597 }
 0xa54   : > { %v6723_v40 = vsel %vm12868_vm14, %v6695_v33, %v6722_v9  ;;  %v6731_v9 = vld [vmem:[#allocation2 + $0x20] sm:$0x4] }
 0xa55   : > { %6724 = vst [vmem:[#allocation2 + $0x8] sm:$0x4] %v6723_v40  ;;  %7511 = vrot.lane.b32.xlu1 %v12585_v61, %s10407_s27  ;;  %7761 = vrot.lane.b32.xlu0 %v12644_v0, %s10408_s28  ;;  %v10384_v33 = vld [vmem:[%s14002_s7] sm:$0xff]  }
 0xa56   : > { %9757 = vmatprep.subr.bf16.mxu1 %v10384_v33 }
 0xa57   : > { %v13179_v26 = vpop.permute.xlu1 %6995  ;;  %v13181_v49 = vpop.permute.xlu0 %6601  ;;  %9758 = vmatpush3.bf16.msra.mxu1 %v10384_v33 }
 0xa59   : > { %7711 = vrot.lane.b32.xlu1 %v12585_v61, %s10405_s25  ;;  %7960 = vrot.lane.b32.xlu0 %v12644_v0, %s10402_s12 }
 0xa5b   : > { %v13187_v57 = vpop.permute.xlu1 %6797  ;;  %v6697_v60 = vpop.permute.xlu0 %6696 }
 0xa5c   : > { %v6726_v45 = vsel %vm12868_vm14, %v6697_v60, %v6725_v35 }
 0xa5d   : > { %7910 = vrot.lane.b32.xlu1 %v12585_v61, %s10397_s21  ;;  %6727 = vst [vmem:[#allocation2 + $0x10] sm:$0x4] %v6726_v45  ;;  %7565 = vrot.lane.b32.xlu0 %v12647_v12, %s10406_s26  ;;  %v6922_v61 = vld [vmem:[#allocation2 + $0x8] sm:$0x8] }
 0xa5f   : > { %v13198_v40 = vpop.permute.xlu1 %6997  ;;  %v6701_v53 = vpop.permute.xlu0 %6700 }
 0xa60   : > { %v6732_v13 = vsel %vm12868_vm14, %v6701_v53, %v6731_v9  ;;  %v6925_v53 = vld [vmem:[#allocation2 + $0x10] sm:$0x8]  ;;  %vm14312_vm14 = vnez %v14269_v51 }
 0xa61   : > { %6845 = vrot.lane.b32.xlu1 %v12602_v5, %s10408_s28  ;;  %6733 = vst [vmem:[#allocation2 + $0x20] sm:$0x4] %v6732_v13  ;;  %7765 = vrot.lane.b32.xlu0 %v12647_v12, %s10408_s28 }
 0xa63   : > { %v13206_v35 = vpop.permute.xlu1 %6801  ;;  %v6895_v60 = vpop.permute.xlu0 %6894 }
 0xa64   : > { %v6923_v45 = vsel %vm12882_vm6, %v6895_v60, %v6922_v61  ;;  %v6931_v61 = vld [vmem:[#allocation2 + $0x20] sm:$0x8]  ;;  %v10385_v60 = vld [vmem:[%s14002_s7 + $0x8] sm:$0xff]  }
 0xa65   : > { %7559 = vrot.lane.b32.xlu1 %v12641_v29, %s10406_s26  ;;  %6924 = vst [vmem:[#allocation2 + $0x8] sm:$0x8] %v6923_v45  ;;  %7964 = vrot.lane.b32.xlu0 %v12647_v12, %s10402_s12  ;;  %v6388_v45 = vld [vmem:[#allocation2 + $0x8] sm:$0x1] }
 0xa66   : > { %9759 = vmatprep.subr.bf16.mxu1 %v10385_v60 }
 0xa67   : > { %v13214_v9 = vpop.permute.xlu1 %7001  ;;  %v6897_v13 = vpop.permute.xlu0 %6896  ;;  %9760 = vmatpush3.bf16.msra.mxu1 %v10385_v60 }
 0xa68   : > { %v6926_v33 = vsel %vm12882_vm6, %v6897_v13, %v6925_v53  ;;  %v6572_v13 = vld [vmem:[#allocation2 + $0x8] sm:$0x2] }
 0xa69   : > { %7958 = vrot.lane.b32.xlu1 %v12641_v29, %s10402_s12  ;;  %6927 = vst [vmem:[#allocation2 + $0x10] sm:$0x8] %v6926_v33  ;;  %6421 = vrot.lane.b32.xlu0 %v12564_v47, %s10403_s24 }
 0xa6b   : > { %v6362_v12 = vpop.permute.xlu1 %6361  ;;  %v6901_v37 = vpop.permute.xlu0 %6900 }
 0xa6c   : > { %v6389_v25 = vsel %vm12900_vm15, %v6362_v12, %v6388_v45  ;;  %v6932_v53 = vsel %vm12882_vm6, %v6901_v37, %v6931_v61  ;;  %v6391_v61 = vld [vmem:[#allocation2 + $0x10] sm:$0x1]  ;;  %vm14311_vm6 = vnez %v14235_v55 }
 0xa6d   : > { %6390 = vst [vmem:[#allocation2 + $0x8] sm:$0x1] %v6389_v25  ;;  %7331 = vrot.lane.b32.xlu1 %v12588_v17, %s10403_s24  ;;  %6933 = vst [vmem:[#allocation2 + $0x20] sm:$0x8] %v6932_v53  ;;  %6504 = vrot.lane.b32.xlu0 %v12564_v47, %s10406_s26 }
 0xa6f   : > { %v6546_v33 = vpop.permute.xlu1 %6545  ;;  %v13233_v15 = vpop.permute.xlu0 %6795 }
 0xa70   : > { %v6573_v12 = vsel %vm12920_vm3, %v6546_v33, %v6572_v13  ;;  %v7436_v13 = vld [vmem:[#allocation2 + $0x8] sm:$0x20] }
 0xa71   : > { %6574 = vst [vmem:[#allocation2 + $0x8] sm:$0x2] %v6573_v12  ;;  %7515 = vrot.lane.b32.xlu1 %v12588_v17, %s10407_s27  ;;  %6605 = vrot.lane.b32.xlu0 %v12564_v47, %s10407_s27  ;;  %v6397_v12 = vld [vmem:[#allocation2 + $0x20] sm:$0x1] }
 0xa73   : > { %v6646_v25 = vpop.permute.xlu1 %6645  ;;  %v6364_v37 = vpop.permute.xlu0 %6363 }
 0xa74   : > { %v6438_v45 = vld [vmem:[#allocation2 + $0x8] sm:$0x1]  ;;  %v6392_v60 = vsel %vm12900_vm15, %v6364_v37, %v6391_v61 }
 0xa75   : > { %v6439_v53 = vsel %vm14296_vm0, %v13146_v50, %v6438_v45  ;;  %7715 = vrot.lane.b32.xlu1 %v12588_v17, %s10405_s25  ;;  %6393 = vst [vmem:[#allocation2 + $0x10] sm:$0x1] %v6392_v60  ;;  %6704 = vrot.lane.b32.xlu0 %v12564_v47, %s10408_s28  ;;  %v7835_v45 = vld [vmem:[#allocation2 + $0x8] sm:$0x80] }
 0xa76   : > { %6440 = vst [vmem:[#allocation2 + $0x8] sm:$0x1] %v6439_v53  ;;  %v6575_v53 = vld [vmem:[#allocation2 + $0x10] sm:$0x2] }
 0xa77   : > { %v7409_v33 = vpop.permute.xlu1 %7408  ;;  %v6368_v20 = vpop.permute.xlu0 %6367 }
 0xa78   : > { %v6622_v34 = vld [vmem:[#allocation2 + $0x8] sm:$0x2]  ;;  %v7437_v37 = vsel %vm14297_vm4, %v7409_v33, %v7436_v13  ;;  %v6398_v61 = vsel %vm12900_vm15, %v6368_v20, %v6397_v12  ;;  %v7439_v12 = vld [vmem:[#allocation2 + $0x10] sm:$0x20]  ;;  %vm14306_vm15 = vnez %v14238_v6 }
 0xa79   : > { %v6623_v50 = vsel %vm14298_vm7, %v13162_v2, %v6622_v34  ;;  %7438 = vst [vmem:[#allocation2 + $0x8] sm:$0x20] %v7437_v37  ;;  %7914 = vrot.lane.b32.xlu1 %v12588_v17, %s10397_s21  ;;  %6399 = vst [vmem:[#allocation2 + $0x20] sm:$0x1] %v6398_v61  ;;  %6904 = vrot.lane.b32.xlu0 %v12564_v47, %s10402_s12 }
 0xa7a   : > { %6624 = vst [vmem:[#allocation2 + $0x8] sm:$0x2] %v6623_v50  ;;  %v6581_v50 = vld [vmem:[#allocation2 + $0x20] sm:$0x2] }
 0xa7b   : > { %v7809_v60 = vpop.permute.xlu1 %7808  ;;  %v6548_v13 = vpop.permute.xlu0 %6547 }
 0xa7c   : > { %v6441_v33 = vld [vmem:[#allocation2 + $0x10] sm:$0x1]  ;;  %v7836_v20 = vsel %vm14299_vm1, %v7809_v60, %v7835_v45  ;;  %v6576_v34 = vsel %vm12920_vm3, %v6548_v13, %v6575_v53 }
 0xa7d   : > { %v6471_v2 = vld [vmem:[#allocation2 + $0x8] sm:$0x1]  ;;  %v6442_v17 = vsel %vm14296_vm0, %v13128_v46, %v6441_v33  ;;  %7837 = vst [vmem:[#allocation2 + $0x8] sm:$0x80] %v7836_v20  ;;  %6847 = vrot.lane.b32.xlu1 %v12599_v56, %s10408_s28  ;;  %6577 = vst [vmem:[#allocation2 + $0x10] sm:$0x2] %v6576_v34  ;;  %6799 = vrot.lane.b32.xlu0 %v12555_v14, %s10405_s25 }
 0xa7e   : > { %v6472_v37 = vsel %vm12992_vm9, %v12602_v5, %v6471_v2  ;;  %6443 = vst [vmem:[#allocation2 + $0x10] sm:$0x1] %v6442_v17  ;;  %v7838_v5 = vld [vmem:[#allocation2 + $0x10] sm:$0x80] }
 0xa7f   : > { %6473 = vst [vmem:[#allocation2 + $0x8] sm:$0x1] %v6472_v37  ;;  %v7411_v61 = vpop.permute.xlu1 %7410  ;;  %v6552_v45 = vpop.permute.xlu0 %6551 }
 0xa80   : > { %v6447_v60 = vld [vmem:[#allocation2 + $0x20] sm:$0x1]  ;;  %v7440_v46 = vsel %vm14297_vm4, %v7411_v61, %v7439_v12  ;;  %v6582_v53 = vsel %vm12920_vm3, %v6552_v45, %v6581_v50  ;;  %v6972_v50 = vld [vmem:[#allocation2 + $0x8] sm:$0x8]  ;;  %vm14305_vm3 = vnez %v14266_v59 }
 0xa81   : > { %v6671_v13 = vld [vmem:[#allocation2 + $0x8] sm:$0x2]  ;;  %v6448_v33 = vsel %vm14296_vm0, %v13148_v58, %v6447_v60  ;;  %7441 = vst [vmem:[#allocation2 + $0x10] sm:$0x20] %v7440_v46  ;;  %7047 = vrot.lane.b32.xlu1 %v12599_v56, %s10402_s12  ;;  %6583 = vst [vmem:[#allocation2 + $0x20] sm:$0x2] %v6582_v53  ;;  %6999 = vrot.lane.b32.xlu0 %v12555_v14, %s10397_s21  ;;  %vm14302_vm0 = vnez %v14220_v7 }
 0xa82   : > { %v6672_v20 = vsel %vm14300_vm5, %v6646_v25, %v6671_v13  ;;  %6449 = vst [vmem:[#allocation2 + $0x20] sm:$0x1] %v6448_v33  ;;  %v7486_v33 = vld [vmem:[#allocation2 + $0x8] sm:$0x20] }
 0xa83   : > { %6673 = vst [vmem:[#allocation2 + $0x8] sm:$0x2] %v6672_v20  ;;  %v7811_v34 = vpop.permute.xlu1 %7810  ;;  %v6648_v2 = vpop.permute.xlu0 %6647 }
 0xa84   : > { %v6625_v17 = vld [vmem:[#allocation2 + $0x10] sm:$0x2]  ;;  %v7839_v58 = vsel %vm14299_vm1, %v7811_v34, %v7838_v5 }
 0xa85   : > { %v6474_v12 = vld [vmem:[#allocation2 + $0x10] sm:$0x1]  ;;  %v6626_v37 = vsel %vm14298_vm7, %v13171_v1, %v6625_v17  ;;  %7840 = vst [vmem:[#allocation2 + $0x10] sm:$0x80] %v7839_v58  ;;  %6851 = vrot.lane.b32.xlu1 %v12608_v22, %s10408_s28  ;;  %6803 = vrot.lane.b32.xlu0 %v12561_v8, %s10405_s25 }
 0xa86   : > { %v6475_v25 = vsel %vm12992_vm9, %v12599_v56, %v6474_v12  ;;  %6627 = vst [vmem:[#allocation2 + $0x10] sm:$0x2] %v6626_v37  ;;  %v7636_v56 = vld [vmem:[#allocation2 + $0x8] sm:$0x40]  ;;  %v7885_v12 = vld [vmem:[#allocation2 + $0x8] sm:$0x80] }
 0xa87   : > { %6476 = vst [vmem:[#allocation2 + $0x10] sm:$0x1] %v6475_v25  ;;  %v6946_v61 = vpop.permute.xlu1 %6945  ;;  %v6652_v45 = vpop.permute.xlu0 %6651 }
 0xa88   : > { %v6631_v60 = vld [vmem:[#allocation2 + $0x20] sm:$0x2]  ;;  %v6973_v1 = vsel %vm14301_vm11, %v6946_v61, %v6972_v50 }
 0xa89   : > { %v6480_v46 = vld [vmem:[#allocation2 + $0x20] sm:$0x1]  ;;  %v6632_v53 = vsel %vm14298_vm7, %v13181_v49, %v6631_v60  ;;  %6974 = vst [vmem:[#allocation2 + $0x8] sm:$0x8] %v6973_v1  ;;  %7051 = vrot.lane.b32.xlu1 %v12608_v22, %s10402_s12  ;;  %7003 = vrot.lane.b32.xlu0 %v12561_v8, %s10397_s21  ;;  %vm14303_vm7 = vnez %v14229_v28 }
 0xa8a   : > { %v6481_v13 = vsel %vm12992_vm9, %v12608_v22, %v6480_v46  ;;  %6633 = vst [vmem:[#allocation2 + $0x20] sm:$0x2] %v6632_v53  ;;  %v7639_v22 = vld [vmem:[#allocation2 + $0x10] sm:$0x40]  ;;  %vm14304_vm9 = vnez %v14227_v11 }
 0xa8b   : > { %6482 = vst [vmem:[#allocation2 + $0x20] sm:$0x1] %v6481_v13  ;;  %v7460_v5 = vpop.permute.xlu1 %7459  ;;  %v7609_v20 = vpop.permute.xlu0 %7608  ;;  %v6772_v13 = vld [vmem:[#allocation2 + $0x8] sm:$0x4] }
 0xa8c   : > { %v7487_v49 = vsel %vm14302_vm0, %v7460_v5, %v7486_v33  ;;  %v7637_v34 = vsel %vm14303_vm7, %v7609_v20, %v7636_v56  ;;  %v7844_v20 = vld [vmem:[#allocation2 + $0x20] sm:$0x80] }
 0xa8d   : > { %v6674_v17 = vld [vmem:[#allocation2 + $0x10] sm:$0x2]  ;;  %7488 = vst [vmem:[#allocation2 + $0x8] sm:$0x20] %v7487_v49  ;;  %6415 = vrot.lane.b32.xlu1 %v12555_v14, %s10403_s24  ;;  %7638 = vst [vmem:[#allocation2 + $0x8] sm:$0x40] %v7637_v34  ;;  %6805 = vrot.lane.b32.xlu0 %v12564_v47, %s10405_s25 }
 0xa8e   : > { %v6675_v58 = vsel %vm14300_vm5, %v6648_v2, %v6674_v17  ;;  %v7445_v2 = vld [vmem:[#allocation2 + $0x20] sm:$0x20]  ;;  %v7302_v49 = vld [vmem:[#allocation2 + $0x8] sm:$0x10] }
 0xa8f   : > { %6676 = vst [vmem:[#allocation2 + $0x10] sm:$0x2] %v6675_v58  ;;  %v7859_v37 = vpop.permute.xlu1 %7858  ;;  %v7611_v25 = vpop.permute.xlu0 %7610  ;;  %v7305_v58 = vld [vmem:[#allocation2 + $0x10] sm:$0x10] }
 0xa90   : > { %v7022_v61 = vld [vmem:[#allocation2 + $0x8] sm:$0x8]  ;;  %v7886_v50 = vsel %vm14304_vm9, %v7859_v37, %v7885_v12  ;;  %v7640_v60 = vsel %vm14303_vm7, %v7611_v25, %v7639_v22 }
 0xa91   : > { %v7023_v1 = vsel %vm14305_vm3, %v13179_v26, %v7022_v61  ;;  %v6680_v46 = vld [vmem:[#allocation2 + $0x20] sm:$0x2]  ;;  %7887 = vst [vmem:[#allocation2 + $0x8] sm:$0x80] %v7886_v50  ;;  %6419 = vrot.lane.b32.xlu1 %v12561_v8, %s10403_s24  ;;  %7641 = vst [vmem:[#allocation2 + $0x10] sm:$0x40] %v7640_v60  ;;  %6371 = vrot.lane.b32.xlu0 %v12611_v10, %s10397_s21 }
 0xa92   : > { %7024 = vst [vmem:[#allocation2 + $0x8] sm:$0x8] %v7023_v1  ;;  %v6681_v53 = vsel %vm14300_vm5, %v6652_v45, %v6680_v46  ;;  %vm14307_vm5 = vnez %v14216_v43  ;;  %v7645_v46 = vld [vmem:[#allocation2 + $0x20] sm:$0x40] }
 0xa93   : > { %6682 = vst [vmem:[#allocation2 + $0x20] sm:$0x2] %v6681_v53  ;;  %v7415_v56 = vpop.permute.xlu1 %7414  ;;  %v6746_v33 = vpop.permute.xlu0 %6745 }
 0xa94   : > { %v7446_v26 = vsel %vm14297_vm4, %v7415_v56, %v7445_v2  ;;  %v6773_v5 = vsel %vm14306_vm15, %v6746_v33, %v6772_v13  ;;  %v7686_v37 = vld [vmem:[#allocation2 + $0x8] sm:$0x40]  ;;  %vm14309_vm4 = vnez %v14262_v38  ;;  %v7489_v2 = vld [vmem:[#allocation2 + $0x10] sm:$0x20] }
 0xa95   : > { %7447 = vst [vmem:[#allocation2 + $0x20] sm:$0x20] %v7446_v26  ;;  %6498 = vrot.lane.b32.xlu1 %v12555_v14, %s10406_s26  ;;  %6774 = vst [vmem:[#allocation2 + $0x8] sm:$0x4] %v6773_v5  ;;  %6555 = vrot.lane.b32.xlu0 %v12611_v10, %s10403_s24  ;;  %v6775_v5 = vld [vmem:[#allocation2 + $0x10] sm:$0x4] }
 0xa97   : > { %v7815_v45 = vpop.permute.xlu1 %7814  ;;  %v7276_v34 = vpop.permute.xlu0 %7275 }
 0xa98   : > { %v7845_v17 = vsel %vm14299_vm1, %v7815_v45, %v7844_v20  ;;  %v7303_v22 = vsel %vm14307_vm5, %v7276_v34, %v7302_v49  ;;  %vm14308_vm1 = vnez %v14251_v30  ;;  %v7689_v26 = vld [vmem:[#allocation2 + $0x10] sm:$0x40]  ;;  %v7888_v34 = vld [vmem:[#allocation2 + $0x10] sm:$0x80] }
 0xa99   : > { %7846 = vst [vmem:[#allocation2 + $0x20] sm:$0x80] %v7845_v17  ;;  %6502 = vrot.lane.b32.xlu1 %v12561_v8, %s10406_s26  ;;  %7304 = vst [vmem:[#allocation2 + $0x8] sm:$0x10] %v7303_v22  ;;  %6655 = vrot.lane.b32.xlu0 %v12611_v10, %s10406_s26  ;;  %v6975_v22 = vld [vmem:[#allocation2 + $0x10] sm:$0x8] }
 0xa9b   : > { %v7278_v12 = vpop.permute.xlu1 %7277  ;;  %v7660_v25 = vpop.permute.xlu0 %7659 }
 0xa9c   : > { %v6822_v61 = vld [vmem:[#allocation2 + $0x8] sm:$0x4]  ;;  %v7306_v50 = vsel %vm14307_vm5, %v7278_v12, %v7305_v58  ;;  %v7687_v60 = vsel %vm14308_vm1, %v7660_v25, %v7686_v37  ;;  %v7536_v25 = vld [vmem:[#allocation2 + $0x8] sm:$0x20] }
 0xa9d   : > { %v6823_v1 = vsel %vm14309_vm4, %v13233_v15, %v6822_v61  ;;  %7307 = vst [vmem:[#allocation2 + $0x10] sm:$0x10] %v7306_v50  ;;  %6599 = vrot.lane.b32.xlu1 %v12555_v14, %s10407_s27  ;;  %7688 = vst [vmem:[#allocation2 + $0x8] sm:$0x40] %v7687_v60  ;;  %7412 = vrot.lane.b32.xlu0 %v12668_v44, %s10406_s26 }
 0xa9e   : > { %6824 = vst [vmem:[#allocation2 + $0x8] sm:$0x4] %v6823_v1 }
 0xa9f   : > { %v7462_v53 = vpop.permute.xlu1 %7461  ;;  %v7615_v56 = vpop.permute.xlu0 %7614 }
 0xaa0   : > { %v7490_v13 = vsel %vm14302_vm0, %v7462_v53, %v7489_v2  ;;  %v7646_v33 = vsel %vm14303_vm7, %v7615_v56, %v7645_v46  ;;  %v7352_v50 = vld [vmem:[#allocation2 + $0x8] sm:$0x10]  ;;  %vm14310_vm7 = vnez %v14245_v19  ;;  %v7935_v56 = vld [vmem:[#allocation2 + $0x8] sm:$0x80] }
 0xaa1   : > { %7491 = vst [vmem:[#allocation2 + $0x10] sm:$0x20] %v7490_v13  ;;  %6603 = vrot.lane.b32.xlu1 %v12561_v8, %s10407_s27  ;;  %7647 = vst [vmem:[#allocation2 + $0x20] sm:$0x40] %v7646_v33  ;;  %7612 = vrot.lane.b32.xlu0 %v12668_v44, %s10408_s28 }
 0xaa3   : > { %v7662_v15 = vpop.permute.xlu1 %7661  ;;  %v6748_v20 = vpop.permute.xlu0 %6747 }
 0xaa4   : > { %v7690_v45 = vsel %vm14308_vm1, %v7662_v15, %v7689_v26  ;;  %v6776_v49 = vsel %vm14306_vm15, %v6748_v20, %v6775_v5  ;;  %v7736_v33 = vld [vmem:[#allocation2 + $0x8] sm:$0x40]  ;;  %v7311_v20 = vld [vmem:[#allocation2 + $0x20] sm:$0x10] }
 0xaa5   : > { %7691 = vst [vmem:[#allocation2 + $0x10] sm:$0x40] %v7690_v45  ;;  %6698 = vrot.lane.b32.xlu1 %v12555_v14, %s10408_s28  ;;  %6777 = vst [vmem:[#allocation2 + $0x10] sm:$0x4] %v6776_v49  ;;  %7812 = vrot.lane.b32.xlu0 %v12668_v44, %s10402_s12  ;;  %v6781_v49 = vld [vmem:[#allocation2 + $0x20] sm:$0x4] }
 0xaa7   : > { %v7861_v17 = vpop.permute.xlu1 %7860  ;;  %v6948_v58 = vpop.permute.xlu0 %6947 }
 0xaa8   : > { %v7889_v12 = vsel %vm14304_vm9, %v7861_v17, %v7888_v34  ;;  %v6976_v37 = vsel %vm14301_vm11, %v6948_v58, %v6975_v22  ;;  %v7495_v58 = vld [vmem:[#allocation2 + $0x20] sm:$0x20] }
 0xaa9   : > { %7890 = vst [vmem:[#allocation2 + $0x10] sm:$0x80] %v7889_v12  ;;  %6702 = vrot.lane.b32.xlu1 %v12561_v8, %s10408_s28  ;;  %6977 = vst [vmem:[#allocation2 + $0x10] sm:$0x8] %v6976_v37  ;;  %7416 = vrot.lane.b32.xlu0 %v12672_v62, %s10406_s26  ;;  %v6981_v37 = vld [vmem:[#allocation2 + $0x20] sm:$0x8] }
 0xaab   : > { %v7510_v61 = vpop.permute.xlu1 %7509  ;;  %v7326_v60 = vpop.permute.xlu0 %7325 }
 0xaac   : > { %v6825_v1 = vld [vmem:[#allocation2 + $0x10] sm:$0x4]  ;;  %v7537_v46 = vsel %vm14310_vm7, %v7510_v61, %v7536_v25  ;;  %v7353_v2 = vsel %vm14311_vm6, %v7326_v60, %v7352_v50  ;;  %v7071_v60 = vld [vmem:[#allocation2 + $0x8] sm:$0x8] }
 0xaad   : > { %v6826_v53 = vsel %vm14309_vm4, %v13187_v57, %v6825_v1  ;;  %7538 = vst [vmem:[#allocation2 + $0x8] sm:$0x20] %v7537_v46  ;;  %6898 = vrot.lane.b32.xlu1 %v12555_v14, %s10402_s12  ;;  %7354 = vst [vmem:[#allocation2 + $0x8] sm:$0x10] %v7353_v2  ;;  %7616 = vrot.lane.b32.xlu0 %v12672_v62, %s10408_s28 }
 0xaae   : > { %6827 = vst [vmem:[#allocation2 + $0x10] sm:$0x4] %v6826_v53 }
 0xaaf   : > { %v7909_v13 = vpop.permute.xlu1 %7908  ;;  %v7710_v15 = vpop.permute.xlu0 %7709 }
 0xab0   : > { %v7025_v26 = vld [vmem:[#allocation2 + $0x10] sm:$0x8]  ;;  %v7936_v5 = vsel %vm14312_vm14, %v7909_v13, %v7935_v56  ;;  %v7737_v57 = vsel %vm14313_vm10, %v7710_v15, %v7736_v33  ;;  %v7894_v13 = vld [vmem:[#allocation2 + $0x20] sm:$0x80] }
 0xab1   : > { %v7026_v14 = vsel %vm14305_vm3, %v13198_v40, %v7025_v26  ;;  %7937 = vst [vmem:[#allocation2 + $0x8] sm:$0x80] %v7936_v5  ;;  %6902 = vrot.lane.b32.xlu1 %v12561_v8, %s10402_s12  ;;  %7738 = vst [vmem:[#allocation2 + $0x8] sm:$0x40] %v7737_v57  ;;  %7816 = vrot.lane.b32.xlu0 %v12672_v62, %s10402_s12 }
 0xab2   : > { %7027 = vst [vmem:[#allocation2 + $0x10] sm:$0x8] %v7026_v14 }
 0xab3   : > { %v7282_v45 = vpop.permute.xlu1 %7281  ;;  %v6752_v34 = vpop.permute.xlu0 %6751 }
 0xab4   : > { %v7385_v17 = vld [vmem:[#allocation2 + $0x8] sm:$0x10]  ;;  %v7312_v22 = vsel %vm14307_vm5, %v7282_v45, %v7311_v20  ;;  %v6782_v40 = vsel %vm14306_vm15, %v6752_v34, %v6781_v49  ;;  %v7355_v20 = vld [vmem:[#allocation2 + $0x10] sm:$0x10] }
 0xab5   : > { %v7386_v8 = vsel %vm14314_vm8, %v12641_v29, %v7385_v17  ;;  %7313 = vst [vmem:[#allocation2 + $0x20] sm:$0x10] %v7312_v22  ;;  %7005 = vrot.lane.b32.xlu1 %v12564_v47, %s10397_s21  ;;  %6783 = vst [vmem:[#allocation2 + $0x20] sm:$0x4] %v6782_v40  ;;  %6749 = vrot.lane.b32.xlu0 %v12605_v48, %s10407_s27  ;;  %v7695_v29 = vld [vmem:[#allocation2 + $0x20] sm:$0x40] }
 0xab6   : > { %7387 = vst [vmem:[#allocation2 + $0x8] sm:$0x10] %v7386_v8 }
 0xab7   : > { %v7466_v12 = vpop.permute.xlu1 %7465  ;;  %v6952_v25 = vpop.permute.xlu0 %6951 }
 0xab8   : > { %v7496_v61 = vsel %vm14302_vm0, %v7466_v12, %v7495_v58  ;;  %v6982_v50 = vsel %vm14301_vm11, %v6952_v25, %v6981_v37  ;;  %v7785_v15 = vld [vmem:[#allocation2 + $0x8] sm:$0x40]  ;;  %v7739_v58 = vld [vmem:[#allocation2 + $0x10] sm:$0x40] }
 0xab9   : > { %7497 = vst [vmem:[#allocation2 + $0x20] sm:$0x20] %v7496_v61  ;;  %6365 = vrot.lane.b32.xlu1 %v12605_v48, %s10397_s21  ;;  %6983 = vst [vmem:[#allocation2 + $0x20] sm:$0x8] %v6982_v50  ;;  %6949 = vrot.lane.b32.xlu0 %v12605_v48, %s10405_s25  ;;  %v7938_v50 = vld [vmem:[#allocation2 + $0x10] sm:$0x80] }
 0xabb   : > { %v7666_v47 = vpop.permute.xlu1 %7665  ;;  %v7046_v1 = vpop.permute.xlu0 %7045 }
 0xabc   : > { %v6831_v46 = vld [vmem:[#allocation2 + $0x20] sm:$0x4]  ;;  %v7696_v2 = vsel %vm14308_vm1, %v7666_v47, %v7695_v29  ;;  %v7072_v53 = vsel %vm13124_vm2, %v7046_v1, %v7071_v60 }
 0xabd   : > { %v6832_v56 = vsel %vm14309_vm4, %v13206_v35, %v6831_v46  ;;  %7697 = vst [vmem:[#allocation2 + $0x20] sm:$0x40] %v7696_v2  ;;  %6369 = vrot.lane.b32.xlu1 %v12621_v16, %s10397_s21  ;;  %7073 = vst [vmem:[#allocation2 + $0x8] sm:$0x8] %v7072_v53  ;;  %7279 = vrot.lane.b32.xlu0 %v12654_v42, %s10397_s21  ;;  %v6871_v2 = vld [vmem:[#allocation2 + $0x8] sm:$0x4] }
 0xabe   : > { %6833 = vst [vmem:[#allocation2 + $0x20] sm:$0x4] %v6832_v56 }
 0xabf   : > { %v7865_v33 = vpop.permute.xlu1 %7864  ;;  %v7760_v26 = vpop.permute.xlu0 %7759 }
 0xac0   : > { %v7031_v5 = vld [vmem:[#allocation2 + $0x20] sm:$0x8]  ;;  %v7895_v57 = vsel %vm14304_vm9, %v7865_v33, %v7894_v13  ;;  %v7786_v35 = vsel %vm13132_vm12, %v7760_v26, %v7785_v15  ;;  %vm14315_vm9 = vnez %v14273_v24  ;;  %v14316_v13 = vld [vmem:[#allocation13_spill] sm:$0xff]  ;;  %v7585_v26 = vld [vmem:[#allocation2 + $0x8] sm:$0x20] }
 0xac1   : > { %v7032_v14 = vsel %vm14305_vm3, %v13214_v9, %v7031_v5  ;;  %7896 = vst [vmem:[#allocation2 + $0x20] sm:$0x80] %v7895_v57  ;;  %6549 = vrot.lane.b32.xlu1 %v12605_v48, %s10403_s24  ;;  %7787 = vst [vmem:[#allocation2 + $0x8] sm:$0x40] %v7786_v35  ;;  %7463 = vrot.lane.b32.xlu0 %v12654_v42, %s10403_s24  ;;  %v7539_v9 = vld [vmem:[#allocation2 + $0x10] sm:$0x20] }
 0xac2   : > { %7033 = vst [vmem:[#allocation2 + $0x20] sm:$0x8] %v7032_v14 }
 0xac3   : > { %v7328_v45 = vpop.permute.xlu1 %7327  ;;  %v7562_v49 = vpop.permute.xlu0 %7561 }
 0xac4   : > { %v7356_v34 = vsel %vm14311_vm6, %v7328_v45, %v7355_v20  ;;  %v14317_v20 = vld [vmem:[#allocation14_spill] sm:$0xff] }
 0xac5   : > { %7357 = vst [vmem:[#allocation2 + $0x10] sm:$0x10] %v7356_v34  ;;  %6553 = vrot.lane.b32.xlu1 %v12621_v16, %s10403_s24  ;;  %7663 = vrot.lane.b32.xlu0 %v12654_v42, %s10407_s27  ;;  %vm14318_vm1 = vnez %v14317_v20  ;;  %v7984_v34 = vld [vmem:[#allocation2 + $0x8] sm:$0x80] }
 0xac7   : > { %v7512_v17 = vpop.permute.xlu1 %7511  ;;  %v7762_v22 = vpop.permute.xlu0 %7761 }
 0xac8   : > { %v7540_v40 = vsel %vm14310_vm7, %v7512_v17, %v7539_v9 }
 0xac9   : > { %7541 = vst [vmem:[#allocation2 + $0x10] sm:$0x20] %v7540_v40  ;;  %6649 = vrot.lane.b32.xlu1 %v12605_v48, %s10406_s26  ;;  %7862 = vrot.lane.b32.xlu0 %v12654_v42, %s10405_s25  ;;  %v6537_v40 = vld [vmem:[#allocation2 + $0x30] sm:$0x2] }
 0xacb   : > { %v7712_v8 = vpop.permute.xlu1 %7711  ;;  %v7961_v12 = vpop.permute.xlu0 %7960 }
 0xacc   : > { %v7388_v37 = vld [vmem:[#allocation2 + $0x10] sm:$0x10]  ;;  %v7740_v25 = vsel %vm14313_vm10, %v7712_v8, %v7739_v58  ;;  %v7361_v8 = vld [vmem:[#allocation2 + $0x20] sm:$0x10] }
 0xacd   : > { %v7389_v61 = vsel %vm14314_vm8, %v12644_v0, %v7388_v37  ;;  %7741 = vst [vmem:[#allocation2 + $0x10] sm:$0x40] %v7740_v25  ;;  %6653 = vrot.lane.b32.xlu1 %v12621_v16, %s10406_s26  ;;  %7618 = vrot.lane.b32.xlu0 %v12678_v23, %s10408_s28  ;;  %v14320_v25 = vld [vmem:[#allocation10_spill] sm:$0xff] }
 0xace   : > { %7390 = vst [vmem:[#allocation2 + $0x10] sm:$0x10] %v7389_v61  ;;  %vm14321_vm3 = vnez %v14320_v25 }
 0xacf   : > { %v7911_v47 = vpop.permute.xlu1 %7910  ;;  %v13470_v29 = vpop.permute.xlu0 %7565 }
 0xad0   : > { %v7588_v60 = vld [vmem:[#allocation2 + $0x10] sm:$0x20]  ;;  %v7939_v1 = vsel %vm14312_vm14, %v7911_v47, %v7938_v50  ;;  %v7545_v50 = vld [vmem:[#allocation2 + $0x20] sm:$0x20] }
 0xad1   : > { %v7589_v46 = vsel %vm14315_vm9, %v7562_v49, %v7588_v60  ;;  %7940 = vst [vmem:[#allocation2 + $0x10] sm:$0x80] %v7939_v1  ;;  %7418 = vrot.lane.b32.xlu1 %v12678_v23, %s10406_s26  ;;  %6753 = vrot.lane.b32.xlu0 %v12621_v16, %s10407_s27  ;;  %v14319_v49 = vld [vmem:[#allocation5_spill] sm:$0xff] }
 0xad2   : > { %7590 = vst [vmem:[#allocation2 + $0x10] sm:$0x20] %v7589_v46 }
 0xad3   : > { %v6846_v0 = vpop.permute.xlu1 %6845  ;;  %v13480_v53 = vpop.permute.xlu0 %7765 }
 0xad4   : > { %v7788_v56 = vld [vmem:[#allocation2 + $0x10] sm:$0x40]  ;;  %v6872_v33 = vsel %vm13106_vm13, %v6846_v0, %v6871_v2  ;;  %v6737_v0 = vld [vmem:[#allocation2 + $0x30] sm:$0x4] }
 0xad5   : > { %v7789_v15 = vsel %vm13132_vm12, %v7762_v22, %v7788_v56  ;;  %6873 = vst [vmem:[#allocation2 + $0x8] sm:$0x4] %v6872_v33  ;;  %7818 = vrot.lane.b32.xlu1 %v12678_v23, %s10402_s12  ;;  %6953 = vrot.lane.b32.xlu0 %v12621_v16, %s10405_s25  ;;  %v7745_v56 = vld [vmem:[#allocation2 + $0x20] sm:$0x40] }
 0xad6   : > { %7790 = vst [vmem:[#allocation2 + $0x10] sm:$0x40] %v7789_v15 }
 0xad7   : > { %v7560_v5 = vpop.permute.xlu1 %7559  ;;  %v13490_v57 = vpop.permute.xlu0 %7964 }
 0xad8   : > { %v7987_v35 = vld [vmem:[#allocation2 + $0x10] sm:$0x80]  ;;  %v7586_v14 = vsel %vm14315_vm9, %v7560_v5, %v7585_v26  ;;  %v14323_v5 = vld [vmem:[#allocation11_spill] sm:$0xff] }
 0xad9   : > { %v7988_v45 = vsel %vm14318_vm1, %v7961_v12, %v7987_v35  ;;  %7587 = vst [vmem:[#allocation2 + $0x8] sm:$0x20] %v7586_v14  ;;  %7513 = vrot.lane.b32.xlu1 %v12668_v44, %s10407_s27  ;;  %7283 = vrot.lane.b32.xlu0 %v14319_v49, %s10397_s21  ;;  %v14325_v14 = vld [vmem:[#allocation4_spill] sm:$0xff] }
 0xada   : > { %7989 = vst [vmem:[#allocation2 + $0x10] sm:$0x80] %v7988_v45 }
 0xadb   : > { %v7959_v9 = vpop.permute.xlu1 %7958  ;;  %v13500_v17 = vpop.permute.xlu0 %6421 }
 0xadc   : > { %v7985_v22 = vsel %vm14318_vm1, %v7959_v9, %v7984_v34  ;;  %v14326_v34 = vld [vmem:[#allocation6_spill] sm:$0xff]  ;;  %v6937_v9 = vld [vmem:[#allocation2 + $0x30] sm:$0x8] }
 0xadd   : > { %7986 = vst [vmem:[#allocation2 + $0x8] sm:$0x80] %v7985_v22  ;;  %7713 = vrot.lane.b32.xlu1 %v12668_v44, %s10405_s25  ;;  %7467 = vrot.lane.b32.xlu0 %v14319_v49, %s10403_s24  ;;  %v7944_v22 = vld [vmem:[#allocation2 + $0x20] sm:$0x80] }
 0xadf   : > { %v7332_v58 = vpop.permute.xlu1 %7331  ;;  %v6505_v12 = vpop.permute.xlu0 %6504 }
 0xae0   : > { %v7362_v37 = vsel %vm14311_vm6, %v7332_v58, %v7361_v8  ;;  %v6538_v61 = vsel %vm14321_vm3, %v6505_v12, %v6537_v40  ;;  %vm14322_vm6 = vcmask 261120  }
 0xae1   : > { %7363 = vst [vmem:[#allocation2 + $0x20] sm:$0x10] %v7362_v37  ;;  %7912 = vrot.lane.b32.xlu1 %v12668_v44, %s10397_s21  ;;  %6539 = vst [vmem:[#allocation2 + $0x30] sm:$0x2] %v6538_v61  ;;  %7667 = vrot.lane.b32.xlu0 %v14319_v49, %s10407_s27  ;;  %v14327_v37 = vld [vmem:[#allocation12_spill] sm:$0xff] }
 0xae3   : > { %v7516_v47 = vpop.permute.xlu1 %7515  ;;  %v13516_v60 = vpop.permute.xlu0 %6605 }
 0xae4   : > { %v7546_v1 = vsel %vm14310_vm7, %v7516_v47, %v7545_v50  ;;  %v8006_v46 = vld [vmem:[#allocation2 + $0x8] sm:$0xff]  ;;  %vm14324_vm7 = vnez %v14323_v5  ;;  %v6874_v47 = vld [vmem:[#allocation2 + $0x10] sm:$0x4] }
 0xae5   : > { %7547 = vst [vmem:[#allocation2 + $0x20] sm:$0x20] %v7546_v1  ;;  %9762 = vmatmul.mubr.msk.bf16.vlgmr.msra.gmra.mrb[40].mxu1 %vm14322_vm6, %v8006_v46  ;;  %6955 = vrot.lane.b32.xlu1 %v12611_v10, %s10405_s25  ;;  %vm14328_vm6 = vnez %v14327_v37 }
 0xae6   : > { %7866 = vrot.lane.b32.xlu0 %v14319_v49, %s10405_s25 }
 0xae7   : > { %v7716_v2 = vpop.permute.xlu1 %7715  ;;  %v6705_v33 = vpop.permute.xlu0 %6704 }
 0xae8   : > { %v7394_v15 = vld [vmem:[#allocation2 + $0x20] sm:$0x10]  ;;  %v7746_v26 = vsel %vm14313_vm10, %v7716_v2, %v7745_v56  ;;  %v6738_v35 = vsel %vm14324_vm7, %v6705_v33, %v6737_v0  ;;  %v7074_v56 = vld [vmem:[#allocation2 + $0x10] sm:$0x8]  ;;  %vm14338_vm10 = vnez %v14255_v18 }
 0xae9   : > { %v7395_v45 = vsel %vm14314_vm8, %v14325_v14, %v7394_v15  ;;  %7747 = vst [vmem:[#allocation2 + $0x20] sm:$0x40] %v7746_v26  ;;  %7469 = vrot.lane.b32.xlu1 %v14326_v34, %s10403_s24  ;;  %6739 = vst [vmem:[#allocation2 + $0x30] sm:$0x4] %v6738_v35  ;;  %v6880_v14 = vld [vmem:[#allocation2 + $0x20] sm:$0x4]  ;;  %vm14336_vm8 = vnez %v14242_v21 }
 0xaea   : > { %7396 = vst [vmem:[#allocation2 + $0x20] sm:$0x10] %v7395_v45  ;;  %7329 = vrot.lane.b32.xlu0 %v12668_v44, %s10403_s24 }
 0xaeb   : > { %v7915_v40 = vpop.permute.xlu1 %7914  ;;  %v6905_v8 = vpop.permute.xlu0 %6904 }
 0xaec   : > { %v7594_v58 = vld [vmem:[#allocation2 + $0x20] sm:$0x20]  ;;  %v7945_v12 = vsel %vm14312_vm14, %v7915_v40, %v7944_v22  ;;  %v6938_v61 = vsel %vm14328_vm6, %v6905_v8, %v6937_v9  ;;  %v7080_v22 = vld [vmem:[#allocation2 + $0x20] sm:$0x8]  ;;  %vm14337_vm14 = vnez %v14208_v32 }
 0xaed   : > { %v7595_v50 = vsel %vm14315_vm9, %v13470_v29, %v7594_v58  ;;  %7946 = vst [vmem:[#allocation2 + $0x20] sm:$0x80] %v7945_v12  ;;  %7868 = vrot.lane.b32.xlu1 %v14326_v34, %s10405_s25  ;;  %6939 = vst [vmem:[#allocation2 + $0x30] sm:$0x8] %v6938_v61  ;;  %vm14332_vm9 = vnez %v14224_v4 }
 0xaee   : > { %7596 = vst [vmem:[#allocation2 + $0x20] sm:$0x20] %v7595_v50  ;;  %6755 = vrot.lane.b32.xlu0 %v12611_v10, %s10407_s27 }
 0xaef   : > { %v6848_v44 = vpop.permute.xlu1 %6847  ;;  %v13547_v1 = vpop.permute.xlu0 %6799 }
 0xaf0   : > { %v7794_v46 = vld [vmem:[#allocation2 + $0x20] sm:$0x40]  ;;  %v6875_v0 = vsel %vm13106_vm13, %v6848_v44, %v6874_v47  ;;  %v6403_v44 = vld [vmem:[#allocation2 + $0x30] sm:$0x1] }
 0xaf1   : > { %v7795_v29 = vsel %vm13132_vm12, %v13480_v53, %v7794_v46  ;;  %6876 = vst [vmem:[#allocation2 + $0x10] sm:$0x4] %v6875_v0  ;;  %7517 = vrot.lane.b32.xlu1 %v12672_v62, %s10407_s27  ;;  %v6528_v46 = vld [vmem:[#allocation2 + $0x18] sm:$0x2]  ;;  %vm14331_vm12 = vnez %v14222_v63 }
 0xaf2   : > { %7796 = vst [vmem:[#allocation2 + $0x20] sm:$0x40] %v7795_v29  ;;  %7285 = vrot.lane.b32.xlu0 %v14326_v34, %s10397_s21  ;;  %v6587_v29 = vld [vmem:[#allocation2 + $0x30] sm:$0x2] }
 0xaf3   : > { %v7048_v2 = vpop.permute.xlu1 %7047  ;;  %v13558_v33 = vpop.permute.xlu0 %6999 }
 0xaf4   : > { %v7993_v15 = vld [vmem:[#allocation2 + $0x20] sm:$0x80]  ;;  %v7075_v26 = vsel %vm13124_vm2, %v7048_v2, %v7074_v56 }
 0xaf5   : > { %v7994_v53 = vsel %vm14318_vm1, %v13490_v57, %v7993_v15  ;;  %7076 = vst [vmem:[#allocation2 + $0x10] sm:$0x8] %v7075_v26  ;;  %7717 = vrot.lane.b32.xlu1 %v12672_v62, %s10405_s25  ;;  %vm14329_vm1 = vcmask 261120   ;;  %v6534_v26 = vld [vmem:[#allocation2 + $0x28] sm:$0x2] }
 0xaf6   : > { %7995 = vst [vmem:[#allocation2 + $0x20] sm:$0x80] %v7994_v53  ;;  %7669 = vrot.lane.b32.xlu0 %v14326_v34, %s10407_s27 }
 0xaf7   : > { %v6852_v35 = vpop.permute.xlu1 %6851  ;;  %v13569_v45 = vpop.permute.xlu0 %6803 }
 0xaf8   : > { %v6881_v9 = vsel %vm13106_vm13, %v6852_v35, %v6880_v14  ;;  %vm14335_vm13 = vnez %v14229_v28 }
 0xaf9   : > { %6882 = vst [vmem:[#allocation2 + $0x20] sm:$0x4] %v6881_v9  ;;  %7916 = vrot.lane.b32.xlu1 %v12672_v62, %s10397_s21 }
 0xafa   : > { %7333 = vrot.lane.b32.xlu0 %v12672_v62, %s10403_s24 }
 0xafb   : > { %v7052_v57 = vpop.permute.xlu1 %7051  ;;  %v13577_v40 = vpop.permute.xlu0 %7003 }
 0xafc   : > { %v7081_v8 = vsel %vm13124_vm2, %v7052_v57, %v7080_v22  ;;  %v8007_v58 = vld [vmem:[#allocation2 + $0x10] sm:$0xff]  ;;  %v7442_v22 = vld [vmem:[#allocation2 + $0x18] sm:$0x20]  ;;  %vm14333_vm2 = vnez %v14206_v31 }
 0xafd   : > { %7082 = vst [vmem:[#allocation2 + $0x20] sm:$0x8] %v7081_v8  ;;  %9765 = vmatprep.mubr.msk.bf16.mxu1 %vm14329_vm1, %v8007_v58  ;;  %6849 = vrot.lane.b32.xlu1 %v12605_v48, %s10408_s28  ;;  %vm14330_vm1 = vnez %v14218_v41 }
 0xafe   : > { %7049 = vrot.lane.b32.xlu0 %v12605_v48, %s10402_s12 }
 0xaff   : > { %v13586_v12 = vpop.permute.xlu1 %6415  ;;  %v13588_v62 = vpop.permute.xlu0 %6805 }
 0xb01   : > { %7563 = vrot.lane.b32.xlu1 %v12654_v42, %s10406_s26 }
 0xb02   : > { %7763 = vrot.lane.b32.xlu0 %v12654_v42, %s10408_s28 }
 0xb03   : > { %v13594_v61 = vpop.permute.xlu1 %6419  ;;  %v6372_v50 = vpop.permute.xlu0 %6371 }
 0xb04   : > { %v6404_v47 = vsel %vm14330_vm1, %v6372_v50, %v6403_v44 }
 0xb05   : > { %7962 = vrot.lane.b32.xlu1 %v12654_v42, %s10402_s12  ;;  %6405 = vst [vmem:[#allocation2 + $0x30] sm:$0x1] %v6404_v47 }
 0xb06   : > { %7335 = vrot.lane.b32.xlu0 %v12678_v23, %s10403_s24 }
 0xb07   : > { %v6499_v0 = vpop.permute.xlu1 %6498  ;;  %v6556_v2 = vpop.permute.xlu0 %6555 }
 0xb08   : > { %v6529_v56 = vsel %vm14321_vm3, %v6499_v0, %v6528_v46  ;;  %v6588_v15 = vsel %vm14331_vm12, %v6556_v2, %v6587_v29  ;;  %v7841_v2 = vld [vmem:[#allocation2 + $0x18] sm:$0x80] }
 0xb09   : > { %6530 = vst [vmem:[#allocation2 + $0x18] sm:$0x2] %v6529_v56  ;;  %7519 = vrot.lane.b32.xlu1 %v12678_v23, %s10407_s27  ;;  %6589 = vst [vmem:[#allocation2 + $0x30] sm:$0x2] %v6588_v15 }
 0xb0a   : > { %7719 = vrot.lane.b32.xlu0 %v12678_v23, %s10405_s25 }
 0xb0b   : > { %v6503_v53 = vpop.permute.xlu1 %6502  ;;  %v6656_v35 = vpop.permute.xlu0 %6655 }
 0xb0c   : > { %v6453_v14 = vld [vmem:[#allocation2 + $0x30] sm:$0x1]  ;;  %v6535_v9 = vsel %vm14321_vm3, %v6503_v53, %v6534_v26  ;;  %vm14334_vm3 = vnez %v14232_v27 }
 0xb0d   : > { %v6454_v57 = vsel %vm14332_vm9, %v13500_v17, %v6453_v14  ;;  %6536 = vst [vmem:[#allocation2 + $0x28] sm:$0x2] %v6535_v9  ;;  %7918 = vrot.lane.b32.xlu1 %v12678_v23, %s10397_s21  ;;  %v7642_v23 = vld [vmem:[#allocation2 + $0x18] sm:$0x40] }
 0xb0e   : > { %6455 = vst [vmem:[#allocation2 + $0x30] sm:$0x1] %v6454_v57  ;;  %7053 = vrot.lane.b32.xlu0 %v12621_v16, %s10402_s12  ;;  %v6734_v57 = vld [vmem:[#allocation2 + $0x28] sm:$0x4] }
 0xb0f   : > { %v13619_v8 = vpop.permute.xlu1 %6599  ;;  %v7413_v58 = vpop.permute.xlu0 %7412 }
 0xb10   : > { %v6637_v50 = vld [vmem:[#allocation2 + $0x30] sm:$0x2]  ;;  %v7443_v44 = vsel %vm14333_vm2, %v7413_v58, %v7442_v22  ;;  %v7448_v22 = vld [vmem:[#allocation2 + $0x28] sm:$0x20] }
 0xb11   : > { %v6638_v17 = vsel %vm14334_vm3, %v13516_v60, %v6637_v50  ;;  %6853 = vrot.lane.b32.xlu1 %v12621_v16, %s10408_s28  ;;  %7444 = vst [vmem:[#allocation2 + $0x18] sm:$0x20] %v7443_v44  ;;  %v6728_v60 = vld [vmem:[#allocation2 + $0x18] sm:$0x4]  ;;  %v14339_v50 = vld [vmem:[#allocation7_spill] sm:$0xff] }
 0xb12   : > { %6639 = vst [vmem:[#allocation2 + $0x30] sm:$0x2] %v6638_v17  ;;  %7767 = vrot.lane.b32.xlu0 %v14319_v49, %s10408_s28 }
 0xb13   : > { %v13630_v47 = vpop.permute.xlu1 %6603  ;;  %v7613_v46 = vpop.permute.xlu0 %7612 }
 0xb14   : > { %v7643_v0 = vsel %vm14335_vm13, %v7613_v46, %v7642_v23 }
 0xb15   : > { %v6486_v29 = vld [vmem:[#allocation2 + $0x30] sm:$0x1]  ;;  %7567 = vrot.lane.b32.xlu1 %v14319_v49, %s10406_s26  ;;  %7644 = vst [vmem:[#allocation2 + $0x18] sm:$0x40] %v7643_v0  ;;  %v6928_v0 = vld [vmem:[#allocation2 + $0x18] sm:$0x8] }
 0xb16   : > { %v6487_v56 = vsel %vm14336_vm8, %v12611_v10, %v6486_v29  ;;  %6855 = vrot.lane.b32.xlu0 %v12611_v10, %s10408_s28  ;;  %v7648_v29 = vld [vmem:[#allocation2 + $0x28] sm:$0x40] }
 0xb17   : > { %6488 = vst [vmem:[#allocation2 + $0x30] sm:$0x1] %v6487_v56  ;;  %v6699_v15 = vpop.permute.xlu1 %6698  ;;  %v7813_v26 = vpop.permute.xlu0 %7812 }
 0xb18   : > { %v6729_v53 = vsel %vm14324_vm7, %v6699_v15, %v6728_v60  ;;  %v7842_v14 = vsel %vm14337_vm14, %v7813_v26, %v7841_v2  ;;  %v6934_v15 = vld [vmem:[#allocation2 + $0x28] sm:$0x8] }
 0xb19   : > { %v6686_v9 = vld [vmem:[#allocation2 + $0x30] sm:$0x2]  ;;  %6730 = vst [vmem:[#allocation2 + $0x18] sm:$0x4] %v6729_v53  ;;  %7966 = vrot.lane.b32.xlu1 %v14319_v49, %s10402_s12  ;;  %7843 = vst [vmem:[#allocation2 + $0x18] sm:$0x80] %v7842_v14 }
 0xb1a   : > { %v6687_v58 = vsel %vm14338_vm10, %v6656_v35, %v6686_v9  ;;  %6807 = vrot.lane.b32.xlu0 %v14339_v50, %s10405_s25  ;;  %v14340_v26 = vld [vmem:[#allocation8_spill] sm:$0xff] }
 0xb1b   : > { %6688 = vst [vmem:[#allocation2 + $0x30] sm:$0x2] %v6687_v58  ;;  %v6703_v44 = vpop.permute.xlu1 %6702  ;;  %v7417_v17 = vpop.permute.xlu0 %7416 }
 0xb1c   : > { %v6735_v23 = vsel %vm14324_vm7, %v6703_v44, %v6734_v57  ;;  %v7449_v46 = vsel %vm14333_vm2, %v7417_v17, %v7448_v22 }
 0xb1d   : > { %6736 = vst [vmem:[#allocation2 + $0x28] sm:$0x4] %v6735_v23  ;;  %7055 = vrot.lane.b32.xlu1 %v12611_v10, %s10402_s12  ;;  %7450 = vst [vmem:[#allocation2 + $0x28] sm:$0x20] %v7449_v46  ;;  %v7847_v10 = vld [vmem:[#allocation2 + $0x28] sm:$0x80] }
 0xb1e   : > { %7007 = vrot.lane.b32.xlu0 %v14339_v50, %s10397_s21  ;;  %v6394_v23 = vld [vmem:[#allocation2 + $0x18] sm:$0x1] }
 0xb1f   : > { %v6899_v35 = vpop.permute.xlu1 %6898  ;;  %v7617_v60 = vpop.permute.xlu0 %7616 }
 0xb20   : > { %v6929_v2 = vsel %vm14328_vm6, %v6899_v35, %v6928_v0  ;;  %v7649_v56 = vsel %vm14335_vm13, %v7617_v60, %v7648_v29  ;;  %v6778_v58 = vld [vmem:[#allocation2 + $0x18] sm:$0x4] }
 0xb21   : > { %6930 = vst [vmem:[#allocation2 + $0x18] sm:$0x8] %v6929_v2  ;;  %6423 = vrot.lane.b32.xlu1 %v14339_v50, %s10403_s24  ;;  %7650 = vst [vmem:[#allocation2 + $0x28] sm:$0x40] %v7649_v56  ;;  %v14341_v2 = vld [vmem:[#allocation3_spill] sm:$0xff] }
 0xb22   : > { %7420 = vrot.lane.b32.xlu0 %v14340_v26, %s10406_s26  ;;  %v6400_v56 = vld [vmem:[#allocation2 + $0x28] sm:$0x1] }
 0xb23   : > { %v6903_v53 = vpop.permute.xlu1 %6902  ;;  %v7817_v14 = vpop.permute.xlu0 %7816 }
 0xb24   : > { %v6935_v9 = vsel %vm14328_vm6, %v6903_v53, %v6934_v15  ;;  %v7848_v57 = vsel %vm14337_vm14, %v7817_v14, %v7847_v10  ;;  %v7308_v10 = vld [vmem:[#allocation2 + $0x18] sm:$0x10]  ;;  %vm14344_vm6 = vnez %v14251_v30 }
 0xb25   : > { %6936 = vst [vmem:[#allocation2 + $0x28] sm:$0x8] %v6935_v9  ;;  %6506 = vrot.lane.b32.xlu1 %v14339_v50, %s10406_s26  ;;  %7849 = vst [vmem:[#allocation2 + $0x28] sm:$0x80] %v7848_v57 }
 0xb26   : > { %7620 = vrot.lane.b32.xlu0 %v14340_v26, %s10408_s28 }
 0xb27   : > { %v13675_v22 = vpop.permute.xlu1 %7005  ;;  %v6750_v44 = vpop.permute.xlu0 %6749 }
 0xb28   : > { %v6779_v17 = vsel %vm14306_vm15, %v6750_v44, %v6778_v58  ;;  %v6978_v0 = vld [vmem:[#allocation2 + $0x18] sm:$0x8]  ;;  %v6578_v44 = vld [vmem:[#allocation2 + $0x18] sm:$0x2] }
 0xb29   : > { %6607 = vrot.lane.b32.xlu1 %v14339_v50, %s10407_s27  ;;  %6780 = vst [vmem:[#allocation2 + $0x18] sm:$0x4] %v6779_v17 }
 0xb2a   : > { %7820 = vrot.lane.b32.xlu0 %v14340_v26, %s10402_s12 }
 0xb2b   : > { %v6366_v46 = vpop.permute.xlu1 %6365  ;;  %v6950_v29 = vpop.permute.xlu0 %6949 }
 0xb2c   : > { %v6395_v35 = vsel %vm14330_vm1, %v6366_v46, %v6394_v23  ;;  %v6979_v60 = vsel %vm14301_vm11, %v6950_v29, %v6978_v0  ;;  %v7492_v23 = vld [vmem:[#allocation2 + $0x18] sm:$0x20] }
 0xb2d   : > { %6396 = vst [vmem:[#allocation2 + $0x18] sm:$0x1] %v6395_v35  ;;  %6706 = vrot.lane.b32.xlu1 %v14339_v50, %s10408_s28  ;;  %6980 = vst [vmem:[#allocation2 + $0x18] sm:$0x8] %v6979_v60 }
 0xb2e   : > { %6757 = vrot.lane.b32.xlu0 %v14341_v2, %s10407_s27 }
 0xb2f   : > { %v6370_v15 = vpop.permute.xlu1 %6369  ;;  %v7280_v53 = vpop.permute.xlu0 %7279 }
 0xb30   : > { %v6828_v14 = vld [vmem:[#allocation2 + $0x18] sm:$0x4]  ;;  %v6401_v9 = vsel %vm14330_vm1, %v6370_v15, %v6400_v56  ;;  %v7309_v57 = vsel %vm14307_vm5, %v7280_v53, %v7308_v10  ;;  %vm14342_vm1 = vnez %v14266_v59  ;;  %v14343_v56 = vld [vmem:[#allocation9_spill] sm:$0xff]  ;;  %v6584_v15 = vld [vmem:[#allocation2 + $0x28] sm:$0x2] }
 0xb31   : > { %v6829_v58 = vsel %vm14309_vm4, %v13547_v1, %v6828_v14  ;;  %6402 = vst [vmem:[#allocation2 + $0x28] sm:$0x1] %v6401_v9  ;;  %6906 = vrot.lane.b32.xlu1 %v14339_v50, %s10402_s12  ;;  %7310 = vst [vmem:[#allocation2 + $0x18] sm:$0x10] %v7309_v57  ;;  %v7692_v53 = vld [vmem:[#allocation2 + $0x18] sm:$0x40] }
 0xb32   : > { %6830 = vst [vmem:[#allocation2 + $0x18] sm:$0x4] %v6829_v58  ;;  %6957 = vrot.lane.b32.xlu0 %v14341_v2, %s10405_s25 }
 0xb33   : > { %v6550_v17 = vpop.permute.xlu1 %6549  ;;  %v7464_v46 = vpop.permute.xlu0 %7463 }
 0xb34   : > { %v6444_v0 = vld [vmem:[#allocation2 + $0x18] sm:$0x1]  ;;  %v7028_v29 = vld [vmem:[#allocation2 + $0x18] sm:$0x8]  ;;  %v6579_v35 = vsel %vm14331_vm12, %v6550_v17, %v6578_v44  ;;  %v7493_v1 = vsel %vm14302_vm0, %v7464_v46, %v7492_v23  ;;  %v7891_v44 = vld [vmem:[#allocation2 + $0x18] sm:$0x80] }
 0xb35   : > { %v6445_v50 = vsel %vm14332_vm9, %v13586_v12, %v6444_v0  ;;  %v7029_v60 = vsel %vm14342_vm1, %v13558_v33, %v7028_v29  ;;  %6580 = vst [vmem:[#allocation2 + $0x18] sm:$0x2] %v6579_v35  ;;  %6373 = vrot.lane.b32.xlu1 %v14341_v2, %s10397_s21  ;;  %7494 = vst [vmem:[#allocation2 + $0x18] sm:$0x20] %v7493_v1  ;;  %v7651_v29 = vld [vmem:[#allocation2 + $0x30] sm:$0x40] }
 0xb36   : > { %6446 = vst [vmem:[#allocation2 + $0x18] sm:$0x1] %v6445_v50  ;;  %7030 = vst [vmem:[#allocation2 + $0x18] sm:$0x8] %v7029_v60  ;;  %7287 = vrot.lane.b32.xlu0 %v14343_v56, %s10397_s21 }
 0xb37   : > { %v6554_v10 = vpop.permute.xlu1 %6553  ;;  %v7664_v14 = vpop.permute.xlu0 %7663 }
 0xb38   : > { %v6450_v9 = vld [vmem:[#allocation2 + $0x28] sm:$0x1]  ;;  %v6585_v12 = vsel %vm14331_vm12, %v6554_v10, %v6584_v15  ;;  %v7693_v33 = vsel %vm14344_vm6, %v7664_v14, %v7692_v53  ;;  %vm14345_vm12 = vnez %v14227_v11 }
 0xb39   : > { %v6451_v57 = vsel %vm14332_vm9, %v13594_v61, %v6450_v9  ;;  %6586 = vst [vmem:[#allocation2 + $0x28] sm:$0x2] %v6585_v12  ;;  %6557 = vrot.lane.b32.xlu1 %v14341_v2, %s10403_s24  ;;  %7694 = vst [vmem:[#allocation2 + $0x18] sm:$0x40] %v7693_v33  ;;  %v6784_v9 = vld [vmem:[#allocation2 + $0x28] sm:$0x4]  ;;  %vm14349_vm9 = vnez %v14235_v55 }
 0xb3a   : > { %6452 = vst [vmem:[#allocation2 + $0x28] sm:$0x1] %v6451_v57  ;;  %7471 = vrot.lane.b32.xlu0 %v14343_v56, %s10403_s24 }
 0xb3b   : > { %v6650_v58 = vpop.permute.xlu1 %6649  ;;  %v7863_v17 = vpop.permute.xlu0 %7862 }
 0xb3c   : > { %v6628_v23 = vld [vmem:[#allocation2 + $0x18] sm:$0x2]  ;;  %v7892_v46 = vsel %vm14345_vm12, %v7863_v17, %v7891_v44 }
 0xb3d   : > { %v6477_v0 = vld [vmem:[#allocation2 + $0x18] sm:$0x1]  ;;  %v6629_v61 = vsel %vm14334_vm3, %v13619_v8, %v6628_v23  ;;  %6657 = vrot.lane.b32.xlu1 %v14341_v2, %s10406_s26  ;;  %7893 = vst [vmem:[#allocation2 + $0x18] sm:$0x80] %v7892_v46  ;;  %v6984_v23 = vld [vmem:[#allocation2 + $0x28] sm:$0x8] }
 0xb3e   : > { %v6478_v35 = vsel %vm14336_vm8, %v12605_v48, %v6477_v0  ;;  %6630 = vst [vmem:[#allocation2 + $0x18] sm:$0x2] %v6629_v61  ;;  %7671 = vrot.lane.b32.xlu0 %v14343_v56, %s10407_s27  ;;  %v7451_v48 = vld [vmem:[#allocation2 + $0x30] sm:$0x20] }
 0xb3f   : > { %6479 = vst [vmem:[#allocation2 + $0x18] sm:$0x1] %v6478_v35  ;;  %v6654_v1 = vpop.permute.xlu1 %6653  ;;  %v7619_v50 = vpop.permute.xlu0 %7618 }
 0xb40   : > { %v6634_v60 = vld [vmem:[#allocation2 + $0x28] sm:$0x2]  ;;  %v7652_v8 = vsel %vm14335_vm13, %v7619_v50, %v7651_v29  ;;  %v7542_v50 = vld [vmem:[#allocation2 + $0x18] sm:$0x20] }
 0xb41   : > { %v6483_v15 = vld [vmem:[#allocation2 + $0x28] sm:$0x1]  ;;  %v6635_v10 = vsel %vm14334_vm3, %v13630_v47, %v6634_v60  ;;  %7769 = vrot.lane.b32.xlu1 %v14326_v34, %s10408_s28  ;;  %7653 = vst [vmem:[#allocation2 + $0x30] sm:$0x40] %v7652_v8  ;;  %v7314_v60 = vld [vmem:[#allocation2 + $0x28] sm:$0x10]  ;;  %vm14348_vm3 = vnez %v14269_v51 }
 0xb42   : > { %v6484_v53 = vsel %vm14336_vm8, %v12621_v16, %v6483_v15  ;;  %6636 = vst [vmem:[#allocation2 + $0x28] sm:$0x2] %v6635_v10  ;;  %7870 = vrot.lane.b32.xlu0 %v14343_v56, %s10405_s25  ;;  %v7850_v16 = vld [vmem:[#allocation2 + $0x30] sm:$0x80]  ;;  %vm14346_vm8 = vnez %v14245_v19 }
 0xb43   : > { %6485 = vst [vmem:[#allocation2 + $0x28] sm:$0x1] %v6484_v53  ;;  %v7419_v14 = vpop.permute.xlu1 %7418  ;;  %v6754_v12 = vpop.permute.xlu0 %6753 }
 0xb44   : > { %v7452_v47 = vsel %vm14333_vm2, %v7419_v14, %v7451_v48  ;;  %v6785_v33 = vsel %vm14306_vm15, %v6754_v12, %v6784_v9  ;;  %v7742_v14 = vld [vmem:[#allocation2 + $0x18] sm:$0x40]  ;;  %v7498_v9 = vld [vmem:[#allocation2 + $0x28] sm:$0x20] }
 0xb45   : > { %v6677_v57 = vld [vmem:[#allocation2 + $0x18] sm:$0x2]  ;;  %7453 = vst [vmem:[#allocation2 + $0x30] sm:$0x20] %v7452_v47  ;;  %7521 = vrot.lane.b32.xlu1 %v14340_v26, %s10407_s27  ;;  %6786 = vst [vmem:[#allocation2 + $0x28] sm:$0x4] %v6785_v33 }
 0xb46   : > { %v6678_v44 = vsel %vm14338_vm10, %v6650_v58, %v6677_v57  ;;  %7569 = vrot.lane.b32.xlu0 %v14326_v34, %s10406_s26 }
 0xb47   : > { %6679 = vst [vmem:[#allocation2 + $0x18] sm:$0x2] %v6678_v44  ;;  %v7819_v17 = vpop.permute.xlu1 %7818  ;;  %v6954_v46 = vpop.permute.xlu0 %6953  ;;  %v7698_v44 = vld [vmem:[#allocation2 + $0x28] sm:$0x40] }
 0xb48   : > { %v7851_v0 = vsel %vm14337_vm14, %v7819_v17, %v7850_v16  ;;  %v6985_v61 = vsel %vm14301_vm11, %v6954_v46, %v6984_v23  ;;  %v7941_v16 = vld [vmem:[#allocation2 + $0x18] sm:$0x80] }
 0xb49   : > { %v6683_v29 = vld [vmem:[#allocation2 + $0x28] sm:$0x2]  ;;  %7852 = vst [vmem:[#allocation2 + $0x30] sm:$0x80] %v7851_v0  ;;  %7721 = vrot.lane.b32.xlu1 %v14340_v26, %s10405_s25  ;;  %6986 = vst [vmem:[#allocation2 + $0x28] sm:$0x8] %v6985_v61 }
 0xb4a   : > { %v6684_v58 = vsel %vm14338_vm10, %v6654_v1, %v6683_v29  ;;  %7337 = vrot.lane.b32.xlu0 %v14340_v26, %s10403_s24  ;;  %vm14347_vm10 = vnez %v14277_v36  ;;  %v6987_v0 = vld [vmem:[#allocation2 + $0x30] sm:$0x8]  ;;  %v7897_v29 = vld [vmem:[#allocation2 + $0x28] sm:$0x80] }
 0xb4b   : > { %6685 = vst [vmem:[#allocation2 + $0x28] sm:$0x2] %v6684_v58  ;;  %v7514_v35 = vpop.permute.xlu1 %7513  ;;  %v7284_v8 = vpop.permute.xlu0 %7283 }
 0xb4c   : > { %v6834_v15 = vld [vmem:[#allocation2 + $0x28] sm:$0x4]  ;;  %v7543_v10 = vsel %vm14346_vm8, %v7514_v35, %v7542_v50  ;;  %v7315_v48 = vsel %vm14307_vm5, %v7284_v8, %v7314_v60  ;;  %v7501_v50 = vld [vmem:[#allocation2 + $0x30] sm:$0x20] }
 0xb4d   : > { %v6835_v53 = vsel %vm14309_vm4, %v13569_v45, %v6834_v15  ;;  %7544 = vst [vmem:[#allocation2 + $0x18] sm:$0x20] %v7543_v10  ;;  %7920 = vrot.lane.b32.xlu1 %v14340_v26, %s10397_s21  ;;  %7316 = vst [vmem:[#allocation2 + $0x28] sm:$0x10] %v7315_v48  ;;  %v7358_v15 = vld [vmem:[#allocation2 + $0x18] sm:$0x10] }
 0xb4e   : > { %6836 = vst [vmem:[#allocation2 + $0x28] sm:$0x4] %v6835_v53  ;;  %7968 = vrot.lane.b32.xlu0 %v14326_v34, %s10402_s12 }
 0xb4f   : > { %v7714_v1 = vpop.permute.xlu1 %7713  ;;  %v7468_v12 = vpop.permute.xlu0 %7467 }
 0xb50   : > { %v7034_v47 = vld [vmem:[#allocation2 + $0x28] sm:$0x8]  ;;  %v7743_v33 = vsel %vm14347_vm10, %v7714_v1, %v7742_v14  ;;  %v7499_v45 = vsel %vm14302_vm0, %v7468_v12, %v7498_v9  ;;  %v7900_v53 = vld [vmem:[#allocation2 + $0x30] sm:$0x80]  ;;  %v6787_v12 = vld [vmem:[#allocation2 + $0x30] sm:$0x4] }
 0xb51   : > { %v7035_v26 = vsel %vm14342_vm1, %v13577_v40, %v7034_v47  ;;  %7744 = vst [vmem:[#allocation2 + $0x18] sm:$0x40] %v7743_v33  ;;  %6857 = vrot.lane.b32.xlu1 %v14341_v2, %s10408_s28  ;;  %7500 = vst [vmem:[#allocation2 + $0x28] sm:$0x20] %v7499_v45 }
 0xb52   : > { %7036 = vst [vmem:[#allocation2 + $0x28] sm:$0x8] %v7035_v26  ;;  %7057 = vrot.lane.b32.xlu0 %v14341_v2, %s10402_s12 }
 0xb53   : > { %v7913_v57 = vpop.permute.xlu1 %7912  ;;  %v7668_v17 = vpop.permute.xlu0 %7667 }
 0xb54   : > { %v7942_v23 = vsel %vm14348_vm3, %v7913_v57, %v7941_v16  ;;  %v7699_v46 = vsel %vm14344_vm6, %v7668_v17, %v7698_v44  ;;  %v7317_v44 = vld [vmem:[#allocation2 + $0x30] sm:$0x10] }
 0xb55   : > { %7943 = vst [vmem:[#allocation2 + $0x18] sm:$0x80] %v7942_v23  ;;  %7571 = vrot.lane.b32.xlu1 %v14343_v56, %s10406_s26  ;;  %7700 = vst [vmem:[#allocation2 + $0x28] sm:$0x40] %v7699_v46 }
 0xb56   : > { %7771 = vrot.lane.b32.xlu0 %v14343_v56, %s10408_s28 }
 0xb57   : > { %v6956_v40 = vpop.permute.xlu1 %6955 }
 0xb58   : > { %v6988_v61 = vsel %vm14301_vm11, %v6956_v40, %v6987_v0  ;;  %v7867_v58 = vpop.permute.xlu0 %7866  ;;  %v7548_v57 = vld [vmem:[#allocation2 + $0x28] sm:$0x20]  ;;  %vm14355_vm11 = vnez %v14317_v20 }
 0xb59   : > { %6989 = vst [vmem:[#allocation2 + $0x30] sm:$0x8] %v6988_v61  ;;  %7970 = vrot.lane.b32.xlu1 %v14343_v56, %s10402_s12  ;;  %v7898_v35 = vsel %vm14345_vm12, %v7867_v58, %v7897_v29  ;;  %v7701_v29 = vld [vmem:[#allocation2 + $0x30] sm:$0x40] }
 0xb5a   : > { %7899 = vst [vmem:[#allocation2 + $0x28] sm:$0x80] %v7898_v35 }
 0xb5b   : > { %v7470_v60 = vpop.permute.xlu1 %7469 }
 0xb5c   : > { %v7502_v8 = vsel %vm14302_vm0, %v7470_v60, %v7501_v50  ;;  %v7330_v10 = vpop.permute.xlu0 %7329  ;;  %v7748_v0 = vld [vmem:[#allocation2 + $0x28] sm:$0x40]  ;;  %vm14354_vm0 = vnez %v14294_v39 }
 0xb5d   : > { %7503 = vst [vmem:[#allocation2 + $0x30] sm:$0x20] %v7502_v8  ;;  %v7359_v48 = vsel %vm14349_vm9, %v7330_v10, %v7358_v15  ;;  %v7364_v10 = vld [vmem:[#allocation2 + $0x28] sm:$0x10] }
 0xb5e   : > { %7360 = vst [vmem:[#allocation2 + $0x18] sm:$0x10] %v7359_v48 }
 0xb5f   : > { %v7869_v1 = vpop.permute.xlu1 %7868 }
 0xb60   : > { %v7037_v14 = vld [vmem:[#allocation2 + $0x30] sm:$0x8]  ;;  %v7901_v9 = vsel %vm14345_vm12, %v7869_v1, %v7900_v53  ;;  %v6756_v47 = vpop.permute.xlu0 %6755  ;;  %vm14351_vm12 = vnez %v14316_v13 }
 0xb61   : > { %v7038_v33 = vsel %vm14342_vm1, %v13675_v22, %v7037_v14  ;;  %7902 = vst [vmem:[#allocation2 + $0x30] sm:$0x80] %v7901_v9  ;;  %v6788_v45 = vsel %vm14306_vm15, %v6756_v47, %v6787_v12  ;;  %vm14350_vm1 = vnez %v14259_v54  ;;  %v7947_v8 = vld [vmem:[#allocation2 + $0x28] sm:$0x80]  ;;  %v6877_v14 = vld [vmem:[#allocation2 + $0x18] sm:$0x4] }
 0xb62   : > { %7039 = vst [vmem:[#allocation2 + $0x30] sm:$0x8] %v7038_v33  ;;  %6789 = vst [vmem:[#allocation2 + $0x30] sm:$0x4] %v6788_v45  ;;  %v7591_v45 = vld [vmem:[#allocation2 + $0x18] sm:$0x20] }
 0xb63   : > { %v7518_v26 = vpop.permute.xlu1 %7517 }
 0xb64   : > { %v7549_v16 = vsel %vm14346_vm8, %v7518_v26, %v7548_v57  ;;  %v7286_v17 = vpop.permute.xlu0 %7285  ;;  %v7791_v57 = vld [vmem:[#allocation2 + $0x18] sm:$0x40] }
 0xb65   : > { %v7391_v23 = vld [vmem:[#allocation2 + $0x18] sm:$0x10]  ;;  %7550 = vst [vmem:[#allocation2 + $0x28] sm:$0x20] %v7549_v16  ;;  %v7318_v46 = vsel %vm14307_vm5, %v7286_v17, %v7317_v44 }
 0xb66   : > { %v7392_v22 = vsel %vm14350_vm1, %v12654_v42, %v7391_v23  ;;  %7319 = vst [vmem:[#allocation2 + $0x30] sm:$0x10] %v7318_v46 }
 0xb67   : > { %7393 = vst [vmem:[#allocation2 + $0x18] sm:$0x10] %v7392_v22  ;;  %v7718_v40 = vpop.permute.xlu1 %7717  ;;  %v7990_v22 = vld [vmem:[#allocation2 + $0x18] sm:$0x80] }
 0xb68   : > { %v7749_v61 = vsel %vm14347_vm10, %v7718_v40, %v7748_v0  ;;  %v7670_v58 = vpop.permute.xlu0 %7669 }
 0xb69   : > { %v6837_v35 = vld [vmem:[#allocation2 + $0x30] sm:$0x4]  ;;  %7750 = vst [vmem:[#allocation2 + $0x28] sm:$0x40] %v7749_v61  ;;  %v7702_v50 = vsel %vm14344_vm6, %v7670_v58, %v7701_v29  ;;  %vm14353_vm6 = vnez %v14273_v24  ;;  %v7551_v58 = vld [vmem:[#allocation2 + $0x30] sm:$0x20] }
 0xb6a   : > { %v6838_v60 = vsel %vm14309_vm4, %v13588_v62, %v6837_v35  ;;  %7703 = vst [vmem:[#allocation2 + $0x30] sm:$0x40] %v7702_v50  ;;  %v7077_v62 = vld [vmem:[#allocation2 + $0x18] sm:$0x8]  ;;  %vm14352_vm4 = vnez %v14290_v3 }
 0xb6b   : > { %6839 = vst [vmem:[#allocation2 + $0x30] sm:$0x4] %v6838_v60  ;;  %v7917_v42 = vpop.permute.xlu1 %7916 }
 0xb6c   : > { %v7948_v15 = vsel %vm14348_vm3, %v7917_v42, %v7947_v8  ;;  %v7334_v48 = vpop.permute.xlu0 %7333  ;;  %v7950_v8 = vld [vmem:[#allocation2 + $0x30] sm:$0x80] }
 0xb6d   : > { %7949 = vst [vmem:[#allocation2 + $0x28] sm:$0x80] %v7948_v15  ;;  %v7365_v53 = vsel %vm14349_vm9, %v7334_v48, %v7364_v10  ;;  %v7367_v0 = vld [vmem:[#allocation2 + $0x30] sm:$0x10] }
 0xb6e   : > { %7366 = vst [vmem:[#allocation2 + $0x28] sm:$0x10] %v7365_v53  ;;  %v7083_v53 = vld [vmem:[#allocation2 + $0x28] sm:$0x8] }
 0xb6f   : > { %v6850_v1 = vpop.permute.xlu1 %6849 }
 0xb70   : > { %v6878_v9 = vsel %vm14351_vm12, %v6850_v1, %v6877_v14  ;;  %v7050_v12 = vpop.permute.xlu0 %7049 }
 0xb71   : > { %6879 = vst [vmem:[#allocation2 + $0x18] sm:$0x4] %v6878_v9  ;;  %v7078_v47 = vsel %vm14352_vm4, %v7050_v12, %v7077_v62  ;;  %v8009_v9 = vld [vmem:[#allocation2 + $0x20] sm:$0xff] }
 0xb72   : > { %7079 = vst [vmem:[#allocation2 + $0x18] sm:$0x8] %v7078_v47 }
 0xb73   : > { %v7564_v33 = vpop.permute.xlu1 %7563 }
 0xb74   : > { %v7592_v26 = vsel %vm14353_vm6, %v7564_v33, %v7591_v45  ;;  %v7764_v16 = vpop.permute.xlu0 %7763  ;;  %v6883_v33 = vld [vmem:[#allocation2 + $0x28] sm:$0x4] }
 0xb75   : > { %v7397_v44 = vld [vmem:[#allocation2 + $0x28] sm:$0x10]  ;;  %7593 = vst [vmem:[#allocation2 + $0x18] sm:$0x20] %v7592_v26  ;;  %v7792_v17 = vsel %vm14354_vm0, %v7764_v16, %v7791_v57  ;;  %v7797_v26 = vld [vmem:[#allocation2 + $0x28] sm:$0x40] }
 0xb76   : > { %v7398_v23 = vsel %vm14350_vm1, %v14319_v49, %v7397_v44  ;;  %7793 = vst [vmem:[#allocation2 + $0x18] sm:$0x40] %v7792_v17  ;;  %v7751_v49 = vld [vmem:[#allocation2 + $0x30] sm:$0x40]  ;;  %v7597_v17 = vld [vmem:[#allocation2 + $0x28] sm:$0x20] }
 0xb77   : > { %7399 = vst [vmem:[#allocation2 + $0x28] sm:$0x10] %v7398_v23  ;;  %v7963_v46 = vpop.permute.xlu1 %7962  ;;  %v6886_v23 = vld [vmem:[#allocation2 + $0x30] sm:$0x4] }
 0xb78   : > { %v7991_v40 = vsel %vm14355_vm11, %v7963_v46, %v7990_v22  ;;  %v7336_v61 = vpop.permute.xlu0 %7335 }
 0xb79   : > { %7992 = vst [vmem:[#allocation2 + $0x18] sm:$0x80] %v7991_v40  ;;  %v7368_v29 = vsel %vm14349_vm9, %v7336_v61, %v7367_v0  ;;  %vm14356_vm9 = vcmask 261120   ;;  %v7996_v0 = vld [vmem:[#allocation2 + $0x28] sm:$0x80] }
 0xb7a   : > { %7369 = vst [vmem:[#allocation2 + $0x30] sm:$0x10] %v7368_v29 }
 0xb7b   : > { %v7520_v35 = vpop.permute.xlu1 %7519 }
 0xb7c   : > { %v7552_v50 = vsel %vm14346_vm8, %v7520_v35, %v7551_v58  ;;  %v7720_v60 = vpop.permute.xlu0 %7719  ;;  %v7086_v35 = vld [vmem:[#allocation2 + $0x30] sm:$0x8] }
 0xb7d   : > { %7553 = vst [vmem:[#allocation2 + $0x30] sm:$0x20] %v7552_v50  ;;  %v7752_v42 = vsel %vm14347_vm10, %v7720_v60, %v7751_v49  ;;  %vm14357_vm10 = vmmov %vm14356_vm9  ;;  %v7454_v60 = vld [vmem:[#allocation2 + $0x38] sm:$0x20] }
 0xb7e   : > { %7753 = vst [vmem:[#allocation2 + $0x30] sm:$0x40] %v7752_v42 }
 0xb7f   : > { %v7919_v15 = vpop.permute.xlu1 %7918 }
 0xb80   : > { %v7951_v10 = vsel %vm14348_vm3, %v7919_v15, %v7950_v8  ;;  %v8008_v48 = vld [vmem:[#allocation2 + $0x18] sm:$0xff]  ;;  %v7054_v1 = vpop.permute.xlu0 %7053 }
 0xb81   : > { %v7400_v14 = vld [vmem:[#allocation2 + $0x30] sm:$0x10]  ;;  %7952 = vst [vmem:[#allocation2 + $0x30] sm:$0x80] %v7951_v10  ;;  %9766 = vmatmul.mubr.msk.bf16.gmra.mrb[44].mxu1 %vm14356_vm9, %v8008_v48  ;;  %v7084_v62 = vsel %vm14352_vm4, %v7054_v1, %v7083_v53  ;;  %v6540_v48 = vld [vmem:[#allocation2 + $0x38] sm:$0x2] }
 0xb82   : > { %v7401_v12 = vsel %vm14350_vm1, %v14326_v34, %v7400_v14  ;;  %9769 = vmatprep.mubr.msk.bf16.mxu1 %vm14357_vm10, %v8009_v9  ;;  %7085 = vst [vmem:[#allocation2 + $0x28] sm:$0x8] %v7084_v62  ;;  %vm14358_vm10 = vmmov %vm14356_vm9  ;;  %v7654_v53 = vld [vmem:[#allocation2 + $0x38] sm:$0x40]  ;;  %vm14359_vm9 = vnez %v14320_v25 }
 0xb83   : > { %7402 = vst [vmem:[#allocation2 + $0x30] sm:$0x10] %v7401_v12  ;;  %v6854_v47 = vpop.permute.xlu1 %6853  ;;  %v7853_v12 = vld [vmem:[#allocation2 + $0x38] sm:$0x80] }
 0xb84   : > { %v6884_v45 = vsel %vm14351_vm12, %v6854_v47, %v6883_v33  ;;  %v7768_v57 = vpop.permute.xlu0 %7767 }
 0xb85   : > { %6885 = vst [vmem:[#allocation2 + $0x28] sm:$0x4] %v6884_v45  ;;  %v7798_v16 = vsel %vm14354_vm0, %v7768_v57, %v7797_v26  ;;  %v6740_v45 = vld [vmem:[#allocation2 + $0x38] sm:$0x4] }
 0xb86   : > { %7799 = vst [vmem:[#allocation2 + $0x28] sm:$0x40] %v7798_v16  ;;  %v6940_v16 = vld [vmem:[#allocation2 + $0x38] sm:$0x8] }
 0xb87   : > { %v7568_v44 = vpop.permute.xlu1 %7567 }
 0xb88   : > { %v7598_v34 = vsel %vm14353_vm6, %v7568_v44, %v7597_v17  ;;  %v6856_v46 = vpop.permute.xlu0 %6855 }
 0xb89   : > { %7599 = vst [vmem:[#allocation2 + $0x28] sm:$0x20] %v7598_v34  ;;  %v6887_v22 = vsel %vm14351_vm12, %v6856_v46, %v6886_v23  ;;  %v6406_v23 = vld [vmem:[#allocation2 + $0x38] sm:$0x1] }
 0xb8a   : > { %6888 = vst [vmem:[#allocation2 + $0x30] sm:$0x4] %v6887_v22  ;;  %v7320_v22 = vld [vmem:[#allocation2 + $0x38] sm:$0x10] }
 0xb8b   : > { %v7967_v40 = vpop.permute.xlu1 %7966 }
 0xb8c   : > { %v7997_v61 = vsel %vm14355_vm11, %v7967_v40, %v7996_v0  ;;  %v13874_v29 = vpop.permute.xlu0 %6807 }
 0xb8d   : > { %7998 = vst [vmem:[#allocation2 + $0x28] sm:$0x80] %v7997_v61 }
 0xb8f   : > { %v7056_v58 = vpop.permute.xlu1 %7055 }
 0xb90   : > { %v7087_v50 = vsel %vm14352_vm4, %v7056_v58, %v7086_v35  ;;  %v13878_v49 = vpop.permute.xlu0 %7007 }
 0xb91   : > { %7088 = vst [vmem:[#allocation2 + $0x30] sm:$0x8] %v7087_v50 }
 0xb93   : > { %v6424_v42 = vpop.permute.xlu1 %6423 }
 0xb94   : > { %v8010_v8 = vld [vmem:[#allocation2 + $0x28] sm:$0xff]  ;;  %v7421_v15 = vpop.permute.xlu0 %7420 }
 0xb95   : > { %9770 = vmatmul.mubr.msk.bf16.gmra.mrb[48].mxu1 %vm14358_vm10, %v8010_v8  ;;  %v7455_v10 = vsel %vm14333_vm2, %v7421_v15, %v7454_v60  ;;  %vm14360_vm2 = vnez %v14327_v37  ;;  %vm14366_vm10 = vnez %v14251_v30 }
 0xb96   : > { %7456 = vst [vmem:[#allocation2 + $0x38] sm:$0x20] %v7455_v10 }
 0xb97   : > { %v6507_v1 = vpop.permute.xlu1 %6506 }
 0xb98   : > { %v6541_v14 = vsel %vm14359_vm9, %v6507_v1, %v6540_v48  ;;  %v7621_v9 = vpop.permute.xlu0 %7620  ;;  %vm14367_vm9 = vnez %v14262_v38 }
 0xb99   : > { %6542 = vst [vmem:[#allocation2 + $0x38] sm:$0x2] %v6541_v14  ;;  %v7655_v62 = vsel %vm14335_vm13, %v7621_v9, %v7654_v53  ;;  %vm14362_vm13 = vnez %v14222_v63 }
 0xb9a   : > { %7656 = vst [vmem:[#allocation2 + $0x38] sm:$0x40] %v7655_v62 }
 0xb9b   : > { %v6608_v47 = vpop.permute.xlu1 %6607 }
 0xb9c   : > { %v7821_v33 = vpop.permute.xlu0 %7820 }
 0xb9d   : > { %v7854_v31 = vsel %vm14337_vm14, %v7821_v33, %v7853_v12  ;;  %vm14361_vm14 = vnez %v14218_v41  ;;  %v7504_v50 = vld [vmem:[#allocation2 + $0x38] sm:$0x20] }
 0xb9e   : > { %7855 = vst [vmem:[#allocation2 + $0x38] sm:$0x80] %v7854_v31 }
 0xb9f   : > { %v6707_v26 = vpop.permute.xlu1 %6706 }
 0xba0   : > { %v6741_v57 = vsel %vm14324_vm7, %v6707_v26, %v6740_v45  ;;  %v6758_v25 = vpop.permute.xlu0 %6757  ;;  %v6590_v37 = vld [vmem:[#allocation2 + $0x38] sm:$0x2]  ;;  %vm14363_vm7 = vnez %v14248_v52 }
 0xba1   : > { %6742 = vst [vmem:[#allocation2 + $0x38] sm:$0x4] %v6741_v57  ;;  %v7704_v15 = vld [vmem:[#allocation2 + $0x38] sm:$0x40] }
 0xba3   : > { %v6907_v44 = vpop.permute.xlu1 %6906 }
 0xba4   : > { %v6941_v28 = vsel %vm14360_vm2, %v6907_v44, %v6940_v16  ;;  %v6958_v17 = vpop.permute.xlu0 %6957  ;;  %vm14368_vm2 = vnez %v14232_v27  ;;  %v7600_v27 = vld [vmem:[#allocation2 + $0x30] sm:$0x20] }
 0xba5   : > { %6942 = vst [vmem:[#allocation2 + $0x38] sm:$0x8] %v6941_v28  ;;  %v7903_v62 = vld [vmem:[#allocation2 + $0x38] sm:$0x80] }
 0xba7   : > { %v6374_v34 = vpop.permute.xlu1 %6373 }
 0xba8   : > { %v6790_v46 = vld [vmem:[#allocation2 + $0x38] sm:$0x4]  ;;  %v6407_v32 = vsel %vm14361_vm14, %v6374_v34, %v6406_v23  ;;  %v7288_v40 = vpop.permute.xlu0 %7287  ;;  %vm14369_vm14 = vnez %v14227_v11 }
 0xba9   : > { %v6791_v5 = vsel %vm14306_vm15, %v6758_v25, %v6790_v46  ;;  %6408 = vst [vmem:[#allocation2 + $0x38] sm:$0x1] %v6407_v32  ;;  %v7321_v0 = vsel %vm14307_vm5, %v7288_v40, %v7320_v22  ;;  %vm14364_vm15 = vnez %v14220_v7  ;;  %vm14365_vm5 = vnez %v14224_v4  ;;  %v7800_v7 = vld [vmem:[#allocation2 + $0x30] sm:$0x40] }
 0xbaa   : > { %6792 = vst [vmem:[#allocation2 + $0x38] sm:$0x4] %v6791_v5  ;;  %7322 = vst [vmem:[#allocation2 + $0x38] sm:$0x10] %v7321_v0  ;;  %v7999_v0 = vld [vmem:[#allocation2 + $0x30] sm:$0x80] }
 0xbab   : > { %v6558_v61 = vpop.permute.xlu1 %6557 }
 0xbac   : > { %v6990_v58 = vld [vmem:[#allocation2 + $0x38] sm:$0x8]  ;;  %v6591_v35 = vsel %vm14362_vm13, %v6558_v61, %v6590_v37  ;;  %v7472_v41 = vpop.permute.xlu0 %7471  ;;  %vm14370_vm13 = vnez %v14266_v59 }
 0xbad   : > { %v6991_v60 = vsel %vm14363_vm7, %v6958_v17, %v6990_v58  ;;  %6592 = vst [vmem:[#allocation2 + $0x38] sm:$0x2] %v6591_v35  ;;  %v7505_v6 = vsel %vm14364_vm15, %v7472_v41, %v7504_v50  ;;  %vm8166_vm7 = vcmask 523264   ;;  %vm14372_vm15 = vnez %v14277_v36 }
 0xbae   : > { %6992 = vst [vmem:[#allocation2 + $0x38] sm:$0x8] %v6991_v60  ;;  %7506 = vst [vmem:[#allocation2 + $0x38] sm:$0x20] %v7505_v6 }
 0xbaf   : > { %v6658_v43 = vpop.permute.xlu1 %6657 }
 0xbb0   : > { %v6456_v8 = vld [vmem:[#allocation2 + $0x38] sm:$0x1]  ;;  %v7672_v10 = vpop.permute.xlu0 %7671 }
 0xbb1   : > { %v6840_v48 = vld [vmem:[#allocation2 + $0x38] sm:$0x4]  ;;  %v6457_v63 = vsel %vm14365_vm5, %v6424_v42, %v6456_v8  ;;  %v7705_v53 = vsel %vm14366_vm10, %v7672_v10, %v7704_v15  ;;  %v7370_v46 = vld [vmem:[#allocation2 + $0x38] sm:$0x10]  ;;  %vm14373_vm5 = vnez %v14235_v55  ;;  %vm14374_vm10 = vnez %v14255_v18 }
 0xbb2   : > { %v6841_v52 = vsel %vm14367_vm9, %v13874_v29, %v6840_v48  ;;  %6458 = vst [vmem:[#allocation2 + $0x38] sm:$0x1] %v6457_v63  ;;  %7706 = vst [vmem:[#allocation2 + $0x38] sm:$0x40] %v7705_v53 }
 0xbb3   : > { %6842 = vst [vmem:[#allocation2 + $0x38] sm:$0x4] %v6841_v52  ;;  %v7770_v1 = vpop.permute.xlu1 %7769 }
 0xbb4   : > { %v6640_v14 = vld [vmem:[#allocation2 + $0x38] sm:$0x2]  ;;  %v7801_v9 = vsel %vm14354_vm0, %v7770_v1, %v7800_v7  ;;  %v7871_v4 = vpop.permute.xlu0 %7870 }
 0xbb5   : > { %v7040_v42 = vld [vmem:[#allocation2 + $0x38] sm:$0x8]  ;;  %v6641_v30 = vsel %vm14368_vm2, %v6608_v47, %v6640_v14  ;;  %7802 = vst [vmem:[#allocation2 + $0x30] sm:$0x40] %v7801_v9  ;;  %v7904_v38 = vsel %vm14369_vm14, %v7871_v4, %v7903_v62  ;;  %v7554_v29 = vld [vmem:[#allocation2 + $0x38] sm:$0x20] }
 0xbb6   : > { %v7041_v12 = vsel %vm14370_vm13, %v13878_v49, %v7040_v42  ;;  %6642 = vst [vmem:[#allocation2 + $0x38] sm:$0x2] %v6641_v30  ;;  %7905 = vst [vmem:[#allocation2 + $0x38] sm:$0x80] %v7904_v38 }
 0xbb7   : > { %7042 = vst [vmem:[#allocation2 + $0x38] sm:$0x8] %v7041_v12  ;;  %v7522_v33 = vpop.permute.xlu1 %7521 }
 0xbb8   : > { %v7555_v31 = vsel %vm14346_vm8, %v7522_v33, %v7554_v29  ;;  %v9763_v11 = vpop.f32.mrb[40].mxu1  ;;  %v7570_v47 = vpop.permute.xlu0 %7569  ;;  %vm14371_vm8 = vnez %v14242_v21 }
 0xbb9   : > { %v6489_v59 = vld [vmem:[#allocation2 + $0x38] sm:$0x1]  ;;  %7556 = vst [vmem:[#allocation2 + $0x38] sm:$0x20] %v7555_v31  ;;  %v8152_v49 = vmax.f32 %v9763_v11, 0.0  ;;  %v8087_v45 = vpop.f32.mrb[41].mxu1  ;;  %v7601_v19 = vsel %vm14353_vm6, %v7570_v47, %v7600_v27 }
 0xbba   : > { %v7754_v26 = vld [vmem:[#allocation2 + $0x38] sm:$0x40]  ;;  %v6490_v57 = vsel %vm14371_vm8, %v14341_v2, %v6489_v59  ;;  %v8150_v25 = vmax.f32 %v8087_v45, 0.0  ;;  %v9764_v16 = vpop.f32.mrb[42].mxu1  ;;  %7602 = vst [vmem:[#allocation2 + $0x30] sm:$0x20] %v7601_v19 }
 0xbbb   : > { %6491 = vst [vmem:[#allocation2 + $0x38] sm:$0x1] %v6490_v57  ;;  %8169 = vst.msk [vmem:[%s13928_s16 + $0x10] sm:$0xff] %vm8166_vm7, %v8152_v49  ;;  %v8153_v44 = vmax.f32 %v9764_v16, 0.0  ;;  %v8090_v28 = vpop.f32.mrb[43].mxu1  ;;  %v7722_v17 = vpop.permute.xlu1 %7721 }
 0xbbc   : > { %8167 = vst.msk [vmem:[%s13928_s16] sm:$0xff] %vm8166_vm7, %v8150_v25  ;;  %v8151_v34 = vmax.f32 %v8090_v28, 0.0  ;;  %v7755_v23 = vsel %vm14372_vm15, %v7722_v17, %v7754_v26  ;;  %v7338_v21 = vpop.permute.xlu0 %7337  ;;  %v6889_v55 = vld [vmem:[#allocation2 + $0x38] sm:$0x4] }
 0xbbd   : > { %v6689_v32 = vld [vmem:[#allocation2 + $0x38] sm:$0x2]  ;;  %8170 = vst.msk [vmem:[%s13928_s16 + $0x18] sm:$0xff] %vm8166_vm7, %v8153_v44  ;;  %7756 = vst [vmem:[#allocation2 + $0x38] sm:$0x40] %v7755_v23  ;;  %v7371_v2 = vsel %vm14373_vm5, %v7338_v21, %v7370_v46 }
 0xbbe   : > { %v7953_v22 = vld [vmem:[#allocation2 + $0x38] sm:$0x80]  ;;  %v6690_v40 = vsel %vm14374_vm10, %v6658_v43, %v6689_v32  ;;  %8168 = vst.msk [vmem:[%s13928_s16 + $0x8] sm:$0xff] %vm8166_vm7, %v8151_v34  ;;  %7372 = vst [vmem:[#allocation2 + $0x38] sm:$0x10] %v7371_v2 }
 0xbbf   : > { %6691 = vst [vmem:[#allocation2 + $0x38] sm:$0x2] %v6690_v40  ;;  %v7921_v5 = vpop.permute.xlu1 %7920  ;;  %v7089_v50 = vld [vmem:[#allocation2 + $0x38] sm:$0x8] }
 0xbc0   : > { %v7954_v36 = vsel %vm14348_vm3, %v7921_v5, %v7953_v22  ;;  %v7969_v37 = vpop.permute.xlu0 %7968  ;;  %v7603_v6 = vld [vmem:[#allocation2 + $0x38] sm:$0x20]  ;;  %vm14375_vm3 = vcmask 261120  }
 0xbc1   : > { %7955 = vst [vmem:[#allocation2 + $0x38] sm:$0x80] %v7954_v36  ;;  %v8000_v61 = vsel %vm14355_vm11, %v7969_v37, %v7999_v0 }
 0xbc2   : > { %8001 = vst [vmem:[#allocation2 + $0x30] sm:$0x80] %v8000_v61 }
 0xbc3   : > { %v6858_v58 = vpop.permute.xlu1 %6857 }
 0xbc4   : > { %v6890_v18 = vsel %vm14351_vm12, %v6858_v58, %v6889_v55  ;;  %v7058_v35 = vpop.permute.xlu0 %7057  ;;  %v7803_v15 = vld [vmem:[#allocation2 + $0x38] sm:$0x40]  ;;  %vm14376_vm12 = vmmov %vm14375_vm3 }
 0xbc5   : > { %v7403_v41 = vld [vmem:[#allocation2 + $0x38] sm:$0x10]  ;;  %6891 = vst [vmem:[#allocation2 + $0x38] sm:$0x4] %v6890_v18  ;;  %v7090_v51 = vsel %vm14352_vm4, %v7058_v35, %v7089_v50 }
 0xbc6   : > { %v7404_v60 = vsel %vm14350_vm1, %v14343_v56, %v7403_v41  ;;  %7091 = vst [vmem:[#allocation2 + $0x38] sm:$0x8] %v7090_v51 }
 0xbc7   : > { %7405 = vst [vmem:[#allocation2 + $0x38] sm:$0x10] %v7404_v60  ;;  %v7572_v43 = vpop.permute.xlu1 %7571 }
 0xbc8   : > { %v7604_v8 = vsel %vm14353_vm6, %v7572_v43, %v7603_v6  ;;  %v7772_v13 = vpop.permute.xlu0 %7771  ;;  %v8002_v54 = vld [vmem:[#allocation2 + $0x38] sm:$0x80] }
 0xbc9   : > { %7605 = vst [vmem:[#allocation2 + $0x38] sm:$0x20] %v7604_v8  ;;  %v7804_v10 = vsel %vm14354_vm0, %v7772_v13, %v7803_v15  ;;  %v8011_v3 = vld [vmem:[#allocation2 + $0x30] sm:$0xff] }
 0xbca   : > { %7805 = vst [vmem:[#allocation2 + $0x38] sm:$0x40] %v7804_v10  ;;  %9773 = vmatprep.mubr.msk.bf16.mxu1 %vm14375_vm3, %v8011_v3 }
 0xbcb   : > { %v7971_v56 = vpop.permute.xlu1 %7970 }
 0xbcc   : > { %v8003_v24 = vsel %vm14355_vm11, %v7971_v56, %v8002_v54 }
 0xbcd   : > { %8004 = vst [vmem:[#allocation2 + $0x38] sm:$0x80] %v8003_v24 }
 0xbd4   : > { %v8012_v48 = vld [vmem:[#allocation2 + $0x38] sm:$0xff] }
 0xbd5   : > { %9774 = vmatmul.mubr.msk.bf16.gmra.mrb[52].mxu1 %vm14376_vm12, %v8012_v48 }
 0xc54   : > { %v9767_v63 = vpop.f32.mrb[44].mxu1 }
 0xc55   : > { %v8156_v39 = vmax.f32 %v9767_v63, 0.0  ;;  %v8103_v53 = vpop.f32.mrb[45].mxu1 }
 0xc56   : > { %v8154_v52 = vmax.f32 %v8103_v53, 0.0  ;;  %v9768_v7 = vpop.f32.mrb[46].mxu1 }
 0xc57   : > { %8173 = vst.msk [vmem:[%s13928_s16 + $0x30] sm:$0xff] %vm8166_vm7, %v8156_v39  ;;  %v8157_v1 = vmax.f32 %v9768_v7, 0.0  ;;  %v8106_v14 = vpop.f32.mrb[47].mxu1 }
 0xc58   : > { %8171 = vst.msk [vmem:[%s13928_s16 + $0x20] sm:$0xff] %vm8166_vm7, %v8154_v52  ;;  %v8155_v20 = vmax.f32 %v8106_v14, 0.0 }
 0xc59   : > { %8174 = vst.msk [vmem:[%s13928_s16 + $0x38] sm:$0xff] %vm8166_vm7, %v8157_v1 }
 0xc5a   : > { %8172 = vst.msk [vmem:[%s13928_s16 + $0x28] sm:$0xff] %vm8166_vm7, %v8155_v20 }
 0xc68   : > { %v9771_v9 = vpop.f32.mrb[48].mxu1 }
 0xc69   : > { %v8160_v62 = vmax.f32 %v9771_v9, 0.0  ;;  %v8119_v4 = vpop.f32.mrb[49].mxu1 }
 0xc6a   : > { %v8158_v42 = vmax.f32 %v8119_v4, 0.0  ;;  %v9772_v30 = vpop.f32.mrb[50].mxu1 }
 0xc6b   : > { %8177 = vst.msk [vmem:[%s13928_s16 + $0x50] sm:$0xff] %vm8166_vm7, %v8160_v62  ;;  %v8161_v38 = vmax.f32 %v9772_v30, 0.0  ;;  %v8122_v29 = vpop.f32.mrb[51].mxu1 }
 0xc6c   : > { %8175 = vst.msk [vmem:[%s13928_s16 + $0x40] sm:$0xff] %vm8166_vm7, %v8158_v42  ;;  %v8159_v12 = vmax.f32 %v8122_v29, 0.0 }
 0xc6d   : > { %8178 = vst.msk [vmem:[%s13928_s16 + $0x58] sm:$0xff] %vm8166_vm7, %v8161_v38 }
 0xc6e   : > { %8176 = vst.msk [vmem:[%s13928_s16 + $0x48] sm:$0xff] %vm8166_vm7, %v8159_v12 }
 0xca8   : > { %v9775_v33 = vpop.f32.mrb[52].mxu1 }
 0xca9   : > { %v8164_v31 = vmax.f32 %v9775_v33, 0.0  ;;  %v8135_v11 = vpop.f32.mrb[53].mxu1 }
 0xcaa   : > { %v8162_v27 = vmax.f32 %v8135_v11, 0.0  ;;  %v9776_v47 = vpop.f32.mrb[54].mxu1 }
 0xcab   : > { %8181 = vst.msk [vmem:[%s13928_s16 + $0x70] sm:$0xff] %vm8166_vm7, %v8164_v31  ;;  %v8165_v59 = vmax.f32 %v9776_v47, 0.0  ;;  %v8138_v49 = vpop.f32.mrb[55].mxu1 }
 0xcac   : > { %8179 = vst.msk [vmem:[%s13928_s16 + $0x60] sm:$0xff] %vm8166_vm7, %v8162_v27  ;;  %v8163_v45 = vmax.f32 %v8138_v49, 0.0 }
 0xcad   : > { %8182 = vst.msk [vmem:[%s13928_s16 + $0x78] sm:$0xff] %vm8166_vm7, %v8165_v59 }
 0xcae   : > { %8180 = vst.msk [vmem:[%s13928_s16 + $0x68] sm:$0xff] %vm8166_vm7, %v8163_v45 }
 0xcaf PF: > { %s20_s13 = sadd.s32 1, %s10392_s13  }
 0xcb0   : > { %p17_p4 = scmp.ge.s32.totalorder %s20_s13, 4  }
 0xcb2   :  { %19 = sbr.rel (!%p17_p4) target bundleno = 1 (0x1), region = 106 }

</bundles_post_ra>
